<compile_context>
chip_gen: v5e
topology: v5e:2x2
jax: 0.10.0
libtpu: 0.0.40
codegen_flags: <defaults>
</compile_context>

<pallas_src>
import functools

import jax
import jax.numpy as jnp
from jax.experimental import pallas as pl
from jax.experimental.pallas import tpu as pltpu

BF16 = jnp.bfloat16
F32 = jnp.float32
LANE = 128


# ----------------------------------------------------------------- Pallas kernels

def _hf_seg_kernel(xh_ref, xf_ref,
                   wh_ref, bh_ref, wh_seg_ref, bh_seg_ref,
                   wf_ref, bf_ref, wf_seg_ref, bf_seg_ref,
                   oh_ref, of_ref):
    """h / f node convs + grouped seg heads, one launch, two lane-dense outputs.

    oh = relu(xh @ Wh + bh) @ Wh_seg_bd + bh_seg   (padded to 128 lanes)
    of = relu(xf @ Wf + bf) @ Wf_seg_bd + bf_seg   (padded to 128 lanes)
    """
    h = jnp.dot(xh_ref[...], wh_ref[...], preferred_element_type=F32)
    h = jnp.maximum(h + bh_ref[...], 0.0).astype(BF16)
    oh = jnp.dot(h, wh_seg_ref[...], preferred_element_type=F32)
    oh_ref[...] = (oh + bh_seg_ref[...]).astype(oh_ref.dtype)

    f = jnp.dot(xf_ref[...], wf_ref[...], preferred_element_type=F32)
    f = jnp.maximum(f + bf_ref[...], 0.0).astype(BF16)
    of = jnp.dot(f, wf_seg_ref[...], preferred_element_type=F32)
    of_ref[...] = (of + bf_seg_ref[...]).astype(of_ref.dtype)


def _refine_kernel(r_ref, xl_ref,
                   xp_ref, wp_ref, bp_ref,
                   wc2_ref, bc2_ref,
                   w1n_ref, w1s_ref, b1_ref,
                   w2_ref, b2_ref,
                   w3_ref, b3_ref,
                   o_ref):
    """p_conv + Final_cls + grouped p_seg head for one tile of output pixels.

    p_feat = relu(xp @ Wp + bp)                 # coarse p node features (recomputed
                                                #  per tile; never leaves VMEM/vregs)
    skip   = relu(xl @ Wc2 + bc2)               # conv2 + BN + ReLU
    p_up   = R_tile @ p_feat                    # bilinear align_corners upsample
    y1     = relu(p_up @ W1n + skip @ W1s + b1) # conv3[i] layer 1, all classes
    y2     = relu(y1 @ W2 + b2)                 # conv3[i] layer 2, all classes
    o      = y2 @ W3 + b3                       # grouped p_seg head (128-lane padded)
    """
    p_feat = jnp.dot(xp_ref[...], wp_ref[...], preferred_element_type=F32)
    p_feat = jnp.maximum(p_feat + bp_ref[...], 0.0).astype(BF16)

    skip = jnp.dot(xl_ref[...], wc2_ref[...], preferred_element_type=F32)
    skip = jnp.maximum(skip + bc2_ref[...], 0.0).astype(BF16)

    p_up = jnp.dot(r_ref[...], p_feat, preferred_element_type=F32).astype(BF16)

    y1 = (jnp.dot(p_up, w1n_ref[...], preferred_element_type=F32)
          + jnp.dot(skip, w1s_ref[...], preferred_element_type=F32)
          + b1_ref[...])
    y1 = jnp.maximum(y1, 0.0).astype(BF16)
    y2 = jnp.dot(y1, w2_ref[...], preferred_element_type=F32)
    y2 = jnp.maximum(y2 + b2_ref[...], 0.0).astype(BF16)
    o_ref[...] = (jnp.dot(y2, w3_ref[...], preferred_element_type=F32)
                  + b3_ref[...]).astype(o_ref.dtype)


# ----------------------------------------------------------- pallas_call wrapper

@functools.lru_cache(maxsize=1)
def _has_two_tensorcores():
    """True only for 2-TC parts (v7x).  v5e/v6e have a single TensorCore, where
    splitting the row dimension just doubles per-step pipeline overhead."""
    try:
        kind = jax.devices()[0].device_kind.lower()
    except Exception:  # pragma: no cover - defensive, never expected on TPU
        return False
    return "7" in kind


def _choose_block_m(m, *, two_tiles, cap=512):
    """Row tile.  Single-TC chips: one full-M step (per-step overhead ~0.35us, all
    buffers here are <2 MiB so a full tile always fits).  2-TC chips: split in two
    so both cores get a tile via dimension_semantics=('parallel',)."""
    assert m % 8 == 0, f"row count {m} must be a multiple of 8 (sublane)"
    if two_tiles and m % 16 == 0 and (m // 2) <= cap:
        return m // 2
    if m <= cap:
        return m
    for bm in (512, 256, 128, 64, 32, 16, 8):
        if bm <= cap and m % bm == 0:
            return bm
    return m


def _fused_call(kernel, tiled, bcast, out_dims, out_dtypes):
    """Launch `kernel` over a 1-D row grid: `tiled` inputs are split along rows,
    `bcast` inputs (weights / biases / the full coarse feature map) are whole-array
    blocks kept resident in VMEM across grid steps.  Supports multiple outputs."""
    m = tiled[0].shape[0]
    bm = _choose_block_m(m, two_tiles=_has_two_tensorcores())
    in_specs = ([pl.BlockSpec((bm, t.shape[1]), lambda i: (i, 0)) for t in tiled]
                + [pl.BlockSpec(b.shape, lambda i: (0, 0)) for b in bcast])
    out_shapes = tuple(jax.ShapeDtypeStruct((m, d), dt)
                       for d, dt in zip(out_dims, out_dtypes))
    out_specs = tuple(pl.BlockSpec((bm, d), lambda i: (i, 0)) for d in out_dims)
    if len(out_shapes) == 1:
        out_shapes, out_specs = out_shapes[0], out_specs[0]
    return pl.pallas_call(
        kernel,
        out_shape=out_shapes,
        grid_spec=pltpu.PrefetchScalarGridSpec(
            num_scalar_prefetch=0,
            grid=(m // bm,),
            in_specs=in_specs,
            out_specs=out_specs,
        ),
        compiler_params=pltpu.CompilerParams(dimension_semantics=("parallel",)),
    )(*tiled, *bcast)


# --------------------------------------------------------------- layout helpers

def nchw_to_flat(x, dtype=BF16):
    n, c, h, w = x.shape
    return jnp.transpose(x, (0, 2, 3, 1)).reshape(n * h * w, c).astype(dtype)


def flat_to_nchw(x, n, h, w):
    return jnp.transpose(x.reshape(n, h, w, -1), (0, 3, 1, 2))


def _interp_matrix(src, dst):
    """Row interpolation matrix (dst, src) for bilinear, align_corners=True."""
    coords = jnp.arange(dst, dtype=F32) * (src - 1) / max(dst - 1, 1)
    lo = jnp.clip(jnp.floor(coords).astype(jnp.int32), 0, max(src - 2, 0))
    frac = coords - lo.astype(F32)
    idx = jnp.arange(dst)
    a = jnp.zeros((dst, src), F32)
    a = a.at[idx, lo].add(1.0 - frac)
    a = a.at[idx, jnp.minimum(lo + 1, src - 1)].add(frac)
    return a


def build_upsample_matrices(h, w, th, tw, n, dtype=BF16):
    """R (th*tw, h*w): one-image bilinear upsample as a single matmul.
    R_full (n*th*tw, n*h*w): batch-block-diagonal version so the upsample of the
    whole channels-last batch is one matmul (no NCHW transposes needed)."""
    r = jnp.kron(_interp_matrix(h, th), _interp_matrix(w, tw)).astype(dtype)
    r_full = jnp.kron(jnp.eye(n, dtype=F32), r.astype(F32)).astype(dtype)
    return r, r_full


# ------------------------------------------------------------------- parameters

def bn_fold(gamma, beta, mean, var, eps=1e-5):
    scale = gamma / jnp.sqrt(var + eps)
    return scale, beta - mean * scale


def init_raw_params(key, in_dim=256, hidden=32, cls_p=7, cls_h=3, cls_f=2):
    """Random parameters laid out like the PyTorch module."""
    keys = iter(jax.random.split(key, 128))

    def conv_w(cin, cout):
        return jax.random.normal(next(keys), (cin, cout), F32) / jnp.sqrt(
            jnp.float32(cin))

    def bn(c):
        gamma = 1.0 + 0.1 * jax.random.normal(next(keys), (c,), F32)
        beta = 0.1 * jax.random.normal(next(keys), (c,), F32)
        mean = 0.1 * jax.random.normal(next(keys), (c,), F32)
        var = 1.0 + 0.1 * jnp.abs(jax.random.normal(next(keys), (c,), F32))
        return (gamma, beta, mean, var)

    p = {
        "p_conv_w": conv_w(in_dim, hidden * cls_p), "p_conv_bn": bn(hidden * cls_p),
        "h_conv_w": conv_w(in_dim, hidden * cls_h), "h_conv_bn": bn(hidden * cls_h),
        "f_conv_w": conv_w(in_dim, hidden * cls_f), "f_conv_bn": bn(hidden * cls_f),
        "conv2_w": conv_w(256, 48), "conv2_bn": bn(48),
    }
    for name, k in (("p_seg", cls_p), ("h_seg", cls_h), ("f_seg", cls_f)):
        p[name + "_w"] = jax.random.normal(next(keys), (k, hidden), F32) / jnp.sqrt(
            jnp.float32(hidden))
        p[name + "_b"] = 0.1 * jax.random.normal(next(keys), (k,), F32)
    p["conv3_w1"] = [conv_w(hidden + 48, hidden) for _ in range(cls_p)]
    p["conv3_bn1"] = [bn(hidden) for _ in range(cls_p)]
    p["conv3_w2"] = [conv_w(hidden, hidden) for _ in range(cls_p)]
    p["conv3_bn2"] = [bn(hidden) for _ in range(cls_p)]
    return p


def prepare_params(raw, *, hidden=32, cls_p=7, cls_h=3, cls_f=2, dtype=BF16):
    """Fold BN into the conv weights, build block-diagonal / stacked fused weights,
    lane-pad every matmul width (p 224->256, h 96->128, f 64->128, all seg outputs
    ->128), cast weights to bf16 (biases f32)."""
    lane_pad = lambda c: pl.cdiv(c, LANE) * LANE
    cp, ch, cf = hidden * cls_p, hidden * cls_h, hidden * cls_f
    cp_pad, ch_pad, cf_pad = lane_pad(cp), lane_pad(ch), lane_pad(cf)
    skip_dim = raw["conv2_w"].shape[1]  # 48

    def fold(w, bn_params):
        s, b = bn_fold(*bn_params)
        return (w * s[None, :]).astype(dtype), b.reshape(1, -1).astype(F32)

    def pad_cols(a, n):
        return jnp.pad(a, ((0, 0), (0, n - a.shape[1])))

    def seg_block_diag(wg, bg, k, rows_pad):
        """Grouped 1x1 conv (k groups of `hidden` channels) as a block-diagonal
        matmul weight; rows and columns zero-padded to lane-dense widths so the
        pallas output store is a full-width unmasked vst."""
        bd = jnp.zeros((rows_pad, LANE), dtype)
        for i in range(k):
            bd = bd.at[i * hidden:(i + 1) * hidden, i].set(wg[i].astype(dtype))
        bias = jnp.zeros((1, LANE), F32).at[0, :k].set(bg)
        return bd, bias

    prep = {}
    pw, pb = fold(raw["p_conv_w"], raw["p_conv_bn"])
    prep["p_w"], prep["p_b"] = pad_cols(pw, cp_pad), pad_cols(pb, cp_pad)
    hw_, hb_ = fold(raw["h_conv_w"], raw["h_conv_bn"])
    prep["h_w"], prep["h_b"] = pad_cols(hw_, ch_pad), pad_cols(hb_, ch_pad)
    fw_, fb_ = fold(raw["f_conv_w"], raw["f_conv_bn"])
    prep["f_w"], prep["f_b"] = pad_cols(fw_, cf_pad), pad_cols(fb_, cf_pad)

    prep["h_seg_w"], prep["h_seg_b"] = seg_block_diag(
        raw["h_seg_w"], raw["h_seg_b"], cls_h, ch_pad)
    prep["f_seg_w"], prep["f_seg_b"] = seg_block_diag(
        raw["f_seg_w"], raw["f_seg_b"], cls_f, cf_pad)
    prep["p_seg_w"], prep["p_seg_b"] = seg_block_diag(
        raw["p_seg_w"], raw["p_seg_b"], cls_p, cp_pad)

    prep["c2_w"], prep["c2_b"] = fold(raw["conv2_w"], raw["conv2_bn"])

    # Final_cls conv3, all cls_p branches stacked:
    #   layer 1: node part -> block-diagonal W1n, skip part -> stacked W1s
    #   layer 2: block-diagonal W2
    w1n = jnp.zeros((cp_pad, cp_pad), dtype)
    w1s = jnp.zeros((skip_dim, cp_pad), dtype)
    b1 = jnp.zeros((1, cp_pad), F32)
    w2 = jnp.zeros((cp_pad, cp_pad), dtype)
    b2 = jnp.zeros((1, cp_pad), F32)
    for i in range(cls_p):
        lo, hi = i * hidden, (i + 1) * hidden
        s1, bb1 = bn_fold(*raw["conv3_bn1"][i])
        w1_i = raw["conv3_w1"][i] * s1[None, :]
        w1n = w1n.at[lo:hi, lo:hi].set(w1_i[:hidden].astype(dtype))
        w1s = w1s.at[:, lo:hi].set(w1_i[hidden:].astype(dtype))
        b1 = b1.at[0, lo:hi].set(bb1)
        s2, bb2 = bn_fold(*raw["conv3_bn2"][i])
        w2 = w2.at[lo:hi, lo:hi].set((raw["conv3_w2"][i] * s2[None, :]).astype(dtype))
        b2 = b2.at[0, lo:hi].set(bb2)
    prep.update(w1n=w1n, w1s=w1s, b1=b1, w2=w2, b2=b2)
    return prep


# ---------------------------------------------------------------------- forward

def gnn_infer_forward(prep, xp, xh, xf, xl, *, cls_p=7, cls_h=3, cls_f=2):
    """Fused Pallas forward (2 launches).  Returns the module's 10-tuple."""
    n, _, h, w = xp.shape
    _, _, th, tw = xl.shape

    xp_f = nchw_to_flat(xp)
    xh_f = nchw_to_flat(xh)
    xf_f = nchw_to_flat(xf)
    xl_f = nchw_to_flat(xl)

    # (A) h / f node convs + grouped seg heads: one launch, two 128-lane outputs.
    h_seg_p, f_seg_p = _fused_call(
        _hf_seg_kernel, [xh_f, xf_f],
        [prep["h_w"], prep["h_b"], prep["h_seg_w"], prep["h_seg_b"],
         prep["f_w"], prep["f_b"], prep["f_seg_w"], prep["f_seg_b"]],
        out_dims=(LANE, LANE), out_dtypes=(F32, F32))

    # (B) p node conv + Final_cls (all 7 classes) + grouped p_seg head: one launch.
    #     p_feat is recomputed inside from the broadcast coarse map (no HBM trip).
    p_seg_p = _fused_call(
        _refine_kernel, [prep["r_full"], xl_f],
        [xp_f, prep["p_w"], prep["p_b"],
         prep["c2_w"], prep["c2_b"],
         prep["w1n"], prep["w1s"], prep["b1"],
         prep["w2"], prep["b2"],
         prep["p_seg_w"], prep["p_seg_b"]],
        out_dims=(LANE,), out_dtypes=(F32,))

    p_seg = flat_to_nchw(p_seg_p[:, :cls_p], n, th, tw)
    h_seg = flat_to_nchw(h_seg_p[:, :cls_h], n, h, w)
    f_seg = flat_to_nchw(f_seg_p[:, :cls_f], n, h, w)
    return ([p_seg], [h_seg], [f_seg], [], [], [], [], [], [], [])


# -------------------------------------------------------------------- reference

def gnn_infer_reference(prep, xp, xh, xf, xl, *, hidden=32,
                        cls_p=7, cls_h=3, cls_f=2):
    """Module-faithful pure-jnp reference: per-class Final_cls loop, per-group seg
    convs, per-image/per-class bilinear upsample.  Uses the same folded bf16
    weights and the same rounding points as the kernels, so it validates both the
    block-diagonal / stacked-weight fusion math and the Pallas tiling."""
    n, _, h, w = xp.shape
    _, _, th, tw = xl.shape

    dot = lambda a, b: jnp.dot(a, b, preferred_element_type=F32)
    bf = lambda v: v.astype(BF16)

    xp_f, xh_f, xf_f, xl_f = (nchw_to_flat(v) for v in (xp, xh, xf, xl))

    p_feat = bf(jnp.maximum(dot(xp_f, prep["p_w"]) + prep["p_b"], 0.0))
    h_feat = bf(jnp.maximum(dot(xh_f, prep["h_w"]) + prep["h_b"], 0.0))
    f_feat = bf(jnp.maximum(dot(xf_f, prep["f_w"]) + prep["f_b"], 0.0))

    def grouped_seg(feat, w_bd, bias, k):
        cols = []
        for i in range(k):
            lo, hi = i * hidden, (i + 1) * hidden
            cols.append(dot(feat[:, lo:hi], w_bd[lo:hi, i:i + 1]) + bias[0, i])
        return jnp.concatenate(cols, axis=1)

    h_seg_f = grouped_seg(h_feat, prep["h_seg_w"], prep["h_seg_b"], cls_h)
    f_seg_f = grouped_seg(f_feat, prep["f_seg_w"], prep["f_seg_b"], cls_f)

    # Final_cls: skip, per-class upsample + two conv+BN+ReLU, grouped p_seg head.
    skip = bf(jnp.maximum(dot(xl_f, prep["c2_w"]) + prep["c2_b"], 0.0))
    r = prep["r"]
    p_feat_img = p_feat.reshape(n, h * w, -1)
    p_final = []
    for i in range(cls_p):
        lo, hi = i * hidden, (i + 1) * hidden
        node = jnp.concatenate(
            [dot(r, p_feat_img[b, :, lo:hi]) for b in range(n)], axis=0)
        w1_i = jnp.concatenate([prep["w1n"][lo:hi, lo:hi],
                                prep["w1s"][:, lo:hi]], axis=0)
        cat = jnp.concatenate([bf(node), skip], axis=1)
        y1 = bf(jnp.maximum(dot(cat, w1_i) + prep["b1"][:, lo:hi], 0.0))
        y2 = bf(jnp.maximum(dot(y1, prep["w2"][lo:hi, lo:hi])
                            + prep["b2"][:, lo:hi], 0.0))
        p_final.append(y2)
    p_seg_f = jnp.concatenate(
        [dot(p_final[i], prep["p_seg_w"][i * hidden:(i + 1) * hidden, i:i + 1])
         + prep["p_seg_b"][0, i] for i in range(cls_p)], axis=1)

    p_seg = flat_to_nchw(p_seg_f, n, th, tw)
    h_seg = flat_to_nchw(h_seg_f, n, h, w)
    f_seg = flat_to_nchw(f_seg_f, n, h, w)
    return ([p_seg], [h_seg], [f_seg], [], [], [], [], [], [], [])


# ------------------------------------------------------------------------- main

if __name__ == "__main__":
    key = jax.random.PRNGKey(0)
    k_par, k_xp, k_xh, k_xf, k_xl = jax.random.split(key, 5)

    # in_dim=256 is fixed by the module (conv2 takes 256); small spatial sizes.
    N, IN_DIM, H, W = 2, 256, 8, 8
    TH, TW = 16, 16
    HIDDEN, CLS_P, CLS_H, CLS_F = 32, 7, 3, 2

    raw = init_raw_params(k_par, in_dim=IN_DIM, hidden=HIDDEN,
                          cls_p=CLS_P, cls_h=CLS_H, cls_f=CLS_F)
    prep = prepare_params(raw, hidden=HIDDEN, cls_p=CLS_P, cls_h=CLS_H, cls_f=CLS_F)
    # Precompute the bilinear-upsample matrices once (device arrays handed to jit).
    prep["r"], prep["r_full"] = build_upsample_matrices(H, W, TH, TW, N)

    xp = jax.random.normal(k_xp, (N, IN_DIM, H, W), F32)
    xh = jax.random.normal(k_xh, (N, IN_DIM, H, W), F32)
    xf = jax.random.normal(k_xf, (N, IN_DIM, H, W), F32)
    xl = jax.random.normal(k_xl, (N, 256, TH, TW), F32)

    fwd = jax.jit(functools.partial(gnn_infer_forward,
                                    cls_p=CLS_P, cls_h=CLS_H, cls_f=CLS_F))
    out = jax.block_until_ready(fwd(prep, xp, xh, xf, xl))
    ref = gnn_infer_reference(prep, xp, xh, xf, xl, hidden=HIDDEN,
                              cls_p=CLS_P, cls_h=CLS_H, cls_f=CLS_F)

    p_seg, h_seg, f_seg = out[0][0], out[1][0], out[2][0]
    p_ref, h_ref, f_ref = ref[0][0], ref[1][0], ref[2][0]

    assert p_seg.shape == (N, CLS_P, TH, TW), p_seg.shape
    assert h_seg.shape == (N, CLS_H, H, W), h_seg.shape
    assert f_seg.shape == (N, CLS_F, H, W), f_seg.shape
    for a, b in ((p_seg, p_ref), (h_seg, h_ref), (f_seg, f_ref)):
        assert jnp.all(jnp.isfinite(a))
        assert jnp.allclose(a, b, rtol=2e-3, atol=2e-3), float(
            jnp.max(jnp.abs(a - b)))

    print("KERNEL_OK")
</pallas_src>

<mosaic_0001>
module attributes {stable_mosaic.version = 11 : i64} {
  func.func @_refine_kernel(%arg0: i32, %arg1: memref<512x128xbf16, #tpu.memory_space<vmem>>, %arg2: memref<512x256xbf16, #tpu.memory_space<vmem>>, %arg3: memref<128x256xbf16, #tpu.memory_space<vmem>>, %arg4: memref<256x256xbf16, #tpu.memory_space<vmem>>, %arg5: memref<1x256xf32, #tpu.memory_space<vmem>>, %arg6: memref<256x48xbf16, #tpu.memory_space<vmem>>, %arg7: memref<1x48xf32, #tpu.memory_space<vmem>>, %arg8: memref<256x256xbf16, #tpu.memory_space<vmem>>, %arg9: memref<48x256xbf16, #tpu.memory_space<vmem>>, %arg10: memref<1x256xf32, #tpu.memory_space<vmem>>, %arg11: memref<256x256xbf16, #tpu.memory_space<vmem>>, %arg12: memref<1x256xf32, #tpu.memory_space<vmem>>, %arg13: memref<256x128xbf16, #tpu.memory_space<vmem>>, %arg14: memref<1x128xf32, #tpu.memory_space<vmem>>, %arg15: memref<512x128xf32, #tpu.memory_space<vmem>>) attributes {dimension_semantics = [#tpu.dimension_semantics<parallel>], iteration_bounds = array<i64: 1>, scalar_prefetch = 0 : i64, scratch_operands = 0 : i64, tpu.core_type = #tpu.core_type<tc>, window_params = [{transform_indices = @transform_0, window_bounds = array<i64: 512, 128>}, {transform_indices = @transform_1, window_bounds = array<i64: 512, 256>}, {pipeline_mode = #tpu.pipeline_mode<synchronous>, transform_indices = @transform_2, window_bounds = array<i64: 128, 256>}, {pipeline_mode = #tpu.pipeline_mode<synchronous>, transform_indices = @transform_3, window_bounds = array<i64: 256, 256>}, {pipeline_mode = #tpu.pipeline_mode<synchronous>, transform_indices = @transform_4, window_bounds = array<i64: 1, 256>}, {pipeline_mode = #tpu.pipeline_mode<synchronous>, transform_indices = @transform_5, window_bounds = array<i64: 256, 48>}, {pipeline_mode = #tpu.pipeline_mode<synchronous>, transform_indices = @transform_6, window_bounds = array<i64: 1, 48>}, {pipeline_mode = #tpu.pipeline_mode<synchronous>, transform_indices = @transform_7, window_bounds = array<i64: 256, 256>}, {pipeline_mode = #tpu.pipeline_mode<synchronous>, transform_indices = @transform_8, window_bounds = array<i64: 48, 256>}, {pipeline_mode = #tpu.pipeline_mode<synchronous>, transform_indices = @transform_9, window_bounds = array<i64: 1, 256>}, {pipeline_mode = #tpu.pipeline_mode<synchronous>, transform_indices = @transform_10, window_bounds = array<i64: 256, 256>}, {pipeline_mode = #tpu.pipeline_mode<synchronous>, transform_indices = @transform_11, window_bounds = array<i64: 1, 256>}, {pipeline_mode = #tpu.pipeline_mode<synchronous>, transform_indices = @transform_12, window_bounds = array<i64: 256, 128>}, {pipeline_mode = #tpu.pipeline_mode<synchronous>, transform_indices = @transform_13, window_bounds = array<i64: 1, 128>}, {transform_indices = @transform_14, window_bounds = array<i64: 512, 128>}]} {
    %c0 = arith.constant 0 : index
    %c0_0 = arith.constant 0 : index
    %0 = vector.load %arg3[%c0, %c0_0] : memref<128x256xbf16, #tpu.memory_space<vmem>>, vector<128x256xbf16>
    %c0_1 = arith.constant 0 : index
    %c0_2 = arith.constant 0 : index
    %1 = vector.load %arg4[%c0_1, %c0_2] : memref<256x256xbf16, #tpu.memory_space<vmem>>, vector<256x256xbf16>
    %cst = arith.constant dense<0.000000e+00> : vector<128x256xf32>
    %2 = tpu.matmul %0, %1, %cst {dimension_numbers = #tpu.dot_dimension_numbers<[1], [0], [0], [1], [0, 0, 1, 1], [], []>} : vector<128x256xbf16>, vector<256x256xbf16>, vector<128x256xf32> -> vector<128x256xf32>
    %c0_3 = arith.constant 0 : index
    %c0_4 = arith.constant 0 : index
    %3 = vector.load %arg5[%c0_3, %c0_4] : memref<1x256xf32, #tpu.memory_space<vmem>>, vector<1x256xf32>
    %4 = vector.broadcast %3 : vector<1x256xf32> to vector<128x256xf32>
    %5 = arith.addf %2, %4 : vector<128x256xf32>
    %cst_5 = arith.constant 0.000000e+00 : f32
    %6 = vector.broadcast %cst_5 : f32 to vector<128x256xf32>
    %7 = arith.maximumf %5, %6 : vector<128x256xf32>
    %8 = arith.truncf %7 : vector<128x256xf32> to vector<128x256xbf16>
    %c0_6 = arith.constant 0 : index
    %c0_7 = arith.constant 0 : index
    %9 = vector.load %arg2[%c0_6, %c0_7] : memref<512x256xbf16, #tpu.memory_space<vmem>>, vector<512x256xbf16>
    %c0_8 = arith.constant 0 : index
    %c0_9 = arith.constant 0 : index
    %10 = vector.load %arg6[%c0_8, %c0_9] : memref<256x48xbf16, #tpu.memory_space<vmem>>, vector<256x48xbf16>
    %cst_10 = arith.constant dense<0.000000e+00> : vector<512x48xf32>
    %11 = tpu.matmul %9, %10, %cst_10 {dimension_numbers = #tpu.dot_dimension_numbers<[1], [0], [0], [1], [0, 0, 1, 1], [], []>} : vector<512x256xbf16>, vector<256x48xbf16>, vector<512x48xf32> -> vector<512x48xf32>
    %c0_11 = arith.constant 0 : index
    %c0_12 = arith.constant 0 : index
    %12 = vector.load %arg7[%c0_11, %c0_12] : memref<1x48xf32, #tpu.memory_space<vmem>>, vector<1x48xf32>
    %13 = vector.broadcast %12 : vector<1x48xf32> to vector<512x48xf32>
    %14 = arith.addf %11, %13 : vector<512x48xf32>
    %cst_13 = arith.constant 0.000000e+00 : f32
    %15 = vector.broadcast %cst_13 : f32 to vector<512x48xf32>
    %16 = arith.maximumf %14, %15 : vector<512x48xf32>
    %17 = arith.truncf %16 : vector<512x48xf32> to vector<512x48xbf16>
    %c0_14 = arith.constant 0 : index
    %c0_15 = arith.constant 0 : index
    %18 = vector.load %arg1[%c0_14, %c0_15] : memref<512x128xbf16, #tpu.memory_space<vmem>>, vector<512x128xbf16>
    %cst_16 = arith.constant dense<0.000000e+00> : vector<512x256xf32>
    %19 = tpu.matmul %18, %8, %cst_16 {dimension_numbers = #tpu.dot_dimension_numbers<[1], [0], [0], [1], [0, 0, 1, 1], [], []>} : vector<512x128xbf16>, vector<128x256xbf16>, vector<512x256xf32> -> vector<512x256xf32>
    %20 = arith.truncf %19 : vector<512x256xf32> to vector<512x256xbf16>
    %c0_17 = arith.constant 0 : index
    %c0_18 = arith.constant 0 : index
    %21 = vector.load %arg8[%c0_17, %c0_18] : memref<256x256xbf16, #tpu.memory_space<vmem>>, vector<256x256xbf16>
    %cst_19 = arith.constant dense<0.000000e+00> : vector<512x256xf32>
    %22 = tpu.matmul %20, %21, %cst_19 {dimension_numbers = #tpu.dot_dimension_numbers<[1], [0], [0], [1], [0, 0, 1, 1], [], []>} : vector<512x256xbf16>, vector<256x256xbf16>, vector<512x256xf32> -> vector<512x256xf32>
    %c0_20 = arith.constant 0 : index
    %c0_21 = arith.constant 0 : index
    %23 = vector.load %arg9[%c0_20, %c0_21] : memref<48x256xbf16, #tpu.memory_space<vmem>>, vector<48x256xbf16>
    %cst_22 = arith.constant dense<0.000000e+00> : vector<512x256xf32>
    %24 = tpu.matmul %17, %23, %cst_22 {dimension_numbers = #tpu.dot_dimension_numbers<[1], [0], [0], [1], [0, 0, 1, 1], [], []>} : vector<512x48xbf16>, vector<48x256xbf16>, vector<512x256xf32> -> vector<512x256xf32>
    %25 = arith.addf %22, %24 : vector<512x256xf32>
    %c0_23 = arith.constant 0 : index
    %c0_24 = arith.constant 0 : index
    %26 = vector.load %arg10[%c0_23, %c0_24] : memref<1x256xf32, #tpu.memory_space<vmem>>, vector<1x256xf32>
    %27 = vector.broadcast %26 : vector<1x256xf32> to vector<512x256xf32>
    %28 = arith.addf %25, %27 : vector<512x256xf32>
    %cst_25 = arith.constant 0.000000e+00 : f32
    %29 = vector.broadcast %cst_25 : f32 to vector<512x256xf32>
    %30 = arith.maximumf %28, %29 : vector<512x256xf32>
    %31 = arith.truncf %30 : vector<512x256xf32> to vector<512x256xbf16>
    %c0_26 = arith.constant 0 : index
    %c0_27 = arith.constant 0 : index
    %32 = vector.load %arg11[%c0_26, %c0_27] : memref<256x256xbf16, #tpu.memory_space<vmem>>, vector<256x256xbf16>
    %cst_28 = arith.constant dense<0.000000e+00> : vector<512x256xf32>
    %33 = tpu.matmul %31, %32, %cst_28 {dimension_numbers = #tpu.dot_dimension_numbers<[1], [0], [0], [1], [0, 0, 1, 1], [], []>} : vector<512x256xbf16>, vector<256x256xbf16>, vector<512x256xf32> -> vector<512x256xf32>
    %c0_29 = arith.constant 0 : index
    %c0_30 = arith.constant 0 : index
    %34 = vector.load %arg12[%c0_29, %c0_30] : memref<1x256xf32, #tpu.memory_space<vmem>>, vector<1x256xf32>
    %35 = vector.broadcast %34 : vector<1x256xf32> to vector<512x256xf32>
    %36 = arith.addf %33, %35 : vector<512x256xf32>
    %cst_31 = arith.constant 0.000000e+00 : f32
    %37 = vector.broadcast %cst_31 : f32 to vector<512x256xf32>
    %38 = arith.maximumf %36, %37 : vector<512x256xf32>
    %39 = arith.truncf %38 : vector<512x256xf32> to vector<512x256xbf16>
    %c0_32 = arith.constant 0 : index
    %c0_33 = arith.constant 0 : index
    %40 = vector.load %arg13[%c0_32, %c0_33] : memref<256x128xbf16, #tpu.memory_space<vmem>>, vector<256x128xbf16>
    %cst_34 = arith.constant dense<0.000000e+00> : vector<512x128xf32>
    %41 = tpu.matmul %39, %40, %cst_34 {dimension_numbers = #tpu.dot_dimension_numbers<[1], [0], [0], [1], [0, 0, 1, 1], [], []>} : vector<512x256xbf16>, vector<256x128xbf16>, vector<512x128xf32> -> vector<512x128xf32>
    %c0_35 = arith.constant 0 : index
    %c0_36 = arith.constant 0 : index
    %42 = vector.load %arg14[%c0_35, %c0_36] : memref<1x128xf32, #tpu.memory_space<vmem>>, vector<1x128xf32>
    %43 = vector.broadcast %42 : vector<1x128xf32> to vector<512x128xf32>
    %44 = arith.addf %41, %43 : vector<512x128xf32>
    %c0_37 = arith.constant 0 : index
    %c0_38 = arith.constant 0 : index
    %45 = vector.load %arg15[%c0_37, %c0_38] : memref<512x128xf32, #tpu.memory_space<vmem>>, vector<512x128xf32>
    tpu.vector_store %arg15[%c0_37, %c0_38], %44 {strides = array<i32>} : memref<512x128xf32, #tpu.memory_space<vmem>>, vector<512x128xf32>,
    return
  }
  func.func @transform_0(%arg0: i32) -> (i32, i32) {
    %c0_i32 = arith.constant 0 : i32
    %c0_i32_0 = arith.constant 0 : i32
    return %arg0, %c0_i32 : i32, i32
  }
  func.func @transform_1(%arg0: i32) -> (i32, i32) {
    %c0_i32 = arith.constant 0 : i32
    %c0_i32_0 = arith.constant 0 : i32
    return %arg0, %c0_i32 : i32, i32
  }
  func.func @transform_2(%arg0: i32) -> (i32, i32) {
    %c0_i32 = arith.constant 0 : i32
    %c0_i32_0 = arith.constant 0 : i32
    %c0_i32_1 = arith.constant 0 : i32
    return %c0_i32, %c0_i32_0 : i32, i32
  }
  func.func @transform_3(%arg0: i32) -> (i32, i32) {
    %c0_i32 = arith.constant 0 : i32
    %c0_i32_0 = arith.constant 0 : i32
    %c0_i32_1 = arith.constant 0 : i32
    return %c0_i32, %c0_i32_0 : i32, i32
  }
  func.func @transform_4(%arg0: i32) -> (i32, i32) {
    %c0_i32 = arith.constant 0 : i32
    %c0_i32_0 = arith.constant 0 : i32
    %c0_i32_1 = arith.constant 0 : i32
    return %c0_i32, %c0_i32_0 : i32, i32
  }
  func.func @transform_5(%arg0: i32) -> (i32, i32) {
    %c0_i32 = arith.constant 0 : i32
    %c0_i32_0 = arith.constant 0 : i32
    %c0_i32_1 = arith.constant 0 : i32
    return %c0_i32, %c0_i32_0 : i32, i32
  }
  func.func @transform_6(%arg0: i32) -> (i32, i32) {
    %c0_i32 = arith.constant 0 : i32
    %c0_i32_0 = arith.constant 0 : i32
    %c0_i32_1 = arith.constant 0 : i32
    return %c0_i32, %c0_i32_0 : i32, i32
  }
  func.func @transform_7(%arg0: i32) -> (i32, i32) {
    %c0_i32 = arith.constant 0 : i32
    %c0_i32_0 = arith.constant 0 : i32
    %c0_i32_1 = arith.constant 0 : i32
    return %c0_i32, %c0_i32_0 : i32, i32
  }
  func.func @transform_8(%arg0: i32) -> (i32, i32) {
    %c0_i32 = arith.constant 0 : i32
    %c0_i32_0 = arith.constant 0 : i32
    %c0_i32_1 = arith.constant 0 : i32
    return %c0_i32, %c0_i32_0 : i32, i32
  }
  func.func @transform_9(%arg0: i32) -> (i32, i32) {
    %c0_i32 = arith.constant 0 : i32
    %c0_i32_0 = arith.constant 0 : i32
    %c0_i32_1 = arith.constant 0 : i32
    return %c0_i32, %c0_i32_0 : i32, i32
  }
  func.func @transform_10(%arg0: i32) -> (i32, i32) {
    %c0_i32 = arith.constant 0 : i32
    %c0_i32_0 = arith.constant 0 : i32
    %c0_i32_1 = arith.constant 0 : i32
    return %c0_i32, %c0_i32_0 : i32, i32
  }
  func.func @transform_11(%arg0: i32) -> (i32, i32) {
    %c0_i32 = arith.constant 0 : i32
    %c0_i32_0 = arith.constant 0 : i32
    %c0_i32_1 = arith.constant 0 : i32
    return %c0_i32, %c0_i32_0 : i32, i32
  }
  func.func @transform_12(%arg0: i32) -> (i32, i32) {
    %c0_i32 = arith.constant 0 : i32
    %c0_i32_0 = arith.constant 0 : i32
    %c0_i32_1 = arith.constant 0 : i32
    return %c0_i32, %c0_i32_0 : i32, i32
  }
  func.func @transform_13(%arg0: i32) -> (i32, i32) {
    %c0_i32 = arith.constant 0 : i32
    %c0_i32_0 = arith.constant 0 : i32
    %c0_i32_1 = arith.constant 0 : i32
    return %c0_i32, %c0_i32_0 : i32, i32
  }
  func.func @transform_14(%arg0: i32) -> (i32, i32) {
    %c0_i32 = arith.constant 0 : i32
    %c0_i32_0 = arith.constant 0 : i32
    return %arg0, %c0_i32 : i32, i32
  }
}

module attributes {stable_mosaic.version = 11 : i64} {
  func.func @_hf_seg_kernel(%arg0: i32, %arg1: memref<128x256xbf16, #tpu.memory_space<vmem>>, %arg2: memref<128x256xbf16, #tpu.memory_space<vmem>>, %arg3: memref<256x128xbf16, #tpu.memory_space<vmem>>, %arg4: memref<1x128xf32, #tpu.memory_space<vmem>>, %arg5: memref<128x128xbf16, #tpu.memory_space<vmem>>, %arg6: memref<1x128xf32, #tpu.memory_space<vmem>>, %arg7: memref<256x128xbf16, #tpu.memory_space<vmem>>, %arg8: memref<1x128xf32, #tpu.memory_space<vmem>>, %arg9: memref<128x128xbf16, #tpu.memory_space<vmem>>, %arg10: memref<1x128xf32, #tpu.memory_space<vmem>>, %arg11: memref<128x128xf32, #tpu.memory_space<vmem>>, %arg12: memref<128x128xf32, #tpu.memory_space<vmem>>) attributes {dimension_semantics = [#tpu.dimension_semantics<parallel>], iteration_bounds = array<i64: 1>, scalar_prefetch = 0 : i64, scratch_operands = 0 : i64, tpu.core_type = #tpu.core_type<tc>, window_params = [{transform_indices = @transform_0, window_bounds = array<i64: 128, 256>}, {transform_indices = @transform_1, window_bounds = array<i64: 128, 256>}, {pipeline_mode = #tpu.pipeline_mode<synchronous>, transform_indices = @transform_2, window_bounds = array<i64: 256, 128>}, {pipeline_mode = #tpu.pipeline_mode<synchronous>, transform_indices = @transform_3, window_bounds = array<i64: 1, 128>}, {pipeline_mode = #tpu.pipeline_mode<synchronous>, transform_indices = @transform_4, window_bounds = array<i64: 128, 128>}, {pipeline_mode = #tpu.pipeline_mode<synchronous>, transform_indices = @transform_5, window_bounds = array<i64: 1, 128>}, {pipeline_mode = #tpu.pipeline_mode<synchronous>, transform_indices = @transform_6, window_bounds = array<i64: 256, 128>}, {pipeline_mode = #tpu.pipeline_mode<synchronous>, transform_indices = @transform_7, window_bounds = array<i64: 1, 128>}, {pipeline_mode = #tpu.pipeline_mode<synchronous>, transform_indices = @transform_8, window_bounds = array<i64: 128, 128>}, {pipeline_mode = #tpu.pipeline_mode<synchronous>, transform_indices = @transform_9, window_bounds = array<i64: 1, 128>}, {transform_indices = @transform_10, window_bounds = array<i64: 128, 128>}, {transform_indices = @transform_11, window_bounds = array<i64: 128, 128>}]} {
    %c0 = arith.constant 0 : index
    %c0_0 = arith.constant 0 : index
    %0 = vector.load %arg1[%c0, %c0_0] : memref<128x256xbf16, #tpu.memory_space<vmem>>, vector<128x256xbf16>
    %c0_1 = arith.constant 0 : index
    %c0_2 = arith.constant 0 : index
    %1 = vector.load %arg3[%c0_1, %c0_2] : memref<256x128xbf16, #tpu.memory_space<vmem>>, vector<256x128xbf16>
    %cst = arith.constant dense<0.000000e+00> : vector<128x128xf32>
    %2 = tpu.matmul %0, %1, %cst {dimension_numbers = #tpu.dot_dimension_numbers<[1], [0], [0], [1], [0, 0, 1, 1], [], []>} : vector<128x256xbf16>, vector<256x128xbf16>, vector<128x128xf32> -> vector<128x128xf32>
    %c0_3 = arith.constant 0 : index
    %c0_4 = arith.constant 0 : index
    %3 = vector.load %arg4[%c0_3, %c0_4] : memref<1x128xf32, #tpu.memory_space<vmem>>, vector<1x128xf32>
    %4 = vector.broadcast %3 : vector<1x128xf32> to vector<128x128xf32>
    %5 = arith.addf %2, %4 : vector<128x128xf32>
    %cst_5 = arith.constant 0.000000e+00 : f32
    %6 = vector.broadcast %cst_5 : f32 to vector<128x128xf32>
    %7 = arith.maximumf %5, %6 : vector<128x128xf32>
    %8 = arith.truncf %7 : vector<128x128xf32> to vector<128x128xbf16>
    %c0_6 = arith.constant 0 : index
    %c0_7 = arith.constant 0 : index
    %9 = vector.load %arg5[%c0_6, %c0_7] : memref<128x128xbf16, #tpu.memory_space<vmem>>, vector<128x128xbf16>
    %cst_8 = arith.constant dense<0.000000e+00> : vector<128x128xf32>
    %10 = tpu.matmul %8, %9, %cst_8 {dimension_numbers = #tpu.dot_dimension_numbers<[1], [0], [0], [1], [0, 0, 1, 1], [], []>} : vector<128x128xbf16>, vector<128x128xbf16>, vector<128x128xf32> -> vector<128x128xf32>
    %c0_9 = arith.constant 0 : index
    %c0_10 = arith.constant 0 : index
    %11 = vector.load %arg6[%c0_9, %c0_10] : memref<1x128xf32, #tpu.memory_space<vmem>>, vector<1x128xf32>
    %12 = vector.broadcast %11 : vector<1x128xf32> to vector<128x128xf32>
    %13 = arith.addf %10, %12 : vector<128x128xf32>
    %c0_11 = arith.constant 0 : index
    %c0_12 = arith.constant 0 : index
    %14 = vector.load %arg11[%c0_11, %c0_12] : memref<128x128xf32, #tpu.memory_space<vmem>>, vector<128x128xf32>
    tpu.vector_store %arg11[%c0_11, %c0_12], %13 {strides = array<i32>} : memref<128x128xf32, #tpu.memory_space<vmem>>, vector<128x128xf32>,
    %c0_13 = arith.constant 0 : index
    %c0_14 = arith.constant 0 : index
    %15 = vector.load %arg2[%c0_13, %c0_14] : memref<128x256xbf16, #tpu.memory_space<vmem>>, vector<128x256xbf16>
    %c0_15 = arith.constant 0 : index
    %c0_16 = arith.constant 0 : index
    %16 = vector.load %arg7[%c0_15, %c0_16] : memref<256x128xbf16, #tpu.memory_space<vmem>>, vector<256x128xbf16>
    %cst_17 = arith.constant dense<0.000000e+00> : vector<128x128xf32>
    %17 = tpu.matmul %15, %16, %cst_17 {dimension_numbers = #tpu.dot_dimension_numbers<[1], [0], [0], [1], [0, 0, 1, 1], [], []>} : vector<128x256xbf16>, vector<256x128xbf16>, vector<128x128xf32> -> vector<128x128xf32>
    %c0_18 = arith.constant 0 : index
    %c0_19 = arith.constant 0 : index
    %18 = vector.load %arg8[%c0_18, %c0_19] : memref<1x128xf32, #tpu.memory_space<vmem>>, vector<1x128xf32>
    %19 = vector.broadcast %18 : vector<1x128xf32> to vector<128x128xf32>
    %20 = arith.addf %17, %19 : vector<128x128xf32>
    %cst_20 = arith.constant 0.000000e+00 : f32
    %21 = vector.broadcast %cst_20 : f32 to vector<128x128xf32>
    %22 = arith.maximumf %20, %21 : vector<128x128xf32>
    %23 = arith.truncf %22 : vector<128x128xf32> to vector<128x128xbf16>
    %c0_21 = arith.constant 0 : index
    %c0_22 = arith.constant 0 : index
    %24 = vector.load %arg9[%c0_21, %c0_22] : memref<128x128xbf16, #tpu.memory_space<vmem>>, vector<128x128xbf16>
    %cst_23 = arith.constant dense<0.000000e+00> : vector<128x128xf32>
    %25 = tpu.matmul %23, %24, %cst_23 {dimension_numbers = #tpu.dot_dimension_numbers<[1], [0], [0], [1], [0, 0, 1, 1], [], []>} : vector<128x128xbf16>, vector<128x128xbf16>, vector<128x128xf32> -> vector<128x128xf32>
    %c0_24 = arith.constant 0 : index
    %c0_25 = arith.constant 0 : index
    %26 = vector.load %arg10[%c0_24, %c0_25] : memref<1x128xf32, #tpu.memory_space<vmem>>, vector<1x128xf32>
    %27 = vector.broadcast %26 : vector<1x128xf32> to vector<128x128xf32>
    %28 = arith.addf %25, %27 : vector<128x128xf32>
    %c0_26 = arith.constant 0 : index
    %c0_27 = arith.constant 0 : index
    %29 = vector.load %arg12[%c0_26, %c0_27] : memref<128x128xf32, #tpu.memory_space<vmem>>, vector<128x128xf32>
    tpu.vector_store %arg12[%c0_26, %c0_27], %28 {strides = array<i32>} : memref<128x128xf32, #tpu.memory_space<vmem>>, vector<128x128xf32>,
    return
  }
  func.func @transform_0(%arg0: i32) -> (i32, i32) {
    %c0_i32 = arith.constant 0 : i32
    %c0_i32_0 = arith.constant 0 : i32
    return %arg0, %c0_i32 : i32, i32
  }
  func.func @transform_1(%arg0: i32) -> (i32, i32) {
    %c0_i32 = arith.constant 0 : i32
    %c0_i32_0 = arith.constant 0 : i32
    return %arg0, %c0_i32 : i32, i32
  }
  func.func @transform_2(%arg0: i32) -> (i32, i32) {
    %c0_i32 = arith.constant 0 : i32
    %c0_i32_0 = arith.constant 0 : i32
    %c0_i32_1 = arith.constant 0 : i32
    return %c0_i32, %c0_i32_0 : i32, i32
  }
  func.func @transform_3(%arg0: i32) -> (i32, i32) {
    %c0_i32 = arith.constant 0 : i32
    %c0_i32_0 = arith.constant 0 : i32
    %c0_i32_1 = arith.constant 0 : i32
    return %c0_i32, %c0_i32_0 : i32, i32
  }
  func.func @transform_4(%arg0: i32) -> (i32, i32) {
    %c0_i32 = arith.constant 0 : i32
    %c0_i32_0 = arith.constant 0 : i32
    %c0_i32_1 = arith.constant 0 : i32
    return %c0_i32, %c0_i32_0 : i32, i32
  }
  func.func @transform_5(%arg0: i32) -> (i32, i32) {
    %c0_i32 = arith.constant 0 : i32
    %c0_i32_0 = arith.constant 0 : i32
    %c0_i32_1 = arith.constant 0 : i32
    return %c0_i32, %c0_i32_0 : i32, i32
  }
  func.func @transform_6(%arg0: i32) -> (i32, i32) {
    %c0_i32 = arith.constant 0 : i32
    %c0_i32_0 = arith.constant 0 : i32
    %c0_i32_1 = arith.constant 0 : i32
    return %c0_i32, %c0_i32_0 : i32, i32
  }
  func.func @transform_7(%arg0: i32) -> (i32, i32) {
    %c0_i32 = arith.constant 0 : i32
    %c0_i32_0 = arith.constant 0 : i32
    %c0_i32_1 = arith.constant 0 : i32
    return %c0_i32, %c0_i32_0 : i32, i32
  }
  func.func @transform_8(%arg0: i32) -> (i32, i32) {
    %c0_i32 = arith.constant 0 : i32
    %c0_i32_0 = arith.constant 0 : i32
    %c0_i32_1 = arith.constant 0 : i32
    return %c0_i32, %c0_i32_0 : i32, i32
  }
  func.func @transform_9(%arg0: i32) -> (i32, i32) {
    %c0_i32 = arith.constant 0 : i32
    %c0_i32_0 = arith.constant 0 : i32
    %c0_i32_1 = arith.constant 0 : i32
    return %c0_i32, %c0_i32_0 : i32, i32
  }
  func.func @transform_10(%arg0: i32) -> (i32, i32) {
    %c0_i32 = arith.constant 0 : i32
    %c0_i32_0 = arith.constant 0 : i32
    return %arg0, %c0_i32 : i32, i32
  }
  func.func @transform_11(%arg0: i32) -> (i32, i32) {
    %c0_i32 = arith.constant 0 : i32
    %c0_i32_0 = arith.constant 0 : i32
    return %arg0, %c0_i32 : i32, i32
  }
}

</mosaic_0001>

<bundles_post_ra>
// kernel: gnn_infer_forward.2
= control target key start
LH: loop header
LB: loop body
LE: loop exit
PB: predicated region body
PF: predicated region fallthrough
CT: control target
= control target key end

     0   :  { %s2013_s2 = inlined_call_operand.vmem [shape: bf16[256,128], index: 2, kind: input, shape index: {}]   ;;  %s2014_s3 = inlined_call_operand.vmem [shape: f32[1,128], index: 3, kind: input, shape index: {}]   ;;  %s2015_s0 = inlined_call_operand.vmem [shape: bf16[128,256], index: 0, kind: input, shape index: {}]   ;;  %s2016_s6 = inlined_call_operand.vmem [shape: bf16[256,128], index: 6, kind: input, shape index: {}]   ;;  %s2017_s1 = inlined_call_operand.vmem [shape: bf16[128,256], index: 1, kind: input, shape index: {}]   ;;  %s2018_s4 = inlined_call_operand.vmem [shape: bf16[128,128], index: 4, kind: input, shape index: {}]   ;;  %s2019_s7 = inlined_call_operand.vmem [shape: f32[1,128], index: 7, kind: input, shape index: {}]   ;;  %s2020_s8 = inlined_call_operand.vmem [shape: bf16[128,128], index: 8, kind: input, shape index: {}]   ;;  %s2021_s5 = inlined_call_operand.vmem [shape: f32[1,128], index: 5, kind: input, shape index: {}]   ;;  %s2022_s9 = inlined_call_operand.vmem [shape: f32[1,128], index: 9, kind: input, shape index: {}]   ;;  %s2023_s10 = inlined_call_operand.vmem [shape: f32[128,128], index: 10, kind: output, shape index: {0}]   ;;  %s2024_s11 = inlined_call_operand.vmem [shape: f32[128,128], index: 11, kind: output, shape index: {1}]  }
   0x1   :  { %v1354_v0 = vld [vmem:[%s2013_s2 + $0x38] sm:$0xff]  ;;  %v1353_v2 = vld [vmem:[%s2013_s2 + $0x30] sm:$0xff]  ;;  %v1352_v4 = vld [vmem:[%s2013_s2 + $0x28] sm:$0xff] }
   0x2   :  { %v1362_v1 = vld [vmem:[%s2013_s2 + $0x78] sm:$0xff]  ;;  %265 = vmatpush.bf16.msra.mxu0 %v1354_v0  ;;  %1411 = vmatpush.bf16.msra.mxu2 %v1354_v0  ;;  %v1361_v3 = vld [vmem:[%s2013_s2 + $0x70] sm:$0xff]  ;;  %v1360_v5 = vld [vmem:[%s2013_s2 + $0x68] sm:$0xff] }
   0x3   :  { %1419 = vmatpush.bf16.msra.mxu3 %v1362_v1  ;;  %314 = vmatpush.bf16.msra.mxu1 %v1362_v1  ;;  %v1351_v6 = vld [vmem:[%s2013_s2 + $0x20] sm:$0xff]  ;;  %v1350_v8 = vld [vmem:[%s2013_s2 + $0x18] sm:$0xff]  ;;  %v1349_v10 = vld [vmem:[%s2013_s2 + $0x10] sm:$0xff] }
   0x4   :  { %v1359_v7 = vld [vmem:[%s2013_s2 + $0x60] sm:$0xff]  ;;  %v1358_v9 = vld [vmem:[%s2013_s2 + $0x58] sm:$0xff]  ;;  %v1357_v11 = vld [vmem:[%s2013_s2 + $0x50] sm:$0xff] }
   0x5   :  { %v1348_v12 = vld [vmem:[%s2013_s2 + $0x8] sm:$0xff]  ;;  %v1347_v14 = vld [vmem:[%s2013_s2] sm:$0xff]  ;;  %v1394_v24 = vld [vmem:[%s2016_s6 + $0x38] sm:$0xff] }
   0x6   :  { %266 = vmatpush.bf16.msra.mxu0 %v1353_v2  ;;  %1412 = vmatpush.bf16.msra.mxu2 %v1353_v2  ;;  %v1356_v13 = vld [vmem:[%s2013_s2 + $0x48] sm:$0xff]  ;;  %v1355_v15 = vld [vmem:[%s2013_s2 + $0x40] sm:$0xff]  ;;  %v1402_v25 = vld [vmem:[%s2016_s6 + $0x78] sm:$0xff] }
   0x7   :  { %1420 = vmatpush.bf16.msra.mxu3 %v1361_v3  ;;  %315 = vmatpush.bf16.msra.mxu1 %v1361_v3  ;;  %v1013_v16 = vld [vmem:[%s2015_s0] sm:$0xf]  ;;  %v1332_v17 = vld [vmem:[%s2015_s0 + $0x4] sm:$0xf0]  ;;  %v1339_v20 = vld [vmem:[%s2015_s0 + $0x44] sm:$0xf] }
   0x8   :  { %v1045_v18 = vld [vmem:[%s2015_s0 + $0x40] sm:$0xf]  ;;  %v1340_v19 = vld [vmem:[%s2015_s0 + $0x44] sm:$0xf0]  ;;  %v1047_v21 = vld [vmem:[%s2015_s0 + $0x48] sm:$0xf0]  ;;  %v1014_v26 = vor.u32 %v1332_v17, %v1013_v16 }
   0x9   :  { %v1331_v22 = vld [vmem:[%s2015_s0 + $0x4] sm:$0xf]  ;;  %v1015_v23 = vld [vmem:[%s2015_s0 + $0x8] sm:$0xf0]  ;;  %v1046_v27 = vor.u32 %v1340_v19, %v1045_v18  ;;  %v1050_v28 = vor.u32 %v1339_v20, %v1047_v21  ;;  %v1393_v30 = vld [vmem:[%s2016_s6 + $0x30] sm:$0xff] }
   0xa   :  { %267 = vmatpush.bf16.msra.mxu0 %v1352_v4  ;;  %1413 = vmatpush.bf16.msra.mxu2 %v1352_v4  ;;  %v1018_v29 = vor.u32 %v1331_v22, %v1015_v23  ;;  %v1401_v31 = vld [vmem:[%s2016_s6 + $0x70] sm:$0xff]  ;;  %v1392_v32 = vld [vmem:[%s2016_s6 + $0x28] sm:$0xff]  ;;  %v1391_v34 = vld [vmem:[%s2016_s6 + $0x20] sm:$0xff] }
   0xb   :  { %1421 = vmatpush.bf16.msra.mxu3 %v1360_v5  ;;  %316 = vmatpush.bf16.msra.mxu1 %v1360_v5  ;;  %v1400_v33 = vld [vmem:[%s2016_s6 + $0x68] sm:$0xff]  ;;  %v1399_v35 = vld [vmem:[%s2016_s6 + $0x60] sm:$0xff]  ;;  %v1021_v36 = vld [vmem:[%s2015_s0 + $0x10] sm:$0xf] }
   0xc   :  { %v1334_v37 = vld [vmem:[%s2015_s0 + $0x14] sm:$0xf0]  ;;  %v1053_v38 = vld [vmem:[%s2015_s0 + $0x50] sm:$0xf]  ;;  %v1341_v40 = vld [vmem:[%s2015_s0 + $0x54] sm:$0xf] }
   0xd   :  { %v1342_v39 = vld [vmem:[%s2015_s0 + $0x54] sm:$0xf0]  ;;  %v1055_v41 = vld [vmem:[%s2015_s0 + $0x58] sm:$0xf0]  ;;  %v1333_v42 = vld [vmem:[%s2015_s0 + $0x14] sm:$0xf]  ;;  %v1022_v46 = vor.u32 %v1334_v37, %v1021_v36 }
   0xe   :  { %268 = vmatpush.bf16.msra.mxu0 %v1351_v6  ;;  %1414 = vmatpush.bf16.msra.mxu2 %v1351_v6  ;;  %v1023_v43 = vld [vmem:[%s2015_s0 + $0x18] sm:$0xf0]  ;;  %v1054_v47 = vor.u32 %v1342_v39, %v1053_v38  ;;  %v1058_v48 = vor.u32 %v1341_v40, %v1055_v41  ;;  %v1389_v50 = vld [vmem:[%s2016_s6 + $0x10] sm:$0xff]  ;;  %v1388_v52 = vld [vmem:[%s2016_s6 + $0x8] sm:$0xff] }
   0xf   :  { %1422 = vmatpush.bf16.msra.mxu3 %v1359_v7  ;;  %317 = vmatpush.bf16.msra.mxu1 %v1359_v7  ;;  %v1390_v44 = vld [vmem:[%s2016_s6 + $0x18] sm:$0xff]  ;;  %v1026_v49 = vor.u32 %v1333_v42, %v1023_v43  ;;  %v1397_v51 = vld [vmem:[%s2016_s6 + $0x50] sm:$0xff]  ;;  %v1396_v53 = vld [vmem:[%s2016_s6 + $0x48] sm:$0xff] }
  0x10   :  { %v1398_v45 = vld [vmem:[%s2016_s6 + $0x58] sm:$0xff]  ;;  %v1387_v54 = vld [vmem:[%s2016_s6] sm:$0xff]  ;;  %v1336_v57 = vld [vmem:[%s2015_s0 + $0x24] sm:$0xf0] }
  0x11   :  { %v1395_v55 = vld [vmem:[%s2016_s6 + $0x40] sm:$0xff]  ;;  %v1344_v59 = vld [vmem:[%s2015_s0 + $0x64] sm:$0xf0]  ;;  %v1063_v61 = vld [vmem:[%s2015_s0 + $0x68] sm:$0xf0] }
  0x12   :  { %269 = vmatpush.bf16.msra.mxu0 %v1350_v8  ;;  %1415 = vmatpush.bf16.msra.mxu2 %v1350_v8  ;;  %v1029_v56 = vld [vmem:[%s2015_s0 + $0x20] sm:$0xf]  ;;  %v1343_v60 = vld [vmem:[%s2015_s0 + $0x64] sm:$0xf]  ;;  %v1031_v63 = vld [vmem:[%s2015_s0 + $0x28] sm:$0xf0] }
  0x13   :  { %1423 = vmatpush.bf16.msra.mxu3 %v1358_v9  ;;  %318 = vmatpush.bf16.msra.mxu1 %v1358_v9  ;;  %v1061_v58 = vld [vmem:[%s2015_s0 + $0x60] sm:$0xf]  ;;  %v1335_v62 = vld [vmem:[%s2015_s0 + $0x24] sm:$0xf]  ;;  %v1030_v0 = vor.u32 %v1336_v57, %v1029_v56  ;;  %v1066_v2 = vor.u32 %v1343_v60, %v1063_v61  ;;  %v1037_v4 = vld [vmem:[%s2015_s0 + $0x30] sm:$0xf] }
  0x14   :  { %v1062_v1 = vor.u32 %v1344_v59, %v1061_v58  ;;  %v1034_v3 = vor.u32 %v1335_v62, %v1031_v63  ;;  %v1338_v5 = vld [vmem:[%s2015_s0 + $0x34] sm:$0xf0]  ;;  %v1069_v6 = vld [vmem:[%s2015_s0 + $0x70] sm:$0xf]  ;;  %v1345_v8 = vld [vmem:[%s2015_s0 + $0x74] sm:$0xf] }
  0x15   :  { %v1346_v7 = vld [vmem:[%s2015_s0 + $0x74] sm:$0xf0]  ;;  %v1071_v9 = vld [vmem:[%s2015_s0 + $0x78] sm:$0xf0]  ;;  %v1371_v16 = vld [vmem:[%s2017_s1 + $0x4] sm:$0xf] }
  0x16   :  { %270 = vmatpush.bf16.msra.mxu0 %v1349_v10  ;;  %1416 = vmatpush.bf16.msra.mxu2 %v1349_v10  ;;  %v1337_v10 = vld [vmem:[%s2015_s0 + $0x34] sm:$0xf]  ;;  %v1175_v17 = vld [vmem:[%s2017_s1 + $0x8] sm:$0xf0]  ;;  %v1173_v18 = vld [vmem:[%s2017_s1] sm:$0xf] }
  0x17   :  { %1424 = vmatpush.bf16.msra.mxu3 %v1357_v11  ;;  %319 = vmatpush.bf16.msra.mxu1 %v1357_v11  ;;  %v1039_v11 = vld [vmem:[%s2015_s0 + $0x38] sm:$0xf0]  ;;  %v1372_v19 = vld [vmem:[%s2017_s1 + $0x4] sm:$0xf0]  ;;  %v1178_v20 = vor.u32 %v1371_v16, %v1175_v17  ;;  %v1373_v23 = vld [vmem:[%s2017_s1 + $0x14] sm:$0xf] }
  0x18   :  { %v1174_v21 = vor.u32 %v1372_v19, %v1173_v18  ;;  %v1370_v22 = vld [vmem:[%s2018_s4 + $0x38] sm:$0xff]  ;;  %v1365_v39 = vld [vmem:[%s2018_s4 + $0x10] sm:$0xff]  ;;  %v1364_v40 = vld [vmem:[%s2018_s4 + $0x8] sm:$0xff] }
  0x19   :  { %v1366_v38 = vld [vmem:[%s2018_s4 + $0x18] sm:$0xff]  ;;  %v1377_v41 = vld [vmem:[%s2017_s1 + $0x34] sm:$0xf]  ;;  %v1197_v43 = vld [vmem:[%s2017_s1 + $0x30] sm:$0xf] }
  0x1a   :  { %271 = vmatpush.bf16.msra.mxu0 %v1348_v12  ;;  %1417 = vmatpush.bf16.msra.mxu2 %v1348_v12  ;;  %v1038_v12 = vor.u32 %v1338_v5, %v1037_v4  ;;  %v1199_v42 = vld [vmem:[%s2017_s1 + $0x38] sm:$0xf0]  ;;  %v1773_v56 = vld [vmem:[%s2014_s3] ss:$0 sm:$0xff]  ;;  %v1409_v59 = vld [vmem:[%s2020_s8 + $0x30] sm:$0xff] }
  0x1b   :  { %1425 = vmatpush.bf16.msra.mxu3 %v1356_v13  ;;  %320 = vmatpush.bf16.msra.mxu1 %v1356_v13  ;;  %v1070_v13 = vor.u32 %v1346_v7, %v1069_v6  ;;  %v1408_v6 = vld [vmem:[%s2020_s8 + $0x28] sm:$0xff]  ;;  %v1381_v7 = vld [vmem:[%s2017_s1 + $0x54] sm:$0xf] }
  0x1e   :  { %272 = vmatpush.bf16.msra.mxu0 %v1347_v14  ;;  %1418 = vmatpush.bf16.msra.mxu2 %v1347_v14  ;;  %v1074_v14 = vor.u32 %v1345_v8, %v1071_v9  ;;  %v1215_v8 = vld [vmem:[%s2017_s1 + $0x58] sm:$0xf0] }
  0x1f   :  { %1426 = vmatpush.bf16.msra.mxu3 %v1355_v15  ;;  %321 = vmatpush.bf16.msra.mxu1 %v1355_v15  ;;  %v1042_v15 = vor.u32 %v1337_v10, %v1039_v11  ;;  %v1213_v10 = vld [vmem:[%s2017_s1 + $0x50] sm:$0xf]  ;;  %v1382_v11 = vld [vmem:[%s2017_s1 + $0x54] sm:$0xf0]  ;;  %v1218_v16 = vor.u32 %v1381_v7, %v1215_v8 }
  0x20   :  { %v1214_v18 = vor.u32 %v1382_v11, %v1213_v10  ;;  %v1229_v7 = vld [vmem:[%s2017_s1 + $0x70] sm:$0xf]  ;;  %v1386_v8 = vld [vmem:[%s2017_s1 + $0x74] sm:$0xf0] }
  0x21   :  { %273 = vmatmul.bf16.vlgmr.msra.gmra.mxu0 %v1014_v26  ;;  %293 = vmatmul.bf16.vlgmr.msra.gmra.mxu2 %v1046_v27  ;;  %v1374_v26 = vld [vmem:[%s2017_s1 + $0x14] sm:$0xf0] }
  0x22   :  { %797 = vmatpush.bf16.msrb.mxu0 %v1402_v25  ;;  %342 = vmatmul.bf16.vlgmr.msra.gmra.mxu3 %v1050_v28  ;;  %v1181_v25 = vld [vmem:[%s2017_s1 + $0x10] sm:$0xf] }
  0x23   :  { %748 = vmatpush.bf16.msrb.mxu3 %v1394_v24  ;;  %322 = vmatmul.bf16.vlgmr.msra.gmra.mxu1 %v1018_v29  ;;  %v1183_v24 = vld [vmem:[%s2017_s1 + $0x18] sm:$0xf0]  ;;  %v1182_v28 = vor.u32 %v1374_v26, %v1181_v25  ;;  %v1369_v29 = vld [vmem:[%s2018_s4 + $0x30] sm:$0xff] }
  0x24   :  { %455 = vmatpush.bf16.msrb.mxu2 %v1370_v22  ;;  %v1186_v27 = vor.u32 %v1373_v23, %v1183_v24  ;;  %v1407_v24 = vld [vmem:[%s2020_s8 + $0x20] sm:$0xff] }
  0x26   :  { %798 = vmatpush.bf16.msrb.mxu0 %v1401_v31  ;;  %v1367_v31 = vld [vmem:[%s2018_s4 + $0x20] sm:$0xff] }
  0x27   :  { %749 = vmatpush.bf16.msrb.mxu3 %v1393_v30  ;;  %v1368_v30 = vld [vmem:[%s2018_s4 + $0x28] sm:$0xff] }
  0x28   :  { %456 = vmatpush.bf16.msrb.mxu2 %v1369_v29 }
  0x2a   :  { %799 = vmatpush.bf16.msrb.mxu0 %v1400_v33  ;;  %v1191_v33 = vld [vmem:[%s2017_s1 + $0x28] sm:$0xf0] }
  0x2b   :  { %750 = vmatpush.bf16.msrb.mxu3 %v1392_v32  ;;  %v1375_v32 = vld [vmem:[%s2017_s1 + $0x24] sm:$0xf] }
  0x2c   :  { %457 = vmatpush.bf16.msrb.mxu2 %v1368_v30  ;;  %v1194_v36 = vor.u32 %v1375_v32, %v1191_v33 }
  0x2e   :  { %800 = vmatpush.bf16.msrb.mxu0 %v1399_v35  ;;  %v1376_v35 = vld [vmem:[%s2017_s1 + $0x24] sm:$0xf0] }
  0x2f   :  { %751 = vmatpush.bf16.msrb.mxu3 %v1391_v34  ;;  %v1189_v34 = vld [vmem:[%s2017_s1 + $0x20] sm:$0xf] }
  0x30   :  { %458 = vmatpush.bf16.msrb.mxu2 %v1367_v31  ;;  %v1190_v37 = vor.u32 %v1376_v35, %v1189_v34 }
  0x31   :  { %278 = vmatmul.bf16.gmra.mxu0 %v1022_v46  ;;  %298 = vmatmul.bf16.gmra.mxu2 %v1054_v47  ;;  %v1202_v46 = vor.u32 %v1377_v41, %v1199_v42  ;;  %v1384_v41 = vld [vmem:[%s2017_s1 + $0x64] sm:$0xf0] }
  0x32   :  { %801 = vmatpush.bf16.msrb.mxu0 %v1398_v45  ;;  %347 = vmatmul.bf16.gmra.mxu3 %v1058_v48  ;;  %v1363_v45 = vld [vmem:[%s2018_s4] sm:$0xff]  ;;  %v1410_v48 = vld [vmem:[%s2020_s8 + $0x38] sm:$0xff] }
  0x33   :  { %752 = vmatpush.bf16.msrb.mxu3 %v1390_v44  ;;  %327 = vmatmul.bf16.gmra.mxu1 %v1026_v49  ;;  %v1378_v44 = vld [vmem:[%s2017_s1 + $0x34] sm:$0xf0]  ;;  %v1379_v49 = vld [vmem:[%s2017_s1 + $0x44] sm:$0xf] }
  0x34   :  { %459 = vmatpush.bf16.msrb.mxu2 %v1366_v38  ;;  %v1198_v47 = vor.u32 %v1378_v44, %v1197_v43  ;;  %938 = vmatpush.bf16.msrb.mxu1 %v1410_v48  ;;  %v1223_v38 = vld [vmem:[%s2017_s1 + $0x68] sm:$0xf0] }
  0x36   :  { %802 = vmatpush.bf16.msrb.mxu0 %v1397_v51  ;;  %v1205_v51 = vld [vmem:[%s2017_s1 + $0x40] sm:$0xf] }
  0x37   :  { %753 = vmatpush.bf16.msrb.mxu3 %v1389_v50  ;;  %v1207_v50 = vld [vmem:[%s2017_s1 + $0x48] sm:$0xf0] }
  0x38   :  { %460 = vmatpush.bf16.msrb.mxu2 %v1365_v39  ;;  %939 = vmatpush.bf16.msrb.mxu1 %v1409_v59 }
  0x3a   :  { %803 = vmatpush.bf16.msrb.mxu0 %v1396_v53  ;;  %v1210_v53 = vor.u32 %v1379_v49, %v1207_v50 }
  0x3b   :  { %754 = vmatpush.bf16.msrb.mxu3 %v1388_v52  ;;  %v1380_v52 = vld [vmem:[%s2017_s1 + $0x44] sm:$0xf0] }
  0x3c   :  { %461 = vmatpush.bf16.msrb.mxu2 %v1364_v40  ;;  %940 = vmatpush.bf16.msrb.mxu1 %v1408_v6  ;;  %v1221_v40 = vld [vmem:[%s2017_s1 + $0x60] sm:$0xf] }
  0x3d   :  { %v1222_v48 = vor.u32 %v1384_v41, %v1221_v40 }
  0x3e   :  { %804 = vmatpush.bf16.msrb.mxu0 %v1395_v55  ;;  %v1206_v55 = vor.u32 %v1380_v52, %v1205_v51 }
  0x3f   :  { %755 = vmatpush.bf16.msrb.mxu3 %v1387_v54 }
  0x40   :  { %462 = vmatpush.bf16.msrb.mxu2 %v1363_v45  ;;  %941 = vmatpush.bf16.msrb.mxu1 %v1407_v24 }
  0x41   :  { %283 = vmatmul.bf16.gmra.mxu0 %v1030_v0  ;;  %303 = vmatmul.bf16.gmra.mxu2 %v1062_v1 }
  0x42   :  { %352 = vmatmul.bf16.gmra.mxu3 %v1066_v2 }
  0x43   :  { %332 = vmatmul.bf16.gmra.mxu1 %v1034_v3 }
  0x51   :  { %288 = vmatmul.bf16.gmra.mxu0 %v1038_v12  ;;  %308 = vmatmul.bf16.gmra.mxu2 %v1070_v13 }
  0x52   :  { %357 = vmatmul.bf16.gmra.mxu3 %v1074_v14 }
  0x53   :  { %337 = vmatmul.bf16.gmra.mxu1 %v1042_v15 }
  0x61   :  { %805 = vmatmul.bf16.vlgmr.msrb.gmra.mxu0 %v1178_v20 }
  0x62   :  { %756 = vmatmul.bf16.vlgmr.msrb.gmra.mxu3 %v1174_v21 }
  0x71   :  { %810 = vmatmul.bf16.gmra.mxu0 %v1186_v27 }
  0x72   :  { %761 = vmatmul.bf16.gmra.mxu3 %v1182_v28 }
  0x81   :  { %815 = vmatmul.bf16.gmra.mxu0 %v1194_v36  ;;  %v1406_v36 = vld [vmem:[%s2020_s8 + $0x18] sm:$0xff] }
  0x82   :  { %766 = vmatmul.bf16.gmra.mxu3 %v1190_v37  ;;  %v1383_v37 = vld [vmem:[%s2017_s1 + $0x64] sm:$0xf]  ;;  %942 = vmatpush.bf16.msrb.mxu1 %v1406_v36 }
  0x91   :  { %820 = vmatmul.bf16.gmra.mxu0 %v1202_v46  ;;  %v1226_v46 = vor.u32 %v1383_v37, %v1223_v38 }
  0x92   :  { %771 = vmatmul.bf16.gmra.mxu3 %v1198_v47 }
  0x9e   :  { %v274_v54 = vpop.f32.mrf.mxu0 }
  0x9f   :  { %v275_v58 = vadd.f32 %v1773_v56, %v274_v54  ;;  %v1405_v54 = vld [vmem:[%s2020_s8 + $0x10] sm:$0xff] }
  0xa0   :  { %v323_v57 = vpop.f32.mrf.mxu1  ;;  %943 = vmatpush.bf16.msrb.mxu1 %v1405_v54 }
  0xa1   :  { %825 = vmatmul.bf16.gmra.mxu0 %v1210_v53  ;;  %v324_v61 = vadd.f32 %v323_v57, %v275_v58 }
  0xa2   :  { %776 = vmatmul.bf16.gmra.mxu3 %v1206_v55 }
  0xa3   :  { %v363_v4 = vmax.f32 %v324_v61, 0.0 }
  0xa4   :  { %v294_v60 = vpop.f32.mrf.mxu2 }
  0xa5   :  { %v295_v62 = vadd.f32 %v1773_v56, %v294_v60  ;;  %v343_v63 = vpop.f32.mrf.mxu3 }
  0xa6   :  { %v276_v0 = vpop.f32.mrf.mxu0 }
  0xa7   :  { %v344_v1 = vadd.f32 %v343_v63, %v295_v62  ;;  %v277_v2 = vadd.f32 %v1773_v56, %v276_v0 }
  0xa8   :  { %v325_v3 = vpop.f32.mrf.mxu1 }
  0xa9   :  { %v326_v5 = vadd.f32 %v325_v3, %v277_v2  ;;  %v371_v21 = vmax.f32 %v344_v1, 0.0  ;;  %v1385_v3 = vld [vmem:[%s2017_s1 + $0x74] sm:$0xf] }
  0xab   :  { %v364_v9 = vmax.f32 %v326_v5, 0.0  ;;  %v1404_v5 = vld [vmem:[%s2020_s8 + $0x8] sm:$0xff] }
  0xac   :  { %v296_v12 = vpop.f32.mrf.mxu2  ;;  %944 = vmatpush.bf16.msrb.mxu1 %v1404_v5 }
  0xad   :  { %v379_v13 = vpack.c.bf16 %v364_v9, %v363_v4  ;;  %v297_v14 = vadd.f32 %v1773_v56, %v296_v12  ;;  %v345_v15 = vpop.f32.mrf.mxu3  ;;  %v1231_v4 = vld [vmem:[%s2017_s1 + $0x78] sm:$0xf0] }
  0xae   :  { %v279_v17 = vpop.f32.mrf.mxu0 }
  0xaf   :  { %v346_v19 = vadd.f32 %v345_v15, %v297_v14  ;;  %463 = vmatmul.bf16.vlgmr.msrb.gmra.mxu2 %v379_v13  ;;  %v280_v23 = vadd.f32 %v1773_v56, %v279_v17  ;;  %v1234_v13 = vor.u32 %v1385_v3, %v1231_v4  ;;  %v1230_v15 = vor.u32 %v1386_v8, %v1229_v7 }
  0xb0   :  { %v328_v20 = vpop.f32.mrf.mxu1 }
  0xb1   :  { %v372_v22 = vmax.f32 %v346_v19, 0.0  ;;  %830 = vmatmul.bf16.gmra.mxu0 %v1218_v16  ;;  %v329_v27 = vadd.f32 %v328_v20, %v280_v23 }
  0xb2   :  { %781 = vmatmul.bf16.gmra.mxu3 %v1214_v18 }
  0xb3   :  { %v1801_v25 = vpack.c.bf16 %v372_v22, %v371_v21  ;;  %v365_v34 = vmax.f32 %v329_v27, 0.0  ;;  %v1403_v21 = vld [vmem:[%s2020_s8] sm:$0xff] }
  0xb4   :  { %v299_v26 = vpop.f32.mrf.mxu2  ;;  %945 = vmatpush.bf16.msrb.mxu1 %v1403_v21 }
  0xb5   :  { %v300_v28 = vadd.f32 %v1773_v56, %v299_v26  ;;  %v348_v29 = vpop.f32.mrf.mxu3 }
  0xb6   :  { %v281_v30 = vpop.f32.mrf.mxu0 }
  0xb7   :  { %v349_v31 = vadd.f32 %v348_v29, %v300_v28  ;;  %v282_v32 = vadd.f32 %v1773_v56, %v281_v30 }
  0xb8   :  { %v330_v33 = vpop.f32.mrf.mxu1 }
  0xb9   :  { %v331_v35 = vadd.f32 %v330_v33, %v282_v32  ;;  %v373_v51 = vmax.f32 %v349_v31, 0.0 }
  0xbb   :  { %v366_v39 = vmax.f32 %v331_v35, 0.0 }
  0xbc   :  { %v301_v42 = vpop.f32.mrf.mxu2 }
  0xbd   :  { %v302_v43 = vadd.f32 %v1773_v56, %v301_v42  ;;  %v350_v44 = vpop.f32.mrf.mxu3  ;;  %v380_v45 = vpack.c.bf16 %v366_v39, %v365_v34 }
  0xbe   :  { %v284_v47 = vpop.f32.mrf.mxu0 }
  0xbf   :  { %v351_v49 = vadd.f32 %v350_v44, %v302_v43  ;;  %468 = vmatmul.bf16.gmra.mxu2 %v380_v45  ;;  %v285_v53 = vadd.f32 %v1773_v56, %v284_v47  ;;  %v1855_v45 = vld [vmem:[%s2019_s7] ss:$0 sm:$0xff] }
  0xc0   :  { %v333_v50 = vpop.f32.mrf.mxu1 }
  0xc1   :  { %v374_v52 = vmax.f32 %v351_v49, 0.0  ;;  %835 = vmatmul.bf16.gmra.mxu0 %v1226_v46  ;;  %v334_v58 = vadd.f32 %v333_v50, %v285_v53 }
  0xc2   :  { %786 = vmatmul.bf16.gmra.mxu3 %v1222_v48 }
  0xc3   :  { %v1825_v55 = vpack.c.bf16 %v374_v52, %v373_v51  ;;  %v367_v1 = vmax.f32 %v334_v58, 0.0 }
  0xc4   :  { %v304_v57 = vpop.f32.mrf.mxu2 }
  0xc5   :  { %v305_v59 = vadd.f32 %v1773_v56, %v304_v57  ;;  %v353_v60 = vpop.f32.mrf.mxu3 }
  0xc6   :  { %v286_v61 = vpop.f32.mrf.mxu0 }
  0xc7   :  { %v354_v62 = vadd.f32 %v353_v60, %v305_v59  ;;  %v287_v63 = vadd.f32 %v1773_v56, %v286_v61 }
  0xc8   :  { %v335_v0 = vpop.f32.mrf.mxu1 }
  0xc9   :  { %v336_v2 = vadd.f32 %v335_v0, %v287_v63  ;;  %v375_v18 = vmax.f32 %v354_v62, 0.0 }
  0xcb   :  { %v368_v6 = vmax.f32 %v336_v2, 0.0 }
  0xcc   :  { %v306_v9 = vpop.f32.mrf.mxu2 }
  0xcd   :  { %v307_v10 = vadd.f32 %v1773_v56, %v306_v9  ;;  %v355_v11 = vpop.f32.mrf.mxu3  ;;  %v381_v12 = vpack.c.bf16 %v368_v6, %v367_v1 }
  0xce   :  { %v289_v14 = vpop.f32.mrf.mxu0 }
  0xcf   :  { %v356_v16 = vadd.f32 %v355_v11, %v307_v10  ;;  %473 = vmatmul.bf16.gmra.mxu2 %v381_v12  ;;  %v290_v20 = vadd.f32 %v1773_v56, %v289_v14 }
  0xd0   :  { %v338_v17 = vpop.f32.mrf.mxu1 }
  0xd1   :  { %v376_v19 = vmax.f32 %v356_v16, 0.0  ;;  %840 = vmatmul.bf16.gmra.mxu0 %v1234_v13  ;;  %v339_v24 = vadd.f32 %v338_v17, %v290_v20 }
  0xd2   :  { %791 = vmatmul.bf16.gmra.mxu3 %v1230_v15 }
  0xd3   :  { %v385_v22 = vpack.c.bf16 %v376_v19, %v375_v18  ;;  %v369_v32 = vmax.f32 %v339_v24, 0.0 }
  0xd4   :  { %v309_v23 = vpop.f32.mrf.mxu2 }
  0xd5   :  { %v310_v26 = vadd.f32 %v1773_v56, %v309_v23  ;;  %v358_v27 = vpop.f32.mrf.mxu3 }
  0xd6   :  { %v291_v28 = vpop.f32.mrf.mxu0 }
  0xd7   :  { %v359_v29 = vadd.f32 %v358_v27, %v310_v26  ;;  %v292_v30 = vadd.f32 %v1773_v56, %v291_v28 }
  0xd8   :  { %v340_v31 = vpop.f32.mrf.mxu1 }
  0xd9   :  { %v341_v33 = vadd.f32 %v340_v31, %v292_v30  ;;  %v377_v41 = vmax.f32 %v359_v29, 0.0 }
  0xdb   :  { %v370_v34 = vmax.f32 %v341_v33, 0.0 }
  0xdc   :  { %v311_v35 = vpop.f32.mrf.mxu2 }
  0xdd   :  { %v312_v36 = vadd.f32 %v1773_v56, %v311_v35  ;;  %v360_v37 = vpop.f32.mrf.mxu3  ;;  %v382_v38 = vpack.c.bf16 %v370_v34, %v369_v32  ;;  %v1872_v32 = vld [vmem:[%s2021_s5] ss:$0 sm:$0xff] }
  0xde   :  { %v806_v39 = vpop.f32.mrf.mxu0 }
  0xdf   :  { %v361_v40 = vadd.f32 %v360_v37, %v312_v36  ;;  %478 = vmatmul.bf16.gmra.mxu2 %v382_v38 }
  0xe1   :  { %v378_v42 = vmax.f32 %v361_v40, 0.0 }
  0xe3   :  { %v386_v43 = vpack.c.bf16 %v378_v42, %v377_v41 }
  0xe5   :  { %v757_v44 = vpop.f32.mrf.mxu3 }
  0xe6   :  { %v808_v46 = vpop.f32.mrf.mxu0  ;;  %v758_v47 = vadd.f32 %v1855_v45, %v757_v44 }
  0xe8   :  { %v807_v49 = vadd.f32 %v806_v39, %v758_v47 }
  0xea   :  { %v846_v52 = vmax.f32 %v807_v49, 0.0 }
  0xed   :  { %v759_v48 = vpop.f32.mrf.mxu3 }
  0xee   :  { %v760_v56 = vadd.f32 %v1855_v45, %v759_v48  ;;  %v811_v50 = vpop.f32.mrf.mxu0 }
  0xef   :  { %483 = vmatmul.bf16.gmra.mxu2 %v1801_v25 }
  0xf0   :  { %v809_v51 = vadd.f32 %v808_v46, %v760_v56 }
  0xf2   :  { %v847_v53 = vmax.f32 %v809_v51, 0.0 }
  0xf4   :  { %v862_v54 = vpack.c.bf16 %v847_v53, %v846_v52 }
  0xf5   :  { %v762_v57 = vpop.f32.mrf.mxu3 }
  0xf6   :  { %946 = vmatmul.bf16.vlgmr.msrb.gmra.mxu1 %v862_v54  ;;  %v813_v58 = vpop.f32.mrf.mxu0  ;;  %v763_v59 = vadd.f32 %v1855_v45, %v762_v57 }
  0xf8   :  { %v812_v61 = vadd.f32 %v811_v50, %v763_v59 }
  0xfa   :  { %v848_v1 = vmax.f32 %v812_v61, 0.0 }
  0xfd   :  { %v764_v60 = vpop.f32.mrf.mxu3 }
  0xfe   :  { %v765_v62 = vadd.f32 %v1855_v45, %v764_v60  ;;  %v816_v63 = vpop.f32.mrf.mxu0 }
  0xff   :  { %488 = vmatmul.bf16.gmra.mxu2 %v1825_v55 }
 0x100   :  { %v814_v0 = vadd.f32 %v813_v58, %v765_v62 }
 0x102   :  { %v849_v2 = vmax.f32 %v814_v0, 0.0 }
 0x104   :  { %v863_v25 = vpack.c.bf16 %v849_v2, %v848_v1 }
 0x105   :  { %v767_v3 = vpop.f32.mrf.mxu3 }
 0x106   :  { %951 = vmatmul.bf16.gmra.mxu1 %v863_v25  ;;  %v818_v4 = vpop.f32.mrf.mxu0  ;;  %v768_v5 = vadd.f32 %v1855_v45, %v767_v3 }
 0x108   :  { %v817_v7 = vadd.f32 %v816_v63, %v768_v5 }
 0x10a   :  { %v850_v11 = vmax.f32 %v817_v7, 0.0 }
 0x10d   :  { %v769_v6 = vpop.f32.mrf.mxu3 }
 0x10e   :  { %v770_v8 = vadd.f32 %v1855_v45, %v769_v6  ;;  %v821_v9 = vpop.f32.mrf.mxu0 }
 0x10f   :  { %493 = vmatmul.bf16.gmra.mxu2 %v385_v22 }
 0x110   :  { %v819_v10 = vadd.f32 %v818_v4, %v770_v8 }
 0x112   :  { %v851_v12 = vmax.f32 %v819_v10, 0.0 }
 0x114   :  { %v864_v13 = vpack.c.bf16 %v851_v12, %v850_v11 }
 0x115   :  { %v772_v55 = vpop.f32.mrf.mxu3 }
 0x116   :  { %956 = vmatmul.bf16.gmra.mxu1 %v864_v13  ;;  %v823_v14 = vpop.f32.mrf.mxu0  ;;  %v773_v15 = vadd.f32 %v1855_v45, %v772_v55 }
 0x118   :  { %v822_v17 = vadd.f32 %v821_v9, %v773_v15 }
 0x11a   :  { %v852_v21 = vmax.f32 %v822_v17, 0.0 }
 0x11d   :  { %v774_v16 = vpop.f32.mrf.mxu3 }
 0x11e   :  { %v775_v18 = vadd.f32 %v1855_v45, %v774_v16  ;;  %v826_v19 = vpop.f32.mrf.mxu0 }
 0x11f   :  { %498 = vmatmul.bf16.gmra.mxu2 %v386_v43 }
 0x120   :  { %v824_v20 = vadd.f32 %v823_v14, %v775_v18 }
 0x122   :  { %v853_v23 = vmax.f32 %v824_v20, 0.0 }
 0x124   :  { %v865_v24 = vpack.c.bf16 %v853_v23, %v852_v21 }
 0x125   :  { %v777_v22 = vpop.f32.mrf.mxu3 }
 0x126   :  { %961 = vmatmul.bf16.gmra.mxu1 %v865_v24  ;;  %v828_v26 = vpop.f32.mrf.mxu0  ;;  %v778_v27 = vadd.f32 %v1855_v45, %v777_v22 }
 0x128   :  { %v827_v29 = vadd.f32 %v826_v19, %v778_v27 }
 0x12a   :  { %v854_v34 = vmax.f32 %v827_v29, 0.0 }
 0x12d   :  { %v779_v28 = vpop.f32.mrf.mxu3 }
 0x12e   :  { %v780_v30 = vadd.f32 %v1855_v45, %v779_v28  ;;  %v831_v31 = vpop.f32.mrf.mxu0 }
 0x130   :  { %v829_v33 = vadd.f32 %v828_v26, %v780_v30 }
 0x132   :  { %v855_v35 = vmax.f32 %v829_v33, 0.0  ;;  %v464_v36 = vpop.f32.mrf.mxu2 }
 0x133   :  { %v465_v37 = vadd.f32 %v1872_v32, %v464_v36 }
 0x134   :  { %v866_v38 = vpack.c.bf16 %v855_v35, %v854_v34 }
 0x135   :  { %504 = vst [vmem:[%s2023_s10] sm:$0xff] %v465_v37  ;;  %v782_v39 = vpop.f32.mrf.mxu3 }
 0x136   :  { %966 = vmatmul.bf16.gmra.mxu1 %v866_v38  ;;  %v833_v40 = vpop.f32.mrf.mxu0  ;;  %v783_v41 = vadd.f32 %v1855_v45, %v782_v39 }
 0x138   :  { %v832_v46 = vadd.f32 %v831_v31, %v783_v41 }
 0x13a   :  { %v466_v42 = vpop.f32.mrf.mxu2  ;;  %v856_v56 = vmax.f32 %v832_v46, 0.0 }
 0x13b   :  { %v467_v43 = vadd.f32 %v1872_v32, %v466_v42 }
 0x13d   :  { %505 = vst [vmem:[%s2023_s10 + $0x8] sm:$0xff] %v467_v43  ;;  %v784_v44 = vpop.f32.mrf.mxu3 }
 0x13e   :  { %v785_v47 = vadd.f32 %v1855_v45, %v784_v44  ;;  %v836_v49 = vpop.f32.mrf.mxu0 }
 0x140   :  { %v834_v48 = vadd.f32 %v833_v40, %v785_v47 }
 0x142   :  { %v857_v50 = vmax.f32 %v834_v48, 0.0  ;;  %v469_v51 = vpop.f32.mrf.mxu2 }
 0x143   :  { %v470_v52 = vadd.f32 %v1872_v32, %v469_v51 }
 0x144   :  { %v867_v53 = vpack.c.bf16 %v857_v50, %v856_v56 }
 0x145   :  { %506 = vst [vmem:[%s2023_s10 + $0x10] sm:$0xff] %v470_v52  ;;  %v787_v54 = vpop.f32.mrf.mxu3 }
 0x146   :  { %971 = vmatmul.bf16.gmra.mxu1 %v867_v53  ;;  %v788_v57 = vadd.f32 %v1855_v45, %v787_v54  ;;  %v838_v59 = vpop.f32.mrf.mxu0 }
 0x148   :  { %v837_v62 = vadd.f32 %v836_v49, %v788_v57 }
 0x14a   :  { %v471_v58 = vpop.f32.mrf.mxu2  ;;  %v858_v1 = vmax.f32 %v837_v62, 0.0 }
 0x14b   :  { %v472_v60 = vadd.f32 %v1872_v32, %v471_v58 }
 0x14d   :  { %507 = vst [vmem:[%s2023_s10 + $0x18] sm:$0xff] %v472_v60  ;;  %v789_v61 = vpop.f32.mrf.mxu3 }
 0x14e   :  { %v790_v63 = vadd.f32 %v1855_v45, %v789_v61  ;;  %v841_v5 = vpop.f32.mrf.mxu0 }
 0x150   :  { %v839_v0 = vadd.f32 %v838_v59, %v790_v63 }
 0x152   :  { %v859_v2 = vmax.f32 %v839_v0, 0.0  ;;  %v474_v25 = vpop.f32.mrf.mxu2 }
 0x153   :  { %v475_v3 = vadd.f32 %v1872_v32, %v474_v25 }
 0x154   :  { %v868_v4 = vpack.c.bf16 %v859_v2, %v858_v1 }
 0x155   :  { %508 = vst [vmem:[%s2023_s10 + $0x20] sm:$0xff] %v475_v3  ;;  %v792_v6 = vpop.f32.mrf.mxu3 }
 0x156   :  { %976 = vmatmul.bf16.gmra.mxu1 %v868_v4  ;;  %v793_v7 = vadd.f32 %v1855_v45, %v792_v6  ;;  %v843_v13 = vpop.f32.mrf.mxu0 }
 0x158   :  { %v842_v11 = vadd.f32 %v841_v5, %v793_v7 }
 0x15a   :  { %v476_v8 = vpop.f32.mrf.mxu2  ;;  %v860_v14 = vmax.f32 %v842_v11, 0.0 }
 0x15b   :  { %v477_v9 = vadd.f32 %v1872_v32, %v476_v8 }
 0x15d   :  { %509 = vst [vmem:[%s2023_s10 + $0x28] sm:$0xff] %v477_v9  ;;  %v794_v10 = vpop.f32.mrf.mxu3 }
 0x15e   :  { %v795_v12 = vadd.f32 %v1855_v45, %v794_v10  ;;  %v1915_v45 = vld [vmem:[%s2022_s9] ss:$0 sm:$0xff] }
 0x160   :  { %v844_v55 = vadd.f32 %v843_v13, %v795_v12 }
 0x162   :  { %v861_v15 = vmax.f32 %v844_v55, 0.0  ;;  %v479_v16 = vpop.f32.mrf.mxu2 }
 0x163   :  { %v480_v17 = vadd.f32 %v1872_v32, %v479_v16 }
 0x164   :  { %v869_v18 = vpack.c.bf16 %v861_v15, %v860_v14 }
 0x165   :  { %510 = vst [vmem:[%s2023_s10 + $0x30] sm:$0xff] %v480_v17 }
 0x166   :  { %981 = vmatmul.bf16.gmra.mxu1 %v869_v18 }
 0x16a   :  { %v481_v19 = vpop.f32.mrf.mxu2 }
 0x16b   :  { %v482_v20 = vadd.f32 %v1872_v32, %v481_v19 }
 0x16d   :  { %511 = vst [vmem:[%s2023_s10 + $0x38] sm:$0xff] %v482_v20 }
 0x172   :  { %v484_v21 = vpop.f32.mrf.mxu2 }
 0x173   :  { %v485_v23 = vadd.f32 %v1872_v32, %v484_v21  ;;  %v947_v24 = vpop.f32.mrf.mxu1 }
 0x174   :  { %v948_v22 = vadd.f32 %v1915_v45, %v947_v24 }
 0x175   :  { %512 = vst [vmem:[%s2023_s10 + $0x40] sm:$0xff] %v485_v23 }
 0x176   :  { %987 = vst [vmem:[%s2024_s11] sm:$0xff] %v948_v22 }
 0x17a   :  { %v486_v26 = vpop.f32.mrf.mxu2 }
 0x17b   :  { %v487_v27 = vadd.f32 %v1872_v32, %v486_v26  ;;  %v949_v28 = vpop.f32.mrf.mxu1 }
 0x17c   :  { %v950_v29 = vadd.f32 %v1915_v45, %v949_v28 }
 0x17d   :  { %513 = vst [vmem:[%s2023_s10 + $0x48] sm:$0xff] %v487_v27 }
 0x17e   :  { %988 = vst [vmem:[%s2024_s11 + $0x8] sm:$0xff] %v950_v29 }
 0x182   :  { %v489_v30 = vpop.f32.mrf.mxu2 }
 0x183   :  { %v490_v31 = vadd.f32 %v1872_v32, %v489_v30  ;;  %v952_v33 = vpop.f32.mrf.mxu1 }
 0x184   :  { %v953_v34 = vadd.f32 %v1915_v45, %v952_v33 }
 0x185   :  { %514 = vst [vmem:[%s2023_s10 + $0x50] sm:$0xff] %v490_v31 }
 0x186   :  { %989 = vst [vmem:[%s2024_s11 + $0x10] sm:$0xff] %v953_v34 }
 0x18a   :  { %v491_v35 = vpop.f32.mrf.mxu2 }
 0x18b   :  { %v492_v36 = vadd.f32 %v1872_v32, %v491_v35  ;;  %v954_v37 = vpop.f32.mrf.mxu1 }
 0x18c   :  { %v955_v38 = vadd.f32 %v1915_v45, %v954_v37 }
 0x18d   :  { %515 = vst [vmem:[%s2023_s10 + $0x58] sm:$0xff] %v492_v36 }
 0x18e   :  { %990 = vst [vmem:[%s2024_s11 + $0x18] sm:$0xff] %v955_v38 }
 0x192   :  { %v494_v39 = vpop.f32.mrf.mxu2 }
 0x193   :  { %v495_v40 = vadd.f32 %v1872_v32, %v494_v39  ;;  %v957_v41 = vpop.f32.mrf.mxu1 }
 0x194   :  { %v958_v42 = vadd.f32 %v1915_v45, %v957_v41 }
 0x195   :  { %516 = vst [vmem:[%s2023_s10 + $0x60] sm:$0xff] %v495_v40 }
 0x196   :  { %991 = vst [vmem:[%s2024_s11 + $0x20] sm:$0xff] %v958_v42 }
 0x19a   :  { %v496_v43 = vpop.f32.mrf.mxu2 }
 0x19b   :  { %v497_v44 = vadd.f32 %v1872_v32, %v496_v43  ;;  %v959_v46 = vpop.f32.mrf.mxu1 }
 0x19c   :  { %v960_v47 = vadd.f32 %v1915_v45, %v959_v46 }
 0x19d   :  { %517 = vst [vmem:[%s2023_s10 + $0x68] sm:$0xff] %v497_v44 }
 0x19e   :  { %992 = vst [vmem:[%s2024_s11 + $0x28] sm:$0xff] %v960_v47 }
 0x1a2   :  { %v499_v48 = vpop.f32.mrf.mxu2 }
 0x1a3   :  { %v500_v49 = vadd.f32 %v1872_v32, %v499_v48  ;;  %v962_v56 = vpop.f32.mrf.mxu1 }
 0x1a4   :  { %v963_v50 = vadd.f32 %v1915_v45, %v962_v56 }
 0x1a5   :  { %518 = vst [vmem:[%s2023_s10 + $0x70] sm:$0xff] %v500_v49 }
 0x1a6   :  { %993 = vst [vmem:[%s2024_s11 + $0x30] sm:$0xff] %v963_v50 }
 0x1aa   :  { %v501_v51 = vpop.f32.mrf.mxu2 }
 0x1ab   :  { %v502_v52 = vadd.f32 %v1872_v32, %v501_v51  ;;  %v964_v53 = vpop.f32.mrf.mxu1 }
 0x1ac   :  { %v965_v54 = vadd.f32 %v1915_v45, %v964_v53 }
 0x1ad   :  { %519 = vst [vmem:[%s2023_s10 + $0x78] sm:$0xff] %v502_v52 }
 0x1ae   :  { %994 = vst [vmem:[%s2024_s11 + $0x38] sm:$0xff] %v965_v54 }
 0x1b3   :  { %v967_v57 = vpop.f32.mrf.mxu1 }
 0x1b4   :  { %v968_v58 = vadd.f32 %v1915_v45, %v967_v57 }
 0x1b6   :  { %995 = vst [vmem:[%s2024_s11 + $0x40] sm:$0xff] %v968_v58 }
 0x1bb   :  { %v969_v59 = vpop.f32.mrf.mxu1 }
 0x1bc   :  { %v970_v32 = vadd.f32 %v1915_v45, %v969_v59 }
 0x1be   :  { %996 = vst [vmem:[%s2024_s11 + $0x48] sm:$0xff] %v970_v32 }
 0x1c3   :  { %v972_v60 = vpop.f32.mrf.mxu1 }
 0x1c4   :  { %v973_v61 = vadd.f32 %v1915_v45, %v972_v60 }
 0x1c6   :  { %997 = vst [vmem:[%s2024_s11 + $0x50] sm:$0xff] %v973_v61 }
 0x1cb   :  { %v974_v62 = vpop.f32.mrf.mxu1 }
 0x1cc   :  { %v975_v63 = vadd.f32 %v1915_v45, %v974_v62 }
 0x1ce   :  { %998 = vst [vmem:[%s2024_s11 + $0x58] sm:$0xff] %v975_v63 }
 0x1d3   :  { %v977_v0 = vpop.f32.mrf.mxu1 }
 0x1d4   :  { %v978_v1 = vadd.f32 %v1915_v45, %v977_v0 }
 0x1d6   :  { %999 = vst [vmem:[%s2024_s11 + $0x60] sm:$0xff] %v978_v1 }
 0x1db   :  { %v979_v2 = vpop.f32.mrf.mxu1 }
 0x1dc   :  { %v980_v25 = vadd.f32 %v1915_v45, %v979_v2 }
 0x1de   :  { %1000 = vst [vmem:[%s2024_s11 + $0x68] sm:$0xff] %v980_v25 }
 0x1e3   :  { %v982_v3 = vpop.f32.mrf.mxu1 }
 0x1e4   :  { %v983_v4 = vadd.f32 %v1915_v45, %v982_v3 }
 0x1e6   :  { %1001 = vst [vmem:[%s2024_s11 + $0x70] sm:$0xff] %v983_v4 }
 0x1eb   :  { %v984_v5 = vpop.f32.mrf.mxu1 }
 0x1ec   :  { %v985_v6 = vadd.f32 %v1915_v45, %v984_v5 }
 0x1ee   :  { %1002 = vst [vmem:[%s2024_s11 + $0x78] sm:$0xff] %v985_v6 }

// kernel: gnn_infer_forward.3
= control target key start
LH: loop header
LB: loop body
LE: loop exit
PB: predicated region body
PF: predicated region fallthrough
CT: control target
= control target key end

     0   :  { %vm2262_vm0 = vcmask 392192   ;;  %s10054_s3 = inlined_call_operand.vmem [shape: bf16[256,256], index: 3, kind: input, shape index: {}]   ;;  %s10055_s2 = inlined_call_operand.vmem [shape: bf16[128,256], index: 2, kind: input, shape index: {}]   ;;  %s10056_s5 = inlined_call_operand.vmem [shape: bf16[256,48], index: 5, kind: input, shape index: {}]   ;;  %s10057_s4 = inlined_call_operand.vmem [shape: f32[1,256], index: 4, kind: input, shape index: {}]   ;;  %s10058_s1 = inlined_call_operand.vmem [shape: bf16[512,256], index: 1, kind: input, shape index: {}]   ;;  %s10059_s6 = inlined_call_operand.vmem [shape: f32[1,48], index: 6, kind: input, shape index: {}]   ;;  %s10060_s8 = inlined_call_operand.vmem [shape: bf16[48,256], index: 8, kind: input, shape index: {}]   ;;  %s10061_s0 = inlined_call_operand.vmem [shape: bf16[512,128], index: 0, kind: input, shape index: {}]   ;;  %s10062_s7 = inlined_call_operand.vmem [shape: bf16[256,256], index: 7, kind: input, shape index: {}]   ;;  %s10063_s10 = inlined_call_operand.vmem [shape: bf16[256,256], index: 10, kind: input, shape index: {}]   ;;  %s10064_s9 = inlined_call_operand.vmem [shape: f32[1,256], index: 9, kind: input, shape index: {}]   ;;  %s10065_s12 = inlined_call_operand.vmem [shape: bf16[256,128], index: 12, kind: input, shape index: {}]   ;;  %s10066_s11 = inlined_call_operand.vmem [shape: f32[1,256], index: 11, kind: input, shape index: {}]   ;;  %s10067_s13 = inlined_call_operand.vmem [shape: f32[1,128], index: 13, kind: input, shape index: {}]   ;;  %s10068_s14 = inlined_call_operand.vmem [shape: f32[512,128], index: 14, kind: output, shape index: {}]  }
   0x1   :  { %v5585_v0 = vld [vmem:[%s10054_s3 + $0x70] sm:$0xf]  ;;  %v6542_v1 = vld [vmem:[%s10054_s3 + $0x74] sm:$0xf0]  ;;  %v6541_v5 = vld [vmem:[%s10054_s3 + $0x74] sm:$0xf] }
   0x2   :  { %v5649_v2 = vld [vmem:[%s10054_s3 + $0xf0] sm:$0xf]  ;;  %v5586_v3 = vor.u32 %v6542_v1, %v5585_v0  ;;  %v6558_v4 = vld [vmem:[%s10054_s3 + $0xf4] sm:$0xf0]  ;;  %v5587_v6 = vld [vmem:[%s10054_s3 + $0x78] sm:$0xf0] }
   0x3   :  { %v5650_v7 = vor.u32 %v6558_v4, %v5649_v2  ;;  %v5590_v8 = vor.u32 %v6541_v5, %v5587_v6  ;;  %v6557_v9 = vld [vmem:[%s10054_s3 + $0xf4] sm:$0xf]  ;;  %v5651_v10 = vld [vmem:[%s10054_s3 + $0xf8] sm:$0xf0]  ;;  %v5577_v11 = vld [vmem:[%s10054_s3 + $0x60] sm:$0xf] }
   0x4   :  { %342 = vmatpush.bf16.msra.mxu0 %v5586_v3  ;;  %v5654_v12 = vor.u32 %v6557_v9, %v5651_v10  ;;  %v6540_v13 = vld [vmem:[%s10054_s3 + $0x64] sm:$0xf0]  ;;  %v5641_v14 = vld [vmem:[%s10054_s3 + $0xe0] sm:$0xf]  ;;  %v6539_v18 = vld [vmem:[%s10054_s3 + $0x64] sm:$0xf] }
   0x5   :  { %v6556_v15 = vld [vmem:[%s10054_s3 + $0xe4] sm:$0xf0]  ;;  %391 = vmatpush.bf16.msra.mxu1 %v5650_v7  ;;  %440 = vmatpush.bf16.msra.mxu2 %v5590_v8  ;;  %v5578_v16 = vor.u32 %v6540_v13, %v5577_v11  ;;  %v5579_v19 = vld [vmem:[%s10054_s3 + $0x68] sm:$0xf0]  ;;  %v6555_v20 = vld [vmem:[%s10054_s3 + $0xe4] sm:$0xf] }
   0x6   :  { %v5642_v17 = vor.u32 %v6556_v15, %v5641_v14  ;;  %489 = vmatpush.bf16.msra.mxu3 %v5654_v12  ;;  %v5582_v21 = vor.u32 %v6539_v18, %v5579_v19  ;;  %v5643_v22 = vld [vmem:[%s10054_s3 + $0xe8] sm:$0xf0]  ;;  %v5569_v23 = vld [vmem:[%s10054_s3 + $0x50] sm:$0xf]  ;;  %v6538_v24 = vld [vmem:[%s10054_s3 + $0x54] sm:$0xf0] }
   0x7   :  { %v5646_v25 = vor.u32 %v6555_v20, %v5643_v22  ;;  %v5633_v26 = vld [vmem:[%s10054_s3 + $0xd0] sm:$0xf]  ;;  %v6554_v27 = vld [vmem:[%s10054_s3 + $0xd4] sm:$0xf0]  ;;  %v6537_v28 = vld [vmem:[%s10054_s3 + $0x54] sm:$0xf]  ;;  %v5570_v29 = vor.u32 %v6538_v24, %v5569_v23 }
   0x8   :  { %343 = vmatpush.bf16.msra.mxu0 %v5578_v16  ;;  %v5571_v30 = vld [vmem:[%s10054_s3 + $0x58] sm:$0xf0]  ;;  %v6553_v31 = vld [vmem:[%s10054_s3 + $0xd4] sm:$0xf]  ;;  %v5634_v33 = vor.u32 %v6554_v27, %v5633_v26  ;;  %v5561_v35 = vld [vmem:[%s10054_s3 + $0x40] sm:$0xf] }
   0x9   :  { %v5635_v32 = vld [vmem:[%s10054_s3 + $0xd8] sm:$0xf0]  ;;  %392 = vmatpush.bf16.msra.mxu1 %v5642_v17  ;;  %441 = vmatpush.bf16.msra.mxu2 %v5582_v21  ;;  %v5574_v34 = vor.u32 %v6537_v28, %v5571_v30  ;;  %v6536_v36 = vld [vmem:[%s10054_s3 + $0x44] sm:$0xf0]  ;;  %v5625_v37 = vld [vmem:[%s10054_s3 + $0xc0] sm:$0xf] }
   0xa   :  { %490 = vmatpush.bf16.msra.mxu3 %v5646_v25  ;;  %v5638_v38 = vor.u32 %v6553_v31, %v5635_v32  ;;  %v6552_v39 = vld [vmem:[%s10054_s3 + $0xc4] sm:$0xf0]  ;;  %v6535_v40 = vld [vmem:[%s10054_s3 + $0x44] sm:$0xf]  ;;  %v5563_v41 = vld [vmem:[%s10054_s3 + $0x48] sm:$0xf0]  ;;  %v5562_v44 = vor.u32 %v6536_v36, %v5561_v35 }
   0xb   :  { %v6551_v42 = vld [vmem:[%s10054_s3 + $0xc4] sm:$0xf]  ;;  %v5627_v43 = vld [vmem:[%s10054_s3 + $0xc8] sm:$0xf0]  ;;  %v5626_v45 = vor.u32 %v6552_v39, %v5625_v37  ;;  %v5566_v46 = vor.u32 %v6535_v40, %v5563_v41  ;;  %v5553_v47 = vld [vmem:[%s10054_s3 + $0x30] sm:$0xf] }
   0xc   :  { %344 = vmatpush.bf16.msra.mxu0 %v5570_v29  ;;  %v6534_v48 = vld [vmem:[%s10054_s3 + $0x34] sm:$0xf0]  ;;  %v5617_v49 = vld [vmem:[%s10054_s3 + $0xb0] sm:$0xf]  ;;  %v5630_v50 = vor.u32 %v6551_v42, %v5627_v43  ;;  %v6533_v52 = vld [vmem:[%s10054_s3 + $0x34] sm:$0xf] }
   0xd   :  { %393 = vmatpush.bf16.msra.mxu1 %v5634_v33  ;;  %442 = vmatpush.bf16.msra.mxu2 %v5574_v34  ;;  %v6550_v51 = vld [vmem:[%s10054_s3 + $0xb4] sm:$0xf0]  ;;  %v5555_v53 = vld [vmem:[%s10054_s3 + $0x38] sm:$0xf0]  ;;  %v6549_v54 = vld [vmem:[%s10054_s3 + $0xb4] sm:$0xf]  ;;  %v5554_v56 = vor.u32 %v6534_v48, %v5553_v47 }
   0xe   :  { %491 = vmatpush.bf16.msra.mxu3 %v5638_v38  ;;  %v5619_v55 = vld [vmem:[%s10054_s3 + $0xb8] sm:$0xf0]  ;;  %v5618_v57 = vor.u32 %v6550_v51, %v5617_v49  ;;  %v5558_v58 = vor.u32 %v6533_v52, %v5555_v53  ;;  %v5545_v59 = vld [vmem:[%s10054_s3 + $0x20] sm:$0xf]  ;;  %v6532_v60 = vld [vmem:[%s10054_s3 + $0x24] sm:$0xf0] }
   0xf   :  { %v5609_v61 = vld [vmem:[%s10054_s3 + $0xa0] sm:$0xf]  ;;  %v5622_v62 = vor.u32 %v6549_v54, %v5619_v55  ;;  %v6548_v63 = vld [vmem:[%s10054_s3 + $0xa4] sm:$0xf0]  ;;  %v6531_v0 = vld [vmem:[%s10054_s3 + $0x24] sm:$0xf]  ;;  %v5546_v4 = vor.u32 %v6532_v60, %v5545_v59 }
  0x10   :  { %345 = vmatpush.bf16.msra.mxu0 %v5562_v44  ;;  %v5547_v1 = vld [vmem:[%s10054_s3 + $0x28] sm:$0xf0]  ;;  %v6547_v2 = vld [vmem:[%s10054_s3 + $0xa4] sm:$0xf]  ;;  %v5610_v5 = vor.u32 %v6548_v63, %v5609_v61  ;;  %v5537_v7 = vld [vmem:[%s10054_s3 + $0x10] sm:$0xf] }
  0x11   :  { %394 = vmatpush.bf16.msra.mxu1 %v5626_v45  ;;  %443 = vmatpush.bf16.msra.mxu2 %v5566_v46  ;;  %v5611_v3 = vld [vmem:[%s10054_s3 + $0xa8] sm:$0xf0]  ;;  %v5550_v6 = vor.u32 %v6531_v0, %v5547_v1  ;;  %v6530_v8 = vld [vmem:[%s10054_s3 + $0x14] sm:$0xf0]  ;;  %v5601_v9 = vld [vmem:[%s10054_s3 + $0x90] sm:$0xf] }
  0x12   :  { %492 = vmatpush.bf16.msra.mxu3 %v5630_v50  ;;  %v5614_v10 = vor.u32 %v6547_v2, %v5611_v3  ;;  %v6546_v11 = vld [vmem:[%s10054_s3 + $0x94] sm:$0xf0]  ;;  %v6529_v12 = vld [vmem:[%s10054_s3 + $0x14] sm:$0xf]  ;;  %v5539_v13 = vld [vmem:[%s10054_s3 + $0x18] sm:$0xf0]  ;;  %v5538_v16 = vor.u32 %v6530_v8, %v5537_v7 }
  0x13   :  { %v6545_v14 = vld [vmem:[%s10054_s3 + $0x94] sm:$0xf]  ;;  %v5603_v15 = vld [vmem:[%s10054_s3 + $0x98] sm:$0xf0]  ;;  %v5602_v17 = vor.u32 %v6546_v11, %v5601_v9  ;;  %v5542_v18 = vor.u32 %v6529_v12, %v5539_v13  ;;  %v5529_v19 = vld [vmem:[%s10054_s3] sm:$0xf] }
  0x14   :  { %346 = vmatpush.bf16.msra.mxu0 %v5554_v56  ;;  %v6528_v20 = vld [vmem:[%s10054_s3 + $0x4] sm:$0xf0]  ;;  %v5593_v21 = vld [vmem:[%s10054_s3 + $0x80] sm:$0xf]  ;;  %v5606_v22 = vor.u32 %v6545_v14, %v5603_v15  ;;  %v6527_v24 = vld [vmem:[%s10054_s3 + $0x4] sm:$0xf] }
  0x15   :  { %395 = vmatpush.bf16.msra.mxu1 %v5618_v57  ;;  %444 = vmatpush.bf16.msra.mxu2 %v5558_v58  ;;  %v6544_v23 = vld [vmem:[%s10054_s3 + $0x84] sm:$0xf0]  ;;  %v5531_v25 = vld [vmem:[%s10054_s3 + $0x8] sm:$0xf0]  ;;  %v6543_v26 = vld [vmem:[%s10054_s3 + $0x84] sm:$0xf]  ;;  %v5530_v28 = vor.u32 %v6528_v20, %v5529_v19 }
  0x16   :  { %493 = vmatpush.bf16.msra.mxu3 %v5622_v62  ;;  %v5595_v27 = vld [vmem:[%s10054_s3 + $0x88] sm:$0xf0]  ;;  %v5465_v29 = vld [vmem:[%s10055_s2] sm:$0xf]  ;;  %v6512_v30 = vld [vmem:[%s10055_s2 + $0x4] sm:$0xf0]  ;;  %v5594_v31 = vor.u32 %v6544_v23, %v5593_v21  ;;  %v5534_v32 = vor.u32 %v6527_v24, %v5531_v25 }
  0x17   :  { %v6511_v33 = vld [vmem:[%s10055_s2 + $0x4] sm:$0xf]  ;;  %v5467_v34 = vld [vmem:[%s10055_s2 + $0x8] sm:$0xf0]  ;;  %v5598_v35 = vor.u32 %v6543_v26, %v5595_v27  ;;  %v5466_v36 = vor.u32 %v6512_v30, %v5465_v29  ;;  %v5473_v38 = vld [vmem:[%s10055_s2 + $0x10] sm:$0xf] }
  0x18   :  { %347 = vmatpush.bf16.msra.mxu0 %v5546_v4  ;;  %v5470_v37 = vor.u32 %v6511_v33, %v5467_v34  ;;  %v6514_v39 = vld [vmem:[%s10055_s2 + $0x14] sm:$0xf0]  ;;  %v6513_v40 = vld [vmem:[%s10055_s2 + $0x14] sm:$0xf]  ;;  %v5475_v41 = vld [vmem:[%s10055_s2 + $0x18] sm:$0xf0] }
  0x19   :  { %396 = vmatpush.bf16.msra.mxu1 %v5610_v5  ;;  %445 = vmatpush.bf16.msra.mxu2 %v5550_v6  ;;  %v5474_v42 = vor.u32 %v6514_v39, %v5473_v38  ;;  %v5478_v43 = vor.u32 %v6513_v40, %v5475_v41  ;;  %v5481_v44 = vld [vmem:[%s10055_s2 + $0x20] sm:$0xf]  ;;  %v6516_v45 = vld [vmem:[%s10055_s2 + $0x24] sm:$0xf0]  ;;  %v6515_v46 = vld [vmem:[%s10055_s2 + $0x24] sm:$0xf] }
  0x1a   :  { %494 = vmatpush.bf16.msra.mxu3 %v5614_v10  ;;  %v5483_v47 = vld [vmem:[%s10055_s2 + $0x28] sm:$0xf0]  ;;  %v5482_v48 = vor.u32 %v6516_v45, %v5481_v44  ;;  %v5489_v50 = vld [vmem:[%s10055_s2 + $0x30] sm:$0xf]  ;;  %v6518_v51 = vld [vmem:[%s10055_s2 + $0x34] sm:$0xf0] }
  0x1b   :  { %v5486_v49 = vor.u32 %v6515_v46, %v5483_v47  ;;  %v6517_v52 = vld [vmem:[%s10055_s2 + $0x34] sm:$0xf]  ;;  %v5491_v53 = vld [vmem:[%s10055_s2 + $0x38] sm:$0xf0]  ;;  %v5490_v54 = vor.u32 %v6518_v51, %v5489_v50  ;;  %v5497_v56 = vld [vmem:[%s10055_s2 + $0x40] sm:$0xf] }
  0x1c   :  { %348 = vmatpush.bf16.msra.mxu0 %v5538_v16  ;;  %v5494_v55 = vor.u32 %v6517_v52, %v5491_v53  ;;  %v6520_v57 = vld [vmem:[%s10055_s2 + $0x44] sm:$0xf0]  ;;  %v6519_v58 = vld [vmem:[%s10055_s2 + $0x44] sm:$0xf]  ;;  %v5499_v59 = vld [vmem:[%s10055_s2 + $0x48] sm:$0xf0] }
  0x1d   :  { %397 = vmatpush.bf16.msra.mxu1 %v5602_v17  ;;  %446 = vmatpush.bf16.msra.mxu2 %v5542_v18  ;;  %v5498_v60 = vor.u32 %v6520_v57, %v5497_v56  ;;  %v5502_v61 = vor.u32 %v6519_v58, %v5499_v59  ;;  %v6630_v62 = vld [vmem:[%s10056_s5 + $0x38] sm:$0xff]  ;;  %v6629_v0 = vld [vmem:[%s10056_s5 + $0x30] sm:$0xff]  ;;  %v6628_v2 = vld [vmem:[%s10056_s5 + $0x28] sm:$0xff] }
  0x1e   :  { %495 = vmatpush.bf16.msra.mxu3 %v5606_v22  ;;  %v6638_v63 = vld [vmem:[%s10056_s5 + $0x78] sm:$0xff]  ;;  %v6637_v1 = vld [vmem:[%s10056_s5 + $0x70] sm:$0xff]  ;;  %v6636_v3 = vld [vmem:[%s10056_s5 + $0x68] sm:$0xff] }
  0x1f   :  { %v5505_v4 = vld [vmem:[%s10055_s2 + $0x50] sm:$0xf]  ;;  %v6522_v5 = vld [vmem:[%s10055_s2 + $0x54] sm:$0xf0]  ;;  %v6521_v6 = vld [vmem:[%s10055_s2 + $0x54] sm:$0xf] }
  0x20   :  { %349 = vmatpush.bf16.msra.mxu0 %v5530_v28  ;;  %v5507_v7 = vld [vmem:[%s10055_s2 + $0x58] sm:$0xf0]  ;;  %v6627_v8 = vld [vmem:[%s10056_s5 + $0x20] sm:$0xff]  ;;  %v5506_v10 = vor.u32 %v6522_v5, %v5505_v4  ;;  %v6625_v14 = vld [vmem:[%s10056_s5 + $0x10] sm:$0xff] }
  0x21   :  { %398 = vmatpush.bf16.msra.mxu1 %v5594_v31  ;;  %447 = vmatpush.bf16.msra.mxu2 %v5534_v32  ;;  %v6635_v9 = vld [vmem:[%s10056_s5 + $0x60] sm:$0xff]  ;;  %v5510_v11 = vor.u32 %v6521_v6, %v5507_v7  ;;  %v6626_v12 = vld [vmem:[%s10056_s5 + $0x18] sm:$0xff]  ;;  %v6633_v15 = vld [vmem:[%s10056_s5 + $0x50] sm:$0xff] }
  0x22   :  { %496 = vmatpush.bf16.msra.mxu3 %v5598_v35  ;;  %v6634_v13 = vld [vmem:[%s10056_s5 + $0x58] sm:$0xff]  ;;  %v6624_v16 = vld [vmem:[%s10056_s5 + $0x8] sm:$0xff]  ;;  %v5513_v18 = vld [vmem:[%s10055_s2 + $0x60] sm:$0xf] }
  0x23   :  { %350 = vmatmul.bf16.vlgmr.msra.gmra.mxu0 %v5466_v36  ;;  %v6632_v17 = vld [vmem:[%s10056_s5 + $0x48] sm:$0xff]  ;;  %v6523_v20 = vld [vmem:[%s10055_s2 + $0x64] sm:$0xf]  ;;  %v5521_v26 = vld [vmem:[%s10055_s2 + $0x70] sm:$0xf] }
  0x24   :  { %399 = vmatmul.bf16.vlgmr.msra.gmra.mxu1 %v5470_v37  ;;  %448 = vmatmul.bf16.vlgmr.msra.gmra.mxu2 %v5466_v36  ;;  %v6524_v19 = vld [vmem:[%s10055_s2 + $0x64] sm:$0xf0]  ;;  %v5515_v21 = vld [vmem:[%s10055_s2 + $0x68] sm:$0xf0]  ;;  %v6623_v24 = vld [vmem:[%s10056_s5] sm:$0xff] }
  0x25   :  { %497 = vmatmul.bf16.vlgmr.msra.gmra.mxu3 %v5470_v37  ;;  %1102 = vmatpush.bf16.msrb.mxu0 %v6630_v62  ;;  %v5514_v22 = vor.u32 %v6524_v19, %v5513_v18  ;;  %v5518_v23 = vor.u32 %v6523_v20, %v5515_v21  ;;  %v6631_v25 = vld [vmem:[%s10056_s5 + $0x40] sm:$0xff]  ;;  %v6526_v27 = vld [vmem:[%s10055_s2 + $0x74] sm:$0xf0]  ;;  %v6525_v28 = vld [vmem:[%s10055_s2 + $0x74] sm:$0xf] }
  0x26   :  { %1271 = vmatpush.bf16.msrb.mxu1 %v6638_v63  ;;  %v5523_v29 = vld [vmem:[%s10055_s2 + $0x78] sm:$0xf0]  ;;  %v5522_v30 = vor.u32 %v6526_v27, %v5521_v26  ;;  %v96_v32 = vld [vmem:[%s10057_s4] sm:$0x3]  ;;  %v6560_v34 = vld [vmem:[%s10058_s1 + $0x4] sm:$0xf0] }
  0x27   :  { %v5526_v31 = vor.u32 %v6525_v28, %v5523_v29  ;;  %v5657_v33 = vld [vmem:[%s10058_s1] sm:$0xf]  ;;  %v7183_v35 = vperm.slane %v96_v32, 0  ;;  %v6559_v36 = vld [vmem:[%s10058_s1 + $0x4] sm:$0xf]  ;;  %v7192_v44 = vperm.slane %v96_v32, 1 }
  0x28   :  { %v5659_v37 = vld [vmem:[%s10058_s1 + $0x8] sm:$0xf0]  ;;  %v5658_v38 = vor.u32 %v6560_v34, %v5657_v33  ;;  %v5665_v53 = vld [vmem:[%s10058_s1 + $0x10] sm:$0xf]  ;;  %v6561_v57 = vld [vmem:[%s10058_s1 + $0x14] sm:$0xf] }
  0x29   :  { %1103 = vmatpush.bf16.msrb.mxu0 %v6629_v0  ;;  %v5662_v40 = vor.u32 %v6559_v36, %v5659_v37  ;;  %v5667_v58 = vld [vmem:[%s10058_s1 + $0x18] sm:$0xf0]  ;;  %v5681_v36 = vld [vmem:[%s10058_s1 + $0x30] sm:$0xf]  ;;  %v6566_v37 = vld [vmem:[%s10058_s1 + $0x34] sm:$0xf0] }
  0x2a   :  { %1272 = vmatpush.bf16.msrb.mxu1 %v6637_v1  ;;  %v5670_v0 = vor.u32 %v6561_v57, %v5667_v58 }
  0x2d   :  { %1104 = vmatpush.bf16.msrb.mxu0 %v6628_v2 }
  0x2e   :  { %1273 = vmatpush.bf16.msrb.mxu1 %v6636_v3 }
  0x31   :  { %1105 = vmatpush.bf16.msrb.mxu0 %v6627_v8 }
  0x32   :  { %1274 = vmatpush.bf16.msrb.mxu1 %v6635_v9 }
  0x33   :  { %355 = vmatmul.bf16.gmra.mxu0 %v5474_v42 }
  0x34   :  { %404 = vmatmul.bf16.gmra.mxu1 %v5478_v43  ;;  %453 = vmatmul.bf16.gmra.mxu2 %v5474_v42 }
  0x35   :  { %502 = vmatmul.bf16.gmra.mxu3 %v5478_v43  ;;  %1106 = vmatpush.bf16.msrb.mxu0 %v6626_v12  ;;  %v5673_v12 = vld [vmem:[%s10058_s1 + $0x20] sm:$0xf] }
  0x36   :  { %1275 = vmatpush.bf16.msrb.mxu1 %v6634_v13  ;;  %v6564_v13 = vld [vmem:[%s10058_s1 + $0x24] sm:$0xf0] }
  0x37   :  { %v5674_v19 = vor.u32 %v6564_v13, %v5673_v12 }
  0x39   :  { %1107 = vmatpush.bf16.msrb.mxu0 %v6625_v14 }
  0x3a   :  { %1276 = vmatpush.bf16.msrb.mxu1 %v6633_v15 }
  0x3d   :  { %1108 = vmatpush.bf16.msrb.mxu0 %v6624_v16  ;;  %v6563_v16 = vld [vmem:[%s10058_s1 + $0x24] sm:$0xf] }
  0x3e   :  { %1277 = vmatpush.bf16.msrb.mxu1 %v6632_v17  ;;  %v5675_v17 = vld [vmem:[%s10058_s1 + $0x28] sm:$0xf0] }
  0x41   :  { %1109 = vmatpush.bf16.msrb.mxu0 %v6623_v24 }
  0x42   :  { %1278 = vmatpush.bf16.msrb.mxu1 %v6631_v25 }
  0x43   :  { %360 = vmatmul.bf16.gmra.mxu0 %v5482_v48 }
  0x44   :  { %409 = vmatmul.bf16.gmra.mxu1 %v5486_v49  ;;  %458 = vmatmul.bf16.gmra.mxu2 %v5482_v48 }
  0x45   :  { %507 = vmatmul.bf16.gmra.mxu3 %v5486_v49 }
  0x53   :  { %365 = vmatmul.bf16.gmra.mxu0 %v5490_v54 }
  0x54   :  { %414 = vmatmul.bf16.gmra.mxu1 %v5494_v55  ;;  %463 = vmatmul.bf16.gmra.mxu2 %v5490_v54  ;;  %v6562_v54 = vld [vmem:[%s10058_s1 + $0x14] sm:$0xf0] }
  0x55   :  { %512 = vmatmul.bf16.gmra.mxu3 %v5494_v55 }
  0x63   :  { %370 = vmatmul.bf16.gmra.mxu0 %v5498_v60 }
  0x64   :  { %419 = vmatmul.bf16.gmra.mxu1 %v5502_v61  ;;  %468 = vmatmul.bf16.gmra.mxu2 %v5498_v60  ;;  %v5666_v60 = vor.u32 %v6562_v54, %v5665_v53 }
  0x65   :  { %517 = vmatmul.bf16.gmra.mxu3 %v5502_v61 }
  0x73   :  { %375 = vmatmul.bf16.gmra.mxu0 %v5506_v10 }
  0x74   :  { %424 = vmatmul.bf16.gmra.mxu1 %v5510_v11  ;;  %473 = vmatmul.bf16.gmra.mxu2 %v5506_v10 }
  0x75   :  { %522 = vmatmul.bf16.gmra.mxu3 %v5510_v11 }
  0x83   :  { %380 = vmatmul.bf16.gmra.mxu0 %v5514_v22 }
  0x84   :  { %429 = vmatmul.bf16.gmra.mxu1 %v5518_v23  ;;  %478 = vmatmul.bf16.gmra.mxu2 %v5514_v22 }
  0x85   :  { %527 = vmatmul.bf16.gmra.mxu3 %v5518_v23  ;;  %v5678_v23 = vor.u32 %v6563_v16, %v5675_v17 }
  0x93   :  { %385 = vmatmul.bf16.gmra.mxu0 %v5522_v30 }
  0x94   :  { %434 = vmatmul.bf16.gmra.mxu1 %v5526_v31  ;;  %483 = vmatmul.bf16.gmra.mxu2 %v5522_v30 }
  0x95   :  { %532 = vmatmul.bf16.gmra.mxu3 %v5526_v31 }
  0xa0   :  { %v351_v39 = vpop.f32.mrf.mxu0 }
  0xa1   :  { %v352_v41 = vadd.f32 %v351_v39, %v7183_v35  ;;  %v400_v42 = vpop.f32.mrf.mxu1 }
  0xa3   :  { %v401_v43 = vadd.f32 %v400_v42, %v352_v41  ;;  %1110 = vmatmul.bf16.vlgmr.msrb.gmra.mxu0 %v5658_v38  ;;  %v5683_v41 = vld [vmem:[%s10058_s1 + $0x38] sm:$0xf0] }
  0xa4   :  { %1279 = vmatmul.bf16.vlgmr.msrb.gmra.mxu1 %v5662_v40  ;;  %v6565_v40 = vld [vmem:[%s10058_s1 + $0x34] sm:$0xf] }
  0xa5   :  { %v538_v55 = vmax.f32 %v401_v43, 0.0  ;;  %v5682_v43 = vor.u32 %v6566_v37, %v5681_v36 }
  0xa7   :  { %v449_v45 = vpop.f32.mrf.mxu2 }
  0xa8   :  { %v450_v46 = vadd.f32 %v449_v45, %v7192_v44  ;;  %v498_v47 = vpop.f32.mrf.mxu3  ;;  %v353_v48 = vpop.f32.mrf.mxu0 }
  0xa9   :  { %v354_v49 = vadd.f32 %v353_v48, %v7183_v35  ;;  %v402_v50 = vpop.f32.mrf.mxu1  ;;  %v5686_v48 = vor.u32 %v6565_v40, %v5683_v41  ;;  %v5705_v41 = vld [vmem:[%s10058_s1 + $0x60] sm:$0xf] }
  0xaa   :  { %v7196_v51 = vadd.f32 %v498_v47, %v450_v46 }
  0xab   :  { %v403_v52 = vadd.f32 %v402_v50, %v354_v49 }
  0xad   :  { %v540_v56 = vmax.f32 %v403_v52, 0.0 }
  0xaf   :  { %v7210_v59 = vpop.f32.mrf.mxu2  ;;  %v7212_v61 = vpack.c.bf16 %v540_v56, %v538_v55 }
  0xb0   :  { %v7214_v62 = vpop.f32.mrf.mxu3  ;;  %v356_v63 = vpop.f32.mrf.mxu0 }
  0xb1   :  { %v357_v1 = vadd.f32 %v356_v63, %v7183_v35  ;;  %v405_v2 = vpop.f32.mrf.mxu1 }
  0xb3   :  { %v406_v3 = vadd.f32 %v405_v2, %v357_v1  ;;  %1115 = vmatmul.bf16.gmra.mxu0 %v5666_v60  ;;  %v6568_v1 = vld [vmem:[%s10058_s1 + $0x44] sm:$0xf0] }
  0xb4   :  { %1284 = vmatmul.bf16.gmra.mxu1 %v5670_v0  ;;  %v5689_v0 = vld [vmem:[%s10058_s1 + $0x40] sm:$0xf] }
  0xb5   :  { %v542_v14 = vmax.f32 %v406_v3, 0.0 }
  0xb7   :  { %v454_v4 = vpop.f32.mrf.mxu2 }
  0xb8   :  { %v455_v5 = vadd.f32 %v454_v4, %v7192_v44  ;;  %v503_v6 = vpop.f32.mrf.mxu3  ;;  %v358_v7 = vpop.f32.mrf.mxu0  ;;  %v6567_v4 = vld [vmem:[%s10058_s1 + $0x44] sm:$0xf] }
  0xb9   :  { %v359_v8 = vadd.f32 %v358_v7, %v7183_v35  ;;  %v407_v9 = vpop.f32.mrf.mxu1  ;;  %v5690_v7 = vor.u32 %v6568_v1, %v5689_v0 }
  0xba   :  { %v7219_v10 = vadd.f32 %v503_v6, %v455_v5  ;;  %v5691_v5 = vld [vmem:[%s10058_s1 + $0x48] sm:$0xf0] }
  0xbb   :  { %v408_v11 = vadd.f32 %v407_v9, %v359_v8  ;;  %v5694_v12 = vor.u32 %v6567_v4, %v5691_v5 }
  0xbd   :  { %v544_v15 = vmax.f32 %v408_v11, 0.0 }
  0xbf   :  { %v7233_v18 = vpop.f32.mrf.mxu2  ;;  %v7235_v20 = vpack.c.bf16 %v544_v15, %v542_v14 }
  0xc0   :  { %v7237_v21 = vpop.f32.mrf.mxu3  ;;  %v361_v22 = vpop.f32.mrf.mxu0 }
  0xc1   :  { %v362_v24 = vadd.f32 %v361_v22, %v7183_v35  ;;  %v410_v25 = vpop.f32.mrf.mxu1 }
  0xc3   :  { %v411_v26 = vadd.f32 %v410_v25, %v362_v24  ;;  %1120 = vmatmul.bf16.gmra.mxu0 %v5674_v19  ;;  %v5697_v25 = vld [vmem:[%s10058_s1 + $0x50] sm:$0xf] }
  0xc4   :  { %1289 = vmatmul.bf16.gmra.mxu1 %v5678_v23 }
  0xc5   :  { %v546_v38 = vmax.f32 %v411_v26, 0.0  ;;  %v6570_v26 = vld [vmem:[%s10058_s1 + $0x54] sm:$0xf0] }
  0xc7   :  { %v459_v27 = vpop.f32.mrf.mxu2 }
  0xc8   :  { %v460_v28 = vadd.f32 %v459_v27, %v7192_v44  ;;  %v508_v29 = vpop.f32.mrf.mxu3  ;;  %v363_v30 = vpop.f32.mrf.mxu0  ;;  %v6569_v27 = vld [vmem:[%s10058_s1 + $0x54] sm:$0xf] }
  0xc9   :  { %v364_v31 = vadd.f32 %v363_v30, %v7183_v35  ;;  %v412_v32 = vpop.f32.mrf.mxu1  ;;  %v5698_v30 = vor.u32 %v6570_v26, %v5697_v25 }
  0xca   :  { %v7242_v33 = vadd.f32 %v508_v29, %v460_v28  ;;  %v5699_v28 = vld [vmem:[%s10058_s1 + $0x58] sm:$0xf0] }
  0xcb   :  { %v413_v34 = vadd.f32 %v412_v32, %v364_v31 }
  0xcd   :  { %v548_v39 = vmax.f32 %v413_v34, 0.0  ;;  %v5702_v34 = vor.u32 %v6569_v27, %v5699_v28 }
  0xcf   :  { %v7256_v42 = vpop.f32.mrf.mxu2  ;;  %v7258_v45 = vpack.c.bf16 %v548_v39, %v546_v38 }
  0xd0   :  { %v7260_v46 = vpop.f32.mrf.mxu3  ;;  %v366_v47 = vpop.f32.mrf.mxu0 }
  0xd1   :  { %v367_v49 = vadd.f32 %v366_v47, %v7183_v35  ;;  %v415_v50 = vpop.f32.mrf.mxu1  ;;  %v6571_v47 = vld [vmem:[%s10058_s1 + $0x64] sm:$0xf] }
  0xd3   :  { %v416_v52 = vadd.f32 %v415_v50, %v367_v49  ;;  %1125 = vmatmul.bf16.gmra.mxu0 %v5682_v43  ;;  %v6572_v43 = vld [vmem:[%s10058_s1 + $0x64] sm:$0xf0]  ;;  %v5707_v50 = vld [vmem:[%s10058_s1 + $0x68] sm:$0xf0] }
  0xd4   :  { %1294 = vmatmul.bf16.gmra.mxu1 %v5686_v48  ;;  %v6121_v48 = vld [vmem:[%s10060_s8 + $0x20] sm:$0xf]  ;;  %v6708_v49 = vld [vmem:[%s10060_s8 + $0x24] sm:$0xf0]  ;;  %v5710_v0 = vor.u32 %v6571_v47, %v5707_v50 }
  0xd5   :  { %v550_v2 = vmax.f32 %v416_v52, 0.0  ;;  %v6122_v52 = vor.u32 %v6708_v49, %v6121_v48 }
  0xd7   :  { %v464_v53 = vpop.f32.mrf.mxu2  ;;  %2364 = vmatpush.bf16.msra.mxu0 %v6122_v52 }
  0xd8   :  { %v465_v54 = vadd.f32 %v464_v53, %v7192_v44  ;;  %v513_v55 = vpop.f32.mrf.mxu3  ;;  %v368_v56 = vpop.f32.mrf.mxu0  ;;  %v6707_v53 = vld [vmem:[%s10060_s8 + $0x24] sm:$0xf] }
  0xd9   :  { %v369_v57 = vadd.f32 %v368_v56, %v7183_v35  ;;  %v417_v58 = vpop.f32.mrf.mxu1 }
  0xda   :  { %v7265_v60 = vadd.f32 %v513_v55, %v465_v54  ;;  %v6123_v54 = vld [vmem:[%s10060_s8 + $0x28] sm:$0xf0] }
  0xdb   :  { %v418_v63 = vadd.f32 %v417_v58, %v369_v57  ;;  %v6126_v55 = vor.u32 %v6707_v53, %v6123_v54  ;;  %v5706_v57 = vor.u32 %v6572_v43, %v5705_v41 }
  0xdd   :  { %v552_v3 = vmax.f32 %v418_v63, 0.0  ;;  %2533 = vmatpush.bf16.msra.mxu1 %v6126_v55  ;;  %v5721_v55 = vld [vmem:[%s10058_s1 + $0x80] sm:$0xf] }
  0xdf   :  { %v7279_v6 = vpop.f32.mrf.mxu2  ;;  %v7281_v8 = vpack.c.bf16 %v552_v3, %v550_v2 }
  0xe0   :  { %v7283_v9 = vpop.f32.mrf.mxu3  ;;  %v371_v11 = vpop.f32.mrf.mxu0 }
  0xe1   :  { %v372_v13 = vadd.f32 %v371_v11, %v7183_v35  ;;  %v420_v14 = vpop.f32.mrf.mxu1  ;;  %v6574_v11 = vld [vmem:[%s10058_s1 + $0x74] sm:$0xf0] }
  0xe3   :  { %v7286_v15 = vadd.f32 %v420_v14, %v372_v13  ;;  %1130 = vmatmul.bf16.gmra.mxu0 %v5690_v7  ;;  %v5713_v7 = vld [vmem:[%s10058_s1 + $0x70] sm:$0xf]  ;;  %v5715_v13 = vld [vmem:[%s10058_s1 + $0x78] sm:$0xf0] }
  0xe4   :  { %1299 = vmatmul.bf16.gmra.mxu1 %v5694_v12  ;;  %v6573_v12 = vld [vmem:[%s10058_s1 + $0x74] sm:$0xf] }
  0xe5   :  { %v5718_v25 = vor.u32 %v6573_v12, %v5715_v13 }
  0xe7   :  { %v469_v16 = vpop.f32.mrf.mxu2 }
  0xe8   :  { %v470_v17 = vadd.f32 %v469_v16, %v7192_v44  ;;  %v518_v19 = vpop.f32.mrf.mxu3  ;;  %v7289_v22 = vpop.f32.mrf.mxu0  ;;  %v5714_v16 = vor.u32 %v6574_v11, %v5713_v7  ;;  %v7378_v7 = vld [vmem:[%s10059_s6] ss:$0 sm:$0xff]  ;;  %v5723_v11 = vld [vmem:[%s10058_s1 + $0x88] sm:$0xf0] }
  0xe9   :  { %v7291_v23 = vpop.f32.mrf.mxu1  ;;  %v374_v12 = vadd.f32 %v7289_v22, %v7183_v35 }
  0xea   :  { %v7293_v24 = vadd.f32 %v518_v19, %v470_v17 }
  0xef   :  { %v7307_v29 = vpop.f32.mrf.mxu2 }
  0xf0   :  { %v7309_v31 = vpop.f32.mrf.mxu3  ;;  %v376_v32 = vpop.f32.mrf.mxu0 }
  0xf1   :  { %v7311_v36 = vpop.f32.mrf.mxu1 }
  0xf3   :  { %1135 = vmatmul.bf16.gmra.mxu0 %v5698_v30 }
  0xf4   :  { %1304 = vmatmul.bf16.gmra.mxu1 %v5702_v34 }
  0xf7   :  { %v7313_v37 = vpop.f32.mrf.mxu2 }
  0xf8   :  { %v7315_v38 = vpop.f32.mrf.mxu3  ;;  %v378_v39 = vpop.f32.mrf.mxu0 }
  0xf9   :  { %v427_v40 = vpop.f32.mrf.mxu1  ;;  %v379_v50 = vadd.f32 %v378_v39, %v7183_v35 }
  0xff   :  { %v7341_v56 = vpop.f32.mrf.mxu2 }
 0x100   :  { %v7343_v58 = vpop.f32.mrf.mxu3  ;;  %v381_v63 = vpop.f32.mrf.mxu0 }
 0x101   :  { %v430_v1 = vpop.f32.mrf.mxu1  ;;  %v382_v43 = vadd.f32 %v381_v63, %v7183_v35  ;;  %v6575_v63 = vld [vmem:[%s10058_s1 + $0x84] sm:$0xf] }
 0x103   :  { %1140 = vmatmul.bf16.gmra.mxu0 %v5706_v57  ;;  %v6576_v57 = vld [vmem:[%s10058_s1 + $0x84] sm:$0xf0] }
 0x104   :  { %1309 = vmatmul.bf16.gmra.mxu1 %v5710_v0  ;;  %v377_v0 = vadd.f32 %v376_v32, %v7183_v35 }
 0x107   :  { %v479_v2 = vpop.f32.mrf.mxu2 }
 0x108   :  { %v7345_v3 = vpop.f32.mrf.mxu3  ;;  %v383_v4 = vpop.f32.mrf.mxu0 }
 0x109   :  { %v432_v5 = vpop.f32.mrf.mxu1  ;;  %v384_v28 = vadd.f32 %v383_v4, %v7183_v35  ;;  %v431_v4 = vadd.f32 %v430_v1, %v382_v43  ;;  %v426_v43 = vadd.f32 %v7311_v36, %v377_v0  ;;  %v475_v36 = vadd.f32 %v7313_v37, %v7192_v44 }
 0x10b   :  { %v433_v52 = vadd.f32 %v432_v5, %v384_v28 }
 0x10f   :  { %v481_v14 = vpop.f32.mrf.mxu2 }
 0x110   :  { %v530_v17 = vpop.f32.mrf.mxu3  ;;  %v386_v19 = vpop.f32.mrf.mxu0  ;;  %v482_v13 = vadd.f32 %v481_v14, %v7192_v44 }
 0x111   :  { %v435_v26 = vpop.f32.mrf.mxu1  ;;  %v387_v27 = vadd.f32 %v386_v19, %v7183_v35  ;;  %v564_v19 = vmax.f32 %v433_v52, 0.0 }
 0x112   :  { %v531_v14 = vadd.f32 %v530_v17, %v482_v13 }
 0x113   :  { %1145 = vmatmul.bf16.gmra.mxu0 %v5714_v16  ;;  %v436_v47 = vadd.f32 %v435_v26, %v387_v27  ;;  %v428_v16 = vadd.f32 %v427_v40, %v379_v50  ;;  %v480_v26 = vadd.f32 %v479_v2, %v7192_v44  ;;  %v477_v40 = vadd.f32 %v7341_v56, %v7192_v44 }
 0x114   :  { %1314 = vmatmul.bf16.gmra.mxu1 %v5718_v25  ;;  %v5722_v25 = vor.u32 %v6576_v57, %v5721_v55  ;;  %v423_v2 = vadd.f32 %v7291_v23, %v374_v12  ;;  %v558_v57 = vmax.f32 %v426_v43, 0.0  ;;  %v472_v56 = vadd.f32 %v7307_v29, %v7192_v44 }
 0x115   :  { %v566_v39 = vmax.f32 %v436_v47, 0.0  ;;  %v562_v47 = vmax.f32 %v431_v4, 0.0  ;;  %v526_v17 = vadd.f32 %v7343_v58, %v477_v40  ;;  %v565_v23 = vmax.f32 %v531_v14, 0.0 }
 0x116   :  { %v556_v0 = vmax.f32 %v423_v2, 0.0  ;;  %v467_v29 = vadd.f32 %v7279_v6, %v7192_v44  ;;  %v521_v58 = vadd.f32 %v7309_v31, %v472_v56  ;;  %v6577_v6 = vld [vmem:[%s10058_s1 + $0x94] sm:$0xf]  ;;  %v5731_v31 = vld [vmem:[%s10058_s1 + $0x98] sm:$0xf0] }
 0x117   :  { %v484_v30 = vpop.f32.mrf.mxu2  ;;  %v582_v52 = vpack.c.bf16 %v564_v19, %v562_v47  ;;  %v561_v13 = vmax.f32 %v526_v17, 0.0 }
 0x118   :  { %v533_v34 = vpop.f32.mrf.mxu3  ;;  %v388_v41 = vpop.f32.mrf.mxu0  ;;  %v485_v54 = vadd.f32 %v484_v30, %v7192_v44 }
 0x119   :  { %v389_v48 = vadd.f32 %v388_v41, %v7183_v35  ;;  %v437_v49 = vpop.f32.mrf.mxu1  ;;  %v5726_v41 = vor.u32 %v6575_v63, %v5723_v11 }
 0x11a   :  { %v534_v27 = vadd.f32 %v533_v34, %v485_v54  ;;  %v560_v34 = vmax.f32 %v428_v16, 0.0 }
 0x11b   :  { %v438_v53 = vadd.f32 %v437_v49, %v389_v48 }
 0x11c   :  { %v567_v54 = vmax.f32 %v534_v27, 0.0  ;;  %v580_v4 = vpack.c.bf16 %v560_v34, %v558_v57  ;;  %v462_v27 = vadd.f32 %v7256_v42, %v7192_v44  ;;  %v457_v42 = vadd.f32 %v7233_v18, %v7192_v44 }
 0x11d   :  { %v568_v5 = vmax.f32 %v438_v53, 0.0  ;;  %v529_v53 = vadd.f32 %v7345_v3, %v480_v26  ;;  %v554_v3 = vmax.f32 %v7286_v15, 0.0  ;;  %v5729_v15 = vld [vmem:[%s10058_s1 + $0x90] sm:$0xf]  ;;  %v547_v18 = vmax.f32 %v7242_v33, 0.0 }
 0x11e   :  { %v5739_v33 = vld [vmem:[%s10058_s1 + $0xa8] sm:$0xf0] }
 0x11f   :  { %v486_v32 = vpop.f32.mrf.mxu2  ;;  %v584_v1 = vpack.c.bf16 %v568_v5, %v566_v39  ;;  %v524_v39 = vadd.f32 %v7315_v38, %v475_v36  ;;  %v563_v5 = vmax.f32 %v529_v53, 0.0 }
 0x120   :  { %v487_v28 = vadd.f32 %v486_v32, %v7192_v44  ;;  %v1111_v30 = vpop.f32.mrf.mxu0  ;;  %v535_v48 = vpop.f32.mrf.mxu3 }
 0x121   :  { %v1112_v35 = vadd.f32 %v7378_v7, %v1111_v30  ;;  %v1280_v22 = vpop.f32.mrf.mxu1  ;;  %1792 = vmatpush.bf16.msrb.mxu2 %v584_v1  ;;  %v583_v16 = vpack.c.bf16 %v565_v23, %v563_v5  ;;  %v578_v1 = vpack.c.bf16 %v556_v0, %v554_v3  ;;  %v559_v38 = vmax.f32 %v524_v39, 0.0 }
 0x122   :  { %v536_v49 = vadd.f32 %v535_v48, %v487_v28  ;;  %v516_v28 = vadd.f32 %v7283_v9, %v467_v29  ;;  %v557_v30 = vmax.f32 %v521_v58, 0.0  ;;  %v555_v48 = vmax.f32 %v7293_v24, 0.0 }
 0x123   :  { %v1281_v50 = vadd.f32 %v1280_v22, %v1112_v35  ;;  %1150 = vmatmul.bf16.gmra.mxu0 %v5722_v25  ;;  %v6578_v25 = vld [vmem:[%s10058_s1 + $0x94] sm:$0xf0]  ;;  %v5734_v22 = vor.u32 %v6577_v6, %v5731_v31  ;;  %v511_v9 = vadd.f32 %v7260_v46, %v462_v27  ;;  %v452_v24 = vadd.f32 %v7210_v59, %v7192_v44  ;;  %v6639_v59 = vld [vmem:[%s10061_s0] sm:$0xff] }
 0x124   :  { %v569_v55 = vmax.f32 %v536_v49, 0.0  ;;  %1319 = vmatmul.bf16.gmra.mxu1 %v5726_v41  ;;  %v581_v41 = vpack.c.bf16 %v561_v13, %v559_v38  ;;  %v5730_v47 = vor.u32 %v6578_v25, %v5729_v15  ;;  %v553_v49 = vmax.f32 %v516_v28, 0.0  ;;  %v6581_v38 = vld [vmem:[%s10058_s1 + $0xb4] sm:$0xf]  ;;  %v5747_v15 = vld [vmem:[%s10058_s1 + $0xb8] sm:$0xf0] }
 0x125   :  { %1793 = vmatpush.bf16.msrb.mxu2 %v582_v52  ;;  %v1440_v19 = vmax.f32 %v1281_v50, 0.0  ;;  %v579_v2 = vpack.c.bf16 %v557_v30, %v555_v48  ;;  %v551_v50 = vmax.f32 %v7265_v60, 0.0  ;;  %v549_v52 = vmax.f32 %v511_v9, 0.0 }
 0x126   :  { %v585_v63 = vpack.c.bf16 %v569_v55, %v567_v54  ;;  %v501_v60 = vadd.f32 %v7214_v62, %v452_v24  ;;  %v543_v44 = vmax.f32 %v7219_v10, 0.0  ;;  %v6579_v10 = vld [vmem:[%s10058_s1 + $0xa4] sm:$0xf]  ;;  %v5750_v31 = vor.u32 %v6581_v38, %v5747_v15 }
 0x127   :  { %v577_v36 = vpack.c.bf16 %v553_v49, %v551_v50  ;;  %v5742_v5 = vor.u32 %v6579_v10, %v5739_v33  ;;  %v6583_v49 = vld [vmem:[%s10058_s1 + $0xc4] sm:$0xf] }
 0x128   :  { %1961 = vmatpush.bf16.msrb.mxu3 %v585_v63  ;;  %v1113_v37 = vpop.f32.mrf.mxu0  ;;  %v541_v17 = vmax.f32 %v501_v60, 0.0 }
 0x129   :  { %v1114_v11 = vadd.f32 %v7378_v7, %v1113_v37  ;;  %v1282_v12 = vpop.f32.mrf.mxu1  ;;  %1794 = vmatpush.bf16.msrb.mxu2 %v580_v4  ;;  %v539_v4 = vmax.f32 %v7196_v51, 0.0  ;;  %v6640_v51 = vld [vmem:[%s10061_s0 + $0x8] sm:$0xff] }
 0x12b   :  { %v1283_v32 = vadd.f32 %v1282_v12, %v1114_v11  ;;  %v571_v3 = vpack.c.bf16 %v541_v17, %v539_v4 }
 0x12c   :  { %1962 = vmatpush.bf16.msrb.mxu3 %v583_v16 }
 0x12d   :  { %v1441_v26 = vmax.f32 %v1283_v32, 0.0  ;;  %1795 = vmatpush.bf16.msrb.mxu2 %v578_v1  ;;  %v6582_v32 = vld [vmem:[%s10058_s1 + $0xb4] sm:$0xf0] }
 0x12f   :  { %v7420_v43 = vpack.c.bf16 %v1441_v26, %v1440_v19  ;;  %v5745_v19 = vld [vmem:[%s10058_s1 + $0xb0] sm:$0xf] }
 0x130   :  { %1963 = vmatpush.bf16.msrb.mxu3 %v581_v41  ;;  %v1116_v35 = vpop.f32.mrf.mxu0  ;;  %v5746_v26 = vor.u32 %v6582_v32, %v5745_v19 }
 0x131   :  { %v1117_v40 = vadd.f32 %v7378_v7, %v1116_v35  ;;  %v1285_v14 = vpop.f32.mrf.mxu1  ;;  %1796 = vmatpush.bf16.msrb.mxu2 %v7281_v8  ;;  %v506_v8 = vadd.f32 %v7237_v21, %v457_v42  ;;  %v5737_v21 = vld [vmem:[%s10058_s1 + $0xa0] sm:$0xf]  ;;  %v6584_v42 = vld [vmem:[%s10058_s1 + $0xc4] sm:$0xf0] }
 0x133   :  { %v1286_v34 = vadd.f32 %v1285_v14, %v1117_v40  ;;  %1155 = vmatmul.bf16.gmra.mxu0 %v5730_v47  ;;  %v545_v55 = vmax.f32 %v506_v8, 0.0  ;;  %v6641_v40 = vld [vmem:[%s10061_s0 + $0x10] sm:$0xff]  ;;  %v5753_v14 = vld [vmem:[%s10058_s1 + $0xc0] sm:$0xf] }
 0x134   :  { %1324 = vmatmul.bf16.gmra.mxu1 %v5734_v22  ;;  %1964 = vmatpush.bf16.msrb.mxu3 %v579_v2  ;;  %v5755_v2 = vld [vmem:[%s10058_s1 + $0xc8] sm:$0xf0]  ;;  %v5754_v50 = vor.u32 %v6584_v42, %v5753_v14  ;;  %v5777_v14 = vld [vmem:[%s10058_s1 + $0xf0] sm:$0xf]  ;;  %v6590_v42 = vld [vmem:[%s10058_s1 + $0xf4] sm:$0xf0] }
 0x135   :  { %1797 = vmatpush.bf16.msrb.mxu2 %v7258_v45  ;;  %v575_v45 = vpack.c.bf16 %v549_v52, %v547_v18  ;;  %v1442_v57 = vmax.f32 %v1286_v34, 0.0  ;;  %v573_v23 = vpack.c.bf16 %v545_v55, %v543_v44  ;;  %v5758_v8 = vor.u32 %v6583_v49, %v5755_v2  ;;  %v6589_v49 = vld [vmem:[%s10058_s1 + $0xf4] sm:$0xf]  ;;  %v5779_v2 = vld [vmem:[%s10058_s1 + $0xf8] sm:$0xf0] }
 0x138   :  { %1965 = vmatpush.bf16.msrb.mxu3 %v577_v36  ;;  %v1118_v46 = vpop.f32.mrf.mxu0 }
 0x139   :  { %v1119_v53 = vadd.f32 %v7378_v7, %v1118_v46  ;;  %v1287_v54 = vpop.f32.mrf.mxu1  ;;  %1798 = vmatpush.bf16.msrb.mxu2 %v7235_v20  ;;  %v6580_v20 = vld [vmem:[%s10058_s1 + $0xa4] sm:$0xf0] }
 0x13a   :  { %v5738_v0 = vor.u32 %v6580_v20, %v5737_v21  ;;  %v5763_v21 = vld [vmem:[%s10058_s1 + $0xd8] sm:$0xf0] }
 0x13b   :  { %v1288_v56 = vadd.f32 %v1287_v54, %v1119_v53 }
 0x13c   :  { %1966 = vmatpush.bf16.msrb.mxu3 %v575_v45  ;;  %v6642_v45 = vld [vmem:[%s10061_s0 + $0x18] sm:$0xff] }
 0x13d   :  { %v1443_v62 = vmax.f32 %v1288_v56, 0.0  ;;  %1799 = vmatpush.bf16.msrb.mxu2 %v7212_v61  ;;  %v6586_v56 = vld [vmem:[%s10058_s1 + $0xd4] sm:$0xf0] }
 0x13f   :  { %v7454_v63 = vpack.c.bf16 %v1443_v62, %v1442_v57  ;;  %v5761_v57 = vld [vmem:[%s10058_s1 + $0xd0] sm:$0xf] }
 0x140   :  { %1967 = vmatpush.bf16.msrb.mxu3 %v573_v23  ;;  %v1121_v39 = vpop.f32.mrf.mxu0  ;;  %1800 = vmatmul.bf16.vlgmr.msrb.gmra.mxu2 %v6639_v59  ;;  %v5762_v62 = vor.u32 %v6586_v56, %v5761_v57  ;;  %v6645_v57 = vld [vmem:[%s10061_s0 + $0x30] sm:$0xff]  ;;  %v5785_v56 = vld [vmem:[%s10058_s1 + $0x100] sm:$0xf] }
 0x141   :  { %v1122_v61 = vadd.f32 %v7378_v7, %v1121_v39  ;;  %v1290_v37 = vpop.f32.mrf.mxu1 }
 0x143   :  { %v1291_v11 = vadd.f32 %v1290_v37, %v1122_v61  ;;  %1160 = vmatmul.bf16.gmra.mxu0 %v5738_v0 }
 0x144   :  { %1329 = vmatmul.bf16.gmra.mxu1 %v5742_v5  ;;  %1968 = vmatpush.bf16.msrb.mxu3 %v571_v3  ;;  %v6643_v3 = vld [vmem:[%s10061_s0 + $0x20] sm:$0xff] }
 0x145   :  { %v1444_v13 = vmax.f32 %v1291_v11, 0.0  ;;  %v5769_v11 = vld [vmem:[%s10058_s1 + $0xe0] sm:$0xf] }
 0x147   :  { %1969 = vmatmul.bf16.vlgmr.msrb.gmra.mxu3 %v6639_v59  ;;  %v6585_v59 = vld [vmem:[%s10058_s1 + $0xd4] sm:$0xf] }
 0x148   :  { %v1123_v12 = vpop.f32.mrf.mxu0  ;;  %v5766_v33 = vor.u32 %v6585_v59, %v5763_v21  ;;  %v6591_v21 = vld [vmem:[%s10058_s1 + $0x104] sm:$0xf] }
 0x149   :  { %v1124_v29 = vadd.f32 %v7378_v7, %v1123_v12  ;;  %v1292_v58 = vpop.f32.mrf.mxu1  ;;  %v6588_v12 = vld [vmem:[%s10058_s1 + $0xe4] sm:$0xf0] }
 0x14b   :  { %v1293_v16 = vadd.f32 %v1292_v58, %v1124_v29  ;;  %v6587_v58 = vld [vmem:[%s10058_s1 + $0xe4] sm:$0xf] }
 0x14d   :  { %v1445_v1 = vmax.f32 %v1293_v16, 0.0 }
 0x14f   :  { %v7474_v25 = vpack.c.bf16 %v1445_v1, %v1444_v13  ;;  %v5771_v13 = vld [vmem:[%s10058_s1 + $0xe8] sm:$0xf0] }
 0x150   :  { %v1126_v6 = vpop.f32.mrf.mxu0  ;;  %1805 = vmatmul.bf16.gmra.mxu2 %v6640_v51  ;;  %v5774_v32 = vor.u32 %v6587_v58, %v5771_v13 }
 0x151   :  { %v1127_v27 = vadd.f32 %v7378_v7, %v1126_v6  ;;  %v1295_v28 = vpop.f32.mrf.mxu1  ;;  %v6686_v6 = vld [vmem:[%s10062_s7 + $0x74] sm:$0xf0] }
 0x153   :  { %v1296_v30 = vadd.f32 %v1295_v28, %v1127_v27  ;;  %1165 = vmatmul.bf16.gmra.mxu0 %v5746_v26  ;;  %v6249_v26 = vld [vmem:[%s10062_s7 + $0x70] sm:$0xf]  ;;  %v6702_v28 = vld [vmem:[%s10062_s7 + $0xf4] sm:$0xf0] }
 0x154   :  { %1334 = vmatmul.bf16.gmra.mxu1 %v5750_v31  ;;  %v6250_v31 = vor.u32 %v6686_v6, %v6249_v26  ;;  %v6313_v27 = vld [vmem:[%s10062_s7 + $0xf0] sm:$0xf]  ;;  %v6593_v26 = vld [vmem:[%s10058_s1 + $0x114] sm:$0xf]  ;;  %v5795_v6 = vld [vmem:[%s10058_s1 + $0x118] sm:$0xf0] }
 0x155   :  { %v1446_v35 = vmax.f32 %v1296_v30, 0.0 }
 0x156   :  { %2857 = vmatpush.bf16.msra.mxu2 %v6250_v31 }
 0x157   :  { %1974 = vmatmul.bf16.gmra.mxu3 %v6640_v51  ;;  %v5770_v51 = vor.u32 %v6588_v12, %v5769_v11  ;;  %v6115_v11 = vld [vmem:[%s10060_s8 + $0x18] sm:$0xf0] }
 0x158   :  { %v1128_v41 = vpop.f32.mrf.mxu0 }
 0x159   :  { %v1129_v47 = vadd.f32 %v7378_v7, %v1128_v41  ;;  %v1297_v48 = vpop.f32.mrf.mxu1  ;;  %v6314_v41 = vor.u32 %v6702_v28, %v6313_v27 }
 0x15b   :  { %v1298_v22 = vadd.f32 %v1297_v48, %v1129_v47  ;;  %3026 = vmatpush.bf16.msra.mxu3 %v6314_v41 }
 0x15d   :  { %v1447_v9 = vmax.f32 %v1298_v22, 0.0 }
 0x15f   :  { %v7493_v34 = vpack.c.bf16 %v1447_v9, %v1446_v35 }
 0x160   :  { %v1131_v24 = vpop.f32.mrf.mxu0  ;;  %1810 = vmatmul.bf16.gmra.mxu2 %v6641_v40 }
 0x161   :  { %v1132_v52 = vadd.f32 %v7378_v7, %v1131_v24  ;;  %v1300_v36 = vpop.f32.mrf.mxu1  ;;  %v5778_v24 = vor.u32 %v6590_v42, %v5777_v14 }
 0x163   :  { %v1301_v18 = vadd.f32 %v1300_v36, %v1132_v52  ;;  %1170 = vmatmul.bf16.gmra.mxu0 %v5754_v50  ;;  %v5782_v52 = vor.u32 %v6589_v49, %v5779_v2  ;;  %v5801_v49 = vld [vmem:[%s10058_s1 + $0x120] sm:$0xf]  ;;  %v6596_v2 = vld [vmem:[%s10058_s1 + $0x124] sm:$0xf0] }
 0x164   :  { %1339 = vmatmul.bf16.gmra.mxu1 %v5758_v8 }
 0x165   :  { %v1448_v60 = vmax.f32 %v1301_v18, 0.0 }
 0x167   :  { %1979 = vmatmul.bf16.gmra.mxu3 %v6641_v40  ;;  %v6644_v40 = vld [vmem:[%s10061_s0 + $0x28] sm:$0xff] }
 0x168   :  { %v1133_v46 = vpop.f32.mrf.mxu0 }
 0x169   :  { %v1134_v53 = vadd.f32 %v7378_v7, %v1133_v46  ;;  %v1302_v54 = vpop.f32.mrf.mxu1 }
 0x16b   :  { %v1303_v55 = vadd.f32 %v1302_v54, %v1134_v53 }
 0x16d   :  { %v1449_v44 = vmax.f32 %v1303_v55, 0.0 }
 0x16f   :  { %v7512_v20 = vpack.c.bf16 %v1449_v44, %v1448_v60  ;;  %v6592_v44 = vld [vmem:[%s10058_s1 + $0x104] sm:$0xf0] }
 0x170   :  { %v1136_v10 = vpop.f32.mrf.mxu0  ;;  %1815 = vmatmul.bf16.gmra.mxu2 %v6642_v45 }
 0x171   :  { %v1137_v17 = vadd.f32 %v7378_v7, %v1136_v10  ;;  %v1305_v23 = vpop.f32.mrf.mxu1 }
 0x173   :  { %v1306_v0 = vadd.f32 %v1305_v23, %v1137_v17  ;;  %1175 = vmatmul.bf16.gmra.mxu0 %v5762_v62  ;;  %v5787_v62 = vld [vmem:[%s10058_s1 + $0x108] sm:$0xf0] }
 0x174   :  { %1344 = vmatmul.bf16.gmra.mxu1 %v5766_v33  ;;  %v5786_v33 = vor.u32 %v6592_v44, %v5785_v56  ;;  %v5790_v23 = vor.u32 %v6591_v21, %v5787_v62  ;;  %v6684_v56 = vld [vmem:[%s10062_s7 + $0x64] sm:$0xf0] }
 0x175   :  { %v1450_v61 = vmax.f32 %v1306_v0, 0.0  ;;  %v6700_v21 = vld [vmem:[%s10062_s7 + $0xe4] sm:$0xf0] }
 0x177   :  { %1984 = vmatmul.bf16.gmra.mxu3 %v6642_v45 }
 0x178   :  { %v1138_v4 = vpop.f32.mrf.mxu0 }
 0x179   :  { %v1139_v39 = vadd.f32 %v7378_v7, %v1138_v4  ;;  %v1307_v5 = vpop.f32.mrf.mxu1 }
 0x17b   :  { %v1308_v37 = vadd.f32 %v1307_v5, %v1139_v39  ;;  %v6113_v5 = vld [vmem:[%s10060_s8 + $0x10] sm:$0xf] }
 0x17d   :  { %v1451_v29 = vmax.f32 %v1308_v37, 0.0 }
 0x17f   :  { %v7531_v16 = vpack.c.bf16 %v1451_v29, %v1450_v61  ;;  %v6706_v61 = vld [vmem:[%s10060_s8 + $0x14] sm:$0xf0] }
 0x180   :  { %v1141_v19 = vpop.f32.mrf.mxu0  ;;  %1820 = vmatmul.bf16.gmra.mxu2 %v6643_v3  ;;  %v6114_v37 = vor.u32 %v6706_v61, %v6113_v5 }
 0x181   :  { %v1142_v1 = vadd.f32 %v7378_v7, %v1141_v19  ;;  %v1310_v38 = vpop.f32.mrf.mxu1 }
 0x182   :  { %2365 = vmatpush.bf16.msra.mxu0 %v6114_v37  ;;  %v6648_v37 = vld [vmem:[%s10061_s0 + $0x48] sm:$0xff] }
 0x183   :  { %v1311_v15 = vadd.f32 %v1310_v38, %v1142_v1  ;;  %1180 = vmatmul.bf16.gmra.mxu0 %v5770_v51  ;;  %v5793_v1 = vld [vmem:[%s10058_s1 + $0x110] sm:$0xf]  ;;  %v6594_v38 = vld [vmem:[%s10058_s1 + $0x114] sm:$0xf0] }
 0x184   :  { %1349 = vmatmul.bf16.gmra.mxu1 %v5774_v32  ;;  %v6646_v32 = vld [vmem:[%s10061_s0 + $0x38] sm:$0xff]  ;;  %v5794_v27 = vor.u32 %v6594_v38, %v5793_v1 }
 0x185   :  { %v1452_v35 = vmax.f32 %v1311_v15, 0.0 }
 0x187   :  { %1989 = vmatmul.bf16.gmra.mxu3 %v6643_v3  ;;  %v6705_v3 = vld [vmem:[%s10060_s8 + $0x14] sm:$0xf] }
 0x188   :  { %v1143_v30 = vpop.f32.mrf.mxu0  ;;  %v6118_v12 = vor.u32 %v6705_v3, %v6115_v11  ;;  %v5809_v3 = vld [vmem:[%s10058_s1 + $0x130] sm:$0xf]  ;;  %v6598_v11 = vld [vmem:[%s10058_s1 + $0x134] sm:$0xf0] }
 0x189   :  { %v1144_v47 = vadd.f32 %v7378_v7, %v1143_v30  ;;  %v1312_v48 = vpop.f32.mrf.mxu1  ;;  %v5798_v30 = vor.u32 %v6593_v26, %v5795_v6 }
 0x18a   :  { %2534 = vmatpush.bf16.msra.mxu1 %v6118_v12 }
 0x18b   :  { %v1313_v22 = vadd.f32 %v1312_v48, %v1144_v47 }
 0x18d   :  { %v1453_v9 = vmax.f32 %v1313_v22, 0.0 }
 0x18f   :  { %v7562_v50 = vpack.c.bf16 %v1453_v9, %v1452_v35  ;;  %v6647_v9 = vld [vmem:[%s10061_s0 + $0x40] sm:$0xff] }
 0x190   :  { %v1146_v8 = vpop.f32.mrf.mxu0  ;;  %1825 = vmatmul.bf16.gmra.mxu2 %v6644_v40 }
 0x191   :  { %v1147_v36 = vadd.f32 %v7378_v7, %v1146_v8  ;;  %v1315_v18 = vpop.f32.mrf.mxu1  ;;  %v6595_v8 = vld [vmem:[%s10058_s1 + $0x124] sm:$0xf] }
 0x193   :  { %v1316_v46 = vadd.f32 %v1315_v18, %v1147_v36  ;;  %1185 = vmatmul.bf16.gmra.mxu0 %v5778_v24  ;;  %v5802_v18 = vor.u32 %v6596_v2, %v5801_v49  ;;  %v6599_v2 = vld [vmem:[%s10058_s1 + $0x144] sm:$0xf] }
 0x194   :  { %1354 = vmatmul.bf16.gmra.mxu1 %v5782_v52  ;;  %v5803_v52 = vld [vmem:[%s10058_s1 + $0x128] sm:$0xf0] }
 0x195   :  { %v1454_v55 = vmax.f32 %v1316_v46, 0.0 }
 0x197   :  { %1994 = vmatmul.bf16.gmra.mxu3 %v6644_v40 }
 0x198   :  { %v1148_v53 = vpop.f32.mrf.mxu0 }
 0x199   :  { %v1149_v54 = vadd.f32 %v7378_v7, %v1148_v53  ;;  %v1317_v60 = vpop.f32.mrf.mxu1  ;;  %v5806_v53 = vor.u32 %v6595_v8, %v5803_v52 }
 0x19b   :  { %v1318_v45 = vadd.f32 %v1317_v60, %v1149_v54 }
 0x19d   :  { %v1455_v59 = vmax.f32 %v1318_v45, 0.0 }
 0x19f   :  { %v7581_v10 = vpack.c.bf16 %v1455_v59, %v1454_v55  ;;  %v6305_v59 = vld [vmem:[%s10062_s7 + $0xe0] sm:$0xf] }
 0x1a0   :  { %v1151_v17 = vpop.f32.mrf.mxu0  ;;  %1830 = vmatmul.bf16.gmra.mxu2 %v6645_v57 }
 0x1a1   :  { %v1152_v0 = vadd.f32 %v7378_v7, %v1151_v17  ;;  %v1320_v4 = vpop.f32.mrf.mxu1 }
 0x1a3   :  { %v1321_v39 = vadd.f32 %v1320_v4, %v1152_v0  ;;  %1190 = vmatmul.bf16.gmra.mxu0 %v5786_v33  ;;  %v6306_v33 = vor.u32 %v6700_v21, %v6305_v59 }
 0x1a4   :  { %1359 = vmatmul.bf16.gmra.mxu1 %v5790_v23 }
 0x1a5   :  { %v1456_v51 = vmax.f32 %v1321_v39, 0.0  ;;  %3027 = vmatpush.bf16.msra.mxu3 %v6306_v33 }
 0x1a7   :  { %1999 = vmatmul.bf16.gmra.mxu3 %v6645_v57  ;;  %v6241_v57 = vld [vmem:[%s10062_s7 + $0x60] sm:$0xf] }
 0x1a8   :  { %v1153_v29 = vpop.f32.mrf.mxu0  ;;  %v6242_v44 = vor.u32 %v6684_v56, %v6241_v57 }
 0x1a9   :  { %v1154_v58 = vadd.f32 %v7378_v7, %v1153_v29  ;;  %v1322_v13 = vpop.f32.mrf.mxu1  ;;  %v6597_v29 = vld [vmem:[%s10058_s1 + $0x134] sm:$0xf] }
 0x1aa   :  { %2858 = vmatpush.bf16.msra.mxu2 %v6242_v44 }
 0x1ab   :  { %v1323_v19 = vadd.f32 %v1322_v13, %v1154_v58  ;;  %v5811_v58 = vld [vmem:[%s10058_s1 + $0x138] sm:$0xf0] }
 0x1ad   :  { %v1457_v15 = vmax.f32 %v1323_v19, 0.0 }
 0x1af   :  { %v7612_v31 = vpack.c.bf16 %v1457_v15, %v1456_v51  ;;  %v5810_v51 = vor.u32 %v6598_v11, %v5809_v3  ;;  %v5827_v3 = vld [vmem:[%s10058_s1 + $0x158] sm:$0xf0] }
 0x1b0   :  { %v1156_v28 = vpop.f32.mrf.mxu0  ;;  %1835 = vmatmul.bf16.gmra.mxu2 %v6646_v32 }
 0x1b1   :  { %v1157_v41 = vadd.f32 %v7378_v7, %v1156_v28  ;;  %v1325_v47 = vpop.f32.mrf.mxu1 }
 0x1b3   :  { %v1326_v48 = vadd.f32 %v1325_v47, %v1157_v41  ;;  %1195 = vmatmul.bf16.gmra.mxu0 %v5794_v27 }
 0x1b4   :  { %1364 = vmatmul.bf16.gmra.mxu1 %v5798_v30 }
 0x1b5   :  { %v1458_v14 = vmax.f32 %v1326_v48, 0.0 }
 0x1b7   :  { %2004 = vmatmul.bf16.gmra.mxu3 %v6646_v32  ;;  %v5814_v32 = vor.u32 %v6597_v29, %v5811_v58 }
 0x1b8   :  { %v1158_v35 = vpop.f32.mrf.mxu0 }
 0x1b9   :  { %v1159_v22 = vadd.f32 %v7378_v7, %v1158_v35  ;;  %v1327_v40 = vpop.f32.mrf.mxu1 }
 0x1bb   :  { %v1328_v42 = vadd.f32 %v1327_v40, %v1159_v22 }
 0x1bd   :  { %v1459_v24 = vmax.f32 %v1328_v42, 0.0  ;;  %v5817_v42 = vld [vmem:[%s10058_s1 + $0x140] sm:$0xf] }
 0x1bf   :  { %v7631_v36 = vpack.c.bf16 %v1459_v24, %v1458_v14  ;;  %v6649_v14 = vld [vmem:[%s10061_s0 + $0x50] sm:$0xff]  ;;  %v5819_v24 = vld [vmem:[%s10058_s1 + $0x148] sm:$0xf0] }
 0x1c0   :  { %v1161_v46 = vpop.f32.mrf.mxu0  ;;  %1840 = vmatmul.bf16.gmra.mxu2 %v6647_v9 }
 0x1c1   :  { %v1162_v54 = vadd.f32 %v7378_v7, %v1161_v46  ;;  %v1330_v60 = vpop.f32.mrf.mxu1  ;;  %v5822_v46 = vor.u32 %v6599_v2, %v5819_v24  ;;  %v5835_v2 = vld [vmem:[%s10058_s1 + $0x168] sm:$0xf0] }
 0x1c3   :  { %v1331_v55 = vadd.f32 %v1330_v60, %v1162_v54  ;;  %1200 = vmatmul.bf16.gmra.mxu0 %v5802_v18  ;;  %v1801_v45 = vpop.f32.mrf.mxu2 }
 0x1c4   :  { %1369 = vmatmul.bf16.gmra.mxu1 %v5806_v53 }
 0x1c5   :  { %v1460_v4 = vmax.f32 %v1331_v55, 0.0 }
 0x1c7   :  { %2009 = vmatmul.bf16.gmra.mxu3 %v6647_v9  ;;  %v6600_v9 = vld [vmem:[%s10058_s1 + $0x144] sm:$0xf0] }
 0x1c8   :  { %v1163_v62 = vpop.f32.mrf.mxu0  ;;  %v5818_v52 = vor.u32 %v6600_v9, %v5817_v42  ;;  %v6604_v42 = vld [vmem:[%s10058_s1 + $0x164] sm:$0xf0] }
 0x1c9   :  { %v1164_v17 = vadd.f32 %v7378_v7, %v1163_v62  ;;  %v1332_v23 = vpop.f32.mrf.mxu1 }
 0x1ca   :  { %v1970_v0 = vpop.f32.mrf.mxu3 }
 0x1cb   :  { %v1333_v39 = vadd.f32 %v1332_v23, %v1164_v17  ;;  %v1803_v5 = vpop.f32.mrf.mxu2 }
 0x1cc   :  { %v7647_v61 = vpack.c.bf16 %v1803_v5, %v1801_v45 }
 0x1cd   :  { %v1461_v12 = vmax.f32 %v1333_v39, 0.0  ;;  %v6602_v39 = vld [vmem:[%s10058_s1 + $0x154] sm:$0xf0] }
 0x1cf   :  { %v7664_v13 = vpack.c.bf16 %v1461_v12, %v1460_v4  ;;  %v5825_v4 = vld [vmem:[%s10058_s1 + $0x150] sm:$0xf] }
 0x1d0   :  { %v1166_v19 = vpop.f32.mrf.mxu0  ;;  %1845 = vmatmul.bf16.gmra.mxu2 %v6648_v37  ;;  %v5826_v12 = vor.u32 %v6602_v39, %v5825_v4 }
 0x1d1   :  { %v1167_v1 = vadd.f32 %v7378_v7, %v1166_v19  ;;  %v1335_v38 = vpop.f32.mrf.mxu1 }
 0x1d2   :  { %v1972_v15 = vpop.f32.mrf.mxu3 }
 0x1d3   :  { %v1336_v26 = vadd.f32 %v1335_v38, %v1167_v1  ;;  %v7667_v6 = vpack.c.bf16 %v1972_v15, %v1970_v0  ;;  %1205 = vmatmul.bf16.gmra.mxu0 %v5810_v51  ;;  %v1806_v27 = vpop.f32.mrf.mxu2  ;;  %v6650_v0 = vld [vmem:[%s10061_s0 + $0x58] sm:$0xff] }
 0x1d4   :  { %1374 = vmatmul.bf16.gmra.mxu1 %v5814_v32 }
 0x1d5   :  { %v1462_v48 = vmax.f32 %v1336_v26, 0.0 }
 0x1d7   :  { %2014 = vmatmul.bf16.gmra.mxu3 %v6648_v37  ;;  %v6601_v37 = vld [vmem:[%s10058_s1 + $0x154] sm:$0xf] }
 0x1d8   :  { %v1168_v28 = vpop.f32.mrf.mxu0  ;;  %v5830_v58 = vor.u32 %v6601_v37, %v5827_v3 }
 0x1d9   :  { %v1169_v30 = vadd.f32 %v7378_v7, %v1168_v28  ;;  %v1337_v41 = vpop.f32.mrf.mxu1 }
 0x1da   :  { %v1975_v47 = vpop.f32.mrf.mxu3 }
 0x1db   :  { %v1338_v35 = vadd.f32 %v1337_v41, %v1169_v30  ;;  %v1808_v22 = vpop.f32.mrf.mxu2 }
 0x1dc   :  { %v7670_v40 = vpack.c.bf16 %v1808_v22, %v1806_v27  ;;  %v6651_v22 = vld [vmem:[%s10061_s0 + $0x60] sm:$0xff] }
 0x1dd   :  { %v1463_v49 = vmax.f32 %v1338_v35, 0.0 }
 0x1de   :  { %10153 = vst [vmem:[#allocation2_spill] sm:$0xff] %v7670_v40 }
 0x1df   :  { %v7687_v8 = vpack.c.bf16 %v1463_v49, %v1462_v48  ;;  %v6603_v49 = vld [vmem:[%s10058_s1 + $0x164] sm:$0xf] }
 0x1e0   :  { %v1171_v18 = vpop.f32.mrf.mxu0  ;;  %1850 = vmatmul.bf16.gmra.mxu2 %v6649_v14 }
 0x1e1   :  { %v1172_v53 = vadd.f32 %v7378_v7, %v1171_v18  ;;  %v1340_v54 = vpop.f32.mrf.mxu1 }
 0x1e2   :  { %v1977_v60 = vpop.f32.mrf.mxu3 }
 0x1e3   :  { %v1341_v55 = vadd.f32 %v1340_v54, %v1172_v53  ;;  %v7690_v45 = vpack.c.bf16 %v1977_v60, %v1975_v47  ;;  %1210 = vmatmul.bf16.gmra.mxu0 %v5818_v52  ;;  %v1811_v57 = vpop.f32.mrf.mxu2 }
 0x1e4   :  { %1379 = vmatmul.bf16.gmra.mxu1 %v5822_v46  ;;  %v5838_v46 = vor.u32 %v6603_v49, %v5835_v2 }
 0x1e5   :  { %v1464_v62 = vmax.f32 %v1341_v55, 0.0 }
 0x1e7   :  { %2019 = vmatmul.bf16.gmra.mxu3 %v6649_v14  ;;  %v5833_v14 = vld [vmem:[%s10058_s1 + $0x160] sm:$0xf] }
 0x1e8   :  { %v1173_v56 = vpop.f32.mrf.mxu0  ;;  %v5834_v52 = vor.u32 %v6604_v42, %v5833_v14 }
 0x1e9   :  { %v1174_v44 = vadd.f32 %v7378_v7, %v1173_v56  ;;  %v1342_v59 = vpop.f32.mrf.mxu1 }
 0x1ea   :  { %v1980_v21 = vpop.f32.mrf.mxu3 }
 0x1eb   :  { %v1343_v33 = vadd.f32 %v1342_v59, %v1174_v44  ;;  %v1813_v17 = vpop.f32.mrf.mxu2  ;;  %v6233_v44 = vld [vmem:[%s10062_s7 + $0x50] sm:$0xf]  ;;  %v6682_v59 = vld [vmem:[%s10062_s7 + $0x54] sm:$0xf0] }
 0x1ec   :  { %v7693_v23 = vpack.c.bf16 %v1813_v17, %v1811_v57 }
 0x1ed   :  { %v1465_v5 = vmax.f32 %v1343_v33, 0.0  ;;  %v6698_v33 = vld [vmem:[%s10062_s7 + $0xd4] sm:$0xf0] }
 0x1ee   :  { %10154 = vst [vmem:[#allocation3_spill] sm:$0xff] %v7693_v23 }
 0x1ef   :  { %v7710_v11 = vpack.c.bf16 %v1465_v5, %v1464_v62  ;;  %v6297_v62 = vld [vmem:[%s10062_s7 + $0xd0] sm:$0xf] }
 0x1f0   :  { %v1176_v29 = vpop.f32.mrf.mxu0  ;;  %1855 = vmatmul.bf16.gmra.mxu2 %v6650_v0 }
 0x1f1   :  { %v1177_v51 = vadd.f32 %v7378_v7, %v1176_v29  ;;  %v1345_v19 = vpop.f32.mrf.mxu1 }
 0x1f2   :  { %v1982_v32 = vpop.f32.mrf.mxu3 }
 0x1f3   :  { %v1346_v1 = vadd.f32 %v1345_v19, %v1177_v51  ;;  %v7713_v38 = vpack.c.bf16 %v1982_v32, %v1980_v21  ;;  %1215 = vmatmul.bf16.gmra.mxu0 %v5826_v12  ;;  %v1816_v15 = vpop.f32.mrf.mxu2  ;;  %v6234_v21 = vor.u32 %v6682_v59, %v6233_v44  ;;  %v5841_v51 = vld [vmem:[%s10058_s1 + $0x170] sm:$0xf]  ;;  %v6606_v19 = vld [vmem:[%s10058_s1 + $0x174] sm:$0xf0]  ;;  %v6607_v59 = vld [vmem:[%s10058_s1 + $0x184] sm:$0xf] }
 0x1f4   :  { %1384 = vmatmul.bf16.gmra.mxu1 %v5830_v58  ;;  %v6652_v58 = vld [vmem:[%s10061_s0 + $0x68] sm:$0xff] }
 0x1f5   :  { %10155 = vst [vmem:[#allocation4_spill] sm:$0xff] %v7713_v38  ;;  %v1466_v41 = vmax.f32 %v1346_v1, 0.0  ;;  %2859 = vmatpush.bf16.msra.mxu2 %v6234_v21  ;;  %v6605_v1 = vld [vmem:[%s10058_s1 + $0x174] sm:$0xf]  ;;  %v5851_v21 = vld [vmem:[%s10058_s1 + $0x188] sm:$0xf0] }
 0x1f7   :  { %2024 = vmatmul.bf16.gmra.mxu3 %v6650_v0  ;;  %v6298_v0 = vor.u32 %v6698_v33, %v6297_v62 }
 0x1f8   :  { %v1178_v26 = vpop.f32.mrf.mxu0 }
 0x1f9   :  { %v1179_v27 = vadd.f32 %v7378_v7, %v1178_v26  ;;  %v1347_v28 = vpop.f32.mrf.mxu1  ;;  %3028 = vmatpush.bf16.msra.mxu3 %v6298_v0  ;;  %v5854_v0 = vor.u32 %v6607_v59, %v5851_v21 }
 0x1fa   :  { %v1985_v30 = vpop.f32.mrf.mxu3 }
 0x1fb   :  { %v1348_v47 = vadd.f32 %v1347_v28, %v1179_v27  ;;  %v1818_v48 = vpop.f32.mrf.mxu2  ;;  %v5842_v27 = vor.u32 %v6606_v19, %v5841_v51 }
 0x1fc   :  { %v7716_v35 = vpack.c.bf16 %v1818_v48, %v1816_v15  ;;  %v5843_v15 = vld [vmem:[%s10058_s1 + $0x178] sm:$0xf0] }
 0x1fd   :  { %v1467_v9 = vmax.f32 %v1348_v47, 0.0 }
 0x1fe   :  { %10156 = vst [vmem:[#allocation5_spill] sm:$0xff] %v7716_v35 }
 0x1ff   :  { %v7733_v24 = vpack.c.bf16 %v1467_v9, %v1466_v41 }
 0x200   :  { %v1181_v18 = vpop.f32.mrf.mxu0  ;;  %1860 = vmatmul.bf16.gmra.mxu2 %v6651_v22 }
 0x201   :  { %v1182_v53 = vadd.f32 %v7378_v7, %v1181_v18  ;;  %v1350_v54 = vpop.f32.mrf.mxu1 }
 0x202   :  { %v1987_v60 = vpop.f32.mrf.mxu3 }
 0x203   :  { %v1351_v55 = vadd.f32 %v1350_v54, %v1182_v53  ;;  %v7736_v57 = vpack.c.bf16 %v1987_v60, %v1985_v30  ;;  %1220 = vmatmul.bf16.gmra.mxu0 %v5834_v52  ;;  %v1821_v56 = vpop.f32.mrf.mxu2  ;;  %v5846_v30 = vor.u32 %v6605_v1, %v5843_v15  ;;  %v6653_v60 = vld [vmem:[%s10061_s0 + $0x70] sm:$0xff] }
 0x204   :  { %1389 = vmatmul.bf16.gmra.mxu1 %v5838_v46 }
 0x205   :  { %10157 = vst [vmem:[#allocation6_spill] sm:$0xff] %v7736_v57  ;;  %v1468_v37 = vmax.f32 %v1351_v55, 0.0  ;;  %v5849_v55 = vld [vmem:[%s10058_s1 + $0x180] sm:$0xf] }
 0x207   :  { %2029 = vmatmul.bf16.gmra.mxu3 %v6651_v22 }
 0x208   :  { %v1183_v17 = vpop.f32.mrf.mxu0 }
 0x209   :  { %v1184_v4 = vadd.f32 %v7378_v7, %v1183_v17  ;;  %v1352_v39 = vpop.f32.mrf.mxu1 }
 0x20a   :  { %v1990_v5 = vpop.f32.mrf.mxu3 }
 0x20b   :  { %v1353_v3 = vadd.f32 %v1352_v39, %v1184_v4  ;;  %v1823_v12 = vpop.f32.mrf.mxu2 }
 0x20c   :  { %v7751_v29 = vpack.c.bf16 %v1823_v12, %v1821_v56  ;;  %v6608_v56 = vld [vmem:[%s10058_s1 + $0x184] sm:$0xf0] }
 0x20d   :  { %v1469_v32 = vmax.f32 %v1353_v3, 0.0  ;;  %v5850_v33 = vor.u32 %v6608_v56, %v5849_v55 }
 0x20e   :  { %10158 = vst [vmem:[#allocation7_spill] sm:$0xff] %v7751_v29 }
 0x20f   :  { %v7768_v26 = vpack.c.bf16 %v1469_v32, %v1468_v37 }
 0x210   :  { %v1186_v28 = vpop.f32.mrf.mxu0  ;;  %1865 = vmatmul.bf16.gmra.mxu2 %v6652_v58 }
 0x211   :  { %v1187_v41 = vadd.f32 %v7378_v7, %v1186_v28  ;;  %v1355_v47 = vpop.f32.mrf.mxu1 }
 0x212   :  { %v1992_v48 = vpop.f32.mrf.mxu3 }
 0x213   :  { %v1356_v22 = vadd.f32 %v1355_v47, %v1187_v41  ;;  %v7771_v14 = vpack.c.bf16 %v1992_v48, %v1990_v5  ;;  %1225 = vmatmul.bf16.gmra.mxu0 %v5842_v27  ;;  %v1826_v42 = vpop.f32.mrf.mxu2  ;;  %v5857_v41 = vld [vmem:[%s10058_s1 + $0x190] sm:$0xf]  ;;  %v6610_v47 = vld [vmem:[%s10058_s1 + $0x194] sm:$0xf0]  ;;  %v6609_v48 = vld [vmem:[%s10058_s1 + $0x194] sm:$0xf] }
 0x214   :  { %1394 = vmatmul.bf16.gmra.mxu1 %v5846_v30  ;;  %v6654_v30 = vld [vmem:[%s10061_s0 + $0x78] sm:$0xff] }
 0x215   :  { %10159 = vst [vmem:[#allocation8_spill] sm:$0xff] %v7771_v14  ;;  %v1470_v18 = vmax.f32 %v1356_v22, 0.0  ;;  %v5859_v22 = vld [vmem:[%s10058_s1 + $0x198] sm:$0xf0] }
 0x217   :  { %2034 = vmatmul.bf16.gmra.mxu3 %v6652_v58 }
 0x218   :  { %v1188_v9 = vpop.f32.mrf.mxu0 }
 0x219   :  { %v1189_v49 = vadd.f32 %v7378_v7, %v1188_v9  ;;  %v1357_v2 = vpop.f32.mrf.mxu1  ;;  %v5858_v9 = vor.u32 %v6610_v47, %v5857_v41 }
 0x21a   :  { %v1995_v52 = vpop.f32.mrf.mxu3 }
 0x21b   :  { %v1358_v46 = vadd.f32 %v1357_v2, %v1189_v49  ;;  %v1828_v53 = vpop.f32.mrf.mxu2  ;;  %v5862_v2 = vor.u32 %v6609_v48, %v5859_v22 }
 0x21c   :  { %v7774_v54 = vpack.c.bf16 %v1828_v53, %v1826_v42 }
 0x21d   :  { %v1471_v44 = vmax.f32 %v1358_v46, 0.0 }
 0x21f   :  { %v7791_v62 = vpack.c.bf16 %v1471_v44, %v1470_v18 }
 0x220   :  { %v1191_v17 = vpop.f32.mrf.mxu0  ;;  %1870 = vmatmul.bf16.gmra.mxu2 %v6653_v60 }
 0x221   :  { %v1192_v4 = vadd.f32 %v7378_v7, %v1191_v17  ;;  %v1360_v39 = vpop.f32.mrf.mxu1 }
 0x222   :  { %v1997_v5 = vpop.f32.mrf.mxu3 }
 0x223   :  { %v1361_v37 = vadd.f32 %v1360_v39, %v1192_v4  ;;  %v7794_v3 = vpack.c.bf16 %v1997_v5, %v1995_v52  ;;  %1230 = vmatmul.bf16.gmra.mxu0 %v5850_v33  ;;  %v1831_v12 = vpop.f32.mrf.mxu2  ;;  %v7819_v52 = vld [vmem:[%s10059_s6] ss:$0 sm:$0xff] }
 0x224   :  { %1399 = vmatmul.bf16.gmra.mxu1 %v5854_v0  ;;  %v6655_v5 = vld [vmem:[%s10061_s0 + $0x80] sm:$0xff] }
 0x225   :  { %v1472_v1 = vmax.f32 %v1361_v37, 0.0  ;;  %v5865_v37 = vld [vmem:[%s10058_s1 + $0x1a0] sm:$0xf] }
 0x227   :  { %2039 = vmatmul.bf16.gmra.mxu3 %v6653_v60 }
 0x228   :  { %v1193_v58 = vpop.f32.mrf.mxu0 }
 0x229   :  { %v1194_v51 = vadd.f32 %v7378_v7, %v1193_v58  ;;  %v1362_v19 = vpop.f32.mrf.mxu1 }
 0x22a   :  { %v2000_v32 = vpop.f32.mrf.mxu3 }
 0x22b   :  { %v1363_v15 = vadd.f32 %v1362_v19, %v1194_v51  ;;  %v1833_v27 = vpop.f32.mrf.mxu2  ;;  %v6611_v51 = vld [vmem:[%s10058_s1 + $0x1a4] sm:$0xf]  ;;  %v5867_v19 = vld [vmem:[%s10058_s1 + $0x1a8] sm:$0xf0] }
 0x22c   :  { %v7797_v28 = vpack.c.bf16 %v1833_v27, %v1831_v12  ;;  %v6612_v12 = vld [vmem:[%s10058_s1 + $0x1a4] sm:$0xf0]  ;;  %v5870_v27 = vor.u32 %v6611_v51, %v5867_v19  ;;  %v5875_v51 = vld [vmem:[%s10058_s1 + $0x1b8] sm:$0xf0] }
 0x22d   :  { %v1473_v7 = vmax.f32 %v1363_v15, 0.0 }
 0x22e   :  { %10160 = vst [vmem:[#allocation9_spill] sm:$0xff] %v7797_v28 }
 0x22f   :  { %v7814_v42 = vpack.c.bf16 %v1473_v7, %v1472_v1  ;;  %v5866_v1 = vor.u32 %v6612_v12, %v5865_v37  ;;  %v6614_v37 = vld [vmem:[%s10058_s1 + $0x1b4] sm:$0xf0] }
 0x230   :  { %v1196_v49 = vpop.f32.mrf.mxu0  ;;  %1875 = vmatmul.bf16.gmra.mxu2 %v6654_v30 }
 0x231   :  { %v1197_v18 = vadd.f32 %v7819_v52, %v1196_v49  ;;  %v1365_v46 = vpop.f32.mrf.mxu1  ;;  %v6680_v49 = vld [vmem:[%s10062_s7 + $0x44] sm:$0xf0] }
 0x232   :  { %v2002_v53 = vpop.f32.mrf.mxu3 }
 0x233   :  { %v1366_v60 = vadd.f32 %v1365_v46, %v1197_v18  ;;  %v7822_v55 = vpack.c.bf16 %v2002_v53, %v2000_v32  ;;  %1235 = vmatmul.bf16.gmra.mxu0 %v5858_v9  ;;  %v1836_v56 = vpop.f32.mrf.mxu2  ;;  %v6225_v9 = vld [vmem:[%s10062_s7 + $0x40] sm:$0xf]  ;;  %v6696_v46 = vld [vmem:[%s10062_s7 + $0xc4] sm:$0xf0] }
 0x234   :  { %1404 = vmatmul.bf16.gmra.mxu1 %v5862_v2  ;;  %v6226_v2 = vor.u32 %v6680_v49, %v6225_v9  ;;  %v6289_v18 = vld [vmem:[%s10062_s7 + $0xc0] sm:$0xf] }
 0x235   :  { %10161 = vst [vmem:[#allocation10_spill] sm:$0xff] %v7822_v55  ;;  %v1474_v17 = vmax.f32 %v1366_v60, 0.0  ;;  %v6290_v60 = vor.u32 %v6696_v46, %v6289_v18 }
 0x236   :  { %2860 = vmatpush.bf16.msra.mxu2 %v6226_v2 }
 0x237   :  { %2044 = vmatmul.bf16.gmra.mxu3 %v6654_v30 }
 0x238   :  { %v1198_v44 = vpop.f32.mrf.mxu0  ;;  %3029 = vmatpush.bf16.msra.mxu3 %v6290_v60 }
 0x239   :  { %v1199_v59 = vadd.f32 %v7819_v52, %v1198_v44  ;;  %v1367_v21 = vpop.f32.mrf.mxu1 }
 0x23a   :  { %v2005_v33 = vpop.f32.mrf.mxu3 }
 0x23b   :  { %v1368_v0 = vadd.f32 %v1367_v21, %v1199_v59  ;;  %v1838_v4 = vpop.f32.mrf.mxu2 }
 0x23c   :  { %v7825_v39 = vpack.c.bf16 %v1838_v4, %v1836_v56  ;;  %v6656_v4 = vld [vmem:[%s10061_s0 + $0x88] sm:$0xff] }
 0x23d   :  { %v1475_v58 = vmax.f32 %v1368_v0, 0.0 }
 0x23e   :  { %10162 = vst [vmem:[#allocation11_spill] sm:$0xff] %v7825_v39 }
 0x23f   :  { %v7842_v32 = vpack.c.bf16 %v1475_v58, %v1474_v17  ;;  %v6613_v58 = vld [vmem:[%s10058_s1 + $0x1b4] sm:$0xf] }
 0x240   :  { %v1201_v15 = vpop.f32.mrf.mxu0  ;;  %1880 = vmatmul.bf16.gmra.mxu2 %v6655_v5 }
 0x241   :  { %v1202_v30 = vadd.f32 %v7819_v52, %v1201_v15  ;;  %v1370_v41 = vpop.f32.mrf.mxu1  ;;  %v6105_v15 = vld [vmem:[%s10060_s8] sm:$0xf] }
 0x242   :  { %v2007_v47 = vpop.f32.mrf.mxu3 }
 0x243   :  { %v1371_v7 = vadd.f32 %v1370_v41, %v1202_v30  ;;  %v7845_v48 = vpack.c.bf16 %v2007_v47, %v2005_v33  ;;  %1240 = vmatmul.bf16.gmra.mxu0 %v5866_v1  ;;  %v1841_v22 = vpop.f32.mrf.mxu2  ;;  %v6703_v30 = vld [vmem:[%s10060_s8 + $0x4] sm:$0xf]  ;;  %v5878_v47 = vor.u32 %v6613_v58, %v5875_v51  ;;  %v5881_v58 = vld [vmem:[%s10058_s1 + $0x1c0] sm:$0xf] }
 0x244   :  { %1409 = vmatmul.bf16.gmra.mxu1 %v5870_v27  ;;  %v6704_v27 = vld [vmem:[%s10060_s8 + $0x4] sm:$0xf0] }
 0x245   :  { %10163 = vst [vmem:[#allocation12_spill] sm:$0xff] %v7845_v48  ;;  %v1476_v21 = vmax.f32 %v1371_v7, 0.0  ;;  %v6106_v7 = vor.u32 %v6704_v27, %v6105_v15  ;;  %v5883_v15 = vld [vmem:[%s10058_s1 + $0x1c8] sm:$0xf0] }
 0x247   :  { %2049 = vmatmul.bf16.gmra.mxu3 %v6655_v5  ;;  %v5873_v5 = vld [vmem:[%s10058_s1 + $0x1b0] sm:$0xf]  ;;  %2366 = vmatpush.bf16.msra.mxu0 %v6106_v7 }
 0x248   :  { %v1203_v53 = vpop.f32.mrf.mxu0  ;;  %v5874_v1 = vor.u32 %v6614_v37, %v5873_v5 }
 0x249   :  { %v1204_v56 = vadd.f32 %v7819_v52, %v1203_v53  ;;  %v1372_v44 = vpop.f32.mrf.mxu1 }
 0x24a   :  { %v2010_v59 = vpop.f32.mrf.mxu3 }
 0x24b   :  { %v1373_v33 = vadd.f32 %v1372_v44, %v1204_v56  ;;  %v1843_v17 = vpop.f32.mrf.mxu2 }
 0x24c   :  { %v7860_v0 = vpack.c.bf16 %v1843_v17, %v1841_v22  ;;  %v6107_v22 = vld [vmem:[%s10060_s8 + $0x8] sm:$0xf0] }
 0x24d   :  { %v1477_v12 = vmax.f32 %v1373_v33, 0.0  ;;  %v6110_v2 = vor.u32 %v6703_v30, %v6107_v22 }
 0x24e   :  { %10164 = vst [vmem:[#allocation13_spill] sm:$0xff] %v7860_v0 }
 0x24f   :  { %v7877_v19 = vpack.c.bf16 %v1477_v12, %v1476_v21  ;;  %2535 = vmatpush.bf16.msra.mxu1 %v6110_v2 }
 0x250   :  { %v1206_v41 = vpop.f32.mrf.mxu0  ;;  %1885 = vmatmul.bf16.gmra.mxu2 %v6656_v4 }
 0x251   :  { %v1207_v9 = vadd.f32 %v7819_v52, %v1206_v41  ;;  %v1375_v49 = vpop.f32.mrf.mxu1 }
 0x252   :  { %v2012_v18 = vpop.f32.mrf.mxu3 }
 0x253   :  { %v1376_v46 = vadd.f32 %v1375_v49, %v1207_v9  ;;  %v7892_v53 = vpack.c.bf16 %v2012_v18, %v2010_v59  ;;  %1245 = vmatmul.bf16.gmra.mxu0 %v5874_v1  ;;  %v1846_v60 = vpop.f32.mrf.mxu2  ;;  %v6657_v59 = vld [vmem:[%s10061_s0 + $0x90] sm:$0xff]  ;;  %v6615_v1 = vld [vmem:[%s10058_s1 + $0x1c4] sm:$0xf] }
 0x254   :  { %1414 = vmatmul.bf16.gmra.mxu1 %v5878_v47  ;;  %v5886_v47 = vor.u32 %v6615_v1, %v5883_v15  ;;  %v5891_v1 = vld [vmem:[%s10058_s1 + $0x1d8] sm:$0xf0] }
 0x255   :  { %10165 = vst [vmem:[#allocation14_spill] sm:$0xff] %v7892_v53  ;;  %v1478_v17 = vmax.f32 %v1376_v46, 0.0 }
 0x257   :  { %2054 = vmatmul.bf16.gmra.mxu3 %v6656_v4  ;;  %v6616_v4 = vld [vmem:[%s10058_s1 + $0x1c4] sm:$0xf0] }
 0x258   :  { %v1208_v56 = vpop.f32.mrf.mxu0  ;;  %v5882_v30 = vor.u32 %v6616_v4, %v5881_v58  ;;  %v6658_v58 = vld [vmem:[%s10061_s0 + $0x98] sm:$0xff] }
 0x259   :  { %v1209_v44 = vadd.f32 %v7819_v52, %v1208_v56  ;;  %v1377_v21 = vpop.f32.mrf.mxu1 }
 0x25a   :  { %v2015_v33 = vpop.f32.mrf.mxu3 }
 0x25b   :  { %v1378_v5 = vadd.f32 %v1377_v21, %v1209_v44  ;;  %v1848_v37 = vpop.f32.mrf.mxu2 }
 0x25c   :  { %v7895_v12 = vpack.c.bf16 %v1848_v37, %v1846_v60 }
 0x25d   :  { %v1479_v51 = vmax.f32 %v1378_v5, 0.0 }
 0x25f   :  { %v7912_v27 = vpack.c.bf16 %v1479_v51, %v1478_v17  ;;  %v6617_v51 = vld [vmem:[%s10058_s1 + $0x1d4] sm:$0xf] }
 0x260   :  { %v1211_v41 = vpop.f32.mrf.mxu0  ;;  %1890 = vmatmul.bf16.gmra.mxu2 %v6657_v59 }
 0x261   :  { %v1212_v7 = vadd.f32 %v7819_v52, %v1211_v41  ;;  %v1380_v22 = vpop.f32.mrf.mxu1 }
 0x262   :  { %v2017_v9 = vpop.f32.mrf.mxu3 }
 0x263   :  { %v1381_v49 = vadd.f32 %v1380_v22, %v1212_v7  ;;  %v7915_v2 = vpack.c.bf16 %v2017_v9, %v2015_v33  ;;  %1250 = vmatmul.bf16.gmra.mxu0 %v5882_v30  ;;  %v1851_v18 = vpop.f32.mrf.mxu2  ;;  %v5889_v33 = vld [vmem:[%s10058_s1 + $0x1d0] sm:$0xf] }
 0x264   :  { %1419 = vmatmul.bf16.gmra.mxu1 %v5886_v47  ;;  %v5894_v47 = vor.u32 %v6617_v51, %v5891_v1  ;;  %v6659_v51 = vld [vmem:[%s10061_s0 + $0xa0] sm:$0xff] }
 0x265   :  { %v1480_v21 = vmax.f32 %v1381_v49, 0.0 }
 0x267   :  { %2059 = vmatmul.bf16.gmra.mxu3 %v6657_v59  ;;  %v6618_v59 = vld [vmem:[%s10058_s1 + $0x1d4] sm:$0xf0] }
 0x268   :  { %v1213_v46 = vpop.f32.mrf.mxu0  ;;  %v5890_v30 = vor.u32 %v6618_v59, %v5889_v33 }
 0x269   :  { %v1214_v60 = vadd.f32 %v7819_v52, %v1213_v46  ;;  %v1382_v56 = vpop.f32.mrf.mxu1 }
 0x26a   :  { %v2020_v44 = vpop.f32.mrf.mxu3 }
 0x26b   :  { %v1383_v17 = vadd.f32 %v1382_v56, %v1214_v60  ;;  %v1853_v5 = vpop.f32.mrf.mxu2 }
 0x26c   :  { %v7918_v37 = vpack.c.bf16 %v1853_v5, %v1851_v18 }
 0x26d   :  { %v1481_v4 = vmax.f32 %v1383_v17, 0.0 }
 0x26e   :  { %10166 = vst [vmem:[#allocation15_spill] sm:$0xff] %v7918_v37 }
 0x26f   :  { %v7935_v15 = vpack.c.bf16 %v1481_v4, %v1480_v21 }
 0x270   :  { %v1216_v41 = vpop.f32.mrf.mxu0  ;;  %1895 = vmatmul.bf16.gmra.mxu2 %v6658_v58 }
 0x271   :  { %v1217_v7 = vadd.f32 %v7819_v52, %v1216_v41  ;;  %v1385_v22 = vpop.f32.mrf.mxu1  ;;  %v5899_v41 = vld [vmem:[%s10058_s1 + $0x1e8] sm:$0xf0] }
 0x272   :  { %v2022_v9 = vpop.f32.mrf.mxu3 }
 0x273   :  { %v1386_v49 = vadd.f32 %v1385_v22, %v1217_v7  ;;  %v7938_v18 = vpack.c.bf16 %v2022_v9, %v2020_v44  ;;  %1255 = vmatmul.bf16.gmra.mxu0 %v5890_v30  ;;  %v1856_v46 = vpop.f32.mrf.mxu2  ;;  %v5897_v44 = vld [vmem:[%s10058_s1 + $0x1e0] sm:$0xf]  ;;  %v6619_v30 = vld [vmem:[%s10058_s1 + $0x1e4] sm:$0xf] }
 0x274   :  { %1424 = vmatmul.bf16.gmra.mxu1 %v5894_v47  ;;  %v5902_v9 = vor.u32 %v6619_v30, %v5899_v41 }
 0x275   :  { %10167 = vst [vmem:[#allocation16_spill] sm:$0xff] %v7938_v18  ;;  %v1482_v5 = vmax.f32 %v1386_v49, 0.0 }
 0x277   :  { %2064 = vmatmul.bf16.gmra.mxu3 %v6658_v58  ;;  %v6620_v58 = vld [vmem:[%s10058_s1 + $0x1e4] sm:$0xf0] }
 0x278   :  { %v1218_v60 = vpop.f32.mrf.mxu0  ;;  %v5898_v7 = vor.u32 %v6620_v58, %v5897_v44  ;;  %v6281_v58 = vld [vmem:[%s10062_s7 + $0xb0] sm:$0xf] }
 0x279   :  { %v1219_v56 = vadd.f32 %v7819_v52, %v1218_v60  ;;  %v1387_v21 = vpop.f32.mrf.mxu1 }
 0x27a   :  { %v2025_v17 = vpop.f32.mrf.mxu3 }
 0x27b   :  { %v1388_v33 = vadd.f32 %v1387_v21, %v1219_v56  ;;  %v1858_v59 = vpop.f32.mrf.mxu2 }
 0x27c   :  { %v7941_v4 = vpack.c.bf16 %v1858_v59, %v1856_v46  ;;  %v6217_v59 = vld [vmem:[%s10062_s7 + $0x30] sm:$0xf] }
 0x27d   :  { %v1483_v1 = vmax.f32 %v1388_v33, 0.0 }
 0x27e   :  { %10168 = vst [vmem:[#allocation17_spill] sm:$0xff] %v7941_v4 }
 0x27f   :  { %v7958_v47 = vpack.c.bf16 %v1483_v1, %v1482_v5  ;;  %v6678_v5 = vld [vmem:[%s10062_s7 + $0x34] sm:$0xf0] }
 0x280   :  { %v1221_v22 = vpop.f32.mrf.mxu0  ;;  %1900 = vmatmul.bf16.gmra.mxu2 %v6659_v51  ;;  %v6218_v44 = vor.u32 %v6678_v5, %v6217_v59  ;;  %v5905_v59 = vld [vmem:[%s10058_s1 + $0x1f0] sm:$0xf]  ;;  %v6622_v5 = vld [vmem:[%s10058_s1 + $0x1f4] sm:$0xf0] }
 0x281   :  { %10169 = vst [vmem:[#allocation18_spill] sm:$0xff] %v7958_v47  ;;  %v1222_v49 = vadd.f32 %v7819_v52, %v1221_v22  ;;  %v1390_v46 = vpop.f32.mrf.mxu1 }
 0x282   :  { %v2027_v60 = vpop.f32.mrf.mxu3  ;;  %2861 = vmatpush.bf16.msra.mxu2 %v6218_v44 }
 0x283   :  { %v1391_v56 = vadd.f32 %v1390_v46, %v1222_v49  ;;  %v7961_v21 = vpack.c.bf16 %v2027_v60, %v2025_v17  ;;  %1260 = vmatmul.bf16.gmra.mxu0 %v5898_v7  ;;  %v1861_v33 = vpop.f32.mrf.mxu2  ;;  %v6694_v17 = vld [vmem:[%s10062_s7 + $0xb4] sm:$0xf0]  ;;  %v6660_v60 = vld [vmem:[%s10061_s0 + $0xa8] sm:$0xff] }
 0x284   :  { %1429 = vmatmul.bf16.gmra.mxu1 %v5902_v9  ;;  %v6282_v30 = vor.u32 %v6694_v17, %v6281_v58  ;;  %v5906_v17 = vor.u32 %v6622_v5, %v5905_v59 }
 0x285   :  { %10170 = vst [vmem:[#allocation19_spill] sm:$0xff] %v7961_v21  ;;  %v1484_v9 = vmax.f32 %v1391_v56, 0.0  ;;  %v6621_v56 = vld [vmem:[%s10058_s1 + $0x1f4] sm:$0xf] }
 0x286   :  { %3030 = vmatpush.bf16.msra.mxu3 %v6282_v30 }
 0x287   :  { %2069 = vmatmul.bf16.gmra.mxu3 %v6659_v51 }
 0x288   :  { %v1223_v1 = vpop.f32.mrf.mxu0 }
 0x289   :  { %v1224_v41 = vadd.f32 %v7819_v52, %v1223_v1  ;;  %v1392_v7 = vpop.f32.mrf.mxu1 }
 0x28a   :  { %v2030_v22 = vpop.f32.mrf.mxu3 }
 0x28b   :  { %v1393_v49 = vadd.f32 %v1392_v7, %v1224_v41  ;;  %v1863_v46 = vpop.f32.mrf.mxu2 }
 0x28c   :  { %v7976_v51 = vpack.c.bf16 %v1863_v46, %v1861_v33  ;;  %v5907_v33 = vld [vmem:[%s10058_s1 + $0x1f8] sm:$0xf0] }
 0x28d   :  { %v1485_v44 = vmax.f32 %v1393_v49, 0.0  ;;  %v5910_v30 = vor.u32 %v6621_v56, %v5907_v33  ;;  %v6661_v33 = vld [vmem:[%s10061_s0 + $0xb0] sm:$0xff] }
 0x28e   :  { %10171 = vst [vmem:[#allocation20_spill] sm:$0xff] %v7976_v51 }
 0x28f   :  { %v7993_v58 = vpack.c.bf16 %v1485_v44, %v1484_v9 }
 0x290   :  { %v1226_v1 = vpop.f32.mrf.mxu0  ;;  %1905 = vmatmul.bf16.gmra.mxu2 %v6660_v60 }
 0x291   :  { %10172 = vst [vmem:[#allocation21_spill] sm:$0xff] %v7993_v58  ;;  %v1227_v41 = vadd.f32 %v7819_v52, %v1226_v1  ;;  %v1395_v7 = vpop.f32.mrf.mxu1 }
 0x292   :  { %v2032_v46 = vpop.f32.mrf.mxu3 }
 0x293   :  { %v1396_v51 = vadd.f32 %v1395_v7, %v1227_v41  ;;  %v7996_v49 = vpack.c.bf16 %v2032_v46, %v2030_v22  ;;  %1265 = vmatmul.bf16.gmra.mxu0 %v5906_v17  ;;  %v1866_v21 = vpop.f32.mrf.mxu2 }
 0x294   :  { %1434 = vmatmul.bf16.gmra.mxu1 %v5910_v30 }
 0x295   :  { %10173 = vst [vmem:[#allocation22_spill] sm:$0xff] %v7996_v49  ;;  %v1486_v59 = vmax.f32 %v1396_v51, 0.0 }
 0x297   :  { %2074 = vmatmul.bf16.gmra.mxu3 %v6660_v60 }
 0x298   :  { %v1228_v47 = vpop.f32.mrf.mxu0 }
 0x299   :  { %v1229_v4 = vadd.f32 %v7819_v52, %v1228_v47  ;;  %v1397_v9 = vpop.f32.mrf.mxu1 }
 0x29a   :  { %v2035_v44 = vpop.f32.mrf.mxu3 }
 0x29b   :  { %v1398_v5 = vadd.f32 %v1397_v9, %v1229_v4  ;;  %v1868_v58 = vpop.f32.mrf.mxu2 }
 0x29c   :  { %v7999_v56 = vpack.c.bf16 %v1868_v58, %v1866_v21 }
 0x29d   :  { %v1487_v22 = vmax.f32 %v1398_v5, 0.0 }
 0x29f   :  { %v8004_v1 = vpack.c.bf16 %v1487_v22, %v1486_v59 }
 0x2a0   :  { %v1231_v17 = vpop.f32.mrf.mxu0  ;;  %1910 = vmatmul.bf16.gmra.mxu2 %v6661_v33 }
 0x2a1   :  { %v1232_v60 = vadd.f32 %v7819_v52, %v1231_v17  ;;  %v1400_v47 = vpop.f32.mrf.mxu1 }
 0x2a2   :  { %v2037_v30 = vpop.f32.mrf.mxu3 }
 0x2a3   :  { %v1401_v41 = vadd.f32 %v1400_v47, %v1232_v60  ;;  %v8007_v51 = vpack.c.bf16 %v2037_v30, %v2035_v44  ;;  %v1871_v4 = vpop.f32.mrf.mxu2  ;;  %6127 = vmatmul.msk.bf16.vlgmr.msra.gmra.mxu0 %vm2262_vm0, %v7420_v43  ;;  %v6662_v44 = vld [vmem:[%s10061_s0 + $0xb8] sm:$0xff] }
 0x2a4   :  { %6159 = vmatmul.msk.bf16.vlgmr.msra.gmra.mxu1 %vm2262_vm0, %v7420_v43 }
 0x2a5   :  { %10174 = vst [vmem:[#allocation23_spill] sm:$0xff] %v8007_v51  ;;  %v1488_v9 = vmax.f32 %v1401_v41, 0.0 }
 0x2a7   :  { %2079 = vmatmul.bf16.gmra.mxu3 %v6661_v33 }
 0x2a8   :  { %v1233_v21 = vpop.f32.mrf.mxu0 }
 0x2a9   :  { %v1234_v58 = vadd.f32 %v7819_v52, %v1233_v21  ;;  %v1402_v7 = vpop.f32.mrf.mxu1 }
 0x2aa   :  { %v2040_v46 = vpop.f32.mrf.mxu3 }
 0x2ab   :  { %v1403_v59 = vadd.f32 %v1402_v7, %v1234_v58  ;;  %v1873_v5 = vpop.f32.mrf.mxu2 }
 0x2ac   :  { %v8014_v22 = vpack.c.bf16 %v1873_v5, %v1871_v4 }
 0x2ad   :  { %v1489_v17 = vmax.f32 %v1403_v59, 0.0 }
 0x2af   :  { %v8019_v60 = vpack.c.bf16 %v1489_v17, %v1488_v9 }
 0x2b0   :  { %v1236_v47 = vpop.f32.mrf.mxu0  ;;  %1915 = vmatmul.bf16.gmra.mxu2 %v6662_v44 }
 0x2b1   :  { %10175 = vst [vmem:[#allocation24_spill] sm:$0xff] %v8019_v60  ;;  %v1237_v43 = vadd.f32 %v7819_v52, %v1236_v47  ;;  %v1405_v33 = vpop.f32.mrf.mxu1 }
 0x2b2   :  { %v2042_v30 = vpop.f32.mrf.mxu3 }
 0x2b3   :  { %v1406_v21 = vadd.f32 %v1405_v33, %v1237_v43  ;;  %v8022_v51 = vpack.c.bf16 %v2042_v30, %v2040_v46  ;;  %v1876_v41 = vpop.f32.mrf.mxu2  ;;  %6128 = vmatmul.msk.bf16.gmra.mxu0 %vm2262_vm0, %v7454_v63  ;;  %v6663_v46 = vld [vmem:[%s10061_s0 + $0xc0] sm:$0xff] }
 0x2b4   :  { %6160 = vmatmul.msk.bf16.gmra.mxu1 %vm2262_vm0, %v7454_v63 }
 0x2b5   :  { %10176 = vst [vmem:[#allocation25_spill] sm:$0xff] %v8022_v51  ;;  %v1490_v59 = vmax.f32 %v1406_v21, 0.0 }
 0x2b7   :  { %2084 = vmatmul.bf16.gmra.mxu3 %v6662_v44 }
 0x2b8   :  { %v1238_v4 = vpop.f32.mrf.mxu0 }
 0x2b9   :  { %v1239_v58 = vadd.f32 %v7819_v52, %v1238_v4  ;;  %v1407_v7 = vpop.f32.mrf.mxu1 }
 0x2ba   :  { %v2045_v9 = vpop.f32.mrf.mxu3 }
 0x2bb   :  { %v1408_v5 = vadd.f32 %v1407_v7, %v1239_v58  ;;  %v1878_v17 = vpop.f32.mrf.mxu2  ;;  %v6676_v58 = vld [vmem:[%s10062_s7 + $0x24] sm:$0xf0] }
 0x2bc   :  { %v8029_v47 = vpack.c.bf16 %v1878_v17, %v1876_v41  ;;  %v6209_v41 = vld [vmem:[%s10062_s7 + $0x20] sm:$0xf] }
 0x2bd   :  { %v1491_v43 = vmax.f32 %v1408_v5, 0.0  ;;  %v6210_v7 = vor.u32 %v6676_v58, %v6209_v41  ;;  %v6664_v41 = vld [vmem:[%s10061_s0 + $0xc8] sm:$0xff] }
 0x2be   :  { %10177 = vst [vmem:[#allocation26_spill] sm:$0xff] %v8029_v47 }
 0x2bf   :  { %v8034_v33 = vpack.c.bf16 %v1491_v43, %v1490_v59  ;;  %v6692_v59 = vld [vmem:[%s10062_s7 + $0xa4] sm:$0xf0]  ;;  %2862 = vmatpush.bf16.msra.mxu2 %v6210_v7 }
 0x2c0   :  { %v1241_v30 = vpop.f32.mrf.mxu0  ;;  %1920 = vmatmul.bf16.gmra.mxu2 %v6663_v46 }
 0x2c1   :  { %10178 = vst [vmem:[#allocation27_spill] sm:$0xff] %v8034_v33  ;;  %v1242_v63 = vadd.f32 %v7819_v52, %v1241_v30  ;;  %v1410_v44 = vpop.f32.mrf.mxu1 }
 0x2c2   :  { %v2047_v4 = vpop.f32.mrf.mxu3 }
 0x2c3   :  { %v1411_v51 = vadd.f32 %v1410_v44, %v1242_v63  ;;  %v8037_v60 = vpack.c.bf16 %v2047_v4, %v2045_v9  ;;  %v1881_v21 = vpop.f32.mrf.mxu2  ;;  %6129 = vmatmul.msk.bf16.gmra.mxu0 %vm2262_vm0, %v7474_v25  ;;  %v6273_v9 = vld [vmem:[%s10062_s7 + $0xa0] sm:$0xf] }
 0x2c4   :  { %6161 = vmatmul.msk.bf16.gmra.mxu1 %vm2262_vm0, %v7474_v25  ;;  %v6274_v25 = vor.u32 %v6692_v59, %v6273_v9 }
 0x2c5   :  { %10179 = vst [vmem:[#allocation28_spill] sm:$0xff] %v8037_v60  ;;  %v1492_v63 = vmax.f32 %v1411_v51, 0.0 }
 0x2c6   :  { %3031 = vmatpush.bf16.msra.mxu3 %v6274_v25 }
 0x2c7   :  { %2089 = vmatmul.bf16.gmra.mxu3 %v6663_v46 }
 0x2c8   :  { %v1243_v5 = vpop.f32.mrf.mxu0 }
 0x2c9   :  { %v1244_v17 = vadd.f32 %v7819_v52, %v1243_v5  ;;  %v1412_v43 = vpop.f32.mrf.mxu1 }
 0x2ca   :  { %v2050_v30 = vpop.f32.mrf.mxu3 }
 0x2cb   :  { %v1413_v44 = vadd.f32 %v1412_v43, %v1244_v17  ;;  %v1883_v4 = vpop.f32.mrf.mxu2 }
 0x2cc   :  { %v8056_v46 = vpack.c.bf16 %v1883_v4, %v1881_v21 }
 0x2cd   :  { %v1493_v58 = vmax.f32 %v1413_v44, 0.0 }
 0x2ce   :  { %10180 = vst [vmem:[#allocation29_spill] sm:$0xff] %v8056_v46 }
 0x2cf   :  { %v8061_v60 = vpack.c.bf16 %v1493_v58, %v1492_v63 }
 0x2d0   :  { %v1246_v33 = vpop.f32.mrf.mxu0  ;;  %1925 = vmatmul.bf16.gmra.mxu2 %v6664_v41 }
 0x2d1   :  { %10181 = vst [vmem:[#allocation30_spill] sm:$0xff] %v8061_v60  ;;  %v1247_v7 = vadd.f32 %v7819_v52, %v1246_v33  ;;  %v1415_v9 = vpop.f32.mrf.mxu1 }
 0x2d2   :  { %v2052_v59 = vpop.f32.mrf.mxu3 }
 0x2d3   :  { %v1416_v5 = vadd.f32 %v1415_v9, %v1247_v7  ;;  %v8064_v25 = vpack.c.bf16 %v2052_v59, %v2050_v30  ;;  %v1886_v51 = vpop.f32.mrf.mxu2  ;;  %6130 = vmatmul.msk.bf16.gmra.mxu0 %vm2262_vm0, %v7493_v34  ;;  %v6665_v30 = vld [vmem:[%s10061_s0 + $0xd0] sm:$0xff] }
 0x2d4   :  { %6162 = vmatmul.msk.bf16.gmra.mxu1 %vm2262_vm0, %v7493_v34 }
 0x2d5   :  { %10182 = vst [vmem:[#allocation31_spill] sm:$0xff] %v8064_v25  ;;  %v1494_v44 = vmax.f32 %v1416_v5, 0.0 }
 0x2d7   :  { %2094 = vmatmul.bf16.gmra.mxu3 %v6664_v41 }
 0x2d8   :  { %v1248_v21 = vpop.f32.mrf.mxu0 }
 0x2d9   :  { %v1249_v17 = vadd.f32 %v7819_v52, %v1248_v21  ;;  %v1417_v43 = vpop.f32.mrf.mxu1 }
 0x2da   :  { %v2055_v63 = vpop.f32.mrf.mxu3 }
 0x2db   :  { %v1418_v33 = vadd.f32 %v1417_v43, %v1249_v17  ;;  %v1888_v4 = vpop.f32.mrf.mxu2 }
 0x2dc   :  { %v8071_v58 = vpack.c.bf16 %v1888_v4, %v1886_v51 }
 0x2dd   :  { %v1495_v7 = vmax.f32 %v1418_v33, 0.0 }
 0x2df   :  { %v8076_v9 = vpack.c.bf16 %v1495_v7, %v1494_v44 }
 0x2e0   :  { %v1251_v59 = vpop.f32.mrf.mxu0  ;;  %1930 = vmatmul.bf16.gmra.mxu2 %v6665_v30 }
 0x2e1   :  { %10183 = vst [vmem:[#allocation32_spill] sm:$0xff] %v8076_v9  ;;  %v1252_v34 = vadd.f32 %v7819_v52, %v1251_v59  ;;  %v1420_v41 = vpop.f32.mrf.mxu1 }
 0x2e2   :  { %v2057_v21 = vpop.f32.mrf.mxu3 }
 0x2e3   :  { %v1421_v25 = vadd.f32 %v1420_v41, %v1252_v34  ;;  %v8079_v60 = vpack.c.bf16 %v2057_v21, %v2055_v63  ;;  %v1891_v5 = vpop.f32.mrf.mxu2  ;;  %6131 = vmatmul.msk.bf16.gmra.mxu0 %vm2262_vm0, %v7512_v20  ;;  %v6666_v63 = vld [vmem:[%s10061_s0 + $0xd8] sm:$0xff] }
 0x2e4   :  { %6163 = vmatmul.msk.bf16.gmra.mxu1 %vm2262_vm0, %v7512_v20 }
 0x2e5   :  { %10184 = vst [vmem:[#allocation33_spill] sm:$0xff] %v8079_v60  ;;  %v1496_v33 = vmax.f32 %v1421_v25, 0.0 }
 0x2e7   :  { %2099 = vmatmul.bf16.gmra.mxu3 %v6665_v30 }
 0x2e8   :  { %v1253_v51 = vpop.f32.mrf.mxu0 }
 0x2e9   :  { %v1254_v17 = vadd.f32 %v7819_v52, %v1253_v51  ;;  %v1422_v43 = vpop.f32.mrf.mxu1 }
 0x2ea   :  { %v2060_v44 = vpop.f32.mrf.mxu3 }
 0x2eb   :  { %v1423_v4 = vadd.f32 %v1422_v43, %v1254_v17  ;;  %v1893_v7 = vpop.f32.mrf.mxu2  ;;  %v6251_v17 = vld [vmem:[%s10062_s7 + $0x78] sm:$0xf0] }
 0x2ec   :  { %v8086_v59 = vpack.c.bf16 %v1893_v7, %v1891_v5  ;;  %v6685_v5 = vld [vmem:[%s10062_s7 + $0x74] sm:$0xf] }
 0x2ed   :  { %v1497_v34 = vmax.f32 %v1423_v4, 0.0 }
 0x2ee   :  { %10185 = vst [vmem:[#allocation34_spill] sm:$0xff] %v8086_v59 }
 0x2ef   :  { %v8091_v41 = vpack.c.bf16 %v1497_v34, %v1496_v33  ;;  %v6254_v33 = vor.u32 %v6685_v5, %v6251_v17  ;;  %v6701_v5 = vld [vmem:[%s10062_s7 + $0xf4] sm:$0xf]  ;;  %v6315_v17 = vld [vmem:[%s10062_s7 + $0xf8] sm:$0xf0] }
 0x2f0   :  { %v1256_v21 = vpop.f32.mrf.mxu0  ;;  %1935 = vmatmul.bf16.gmra.mxu2 %v6666_v63 }
 0x2f1   :  { %v1257_v20 = vadd.f32 %v7819_v52, %v1256_v21  ;;  %v1425_v30 = vpop.f32.mrf.mxu1  ;;  %3195 = vmatpush.bf16.msrb.mxu0 %v6254_v33 }
 0x2f2   :  { %v2062_v51 = vpop.f32.mrf.mxu3 }
 0x2f3   :  { %v1426_v60 = vadd.f32 %v1425_v30, %v1257_v20  ;;  %v8094_v9 = vpack.c.bf16 %v2062_v51, %v2060_v44  ;;  %v1896_v25 = vpop.f32.mrf.mxu2  ;;  %6132 = vmatmul.msk.bf16.gmra.mxu0 %vm2262_vm0, %v7531_v16 }
 0x2f4   :  { %6164 = vmatmul.msk.bf16.gmra.mxu1 %vm2262_vm0, %v7531_v16 }
 0x2f5   :  { %10186 = vst [vmem:[#allocation35_spill] sm:$0xff] %v8094_v9  ;;  %v1498_v34 = vmax.f32 %v1426_v60, 0.0 }
 0x2f7   :  { %2104 = vmatmul.bf16.gmra.mxu3 %v6666_v63  ;;  %v6667_v63 = vld [vmem:[%s10061_s0 + $0xe0] sm:$0xff] }
 0x2f8   :  { %v1258_v43 = vpop.f32.mrf.mxu0 }
 0x2f9   :  { %v1259_v44 = vadd.f32 %v7819_v52, %v1258_v43  ;;  %v1427_v4 = vpop.f32.mrf.mxu1  ;;  %v6318_v43 = vor.u32 %v6701_v5, %v6315_v17  ;;  %v6690_v17 = vld [vmem:[%s10062_s7 + $0x94] sm:$0xf0] }
 0x2fa   :  { %v2065_v7 = vpop.f32.mrf.mxu3 }
 0x2fb   :  { %v1428_v21 = vadd.f32 %v1427_v4, %v1259_v44  ;;  %v1898_v20 = vpop.f32.mrf.mxu2  ;;  %3364 = vmatpush.bf16.msrb.mxu1 %v6318_v43 }
 0x2fc   :  { %v8107_v16 = vpack.c.bf16 %v1898_v20, %v1896_v25  ;;  %v6201_v20 = vld [vmem:[%s10062_s7 + $0x10] sm:$0xf] }
 0x2fd   :  { %v1499_v30 = vmax.f32 %v1428_v21, 0.0 }
 0x2fe   :  { %10187 = vst [vmem:[#allocation36_spill] sm:$0xff] %v8107_v16 }
 0x2ff   :  { %v8112_v51 = vpack.c.bf16 %v1499_v30, %v1498_v34  ;;  %v6674_v30 = vld [vmem:[%s10062_s7 + $0x14] sm:$0xf0] }
 0x300   :  { %v1261_v60 = vpop.f32.mrf.mxu0  ;;  %1940 = vmatmul.bf16.gmra.mxu2 %v6667_v63  ;;  %v6202_v5 = vor.u32 %v6674_v30, %v6201_v20  ;;  %v6668_v30 = vld [vmem:[%s10061_s0 + $0xe8] sm:$0xff] }
 0x301   :  { %10188 = vst [vmem:[#allocation37_spill] sm:$0xff] %v8112_v51  ;;  %v1262_v25 = vadd.f32 %v7819_v52, %v1261_v60  ;;  %v1430_v33 = vpop.f32.mrf.mxu1 }
 0x302   :  { %v2067_v44 = vpop.f32.mrf.mxu3  ;;  %2863 = vmatpush.bf16.msra.mxu2 %v6202_v5 }
 0x303   :  { %v1431_v4 = vadd.f32 %v1430_v33, %v1262_v25  ;;  %v8121_v21 = vpack.c.bf16 %v2067_v44, %v2065_v7  ;;  %v1901_v34 = vpop.f32.mrf.mxu2  ;;  %6133 = vmatmul.msk.bf16.gmra.mxu0 %vm2262_vm0, %v7562_v50  ;;  %v6265_v7 = vld [vmem:[%s10062_s7 + $0x90] sm:$0xf] }
 0x304   :  { %6165 = vmatmul.msk.bf16.gmra.mxu1 %vm2262_vm0, %v7562_v50  ;;  %v6266_v60 = vor.u32 %v6690_v17, %v6265_v7 }
 0x305   :  { %10189 = vst [vmem:[#allocation38_spill] sm:$0xff] %v8121_v21  ;;  %v1500_v44 = vmax.f32 %v1431_v4, 0.0 }
 0x306   :  { %3032 = vmatpush.bf16.msra.mxu3 %v6266_v60 }
 0x307   :  { %2109 = vmatmul.bf16.gmra.mxu3 %v6667_v63 }
 0x308   :  { %v1263_v50 = vpop.f32.mrf.mxu0 }
 0x309   :  { %v1264_v43 = vadd.f32 %v7819_v52, %v1263_v50  ;;  %v1432_v25 = vpop.f32.mrf.mxu1 }
 0x30a   :  { %v2070_v33 = vpop.f32.mrf.mxu3 }
 0x30b   :  { %v1433_v21 = vadd.f32 %v1432_v25, %v1264_v43  ;;  %v1903_v20 = vpop.f32.mrf.mxu2 }
 0x30c   :  { %v8140_v63 = vpack.c.bf16 %v1903_v20, %v1901_v34 }
 0x30d   :  { %v1501_v5 = vmax.f32 %v1433_v21, 0.0 }
 0x30e   :  { %10190 = vst [vmem:[#allocation39_spill] sm:$0xff] %v8140_v63 }
 0x30f   :  { %v8145_v51 = vpack.c.bf16 %v1501_v5, %v1500_v44 }
 0x310   :  { %v1266_v16 = vpop.f32.mrf.mxu0  ;;  %1945 = vmatmul.bf16.gmra.mxu2 %v6668_v30 }
 0x311   :  { %v1267_v7 = vadd.f32 %v7819_v52, %v1266_v16  ;;  %v1435_v17 = vpop.f32.mrf.mxu1 }
 0x312   :  { %v2072_v50 = vpop.f32.mrf.mxu3 }
 0x313   :  { %v1436_v9 = vadd.f32 %v1435_v17, %v1267_v7  ;;  %v8148_v60 = vpack.c.bf16 %v2072_v50, %v2070_v33  ;;  %v1906_v4 = vpop.f32.mrf.mxu2  ;;  %6134 = vmatmul.msk.bf16.gmra.mxu0 %vm2262_vm0, %v7581_v10  ;;  %v6669_v33 = vld [vmem:[%s10061_s0 + $0xf0] sm:$0xff]  ;;  %v6193_v7 = vld [vmem:[%s10062_s7] sm:$0xf] }
 0x314   :  { %6166 = vmatmul.msk.bf16.gmra.mxu1 %vm2262_vm0, %v7581_v10  ;;  %v6672_v10 = vld [vmem:[%s10062_s7 + $0x4] sm:$0xf0] }
 0x315   :  { %10191 = vst [vmem:[#allocation40_spill] sm:$0xff] %v8148_v60  ;;  %v1502_v44 = vmax.f32 %v1436_v9, 0.0 }
 0x317   :  { %2114 = vmatmul.bf16.gmra.mxu3 %v6668_v30  ;;  %v6194_v30 = vor.u32 %v6672_v10, %v6193_v7 }
 0x318   :  { %v1268_v21 = vpop.f32.mrf.mxu0 }
 0x319   :  { %v1269_v34 = vadd.f32 %v7819_v52, %v1268_v21  ;;  %v1437_v43 = vpop.f32.mrf.mxu1  ;;  %2864 = vmatpush.bf16.msra.mxu2 %v6194_v30  ;;  %v6257_v21 = vld [vmem:[%s10062_s7 + $0x80] sm:$0xf] }
 0x31a   :  { %v2075_v25 = vpop.f32.mrf.mxu3 }
 0x31b   :  { %v1438_v16 = vadd.f32 %v1437_v43, %v1269_v34  ;;  %v1908_v20 = vpop.f32.mrf.mxu2  ;;  %v6688_v34 = vld [vmem:[%s10062_s7 + $0x84] sm:$0xf0] }
 0x31c   :  { %v8155_v5 = vpack.c.bf16 %v1908_v20, %v1906_v4 }
 0x31d   :  { %v1503_v52 = vmax.f32 %v1438_v16, 0.0 }
 0x31f   :  { %v8166_v17 = vpack.c.bf16 %v1503_v52, %v1502_v44  ;;  %v6258_v44 = vor.u32 %v6688_v34, %v6257_v21 }
 0x320   :  { %1950 = vmatmul.bf16.gmra.mxu2 %v6669_v33  ;;  %v8168_v9 = vpop.f32.mrf.mxu0 }
 0x321   :  { %v8170_v50 = vpop.f32.mrf.mxu1  ;;  %3033 = vmatpush.bf16.msra.mxu3 %v6258_v44  ;;  %v6243_v44 = vld [vmem:[%s10062_s7 + $0x68] sm:$0xf0] }
 0x322   :  { %10192 = vst [vmem:[#allocation41_spill] sm:$0xff] %v8170_v50  ;;  %v2077_v4 = vpop.f32.mrf.mxu3 }
 0x323   :  { %v8178_v43 = vpack.c.bf16 %v2077_v4, %v2075_v25  ;;  %v1911_v16 = vpop.f32.mrf.mxu2  ;;  %6135 = vmatmul.msk.bf16.gmra.mxu0 %vm2262_vm0, %v7612_v31  ;;  %v6670_v25 = vld [vmem:[%s10061_s0 + $0xf8] sm:$0xff] }
 0x324   :  { %6167 = vmatmul.msk.bf16.gmra.mxu1 %vm2262_vm0, %v7612_v31 }
 0x327   :  { %2119 = vmatmul.bf16.gmra.mxu3 %v6669_v33 }
 0x328   :  { %v8184_v20 = vpop.f32.mrf.mxu0 }
 0x329   :  { %v8186_v7 = vpop.f32.mrf.mxu1 }
 0x32a   :  { %10193 = vst [vmem:[#allocation42_spill] sm:$0xff] %v8186_v7  ;;  %v2080_v10 = vpop.f32.mrf.mxu3 }
 0x32b   :  { %v1913_v52 = vpop.f32.mrf.mxu2 }
 0x32c   :  { %v8188_v30 = vpack.c.bf16 %v1913_v52, %v1911_v16  ;;  %v6683_v16 = vld [vmem:[%s10062_s7 + $0x64] sm:$0xf] }
 0x32e   :  { %10194 = vst [vmem:[#allocation43_spill] sm:$0xff] %v8188_v30 }
 0x330   :  { %1955 = vmatmul.bf16.gmra.mxu2 %v6670_v25  ;;  %v8193_v4 = vpop.f32.mrf.mxu0 }
 0x331   :  { %v8195_v21 = vpop.f32.mrf.mxu1 }
 0x332   :  { %10195 = vst [vmem:[#allocation44_spill] sm:$0xff] %v8195_v21  ;;  %v2082_v31 = vpop.f32.mrf.mxu3 }
 0x333   :  { %v8197_v34 = vpack.c.bf16 %v2082_v31, %v2080_v10  ;;  %v1916_v33 = vpop.f32.mrf.mxu2  ;;  %6136 = vmatmul.msk.bf16.gmra.mxu0 %vm2262_vm0, %v7631_v36  ;;  %v6246_v10 = vor.u32 %v6683_v16, %v6243_v44 }
 0x334   :  { %6168 = vmatmul.msk.bf16.gmra.mxu1 %vm2262_vm0, %v7631_v36  ;;  %v6699_v36 = vld [vmem:[%s10062_s7 + $0xe4] sm:$0xf] }
 0x335   :  { %10196 = vst [vmem:[#allocation45_spill] sm:$0xff] %v8197_v34  ;;  %3196 = vmatpush.bf16.msrb.mxu0 %v6246_v10 }
 0x337   :  { %2124 = vmatmul.bf16.gmra.mxu3 %v6670_v25  ;;  %v6307_v25 = vld [vmem:[%s10062_s7 + $0xe8] sm:$0xf0] }
 0x338   :  { %v8209_v52 = vpop.f32.mrf.mxu0  ;;  %v6310_v7 = vor.u32 %v6699_v36, %v6307_v25 }
 0x339   :  { %v8211_v31 = vpop.f32.mrf.mxu1 }
 0x33a   :  { %10197 = vst [vmem:[#allocation46_spill] sm:$0xff] %v8211_v31  ;;  %v2085_v21 = vpop.f32.mrf.mxu3  ;;  %3365 = vmatpush.bf16.msrb.mxu1 %v6310_v7 }
 0x33b   :  { %v1918_v50 = vpop.f32.mrf.mxu2 }
 0x33c   :  { %v8219_v34 = vpack.c.bf16 %v1918_v50, %v1916_v33 }
 0x33e   :  { %10198 = vst [vmem:[#allocation47_spill] sm:$0xff] %v8219_v34 }
 0x340   :  { %v8221_v30 = vpop.f32.mrf.mxu0  ;;  %2865 = vmatmul.bf16.vlgmr.msra.gmra.mxu2 %v7647_v61 }
 0x341   :  { %v8224_v16 = vpop.f32.mrf.mxu1 }
 0x342   :  { %10199 = vst [vmem:[#allocation48_spill] sm:$0xff] %v8224_v16  ;;  %v2087_v44 = vpop.f32.mrf.mxu3 }
 0x343   :  { %v8226_v10 = vpack.c.bf16 %v2087_v44, %v2085_v21  ;;  %v1921_v31 = vpop.f32.mrf.mxu2  ;;  %6137 = vmatmul.msk.bf16.gmra.mxu0 %vm2262_vm0, %v7664_v13 }
 0x344   :  { %6169 = vmatmul.msk.bf16.gmra.mxu1 %vm2262_vm0, %v7664_v13 }
 0x345   :  { %10200 = vst [vmem:[#allocation49_spill] sm:$0xff] %v8226_v10 }
 0x347   :  { %3034 = vmatmul.bf16.vlgmr.msra.gmra.mxu3 %v7667_v6 }
 0x348   :  { %v8233_v50 = vpop.f32.mrf.mxu0 }
 0x349   :  { %v8235_v7 = vpop.f32.mrf.mxu1 }
 0x34a   :  { %10201 = vst [vmem:[#allocation50_spill] sm:$0xff] %v8235_v7  ;;  %v2090_v33 = vpop.f32.mrf.mxu3 }
 0x34b   :  { %v1923_v36 = vpop.f32.mrf.mxu2 }
 0x34c   :  { %v8237_v25 = vpack.c.bf16 %v1923_v36, %v1921_v31 }
 0x34e   :  { %10202 = vst [vmem:[#allocation51_spill] sm:$0xff] %v8237_v25 }
 0x350   :  { %v8239_v16 = vpop.f32.mrf.mxu0  ;;  %2870 = vmatmul.bf16.gmra.mxu2 %v7670_v40 }
 0x351   :  { %v8242_v21 = vpop.f32.mrf.mxu1 }
 0x352   :  { %10203 = vst [vmem:[#allocation52_spill] sm:$0xff] %v8242_v21  ;;  %v2092_v44 = vpop.f32.mrf.mxu3 }
 0x353   :  { %v8244_v10 = vpack.c.bf16 %v2092_v44, %v2090_v33  ;;  %v1926_v13 = vpop.f32.mrf.mxu2  ;;  %6138 = vmatmul.msk.bf16.gmra.mxu0 %vm2262_vm0, %v7687_v8 }
 0x354   :  { %6170 = vmatmul.msk.bf16.gmra.mxu1 %vm2262_vm0, %v7687_v8 }
 0x355   :  { %10204 = vst [vmem:[#allocation53_spill] sm:$0xff] %v8244_v10 }
 0x357   :  { %3039 = vmatmul.bf16.gmra.mxu3 %v7690_v45 }
 0x358   :  { %v8251_v31 = vpop.f32.mrf.mxu0 }
 0x359   :  { %v8253_v36 = vpop.f32.mrf.mxu1 }
 0x35a   :  { %10205 = vst [vmem:[#allocation54_spill] sm:$0xff] %v8253_v36  ;;  %v2095_v7 = vpop.f32.mrf.mxu3 }
 0x35b   :  { %v1928_v25 = vpop.f32.mrf.mxu2 }
 0x35c   :  { %v8255_v40 = vpack.c.bf16 %v1928_v25, %v1926_v13 }
 0x35e   :  { %10206 = vst [vmem:[#allocation55_spill] sm:$0xff] %v8255_v40 }
 0x360   :  { %v8257_v21 = vpop.f32.mrf.mxu0  ;;  %2875 = vmatmul.bf16.gmra.mxu2 %v7693_v23 }
 0x361   :  { %v8260_v33 = vpop.f32.mrf.mxu1 }
 0x362   :  { %10207 = vst [vmem:[#allocation56_spill] sm:$0xff] %v8260_v33  ;;  %v2097_v44 = vpop.f32.mrf.mxu3 }
 0x363   :  { %v8262_v10 = vpack.c.bf16 %v2097_v44, %v2095_v7  ;;  %v1931_v8 = vpop.f32.mrf.mxu2  ;;  %6139 = vmatmul.msk.bf16.gmra.mxu0 %vm2262_vm0, %v7710_v11 }
 0x364   :  { %6171 = vmatmul.msk.bf16.gmra.mxu1 %vm2262_vm0, %v7710_v11 }
 0x365   :  { %10208 = vst [vmem:[#allocation57_spill] sm:$0xff] %v8262_v10 }
 0x367   :  { %3044 = vmatmul.bf16.gmra.mxu3 %v7713_v38 }
 0x368   :  { %v8269_v25 = vpop.f32.mrf.mxu0 }
 0x369   :  { %v8271_v13 = vpop.f32.mrf.mxu1 }
 0x36a   :  { %10209 = vst [vmem:[#allocation58_spill] sm:$0xff] %v8271_v13  ;;  %v2100_v36 = vpop.f32.mrf.mxu3 }
 0x36b   :  { %v1933_v40 = vpop.f32.mrf.mxu2 }
 0x36c   :  { %v8273_v23 = vpack.c.bf16 %v1933_v40, %v1931_v8  ;;  %v6681_v40 = vld [vmem:[%s10062_s7 + $0x54] sm:$0xf]  ;;  %v6235_v8 = vld [vmem:[%s10062_s7 + $0x58] sm:$0xf0] }
 0x36e   :  { %10210 = vst [vmem:[#allocation59_spill] sm:$0xff] %v8273_v23 }
 0x370   :  { %v8275_v33 = vpop.f32.mrf.mxu0  ;;  %2880 = vmatmul.bf16.gmra.mxu2 %v7716_v35 }
 0x371   :  { %v8278_v7 = vpop.f32.mrf.mxu1 }
 0x372   :  { %10211 = vst [vmem:[#allocation60_spill] sm:$0xff] %v8278_v7  ;;  %v2102_v44 = vpop.f32.mrf.mxu3 }
 0x373   :  { %v8280_v10 = vpack.c.bf16 %v2102_v44, %v2100_v36  ;;  %v1936_v11 = vpop.f32.mrf.mxu2  ;;  %6140 = vmatmul.msk.bf16.gmra.mxu0 %vm2262_vm0, %v7733_v24  ;;  %v6238_v36 = vor.u32 %v6681_v40, %v6235_v8 }
 0x374   :  { %6172 = vmatmul.msk.bf16.gmra.mxu1 %vm2262_vm0, %v7733_v24  ;;  %v6697_v24 = vld [vmem:[%s10062_s7 + $0xd4] sm:$0xf] }
 0x375   :  { %10212 = vst [vmem:[#allocation61_spill] sm:$0xff] %v8280_v10  ;;  %3197 = vmatpush.bf16.msrb.mxu0 %v6238_v36  ;;  %v6299_v10 = vld [vmem:[%s10062_s7 + $0xd8] sm:$0xf0] }
 0x377   :  { %3049 = vmatmul.bf16.gmra.mxu3 %v7736_v57  ;;  %v6302_v57 = vor.u32 %v6697_v24, %v6299_v10 }
 0x378   :  { %v8293_v7 = vpop.f32.mrf.mxu0 }
 0x379   :  { %v8295_v44 = vpop.f32.mrf.mxu1  ;;  %3366 = vmatpush.bf16.msrb.mxu1 %v6302_v57  ;;  %v6724_v57 = vld [vmem:[%s10063_s10 + $0x74] sm:$0xf0] }
 0x37a   :  { %10213 = vst [vmem:[#allocation62_spill] sm:$0xff] %v8295_v44  ;;  %v2105_v13 = vpop.f32.mrf.mxu3 }
 0x37b   :  { %v1938_v23 = vpop.f32.mrf.mxu2 }
 0x37c   :  { %v8303_v35 = vpack.c.bf16 %v1938_v23, %v1936_v11  ;;  %v6377_v23 = vld [vmem:[%s10063_s10 + $0x70] sm:$0xf] }
 0x37d   :  { %v6378_v10 = vor.u32 %v6724_v57, %v6377_v23 }
 0x37e   :  { %10214 = vst [vmem:[#allocation63_spill] sm:$0xff] %v8303_v35 }
 0x37f   :  { %4057 = vmatpush.bf16.msrb.mxu2 %v6378_v10 }
 0x380   :  { %v8305_v38 = vpop.f32.mrf.mxu0  ;;  %2885 = vmatmul.bf16.gmra.mxu2 %v7751_v29 }
 0x381   :  { %v8308_v40 = vpop.f32.mrf.mxu1 }
 0x382   :  { %10215 = vst [vmem:[#allocation64_spill] sm:$0xff] %v8308_v40  ;;  %v2107_v8 = vpop.f32.mrf.mxu3 }
 0x383   :  { %v8310_v36 = vpack.c.bf16 %v2107_v8, %v2105_v13  ;;  %v1941_v44 = vpop.f32.mrf.mxu2  ;;  %6141 = vmatmul.msk.bf16.gmra.mxu0 %vm2262_vm0, %v7768_v26  ;;  %v6441_v13 = vld [vmem:[%s10063_s10 + $0xf0] sm:$0xf] }
 0x384   :  { %6173 = vmatmul.msk.bf16.gmra.mxu1 %vm2262_vm0, %v7768_v26  ;;  %v6740_v26 = vld [vmem:[%s10063_s10 + $0xf4] sm:$0xf0] }
 0x385   :  { %10216 = vst [vmem:[#allocation65_spill] sm:$0xff] %v8310_v36  ;;  %v6442_v24 = vor.u32 %v6740_v26, %v6441_v13 }
 0x387   :  { %3054 = vmatmul.bf16.gmra.mxu3 %v7771_v14 }
 0x388   :  { %v8329_v11 = vpop.f32.mrf.mxu0  ;;  %4226 = vmatpush.bf16.msrb.mxu3 %v6442_v24 }
 0x389   :  { %v8331_v8 = vpop.f32.mrf.mxu1 }
 0x38a   :  { %10217 = vst [vmem:[#allocation66_spill] sm:$0xff] %v8331_v8  ;;  %v2110_v40 = vpop.f32.mrf.mxu3 }
 0x38b   :  { %v1943_v36 = vpop.f32.mrf.mxu2 }
 0x38c   :  { %v8333_v23 = vpack.c.bf16 %v1943_v36, %v1941_v44 }
 0x38e   :  { %10218 = vst [vmem:[#allocation67_spill] sm:$0xff] %v8333_v23 }
 0x390   :  { %v8335_v57 = vpop.f32.mrf.mxu0  ;;  %2890 = vmatmul.bf16.gmra.mxu2 %v7774_v54 }
 0x391   :  { %v8338_v10 = vpop.f32.mrf.mxu1 }
 0x392   :  { %10219 = vst [vmem:[#allocation68_spill] sm:$0xff] %v8338_v10  ;;  %v2112_v35 = vpop.f32.mrf.mxu3 }
 0x393   :  { %v8340_v14 = vpack.c.bf16 %v2112_v35, %v2110_v40  ;;  %v1946_v29 = vpop.f32.mrf.mxu2  ;;  %6142 = vmatmul.msk.bf16.gmra.mxu0 %vm2262_vm0, %v7791_v62 }
 0x394   :  { %6174 = vmatmul.msk.bf16.gmra.mxu1 %vm2262_vm0, %v7791_v62 }
 0x395   :  { %10220 = vst [vmem:[#allocation69_spill] sm:$0xff] %v8340_v14 }
 0x397   :  { %3059 = vmatmul.bf16.gmra.mxu3 %v7794_v3 }
 0x398   :  { %v8347_v44 = vpop.f32.mrf.mxu0 }
 0x399   :  { %v8349_v36 = vpop.f32.mrf.mxu1 }
 0x39a   :  { %10221 = vst [vmem:[#allocation70_spill] sm:$0xff] %v8349_v36  ;;  %v2115_v13 = vpop.f32.mrf.mxu3 }
 0x39b   :  { %v1948_v26 = vpop.f32.mrf.mxu2 }
 0x39c   :  { %v8351_v24 = vpack.c.bf16 %v1948_v26, %v1946_v29 }
 0x39e   :  { %10222 = vst [vmem:[#allocation71_spill] sm:$0xff] %v8351_v24 }
 0x3a0   :  { %v8353_v10 = vpop.f32.mrf.mxu0  ;;  %2895 = vmatmul.bf16.gmra.mxu2 %v7797_v28 }
 0x3a1   :  { %v8356_v35 = vpop.f32.mrf.mxu1 }
 0x3a2   :  { %10223 = vst [vmem:[#allocation72_spill] sm:$0xff] %v8356_v35  ;;  %v2117_v40 = vpop.f32.mrf.mxu3 }
 0x3a3   :  { %v8358_v8 = vpack.c.bf16 %v2117_v40, %v2115_v13  ;;  %v1951_v62 = vpop.f32.mrf.mxu2  ;;  %6143 = vmatmul.msk.bf16.gmra.mxu0 %vm2262_vm0, %v7814_v42 }
 0x3a4   :  { %6175 = vmatmul.msk.bf16.gmra.mxu1 %vm2262_vm0, %v7814_v42 }
 0x3a5   :  { %10224 = vst [vmem:[#allocation73_spill] sm:$0xff] %v8358_v8 }
 0x3a7   :  { %3064 = vmatmul.bf16.gmra.mxu3 %v7822_v55 }
 0x3a8   :  { %v8365_v29 = vpop.f32.mrf.mxu0 }
 0x3a9   :  { %v8367_v26 = vpop.f32.mrf.mxu1 }
 0x3aa   :  { %10225 = vst [vmem:[#allocation74_spill] sm:$0xff] %v8367_v26  ;;  %v2120_v36 = vpop.f32.mrf.mxu3 }
 0x3ab   :  { %v1953_v24 = vpop.f32.mrf.mxu2 }
 0x3ac   :  { %v8369_v14 = vpack.c.bf16 %v1953_v24, %v1951_v62 }
 0x3ae   :  { %10226 = vst [vmem:[#allocation75_spill] sm:$0xff] %v8369_v14 }
 0x3b0   :  { %v8371_v35 = vpop.f32.mrf.mxu0  ;;  %2900 = vmatmul.bf16.gmra.mxu2 %v7825_v39 }
 0x3b1   :  { %v8374_v13 = vpop.f32.mrf.mxu1 }
 0x3b2   :  { %10227 = vst [vmem:[#allocation76_spill] sm:$0xff] %v8374_v13  ;;  %v2122_v40 = vpop.f32.mrf.mxu3  ;;  %v6679_v13 = vld [vmem:[%s10062_s7 + $0x44] sm:$0xf] }
 0x3b3   :  { %v8376_v8 = vpack.c.bf16 %v2122_v40, %v2120_v36  ;;  %v1956_v42 = vpop.f32.mrf.mxu2  ;;  %6144 = vmatmul.msk.bf16.gmra.mxu0 %vm2262_vm0, %v7842_v32  ;;  %v6227_v36 = vld [vmem:[%s10062_s7 + $0x48] sm:$0xf0] }
 0x3b4   :  { %6176 = vmatmul.msk.bf16.gmra.mxu1 %vm2262_vm0, %v7842_v32  ;;  %v6230_v26 = vor.u32 %v6679_v13, %v6227_v36  ;;  %v6695_v32 = vld [vmem:[%s10062_s7 + $0xc4] sm:$0xf] }
 0x3b5   :  { %10228 = vst [vmem:[#allocation77_spill] sm:$0xff] %v8376_v8 }
 0x3b6   :  { %3198 = vmatpush.bf16.msrb.mxu0 %v6230_v26 }
 0x3b7   :  { %3069 = vmatmul.bf16.gmra.mxu3 %v7845_v48 }
 0x3b8   :  { %v8383_v24 = vpop.f32.mrf.mxu0 }
 0x3b9   :  { %v8385_v62 = vpop.f32.mrf.mxu1 }
 0x3ba   :  { %10229 = vst [vmem:[#allocation78_spill] sm:$0xff] %v8385_v62  ;;  %v2125_v40 = vpop.f32.mrf.mxu3  ;;  %v6291_v62 = vld [vmem:[%s10062_s7 + $0xc8] sm:$0xf0] }
 0x3bb   :  { %v1958_v8 = vpop.f32.mrf.mxu2  ;;  %v6294_v39 = vor.u32 %v6695_v32, %v6291_v62  ;;  %v6722_v62 = vld [vmem:[%s10063_s10 + $0x64] sm:$0xf0] }
 0x3bc   :  { %v8393_v14 = vpack.c.bf16 %v1958_v8, %v1956_v42  ;;  %v6369_v42 = vld [vmem:[%s10063_s10 + $0x60] sm:$0xf] }
 0x3bd   :  { %3367 = vmatpush.bf16.msrb.mxu1 %v6294_v39  ;;  %v6433_v39 = vld [vmem:[%s10063_s10 + $0xe0] sm:$0xf] }
 0x3be   :  { %10230 = vst [vmem:[#allocation79_spill] sm:$0xff] %v8393_v14 }
 0x3c0   :  { %v8401_v48 = vpop.f32.mrf.mxu0  ;;  %2905 = vmatmul.bf16.gmra.mxu2 %v7860_v0  ;;  %v3533_v0 = vld [vmem:[%s10064_s9] sm:$0x3] }
 0x3c1   :  { %v8404_v55 = vpop.f32.mrf.mxu1  ;;  %v8433_v28 = vperm.slane %v3533_v0, 0 }
 0x3c2   :  { %10231 = vst [vmem:[#allocation80_spill] sm:$0xff] %v8404_v55  ;;  %v2127_v13 = vpop.f32.mrf.mxu3 }
 0x3c3   :  { %v8406_v8 = vpack.c.bf16 %v2127_v13, %v2125_v40  ;;  %6145 = vmatmul.msk.bf16.gmra.mxu0 %vm2262_vm0, %v7877_v19  ;;  %v2866_v26 = vpop.f32.mrf.mxu2  ;;  %v6370_v40 = vor.u32 %v6722_v62, %v6369_v42 }
 0x3c4   :  { %6177 = vmatmul.msk.bf16.gmra.mxu1 %vm2262_vm0, %v7877_v19  ;;  %v6738_v19 = vld [vmem:[%s10063_s10 + $0xe4] sm:$0xf0]  ;;  %v2867_v32 = vadd.f32 %v2866_v26, %v8168_v9 }
 0x3c5   :  { %10232 = vst [vmem:[#allocation81_spill] sm:$0xff] %v8406_v8  ;;  %v6434_v55 = vor.u32 %v6738_v19, %v6433_v39  ;;  %4058 = vmatpush.bf16.msrb.mxu2 %v6370_v40 }
 0x3c7   :  { %3074 = vmatmul.bf16.gmra.mxu3 %v7892_v53 }
 0x3c8   :  { %v8422_v36 = vpop.f32.mrf.mxu0  ;;  %4227 = vmatpush.bf16.msrb.mxu3 %v6434_v55 }
 0x3c9   :  { %v8428_v13 = vpop.f32.mrf.mxu1 }
 0x3ca   :  { %10233 = vst [vmem:[#allocation82_spill] sm:$0xff] %v8428_v13  ;;  %v3035_v8 = vpop.f32.mrf.mxu3 }
 0x3cb   :  { %v3036_v14 = vadd.f32 %v3035_v8, %v2867_v32  ;;  %v2868_v53 = vpop.f32.mrf.mxu2 }
 0x3cc   :  { %v2869_v9 = vadd.f32 %v2868_v53, %v8184_v20 }
 0x3cd   :  { %v3539_v39 = vadd.f32 %v8433_v28, %v3036_v14 }
 0x3cf   :  { %v3667_v40 = vmax.f32 %v3539_v39, 0.0 }
 0x3d0   :  { %v8435_v42 = vpop.f32.mrf.mxu0  ;;  %2910 = vmatmul.bf16.gmra.mxu2 %v7895_v12 }
 0x3d1   :  { %v8439_v26 = vpop.f32.mrf.mxu1 }
 0x3d2   :  { %10234 = vst [vmem:[#allocation83_spill] sm:$0xff] %v8439_v26  ;;  %v3037_v62 = vpop.f32.mrf.mxu3 }
 0x3d3   :  { %v3038_v8 = vadd.f32 %v3037_v62, %v2869_v9  ;;  %6146 = vmatmul.msk.bf16.gmra.mxu0 %vm2262_vm0, %v7912_v27  ;;  %v2871_v55 = vpop.f32.mrf.mxu2 }
 0x3d4   :  { %6178 = vmatmul.msk.bf16.gmra.mxu1 %vm2262_vm0, %v7912_v27  ;;  %v2872_v14 = vadd.f32 %v2871_v55, %v8193_v4 }
 0x3d5   :  { %v3541_v0 = vadd.f32 %v8433_v28, %v3038_v8 }
 0x3d7   :  { %v3669_v19 = vmax.f32 %v3541_v0, 0.0  ;;  %3079 = vmatmul.bf16.gmra.mxu3 %v7915_v2 }
 0x3d8   :  { %v8448_v53 = vpop.f32.mrf.mxu0 }
 0x3d9   :  { %v8450_v20 = vpack.c.bf16 %v3669_v19, %v3667_v40  ;;  %v8453_v32 = vpop.f32.mrf.mxu1 }
 0x3da   :  { %10236 = vst [vmem:[#allocation85_spill] sm:$0xff] %v8453_v32  ;;  %v3040_v9 = vpop.f32.mrf.mxu3 }
 0x3db   :  { %10235 = vst [vmem:[#allocation84_spill] sm:$0xff] %v8450_v20  ;;  %v3041_v62 = vadd.f32 %v3040_v9, %v2872_v14  ;;  %v2873_v26 = vpop.f32.mrf.mxu2 }
 0x3dc   :  { %v2874_v27 = vadd.f32 %v2873_v26, %v8209_v52 }
 0x3dd   :  { %v3543_v0 = vadd.f32 %v8433_v28, %v3041_v62 }
 0x3df   :  { %v3671_v19 = vmax.f32 %v3543_v0, 0.0 }
 0x3e0   :  { %v8455_v13 = vpop.f32.mrf.mxu0  ;;  %2915 = vmatmul.bf16.gmra.mxu2 %v7918_v37 }
 0x3e1   :  { %v8459_v39 = vpop.f32.mrf.mxu1 }
 0x3e2   :  { %10237 = vst [vmem:[#allocation86_spill] sm:$0xff] %v8459_v39  ;;  %v3042_v8 = vpop.f32.mrf.mxu3 }
 0x3e3   :  { %v3043_v40 = vadd.f32 %v3042_v8, %v2874_v27  ;;  %6147 = vmatmul.msk.bf16.gmra.mxu0 %vm2262_vm0, %v7935_v15  ;;  %v2876_v4 = vpop.f32.mrf.mxu2 }
 0x3e4   :  { %6179 = vmatmul.msk.bf16.gmra.mxu1 %vm2262_vm0, %v7935_v15  ;;  %v2877_v26 = vadd.f32 %v2876_v4, %v8221_v30  ;;  %v10240_v15 = vld [vmem:[#allocation17_spill] sm:$0xff]  ;;  %v10242_v30 = vld [vmem:[#allocation18_spill] sm:$0xff] }
 0x3e5   :  { %v3545_v55 = vadd.f32 %v8433_v28, %v3043_v40 }
 0x3e7   :  { %v3673_v14 = vmax.f32 %v3545_v55, 0.0  ;;  %3084 = vmatmul.bf16.gmra.mxu3 %v7938_v18 }
 0x3e8   :  { %v8468_v52 = vpop.f32.mrf.mxu0 }
 0x3e9   :  { %v8471_v9 = vpop.f32.mrf.mxu1  ;;  %v8473_v62 = vpack.c.bf16 %v3673_v14, %v3671_v19 }
 0x3ea   :  { %10238 = vst [vmem:[#allocation87_spill] sm:$0xff] %v8471_v9  ;;  %v3045_v27 = vpop.f32.mrf.mxu3  ;;  %v6693_v9 = vld [vmem:[%s10062_s7 + $0xb4] sm:$0xf] }
 0x3eb   :  { %10239 = vst [vmem:[#allocation88_spill] sm:$0xff] %v8473_v62  ;;  %v3046_v8 = vadd.f32 %v3045_v27, %v2877_v26  ;;  %v2878_v39 = vpop.f32.mrf.mxu2  ;;  %v10243_v27 = vld [vmem:[#allocation19_spill] sm:$0xff] }
 0x3ec   :  { %v2879_v0 = vadd.f32 %v2878_v39, %v8233_v50  ;;  %v6677_v50 = vld [vmem:[%s10062_s7 + $0x34] sm:$0xf]  ;;  %v6219_v39 = vld [vmem:[%s10062_s7 + $0x38] sm:$0xf0] }
 0x3ed   :  { %v3547_v18 = vadd.f32 %v8433_v28, %v3046_v8 }
 0x3ef   :  { %v3675_v14 = vmax.f32 %v3547_v18, 0.0 }
 0x3f0   :  { %v8475_v32 = vpop.f32.mrf.mxu0  ;;  %2920 = vmatmul.bf16.gmra.mxu2 %v10240_v15 }
 0x3f1   :  { %v8479_v40 = vpop.f32.mrf.mxu1 }
 0x3f2   :  { %10241 = vst [vmem:[#allocation89_spill] sm:$0xff] %v8479_v40  ;;  %v3047_v55 = vpop.f32.mrf.mxu3 }
 0x3f3   :  { %v3048_v37 = vadd.f32 %v3047_v55, %v2879_v0  ;;  %6148 = vmatmul.msk.bf16.gmra.mxu0 %vm2262_vm0, %v10242_v30  ;;  %v2881_v4 = vpop.f32.mrf.mxu2  ;;  %v6222_v0 = vor.u32 %v6677_v50, %v6219_v39  ;;  %v10246_v50 = vld [vmem:[#allocation20_spill] sm:$0xff] }
 0x3f4   :  { %6180 = vmatmul.msk.bf16.gmra.mxu1 %vm2262_vm0, %v10242_v30  ;;  %v2882_v55 = vadd.f32 %v2881_v4, %v8239_v16 }
 0x3f5   :  { %v3549_v19 = vadd.f32 %v8433_v28, %v3048_v37  ;;  %3199 = vmatpush.bf16.msrb.mxu0 %v6222_v0 }
 0x3f7   :  { %v3677_v26 = vmax.f32 %v3549_v19, 0.0  ;;  %3089 = vmatmul.bf16.gmra.mxu3 %v10243_v27  ;;  %v6283_v27 = vld [vmem:[%s10062_s7 + $0xb8] sm:$0xf0] }
 0x3f8   :  { %v8494_v8 = vpop.f32.mrf.mxu0  ;;  %v6286_v16 = vor.u32 %v6693_v9, %v6283_v27 }
 0x3f9   :  { %v8497_v30 = vpop.f32.mrf.mxu1  ;;  %v8499_v37 = vpack.c.bf16 %v3677_v26, %v3675_v14 }
 0x3fa   :  { %10244 = vst [vmem:[#allocation18_spill] sm:$0xff] %v8497_v30  ;;  %v3050_v18 = vpop.f32.mrf.mxu3  ;;  %3368 = vmatpush.bf16.msrb.mxu1 %v6286_v16  ;;  %v6425_v16 = vld [vmem:[%s10063_s10 + $0xd0] sm:$0xf] }
 0x3fb   :  { %10245 = vst [vmem:[#allocation90_spill] sm:$0xff] %v8499_v37  ;;  %v3051_v19 = vadd.f32 %v3050_v18, %v2882_v55  ;;  %v2883_v40 = vpop.f32.mrf.mxu2  ;;  %v10248_v55 = vld [vmem:[#allocation21_spill] sm:$0xff] }
 0x3fc   :  { %v2884_v4 = vadd.f32 %v2883_v40, %v8251_v31  ;;  %v6361_v31 = vld [vmem:[%s10063_s10 + $0x50] sm:$0xf]  ;;  %v6720_v40 = vld [vmem:[%s10063_s10 + $0x54] sm:$0xf0] }
 0x3fd   :  { %v3551_v39 = vadd.f32 %v8433_v28, %v3051_v19  ;;  %v6362_v19 = vor.u32 %v6720_v40, %v6361_v31 }
 0x3ff   :  { %4059 = vmatpush.bf16.msrb.mxu2 %v6362_v19 }
 0x400   :  { %v8507_v15 = vpop.f32.mrf.mxu0  ;;  %2925 = vmatmul.bf16.gmra.mxu2 %v10246_v50  ;;  %v3679_v50 = vmax.f32 %v3551_v39, 0.0 }
 0x401   :  { %v8511_v14 = vpop.f32.mrf.mxu1 }
 0x402   :  { %10247 = vst [vmem:[#allocation91_spill] sm:$0xff] %v8511_v14  ;;  %v3052_v26 = vpop.f32.mrf.mxu3 }
 0x403   :  { %v3053_v0 = vadd.f32 %v3052_v26, %v2884_v4  ;;  %6149 = vmatmul.msk.bf16.gmra.mxu0 %vm2262_vm0, %v10248_v55  ;;  %v2886_v18 = vpop.f32.mrf.mxu2 }
 0x404   :  { %6181 = vmatmul.msk.bf16.gmra.mxu1 %vm2262_vm0, %v10248_v55  ;;  %v2887_v4 = vadd.f32 %v2886_v18, %v8257_v21 }
 0x405   :  { %v3553_v30 = vadd.f32 %v8433_v28, %v3053_v0 }
 0x407   :  { %v3681_v9 = vmax.f32 %v3553_v30, 0.0  ;;  %3094 = vmatmul.bf16.gmra.mxu3 %v7996_v49  ;;  %v6736_v30 = vld [vmem:[%s10063_s10 + $0xd4] sm:$0xf0] }
 0x408   :  { %v8526_v27 = vpop.f32.mrf.mxu0  ;;  %v6426_v39 = vor.u32 %v6736_v30, %v6425_v16  ;;  %v10251_v30 = vld [vmem:[#allocation23_spill] sm:$0xff] }
 0x409   :  { %v8535_v26 = vpop.f32.mrf.mxu1  ;;  %v8537_v0 = vpack.c.bf16 %v3681_v9, %v3679_v50 }
 0x40a   :  { %10249 = vst [vmem:[#allocation21_spill] sm:$0xff] %v8535_v26  ;;  %v3055_v55 = vpop.f32.mrf.mxu3  ;;  %4228 = vmatpush.bf16.msrb.mxu3 %v6426_v39 }
 0x40b   :  { %v3056_v14 = vadd.f32 %v3055_v55, %v2887_v4  ;;  %v2888_v49 = vpop.f32.mrf.mxu2 }
 0x40c   :  { %v2889_v40 = vadd.f32 %v2888_v49, %v8269_v25 }
 0x40d   :  { %v3555_v21 = vadd.f32 %v8433_v28, %v3056_v14 }
 0x40f   :  { %v3683_v19 = vmax.f32 %v3555_v21, 0.0 }
 0x410   :  { %v8539_v31 = vpop.f32.mrf.mxu0  ;;  %2930 = vmatmul.bf16.gmra.mxu2 %v7999_v56 }
 0x411   :  { %v8543_v37 = vpop.f32.mrf.mxu1 }
 0x412   :  { %10250 = vst [vmem:[#allocation92_spill] sm:$0xff] %v8543_v37  ;;  %v3057_v62 = vpop.f32.mrf.mxu3 }
 0x413   :  { %v3058_v18 = vadd.f32 %v3057_v62, %v2889_v40  ;;  %6150 = vmatmul.msk.bf16.gmra.mxu0 %vm2262_vm0, %v8004_v1  ;;  %v2891_v50 = vpop.f32.mrf.mxu2 }
 0x414   :  { %6182 = vmatmul.msk.bf16.gmra.mxu1 %vm2262_vm0, %v8004_v1  ;;  %v2892_v25 = vadd.f32 %v2891_v50, %v8275_v33  ;;  %v10254_v33 = vld [vmem:[#allocation24_spill] sm:$0xff] }
 0x415   :  { %v3557_v9 = vadd.f32 %v8433_v28, %v3058_v18 }
 0x417   :  { %v3685_v16 = vmax.f32 %v3557_v9, 0.0  ;;  %3099 = vmatmul.bf16.gmra.mxu3 %v10251_v30 }
 0x418   :  { %v8552_v49 = vpop.f32.mrf.mxu0 }
 0x419   :  { %v8555_v4 = vpop.f32.mrf.mxu1  ;;  %v8557_v62 = vpack.c.bf16 %v3685_v16, %v3683_v19 }
 0x41a   :  { %10252 = vst [vmem:[#allocation23_spill] sm:$0xff] %v8555_v4  ;;  %v3060_v14 = vpop.f32.mrf.mxu3 }
 0x41b   :  { %v3061_v39 = vadd.f32 %v3060_v14, %v2892_v25  ;;  %v2893_v55 = vpop.f32.mrf.mxu2  ;;  %v10255_v14 = vld [vmem:[#allocation25_spill] sm:$0xff] }
 0x41c   :  { %v2894_v1 = vadd.f32 %v2893_v55, %v8293_v7 }
 0x41d   :  { %v3559_v9 = vadd.f32 %v8433_v28, %v3061_v39 }
 0x41f   :  { %v3687_v16 = vmax.f32 %v3559_v9, 0.0 }
 0x420   :  { %v8559_v40 = vpop.f32.mrf.mxu0  ;;  %2935 = vmatmul.bf16.gmra.mxu2 %v8014_v22 }
 0x421   :  { %v8563_v21 = vpop.f32.mrf.mxu1 }
 0x422   :  { %10253 = vst [vmem:[#allocation93_spill] sm:$0xff] %v8563_v21  ;;  %v3062_v18 = vpop.f32.mrf.mxu3 }
 0x423   :  { %v3063_v37 = vadd.f32 %v3062_v18, %v2894_v1  ;;  %6151 = vmatmul.msk.bf16.gmra.mxu0 %vm2262_vm0, %v10254_v33  ;;  %v2896_v50 = vpop.f32.mrf.mxu2 }
 0x424   :  { %6183 = vmatmul.msk.bf16.gmra.mxu1 %vm2262_vm0, %v10254_v33  ;;  %v2897_v55 = vadd.f32 %v2896_v50, %v8305_v38  ;;  %v10259_v38 = vld [vmem:[#allocation27_spill] sm:$0xff] }
 0x425   :  { %v3561_v19 = vadd.f32 %v8433_v28, %v3063_v37 }
 0x427   :  { %v3689_v25 = vmax.f32 %v3561_v19, 0.0  ;;  %3104 = vmatmul.bf16.gmra.mxu3 %v10255_v14 }
 0x428   :  { %v8572_v7 = vpop.f32.mrf.mxu0 }
 0x429   :  { %v8575_v21 = vpop.f32.mrf.mxu1  ;;  %v8577_v39 = vpack.c.bf16 %v3689_v25, %v3687_v16 }
 0x42a   :  { %10256 = vst [vmem:[#allocation24_spill] sm:$0xff] %v8575_v21  ;;  %v3065_v1 = vpop.f32.mrf.mxu3  ;;  %v6691_v21 = vld [vmem:[%s10062_s7 + $0xa4] sm:$0xf] }
 0x42b   :  { %10257 = vst [vmem:[#allocation94_spill] sm:$0xff] %v8577_v39  ;;  %v3066_v18 = vadd.f32 %v3065_v1, %v2897_v55  ;;  %v2898_v4 = vpop.f32.mrf.mxu2  ;;  %v10260_v1 = vld [vmem:[#allocation28_spill] sm:$0xff] }
 0x42c   :  { %v2899_v37 = vadd.f32 %v2898_v4, %v8329_v11  ;;  %v6675_v11 = vld [vmem:[%s10062_s7 + $0x24] sm:$0xf]  ;;  %v6211_v4 = vld [vmem:[%s10062_s7 + $0x28] sm:$0xf0] }
 0x42d   :  { %v3563_v19 = vadd.f32 %v8433_v28, %v3066_v18 }
 0x42f   :  { %v3691_v25 = vmax.f32 %v3563_v19, 0.0 }
 0x430   :  { %v8579_v26 = vpop.f32.mrf.mxu0  ;;  %2940 = vmatmul.bf16.gmra.mxu2 %v8029_v47 }
 0x431   :  { %v8583_v9 = vpop.f32.mrf.mxu1 }
 0x432   :  { %10258 = vst [vmem:[#allocation95_spill] sm:$0xff] %v8583_v9  ;;  %v3067_v33 = vpop.f32.mrf.mxu3 }
 0x433   :  { %v3068_v14 = vadd.f32 %v3067_v33, %v2899_v37  ;;  %6152 = vmatmul.msk.bf16.gmra.mxu0 %vm2262_vm0, %v10259_v38  ;;  %v2901_v50 = vpop.f32.mrf.mxu2  ;;  %v6214_v37 = vor.u32 %v6675_v11, %v6211_v4 }
 0x434   :  { %6184 = vmatmul.msk.bf16.gmra.mxu1 %vm2262_vm0, %v10259_v38  ;;  %v2902_v33 = vadd.f32 %v2901_v50, %v8335_v57 }
 0x435   :  { %v3565_v16 = vadd.f32 %v8433_v28, %v3068_v14  ;;  %3200 = vmatpush.bf16.msrb.mxu0 %v6214_v37  ;;  %v10264_v37 = vld [vmem:[#allocation30_spill] sm:$0xff] }
 0x437   :  { %v3693_v55 = vmax.f32 %v3565_v16, 0.0  ;;  %3109 = vmatmul.bf16.gmra.mxu3 %v10260_v1  ;;  %v6275_v1 = vld [vmem:[%s10062_s7 + $0xa8] sm:$0xf0] }
 0x438   :  { %v8598_v18 = vpop.f32.mrf.mxu0  ;;  %v6278_v57 = vor.u32 %v6691_v21, %v6275_v1  ;;  %v10265_v1 = vld [vmem:[#allocation31_spill] sm:$0xff] }
 0x439   :  { %v8601_v38 = vpop.f32.mrf.mxu1  ;;  %v8603_v14 = vpack.c.bf16 %v3693_v55, %v3691_v25 }
 0x43a   :  { %10261 = vst [vmem:[#allocation27_spill] sm:$0xff] %v8601_v38  ;;  %v3070_v19 = vpop.f32.mrf.mxu3  ;;  %3369 = vmatpush.bf16.msrb.mxu1 %v6278_v57 }
 0x43b   :  { %10262 = vst [vmem:[#allocation96_spill] sm:$0xff] %v8603_v14  ;;  %v3071_v16 = vadd.f32 %v3070_v19, %v2902_v33  ;;  %v2903_v9 = vpop.f32.mrf.mxu2 }
 0x43c   :  { %v2904_v50 = vadd.f32 %v2903_v9, %v8347_v44  ;;  %v6353_v44 = vld [vmem:[%s10063_s10 + $0x40] sm:$0xf]  ;;  %v6718_v9 = vld [vmem:[%s10063_s10 + $0x44] sm:$0xf0] }
 0x43d   :  { %v3567_v11 = vadd.f32 %v8433_v28, %v3071_v16  ;;  %v6354_v57 = vor.u32 %v6718_v9, %v6353_v44 }
 0x43f   :  { %v3695_v38 = vmax.f32 %v3567_v11, 0.0  ;;  %4060 = vmatpush.bf16.msrb.mxu2 %v6354_v57 }
 0x440   :  { %v8611_v47 = vpop.f32.mrf.mxu0  ;;  %2945 = vmatmul.bf16.gmra.mxu2 %v8056_v46 }
 0x441   :  { %v8615_v25 = vpop.f32.mrf.mxu1 }
 0x442   :  { %10263 = vst [vmem:[#allocation97_spill] sm:$0xff] %v8615_v25  ;;  %v3072_v55 = vpop.f32.mrf.mxu3 }
 0x443   :  { %v3073_v4 = vadd.f32 %v3072_v55, %v2904_v50  ;;  %6153 = vmatmul.msk.bf16.gmra.mxu0 %vm2262_vm0, %v10264_v37  ;;  %v2906_v33 = vpop.f32.mrf.mxu2  ;;  %v6417_v50 = vld [vmem:[%s10063_s10 + $0xc0] sm:$0xf]  ;;  %v6734_v55 = vld [vmem:[%s10063_s10 + $0xc4] sm:$0xf0] }
 0x444   :  { %6185 = vmatmul.msk.bf16.gmra.mxu1 %vm2262_vm0, %v10264_v37  ;;  %v2907_v11 = vadd.f32 %v2906_v33, %v8353_v10  ;;  %v6418_v37 = vor.u32 %v6734_v55, %v6417_v50  ;;  %v10268_v50 = vld [vmem:[#allocation32_spill] sm:$0xff]  ;;  %v10269_v55 = vld [vmem:[#allocation33_spill] sm:$0xff] }
 0x445   :  { %v3569_v19 = vadd.f32 %v8433_v28, %v3073_v4 }
 0x446   :  { %4229 = vmatpush.bf16.msrb.mxu3 %v6418_v37 }
 0x447   :  { %v3697_v21 = vmax.f32 %v3569_v19, 0.0  ;;  %3114 = vmatmul.bf16.gmra.mxu3 %v10265_v1 }
 0x448   :  { %v8630_v16 = vpop.f32.mrf.mxu0 }
 0x449   :  { %v8639_v4 = vpop.f32.mrf.mxu1  ;;  %v8641_v19 = vpack.c.bf16 %v3697_v21, %v3695_v38 }
 0x44a   :  { %10266 = vst [vmem:[#allocation30_spill] sm:$0xff] %v8639_v4  ;;  %v3075_v25 = vpop.f32.mrf.mxu3 }
 0x44b   :  { %v3076_v1 = vadd.f32 %v3075_v25, %v2907_v11  ;;  %v2908_v46 = vpop.f32.mrf.mxu2 }
 0x44c   :  { %v2909_v9 = vadd.f32 %v2908_v46, %v8365_v29 }
 0x44d   :  { %v3571_v10 = vadd.f32 %v8433_v28, %v3076_v1 }
 0x44f   :  { %v3699_v21 = vmax.f32 %v3571_v10, 0.0 }
 0x450   :  { %v8643_v44 = vpop.f32.mrf.mxu0  ;;  %2950 = vmatmul.bf16.gmra.mxu2 %v8071_v58 }
 0x451   :  { %v8647_v14 = vpop.f32.mrf.mxu1 }
 0x452   :  { %10267 = vst [vmem:[#allocation98_spill] sm:$0xff] %v8647_v14  ;;  %v3077_v39 = vpop.f32.mrf.mxu3 }
 0x453   :  { %v3078_v33 = vadd.f32 %v3077_v39, %v2909_v9  ;;  %6154 = vmatmul.msk.bf16.gmra.mxu0 %vm2262_vm0, %v10268_v50  ;;  %v2911_v38 = vpop.f32.mrf.mxu2 }
 0x454   :  { %6186 = vmatmul.msk.bf16.gmra.mxu1 %vm2262_vm0, %v10268_v50  ;;  %v2912_v29 = vadd.f32 %v2911_v38, %v8371_v35 }
 0x455   :  { %v3573_v25 = vadd.f32 %v8433_v28, %v3078_v33 }
 0x457   :  { %v3701_v57 = vmax.f32 %v3573_v25, 0.0  ;;  %3119 = vmatmul.bf16.gmra.mxu3 %v10269_v55 }
 0x458   :  { %v8656_v46 = vpop.f32.mrf.mxu0 }
 0x459   :  { %v8659_v11 = vpop.f32.mrf.mxu1  ;;  %v8661_v39 = vpack.c.bf16 %v3701_v57, %v3699_v21 }
 0x45a   :  { %10270 = vst [vmem:[#allocation32_spill] sm:$0xff] %v8659_v11  ;;  %v3080_v1 = vpop.f32.mrf.mxu3 }
 0x45b   :  { %v3081_v37 = vadd.f32 %v3080_v1, %v2912_v29  ;;  %v2913_v9 = vpop.f32.mrf.mxu2  ;;  %v10272_v29 = vld [vmem:[#allocation35_spill] sm:$0xff] }
 0x45c   :  { %v2914_v10 = vadd.f32 %v2913_v9, %v8383_v24 }
 0x45d   :  { %v3575_v25 = vadd.f32 %v8433_v28, %v3081_v37 }
 0x45f   :  { %v3703_v21 = vmax.f32 %v3575_v25, 0.0 }
 0x460   :  { %v8663_v14 = vpop.f32.mrf.mxu0  ;;  %2955 = vmatmul.bf16.gmra.mxu2 %v8086_v59 }
 0x461   :  { %v8667_v33 = vpop.f32.mrf.mxu1 }
 0x462   :  { %10271 = vst [vmem:[#allocation33_spill] sm:$0xff] %v8667_v33  ;;  %v3082_v50 = vpop.f32.mrf.mxu3 }
 0x463   :  { %v3083_v4 = vadd.f32 %v3082_v50, %v2914_v10  ;;  %6155 = vmatmul.msk.bf16.gmra.mxu0 %vm2262_vm0, %v8091_v41  ;;  %v2916_v35 = vpop.f32.mrf.mxu2 }
 0x464   :  { %6187 = vmatmul.msk.bf16.gmra.mxu1 %vm2262_vm0, %v8091_v41  ;;  %v2917_v1 = vadd.f32 %v2916_v35, %v8401_v48  ;;  %v10274_v41 = vld [vmem:[#allocation36_spill] sm:$0xff]  ;;  %v10276_v48 = vld [vmem:[#allocation37_spill] sm:$0xff] }
 0x465   :  { %v3577_v38 = vadd.f32 %v8433_v28, %v3083_v4 }
 0x467   :  { %v3705_v57 = vmax.f32 %v3577_v38, 0.0  ;;  %3124 = vmatmul.bf16.gmra.mxu3 %v10272_v29 }
 0x468   :  { %v8676_v24 = vpop.f32.mrf.mxu0 }
 0x469   :  { %v8679_v9 = vpop.f32.mrf.mxu1  ;;  %v8681_v37 = vpack.c.bf16 %v3705_v57, %v3703_v21 }
 0x46a   :  { %10273 = vst [vmem:[#allocation99_spill] sm:$0xff] %v8679_v9  ;;  %v3085_v10 = vpop.f32.mrf.mxu3  ;;  %v6689_v9 = vld [vmem:[%s10062_s7 + $0x94] sm:$0xf] }
 0x46b   :  { %v3086_v50 = vadd.f32 %v3085_v10, %v2917_v1  ;;  %v2918_v33 = vpop.f32.mrf.mxu2  ;;  %v10277_v10 = vld [vmem:[#allocation38_spill] sm:$0xff] }
 0x46c   :  { %v2919_v4 = vadd.f32 %v2918_v33, %v8422_v36  ;;  %v6673_v36 = vld [vmem:[%s10062_s7 + $0x14] sm:$0xf]  ;;  %v6203_v33 = vld [vmem:[%s10062_s7 + $0x18] sm:$0xf0] }
 0x46d   :  { %v3579_v29 = vadd.f32 %v8433_v28, %v3086_v50 }
 0x46f   :  { %v3707_v57 = vmax.f32 %v3579_v29, 0.0 }
 0x470   :  { %v8683_v11 = vpop.f32.mrf.mxu0  ;;  %2960 = vmatmul.bf16.gmra.mxu2 %v10274_v41 }
 0x471   :  { %v8687_v25 = vpop.f32.mrf.mxu1 }
 0x472   :  { %10275 = vst [vmem:[#allocation100_spill] sm:$0xff] %v8687_v25  ;;  %v3087_v38 = vpop.f32.mrf.mxu3 }
 0x473   :  { %v3088_v59 = vadd.f32 %v3087_v38, %v2919_v4  ;;  %6156 = vmatmul.msk.bf16.gmra.mxu0 %vm2262_vm0, %v10276_v48  ;;  %v2921_v35 = vpop.f32.mrf.mxu2  ;;  %v6206_v4 = vor.u32 %v6673_v36, %v6203_v33  ;;  %v6687_v36 = vld [vmem:[%s10062_s7 + $0x84] sm:$0xf] }
 0x474   :  { %6188 = vmatmul.msk.bf16.gmra.mxu1 %vm2262_vm0, %v10276_v48  ;;  %v2922_v38 = vadd.f32 %v2921_v35, %v8435_v42  ;;  %v6671_v42 = vld [vmem:[%s10062_s7 + $0x4] sm:$0xf]  ;;  %v6195_v35 = vld [vmem:[%s10062_s7 + $0x8] sm:$0xf0] }
 0x475   :  { %v3581_v21 = vadd.f32 %v8433_v28, %v3088_v59  ;;  %3201 = vmatpush.bf16.msrb.mxu0 %v6206_v4 }
 0x477   :  { %v3709_v1 = vmax.f32 %v3581_v21, 0.0  ;;  %3129 = vmatmul.bf16.gmra.mxu3 %v10277_v10  ;;  %v6267_v10 = vld [vmem:[%s10062_s7 + $0x98] sm:$0xf0] }
 0x478   :  { %v8702_v50 = vpop.f32.mrf.mxu0  ;;  %v6270_v41 = vor.u32 %v6689_v9, %v6267_v10  ;;  %v6259_v9 = vld [vmem:[%s10062_s7 + $0x88] sm:$0xf0] }
 0x479   :  { %v8705_v48 = vpop.f32.mrf.mxu1  ;;  %v8707_v59 = vpack.c.bf16 %v3709_v1, %v3707_v57  ;;  %v6198_v1 = vor.u32 %v6671_v42, %v6195_v35  ;;  %v6262_v33 = vor.u32 %v6687_v36, %v6259_v9  ;;  %v6732_v9 = vld [vmem:[%s10063_s10 + $0xb4] sm:$0xf0] }
 0x47a   :  { %10278 = vst [vmem:[#allocation37_spill] sm:$0xff] %v8705_v48  ;;  %v3090_v29 = vpop.f32.mrf.mxu3  ;;  %3370 = vmatpush.bf16.msrb.mxu1 %v6270_v41 }
 0x47b   :  { %10279 = vst [vmem:[#allocation101_spill] sm:$0xff] %v8707_v59  ;;  %v3091_v21 = vadd.f32 %v3090_v29, %v2922_v38  ;;  %v2923_v25 = vpop.f32.mrf.mxu2  ;;  %3202 = vmatpush.bf16.msrb.mxu0 %v6198_v1 }
 0x47c   :  { %v2924_v41 = vadd.f32 %v2923_v25, %v8448_v53  ;;  %v6345_v25 = vld [vmem:[%s10063_s10 + $0x30] sm:$0xf] }
 0x47d   :  { %v3583_v38 = vadd.f32 %v8433_v28, %v3091_v21  ;;  %v6716_v21 = vld [vmem:[%s10063_s10 + $0x34] sm:$0xf0] }
 0x47e   :  { %3371 = vmatpush.bf16.msrb.mxu1 %v6262_v33  ;;  %v6346_v36 = vor.u32 %v6716_v21, %v6345_v25 }
 0x47f   :  { %v3711_v48 = vmax.f32 %v3583_v38, 0.0 }
 0x480   :  { %v8721_v57 = vpop.f32.mrf.mxu0  ;;  %2965 = vmatmul.bf16.gmra.mxu2 %v8140_v63 }
 0x481   :  { %v8731_v10 = vpop.f32.mrf.mxu1  ;;  %4061 = vmatpush.bf16.msrb.mxu2 %v6346_v36 }
 0x482   :  { %10280 = vst [vmem:[#allocation102_spill] sm:$0xff] %v8731_v10  ;;  %v3092_v4 = vpop.f32.mrf.mxu3 }
 0x483   :  { %v3093_v29 = vadd.f32 %v3092_v4, %v2924_v41  ;;  %6157 = vmatmul.msk.bf16.gmra.mxu0 %vm2262_vm0, %v8145_v51  ;;  %v2926_v42 = vpop.f32.mrf.mxu2 }
 0x484   :  { %6189 = vmatmul.msk.bf16.gmra.mxu1 %vm2262_vm0, %v8145_v51  ;;  %v6409_v51 = vld [vmem:[%s10063_s10 + $0xb0] sm:$0xf]  ;;  %v2927_v41 = vadd.f32 %v2926_v42, %v8455_v13 }
 0x485   :  { %v3585_v35 = vadd.f32 %v8433_v28, %v3093_v29  ;;  %v6410_v4 = vor.u32 %v6732_v9, %v6409_v51 }
 0x487   :  { %v3713_v53 = vmax.f32 %v3585_v35, 0.0  ;;  %3134 = vmatmul.bf16.gmra.mxu3 %v8148_v60 }
 0x488   :  { %v8746_v1 = vpop.f32.mrf.mxu0  ;;  %4230 = vmatpush.bf16.msrb.mxu3 %v6410_v4 }
 0x489   :  { %v8755_v33 = vpop.f32.mrf.mxu1  ;;  %v8757_v38 = vpack.c.bf16 %v3713_v53, %v3711_v48 }
 0x48a   :  { %10281 = vst [vmem:[#allocation103_spill] sm:$0xff] %v8755_v33  ;;  %v3095_v29 = vpop.f32.mrf.mxu3 }
 0x48b   :  { %v3096_v35 = vadd.f32 %v3095_v29, %v2927_v41  ;;  %v2928_v10 = vpop.f32.mrf.mxu2 }
 0x48c   :  { %v2929_v21 = vadd.f32 %v2928_v10, %v8468_v52 }
 0x48d   :  { %v3587_v13 = vadd.f32 %v8433_v28, %v3096_v35 }
 0x48f   :  { %v3715_v36 = vmax.f32 %v3587_v13, 0.0 }
 0x490   :  { %v8759_v25 = vpop.f32.mrf.mxu0  ;;  %2970 = vmatmul.bf16.gmra.mxu2 %v8155_v5 }
 0x491   :  { %v8763_v60 = vpop.f32.mrf.mxu1 }
 0x492   :  { %10282 = vst [vmem:[#allocation104_spill] sm:$0xff] %v8763_v60  ;;  %v3097_v63 = vpop.f32.mrf.mxu3 }
 0x493   :  { %v3098_v42 = vadd.f32 %v3097_v63, %v2929_v21  ;;  %6158 = vmatmul.msk.bf16.gmra.mxu0 %vm2262_vm0, %v8166_v17  ;;  %v2931_v48 = vpop.f32.mrf.mxu2 }
 0x494   :  { %6190 = vmatmul.msk.bf16.gmra.mxu1 %vm2262_vm0, %v8166_v17  ;;  %v2932_v10 = vadd.f32 %v2931_v48, %v8475_v32  ;;  %v10284_v17 = vld [vmem:[#allocation43_spill] sm:$0xff] }
 0x495   :  { %v3589_v53 = vadd.f32 %v8433_v28, %v3098_v42 }
 0x497   :  { %v3717_v51 = vmax.f32 %v3589_v53, 0.0  ;;  %3139 = vmatmul.bf16.gmra.mxu3 %v8178_v43 }
 0x498   :  { %v8772_v52 = vpop.f32.mrf.mxu0 }
 0x499   :  { %v8775_v9 = vpop.f32.mrf.mxu1  ;;  %v8777_v63 = vpack.c.bf16 %v3717_v51, %v3715_v36 }
 0x49a   :  { %10283 = vst [vmem:[#allocation105_spill] sm:$0xff] %v8775_v9  ;;  %v3100_v41 = vpop.f32.mrf.mxu3 }
 0x49b   :  { %v3101_v4 = vadd.f32 %v3100_v41, %v2932_v10  ;;  %v2933_v29 = vpop.f32.mrf.mxu2  ;;  %v10286_v10 = vld [vmem:[#allocation45_spill] sm:$0xff] }
 0x49c   :  { %v2934_v21 = vadd.f32 %v2933_v29, %v8494_v8 }
 0x49d   :  { %v3591_v53 = vadd.f32 %v8433_v28, %v3101_v4 }
 0x49f   :  { %v3719_v36 = vmax.f32 %v3591_v53, 0.0 }
 0x4a0   :  { %v8779_v35 = vpop.f32.mrf.mxu0  ;;  %2975 = vmatmul.bf16.gmra.mxu2 %v10284_v17 }
 0x4a1   :  { %v8783_v13 = vpop.f32.mrf.mxu1 }
 0x4a2   :  { %10285 = vst [vmem:[#allocation43_spill] sm:$0xff] %v8783_v13  ;;  %v3102_v42 = vpop.f32.mrf.mxu3 }
 0x4a3   :  { %v3103_v60 = vadd.f32 %v3102_v42, %v2934_v21  ;;  %v2936_v32 = vpop.f32.mrf.mxu2  ;;  %3203 = vmatmul.bf16.vlgmr.msrb.gmra.mxu0 %v7647_v61 }
 0x4a4   :  { %3372 = vmatmul.bf16.vlgmr.msrb.gmra.mxu1 %v7667_v6  ;;  %v2937_v8 = vadd.f32 %v2936_v32, %v8507_v15  ;;  %v10290_v32 = vld [vmem:[#allocation2_spill] sm:$0xff] }
 0x4a5   :  { %v3593_v48 = vadd.f32 %v8433_v28, %v3103_v60 }
 0x4a7   :  { %v3721_v51 = vmax.f32 %v3593_v48, 0.0  ;;  %3144 = vmatmul.bf16.gmra.mxu3 %v10286_v10 }
 0x4a8   :  { %v8790_v41 = vpop.f32.mrf.mxu0 }
 0x4a9   :  { %v8793_v29 = vpop.f32.mrf.mxu1  ;;  %v8795_v13 = vpack.c.bf16 %v3721_v51, %v3719_v36 }
 0x4aa   :  { %10287 = vst [vmem:[#allocation45_spill] sm:$0xff] %v8793_v29  ;;  %v3105_v4 = vpop.f32.mrf.mxu3 }
 0x4ab   :  { %10288 = vst [vmem:[#allocation106_spill] sm:$0xff] %v8795_v13  ;;  %v3106_v21 = vadd.f32 %v3105_v4, %v2937_v8  ;;  %v2938_v42 = vpop.f32.mrf.mxu2  ;;  %v10291_v4 = vld [vmem:[#allocation49_spill] sm:$0xff] }
 0x4ac   :  { %v2939_v6 = vadd.f32 %v2938_v42, %v8526_v27 }
 0x4ad   :  { %v3595_v48 = vadd.f32 %v8433_v28, %v3106_v21 }
 0x4af   :  { %v3723_v51 = vmax.f32 %v3595_v48, 0.0 }
 0x4b0   :  { %v8797_v61 = vpop.f32.mrf.mxu0  ;;  %2980 = vmatmul.bf16.gmra.mxu2 %v8219_v34 }
 0x4b1   :  { %v8801_v60 = vpop.f32.mrf.mxu1 }
 0x4b2   :  { %10289 = vst [vmem:[#allocation107_spill] sm:$0xff] %v8801_v60  ;;  %v3107_v53 = vpop.f32.mrf.mxu3 }
 0x4b3   :  { %v3108_v9 = vadd.f32 %v3107_v53, %v2939_v6  ;;  %v2941_v15 = vpop.f32.mrf.mxu2  ;;  %3208 = vmatmul.bf16.gmra.mxu0 %v10290_v32 }
 0x4b4   :  { %3377 = vmatmul.bf16.gmra.mxu1 %v7690_v45  ;;  %v2942_v27 = vadd.f32 %v2941_v15, %v8539_v31  ;;  %v10294_v45 = vld [vmem:[#allocation51_spill] sm:$0xff] }
 0x4b5   :  { %v3597_v36 = vadd.f32 %v8433_v28, %v3108_v9  ;;  %v10296_v15 = vld [vmem:[#allocation3_spill] sm:$0xff] }
 0x4b7   :  { %v3725_v8 = vmax.f32 %v3597_v36, 0.0  ;;  %3149 = vmatmul.bf16.gmra.mxu3 %v10291_v4 }
 0x4b8   :  { %v8808_v29 = vpop.f32.mrf.mxu0 }
 0x4b9   :  { %v8811_v42 = vpop.f32.mrf.mxu1  ;;  %v8813_v60 = vpack.c.bf16 %v3725_v8, %v3723_v51  ;;  %v10297_v51 = vld [vmem:[#allocation4_spill] sm:$0xff] }
 0x4ba   :  { %10292 = vst [vmem:[#allocation2_spill] sm:$0xff] %v8811_v42  ;;  %v3110_v21 = vpop.f32.mrf.mxu3  ;;  %v10298_v42 = vld [vmem:[#allocation53_spill] sm:$0xff] }
 0x4bb   :  { %10293 = vst [vmem:[#allocation108_spill] sm:$0xff] %v8813_v60  ;;  %v3111_v6 = vadd.f32 %v3110_v21, %v2942_v27  ;;  %v2943_v53 = vpop.f32.mrf.mxu2 }
 0x4bc   :  { %v2944_v9 = vadd.f32 %v2943_v53, %v8552_v49  ;;  %v6337_v49 = vld [vmem:[%s10063_s10 + $0x20] sm:$0xf] }
 0x4bd   :  { %v3599_v33 = vadd.f32 %v8433_v28, %v3111_v6  ;;  %v6714_v6 = vld [vmem:[%s10063_s10 + $0x24] sm:$0xf0] }
 0x4bf   :  { %v3727_v27 = vmax.f32 %v3599_v33, 0.0  ;;  %v6730_v33 = vld [vmem:[%s10063_s10 + $0xa4] sm:$0xf0] }
 0x4c0   :  { %v8815_v32 = vpop.f32.mrf.mxu0  ;;  %2985 = vmatmul.bf16.gmra.mxu2 %v10294_v45 }
 0x4c1   :  { %v8819_v48 = vpop.f32.mrf.mxu1 }
 0x4c2   :  { %10295 = vst [vmem:[#allocation109_spill] sm:$0xff] %v8819_v48  ;;  %v3112_v36 = vpop.f32.mrf.mxu3 }
 0x4c3   :  { %v3113_v4 = vadd.f32 %v3112_v36, %v2944_v9  ;;  %v2946_v31 = vpop.f32.mrf.mxu2  ;;  %3213 = vmatmul.bf16.gmra.mxu0 %v10296_v15  ;;  %v6338_v9 = vor.u32 %v6714_v6, %v6337_v49  ;;  %v6401_v36 = vld [vmem:[%s10063_s10 + $0xa0] sm:$0xf]  ;;  %v10301_v6 = vld [vmem:[#allocation55_spill] sm:$0xff] }
 0x4c4   :  { %3382 = vmatmul.bf16.gmra.mxu1 %v10297_v51  ;;  %v6402_v51 = vor.u32 %v6730_v33, %v6401_v36 }
 0x4c5   :  { %v3601_v8 = vadd.f32 %v8433_v28, %v3113_v4  ;;  %v2947_v4 = vadd.f32 %v2946_v31, %v8559_v40  ;;  %4062 = vmatpush.bf16.msrb.mxu2 %v6338_v9 }
 0x4c6   :  { %4231 = vmatpush.bf16.msrb.mxu3 %v6402_v51 }
 0x4c7   :  { %v3729_v21 = vmax.f32 %v3601_v8, 0.0  ;;  %3154 = vmatmul.bf16.gmra.mxu3 %v10298_v42 }
 0x4c8   :  { %v8832_v53 = vpop.f32.mrf.mxu0 }
 0x4c9   :  { %v8841_v15 = vpop.f32.mrf.mxu1  ;;  %v8843_v8 = vpack.c.bf16 %v3729_v21, %v3727_v27  ;;  %v10303_v27 = vld [vmem:[#allocation5_spill] sm:$0xff]  ;;  %v10304_v21 = vld [vmem:[#allocation6_spill] sm:$0xff] }
 0x4ca   :  { %10299 = vst [vmem:[#allocation3_spill] sm:$0xff] %v8841_v15  ;;  %v3115_v48 = vpop.f32.mrf.mxu3 }
 0x4cb   :  { %10300 = vst [vmem:[#allocation4_spill] sm:$0xff] %v8843_v8  ;;  %v3116_v42 = vadd.f32 %v3115_v48, %v2947_v4  ;;  %v2948_v45 = vpop.f32.mrf.mxu2  ;;  %v10305_v4 = vld [vmem:[#allocation57_spill] sm:$0xff] }
 0x4cc   :  { %v2949_v60 = vadd.f32 %v2948_v45, %v8572_v7 }
 0x4cd   :  { %v3603_v40 = vadd.f32 %v8433_v28, %v3116_v42 }
 0x4cf   :  { %v3731_v9 = vmax.f32 %v3603_v40, 0.0 }
 0x4d0   :  { %v8845_v49 = vpop.f32.mrf.mxu0  ;;  %2990 = vmatmul.bf16.gmra.mxu2 %v10301_v6 }
 0x4d1   :  { %v8849_v34 = vpop.f32.mrf.mxu1 }
 0x4d2   :  { %10302 = vst [vmem:[#allocation55_spill] sm:$0xff] %v8849_v34  ;;  %v3117_v13 = vpop.f32.mrf.mxu3 }
 0x4d3   :  { %v3118_v31 = vadd.f32 %v3117_v13, %v2949_v60  ;;  %v2951_v36 = vpop.f32.mrf.mxu2  ;;  %3218 = vmatmul.bf16.gmra.mxu0 %v10303_v27 }
 0x4d4   :  { %3387 = vmatmul.bf16.gmra.mxu1 %v10304_v21  ;;  %v2952_v7 = vadd.f32 %v2951_v36, %v8579_v26  ;;  %v10308_v21 = vld [vmem:[#allocation59_spill] sm:$0xff] }
 0x4d5   :  { %v3605_v48 = vadd.f32 %v8433_v28, %v3118_v31  ;;  %v10310_v36 = vld [vmem:[#allocation7_spill] sm:$0xff] }
 0x4d7   :  { %v3733_v33 = vmax.f32 %v3605_v48, 0.0  ;;  %3159 = vmatmul.bf16.gmra.mxu3 %v10305_v4 }
 0x4d8   :  { %v8856_v51 = vpop.f32.mrf.mxu0 }
 0x4d9   :  { %v8859_v45 = vpop.f32.mrf.mxu1  ;;  %v8861_v34 = vpack.c.bf16 %v3733_v33, %v3731_v9  ;;  %v10311_v9 = vld [vmem:[#allocation8_spill] sm:$0xff] }
 0x4da   :  { %10306 = vst [vmem:[#allocation5_spill] sm:$0xff] %v8859_v45  ;;  %v3120_v13 = vpop.f32.mrf.mxu3  ;;  %v10312_v45 = vld [vmem:[#allocation61_spill] sm:$0xff] }
 0x4db   :  { %10307 = vst [vmem:[#allocation6_spill] sm:$0xff] %v8861_v34  ;;  %v3121_v60 = vadd.f32 %v3120_v13, %v2952_v7  ;;  %v2953_v42 = vpop.f32.mrf.mxu2 }
 0x4dc   :  { %v2954_v40 = vadd.f32 %v2953_v42, %v8598_v18 }
 0x4dd   :  { %v3607_v15 = vadd.f32 %v8433_v28, %v3121_v60 }
 0x4df   :  { %v3735_v7 = vmax.f32 %v3607_v15, 0.0 }
 0x4e0   :  { %v8863_v27 = vpop.f32.mrf.mxu0  ;;  %2995 = vmatmul.bf16.gmra.mxu2 %v10308_v21 }
 0x4e1   :  { %v8867_v31 = vpop.f32.mrf.mxu1 }
 0x4e2   :  { %10309 = vst [vmem:[#allocation110_spill] sm:$0xff] %v8867_v31  ;;  %v3122_v48 = vpop.f32.mrf.mxu3 }
 0x4e3   :  { %v3123_v4 = vadd.f32 %v3122_v48, %v2954_v40  ;;  %v2956_v26 = vpop.f32.mrf.mxu2  ;;  %3223 = vmatmul.bf16.gmra.mxu0 %v10310_v36 }
 0x4e4   :  { %3392 = vmatmul.bf16.gmra.mxu1 %v10311_v9  ;;  %v2957_v18 = vadd.f32 %v2956_v26, %v8611_v47  ;;  %v10315_v9 = vld [vmem:[#allocation63_spill] sm:$0xff] }
 0x4e5   :  { %v3609_v33 = vadd.f32 %v8433_v28, %v3123_v4 }
 0x4e7   :  { %v3737_v13 = vmax.f32 %v3609_v33, 0.0  ;;  %3164 = vmatmul.bf16.gmra.mxu3 %v10312_v45 }
 0x4e8   :  { %v8874_v21 = vpop.f32.mrf.mxu0 }
 0x4e9   :  { %v8877_v42 = vpop.f32.mrf.mxu1  ;;  %v8879_v31 = vpack.c.bf16 %v3737_v13, %v3735_v7 }
 0x4ea   :  { %10313 = vst [vmem:[#allocation7_spill] sm:$0xff] %v8877_v42  ;;  %v3125_v60 = vpop.f32.mrf.mxu3 }
 0x4eb   :  { %10314 = vst [vmem:[#allocation8_spill] sm:$0xff] %v8879_v31  ;;  %v3126_v40 = vadd.f32 %v3125_v60, %v2957_v18  ;;  %v2958_v48 = vpop.f32.mrf.mxu2  ;;  %v10317_v18 = vld [vmem:[#allocation65_spill] sm:$0xff] }
 0x4ec   :  { %v2959_v15 = vadd.f32 %v2958_v48, %v8630_v16 }
 0x4ed   :  { %v3611_v45 = vadd.f32 %v8433_v28, %v3126_v40 }
 0x4ef   :  { %v3739_v7 = vmax.f32 %v3611_v45, 0.0  ;;  %v6739_v45 = vld [vmem:[%s10063_s10 + $0xf4] sm:$0xf] }
 0x4f0   :  { %v8881_v36 = vpop.f32.mrf.mxu0  ;;  %3000 = vmatmul.bf16.gmra.mxu2 %v10315_v9  ;;  %v10323_v9 = vld [vmem:[#allocation69_spill] sm:$0xff] }
 0x4f1   :  { %v8885_v4 = vpop.f32.mrf.mxu1 }
 0x4f2   :  { %10316 = vst [vmem:[#allocation111_spill] sm:$0xff] %v8885_v4  ;;  %v3127_v33 = vpop.f32.mrf.mxu3 }
 0x4f3   :  { %v3128_v34 = vadd.f32 %v3127_v33, %v2959_v15  ;;  %v2961_v47 = vpop.f32.mrf.mxu2  ;;  %3228 = vmatmul.bf16.gmra.mxu0 %v7774_v54  ;;  %v6723_v54 = vld [vmem:[%s10063_s10 + $0x74] sm:$0xf] }
 0x4f4   :  { %3397 = vmatmul.bf16.gmra.mxu1 %v7794_v3  ;;  %v2962_v16 = vadd.f32 %v2961_v47, %v8643_v44  ;;  %v6379_v3 = vld [vmem:[%s10063_s10 + $0x78] sm:$0xf0] }
 0x4f5   :  { %v3613_v26 = vadd.f32 %v8433_v28, %v3128_v34  ;;  %v6382_v44 = vor.u32 %v6723_v54, %v6379_v3  ;;  %v6443_v47 = vld [vmem:[%s10063_s10 + $0xf8] sm:$0xf0]  ;;  %v10322_v3 = vld [vmem:[#allocation10_spill] sm:$0xff] }
 0x4f6   :  { %v10321_v54 = vld [vmem:[#allocation9_spill] sm:$0xff] }
 0x4f7   :  { %v3741_v13 = vmax.f32 %v3613_v26, 0.0  ;;  %3169 = vmatmul.bf16.gmra.mxu3 %v10317_v18  ;;  %4395 = vmatpush.bf16.msra.mxu0 %v6382_v44 }
 0x4f8   :  { %v8892_v60 = vpop.f32.mrf.mxu0 }
 0x4f9   :  { %v8895_v48 = vpop.f32.mrf.mxu1  ;;  %v8897_v4 = vpack.c.bf16 %v3741_v13, %v3739_v7  ;;  %v6446_v13 = vor.u32 %v6739_v45, %v6443_v47  ;;  %v6393_v45 = vld [vmem:[%s10063_s10 + $0x90] sm:$0xf] }
 0x4fa   :  { %10318 = vst [vmem:[#allocation112_spill] sm:$0xff] %v8895_v48  ;;  %v3130_v40 = vpop.f32.mrf.mxu3 }
 0x4fb   :  { %10319 = vst [vmem:[#allocation113_spill] sm:$0xff] %v8897_v4  ;;  %v3131_v15 = vadd.f32 %v3130_v40, %v2962_v16  ;;  %v2963_v33 = vpop.f32.mrf.mxu2  ;;  %4564 = vmatpush.bf16.msra.mxu1 %v6446_v13 }
 0x4fc   :  { %v2964_v26 = vadd.f32 %v2963_v33, %v8656_v46  ;;  %v6329_v46 = vld [vmem:[%s10063_s10 + $0x10] sm:$0xf] }
 0x4fd   :  { %v3615_v40 = vadd.f32 %v8433_v28, %v3131_v15  ;;  %v6712_v15 = vld [vmem:[%s10063_s10 + $0x14] sm:$0xf0] }
 0x4fe   :  { %v6330_v44 = vor.u32 %v6712_v15, %v6329_v46  ;;  %v10326_v46 = vld [vmem:[#allocation71_spill] sm:$0xff] }
 0x4ff   :  { %v3743_v4 = vmax.f32 %v3615_v40, 0.0 }
 0x500   :  { %v8905_v34 = vpop.f32.mrf.mxu0  ;;  %3005 = vmatmul.bf16.gmra.mxu2 %v8333_v23 }
 0x501   :  { %v8915_v7 = vpop.f32.mrf.mxu1  ;;  %4063 = vmatpush.bf16.msrb.mxu2 %v6330_v44 }
 0x502   :  { %10320 = vst [vmem:[#allocation114_spill] sm:$0xff] %v8915_v7  ;;  %v3132_v16 = vpop.f32.mrf.mxu3 }
 0x503   :  { %v3133_v48 = vadd.f32 %v3132_v16, %v2964_v26  ;;  %v2966_v42 = vpop.f32.mrf.mxu2  ;;  %3233 = vmatmul.bf16.gmra.mxu0 %v10321_v54 }
 0x504   :  { %3402 = vmatmul.bf16.gmra.mxu1 %v10322_v3 }
 0x505   :  { %v3617_v23 = vadd.f32 %v8433_v28, %v3133_v48  ;;  %v2967_v48 = vadd.f32 %v2966_v42, %v8663_v14 }
 0x507   :  { %v3745_v18 = vmax.f32 %v3617_v23, 0.0  ;;  %3174 = vmatmul.bf16.gmra.mxu3 %v10323_v9  ;;  %v6728_v23 = vld [vmem:[%s10063_s10 + $0x94] sm:$0xf0] }
 0x508   :  { %v8928_v33 = vpop.f32.mrf.mxu0  ;;  %v6394_v26 = vor.u32 %v6728_v23, %v6393_v45 }
 0x509   :  { %v8937_v47 = vpop.f32.mrf.mxu1  ;;  %v8939_v13 = vpack.c.bf16 %v3745_v18, %v3743_v4  ;;  %v10328_v4 = vld [vmem:[#allocation11_spill] sm:$0xff]  ;;  %v10329_v18 = vld [vmem:[#allocation12_spill] sm:$0xff] }
 0x50a   :  { %10324 = vst [vmem:[#allocation9_spill] sm:$0xff] %v8937_v47  ;;  %v3135_v16 = vpop.f32.mrf.mxu3  ;;  %4232 = vmatpush.bf16.msrb.mxu3 %v6394_v26  ;;  %v10330_v26 = vld [vmem:[#allocation73_spill] sm:$0xff]  ;;  %v10335_v47 = vld [vmem:[#allocation14_spill] sm:$0xff] }
 0x50b   :  { %10325 = vst [vmem:[#allocation10_spill] sm:$0xff] %v8939_v13  ;;  %v3136_v40 = vadd.f32 %v3135_v16, %v2967_v48  ;;  %v2968_v54 = vpop.f32.mrf.mxu2 }
 0x50c   :  { %v2969_v15 = vadd.f32 %v2968_v54, %v8676_v24 }
 0x50d   :  { %v3619_v14 = vadd.f32 %v8433_v28, %v3136_v40 }
 0x50f   :  { %v3747_v23 = vmax.f32 %v3619_v14, 0.0  ;;  %v6710_v14 = vld [vmem:[%s10063_s10 + $0x4] sm:$0xf0] }
 0x510   :  { %v8941_v3 = vpop.f32.mrf.mxu0  ;;  %3010 = vmatmul.bf16.gmra.mxu2 %v10326_v46 }
 0x511   :  { %v8945_v7 = vpop.f32.mrf.mxu1 }
 0x512   :  { %10327 = vst [vmem:[#allocation115_spill] sm:$0xff] %v8945_v7  ;;  %v3137_v9 = vpop.f32.mrf.mxu3 }
 0x513   :  { %v3138_v42 = vadd.f32 %v3137_v9, %v2969_v15  ;;  %v2971_v45 = vpop.f32.mrf.mxu2  ;;  %3238 = vmatmul.bf16.gmra.mxu0 %v10328_v4  ;;  %v6321_v4 = vld [vmem:[%s10063_s10] sm:$0xf] }
 0x514   :  { %3407 = vmatmul.bf16.gmra.mxu1 %v10329_v18  ;;  %v2972_v24 = vadd.f32 %v2971_v45, %v8683_v11  ;;  %v10333_v18 = vld [vmem:[#allocation75_spill] sm:$0xff] }
 0x515   :  { %v3621_v44 = vadd.f32 %v8433_v28, %v3138_v42  ;;  %v6322_v42 = vor.u32 %v6710_v14, %v6321_v4  ;;  %v10334_v14 = vld [vmem:[#allocation13_spill] sm:$0xff] }
 0x517   :  { %v3749_v48 = vmax.f32 %v3621_v44, 0.0  ;;  %3179 = vmatmul.bf16.gmra.mxu3 %v10330_v26  ;;  %4064 = vmatpush.bf16.msrb.mxu2 %v6322_v42 }
 0x518   :  { %v8952_v16 = vpop.f32.mrf.mxu0 }
 0x519   :  { %v8955_v54 = vpop.f32.mrf.mxu1  ;;  %v8957_v7 = vpack.c.bf16 %v3749_v48, %v3747_v23  ;;  %v6385_v48 = vld [vmem:[%s10063_s10 + $0x80] sm:$0xf] }
 0x51a   :  { %10331 = vst [vmem:[#allocation11_spill] sm:$0xff] %v8955_v54  ;;  %v3140_v9 = vpop.f32.mrf.mxu3 }
 0x51b   :  { %10332 = vst [vmem:[#allocation12_spill] sm:$0xff] %v8957_v7  ;;  %v3141_v40 = vadd.f32 %v3140_v9, %v2972_v24  ;;  %v2973_v15 = vpop.f32.mrf.mxu2  ;;  %v6726_v24 = vld [vmem:[%s10063_s10 + $0x84] sm:$0xf0]  ;;  %v10336_v7 = vld [vmem:[#allocation77_spill] sm:$0xff] }
 0x51c   :  { %v2974_v45 = vadd.f32 %v2973_v15, %v8702_v50  ;;  %v6386_v42 = vor.u32 %v6726_v24, %v6385_v48 }
 0x51d   :  { %v3623_v9 = vadd.f32 %v8433_v28, %v3141_v40 }
 0x51e   :  { %4233 = vmatpush.bf16.msrb.mxu3 %v6386_v42 }
 0x51f   :  { %v3751_v15 = vmax.f32 %v3623_v9, 0.0 }
 0x520   :  { %3015 = vmatmul.bf16.gmra.mxu2 %v10333_v18  ;;  %v3204_v11 = vpop.f32.mrf.mxu0 }
 0x521   :  { %v3373_v44 = vpop.f32.mrf.mxu1 }
 0x522   :  { %v3142_v23 = vpop.f32.mrf.mxu3 }
 0x523   :  { %v3143_v54 = vadd.f32 %v3142_v23, %v2974_v45  ;;  %v2976_v4 = vpop.f32.mrf.mxu2  ;;  %3243 = vmatmul.bf16.gmra.mxu0 %v10334_v14  ;;  %v10338_v14 = vld [vmem:[#allocation79_spill] sm:$0xff] }
 0x524   :  { %3412 = vmatmul.bf16.gmra.mxu1 %v10335_v47  ;;  %v2977_v46 = vadd.f32 %v2976_v4, %v8721_v57  ;;  %v10339_v57 = vld [vmem:[#allocation42_spill] sm:$0xff]  ;;  %v10340_v4 = vld [vmem:[#allocation41_spill] sm:$0xff] }
 0x525   :  { %v3625_v50 = vadd.f32 %v8433_v28, %v3143_v54 }
 0x527   :  { %v3753_v18 = vmax.f32 %v3625_v50, 0.0  ;;  %3184 = vmatmul.bf16.gmra.mxu3 %v10336_v7 }
 0x528   :  { %v3206_v26 = vpop.f32.mrf.mxu0 }
 0x529   :  { %v3375_v13 = vpop.f32.mrf.mxu1  ;;  %v8979_v31 = vpack.c.bf16 %v3753_v18, %v3751_v15  ;;  %v3207_v18 = vadd.f32 %v3206_v26, %v10339_v57  ;;  %v3205_v15 = vadd.f32 %v3204_v11, %v10340_v4 }
 0x52a   :  { %v3145_v40 = vpop.f32.mrf.mxu3 }
 0x52b   :  { %10337 = vst [vmem:[#allocation13_spill] sm:$0xff] %v8979_v31  ;;  %v3146_v45 = vadd.f32 %v3145_v40, %v2977_v46  ;;  %v2978_v23 = vpop.f32.mrf.mxu2  ;;  %v10341_v31 = vld [vmem:[#allocation81_spill] sm:$0xff]  ;;  %v3374_v7 = vadd.f32 %v3373_v44, %v3205_v15 }
 0x52c   :  { %v2979_v47 = vadd.f32 %v2978_v23, %v8746_v1  ;;  %v3376_v23 = vadd.f32 %v3375_v13, %v3207_v18  ;;  %v6371_v13 = vld [vmem:[%s10063_s10 + $0x68] sm:$0xf0] }
 0x52d   :  { %v3627_v9 = vadd.f32 %v8433_v28, %v3146_v45 }
 0x52f   :  { %v3755_v40 = vmax.f32 %v3627_v9, 0.0 }
 0x530   :  { %3020 = vmatmul.bf16.gmra.mxu2 %v10338_v14  ;;  %v3209_v48 = vpop.f32.mrf.mxu0 }
 0x531   :  { %v3378_v54 = vpop.f32.mrf.mxu1 }
 0x532   :  { %v3147_v24 = vpop.f32.mrf.mxu3 }
 0x533   :  { %v3148_v42 = vadd.f32 %v3147_v24, %v2979_v47  ;;  %v2981_v50 = vpop.f32.mrf.mxu2  ;;  %3248 = vmatmul.bf16.gmra.mxu0 %v7895_v12 }
 0x534   :  { %3417 = vmatmul.bf16.gmra.mxu1 %v7915_v2  ;;  %v2982_v45 = vadd.f32 %v2981_v50, %v8759_v25  ;;  %v6760_v2 = vld [vmem:[%s10064_s9] sm:$0x3]  ;;  %v6721_v25 = vld [vmem:[%s10063_s10 + $0x64] sm:$0xf] }
 0x535   :  { %v3629_v46 = vadd.f32 %v8433_v28, %v3148_v42  ;;  %v8996_v26 = vperm.slane %v6760_v2, 1  ;;  %v6737_v50 = vld [vmem:[%s10063_s10 + $0xe4] sm:$0xf] }
 0x537   :  { %v3757_v14 = vmax.f32 %v3629_v46, 0.0  ;;  %3189 = vmatmul.bf16.gmra.mxu3 %v10341_v31  ;;  %v3542_v42 = vadd.f32 %v8996_v26, %v3376_v23  ;;  %v3540_v57 = vadd.f32 %v8996_v26, %v3374_v7  ;;  %v6435_v7 = vld [vmem:[%s10063_s10 + $0xe8] sm:$0xf0] }
 0x538   :  { %v3211_v1 = vpop.f32.mrf.mxu0  ;;  %v6438_v15 = vor.u32 %v6737_v50, %v6435_v7 }
 0x539   :  { %v3380_v47 = vpop.f32.mrf.mxu1  ;;  %v8991_v24 = vpack.c.bf16 %v3757_v14, %v3755_v40  ;;  %v6374_v14 = vor.u32 %v6721_v25, %v6371_v13  ;;  %v3670_v18 = vmax.f32 %v3542_v42, 0.0  ;;  %v3668_v23 = vmax.f32 %v3540_v57, 0.0  ;;  %v10343_v25 = vld [vmem:[#allocation15_spill] sm:$0xff]  ;;  %v10344_v13 = vld [vmem:[#allocation16_spill] sm:$0xff] }
 0x53a   :  { %v3150_v12 = vpop.f32.mrf.mxu3  ;;  %4565 = vmatpush.bf16.msra.mxu1 %v6438_v15 }
 0x53b   :  { %10342 = vst [vmem:[#allocation14_spill] sm:$0xff] %v8991_v24  ;;  %v3151_v11 = vadd.f32 %v3150_v12, %v2982_v45  ;;  %v2983_v9 = vpop.f32.mrf.mxu2  ;;  %4396 = vmatpush.bf16.msra.mxu0 %v6374_v14  ;;  %v10345_v24 = vld [vmem:[#allocation46_spill] sm:$0xff] }
 0x53c   :  { %v2984_v46 = vadd.f32 %v2983_v9, %v8772_v52  ;;  %v3212_v42 = vadd.f32 %v3211_v1, %v10345_v24  ;;  %v10346_v9 = vld [vmem:[#allocation44_spill] sm:$0xff] }
 0x53d   :  { %v3631_v45 = vadd.f32 %v8433_v28, %v3151_v11  ;;  %v3210_v50 = vadd.f32 %v3209_v48, %v10346_v9 }
 0x53e   :  { %v3381_v57 = vadd.f32 %v3380_v47, %v3212_v42 }
 0x53f   :  { %v3759_v7 = vmax.f32 %v3631_v45, 0.0  ;;  %v10348_v45 = vld [vmem:[#allocation88_spill] sm:$0xff] }
 0x540   :  { %v3214_v44 = vpop.f32.mrf.mxu0  ;;  %4065 = vmatmul.bf16.vlgmr.msrb.gmra.mxu2 %v8450_v20  ;;  %v9017_v20 = vpack.c.bf16 %v3670_v18, %v3668_v23  ;;  %v3379_v18 = vadd.f32 %v3378_v54, %v3210_v50  ;;  %v3546_v1 = vadd.f32 %v8996_v26, %v3381_v57  ;;  %v10349_v54 = vld [vmem:[#allocation17_spill] sm:$0xff]  ;;  %v10350_v50 = vld [vmem:[#allocation19_spill] sm:$0xff] }
 0x541   :  { %v3383_v4 = vpop.f32.mrf.mxu1 }
 0x542   :  { %v3152_v40 = vpop.f32.mrf.mxu3  ;;  %v3544_v24 = vadd.f32 %v8996_v26, %v3379_v18  ;;  %v10352_v18 = vld [vmem:[#allocation48_spill] sm:$0xff] }
 0x543   :  { %v3153_v12 = vadd.f32 %v3152_v40, %v2984_v46  ;;  %v2986_v2 = vpop.f32.mrf.mxu2  ;;  %3253 = vmatmul.bf16.gmra.mxu0 %v10343_v25 }
 0x544   :  { %3422 = vmatmul.bf16.gmra.mxu1 %v10344_v13  ;;  %v2987_v46 = vadd.f32 %v2986_v2, %v8779_v35  ;;  %v3672_v35 = vmax.f32 %v3544_v24, 0.0 }
 0x545   :  { %v3633_v52 = vadd.f32 %v8433_v28, %v3153_v12  ;;  %v3674_v12 = vmax.f32 %v3546_v1, 0.0  ;;  %v3215_v1 = vadd.f32 %v3214_v44, %v10352_v18 }
 0x547   :  { %v3761_v14 = vmax.f32 %v3633_v52, 0.0  ;;  %4234 = vmatmul.bf16.vlgmr.msrb.gmra.mxu3 %v9017_v20 }
 0x548   :  { %v3216_v11 = vpop.f32.mrf.mxu0 }
 0x549   :  { %v3385_v40 = vpop.f32.mrf.mxu1  ;;  %v9024_v15 = vpack.c.bf16 %v3761_v14, %v3759_v7  ;;  %v10351_v14 = vld [vmem:[#allocation50_spill] sm:$0xff] }
 0x54a   :  { %v3155_v25 = vpop.f32.mrf.mxu3  ;;  %v3217_v57 = vadd.f32 %v3216_v11, %v10351_v14 }
 0x54b   :  { %10347 = vst [vmem:[#allocation42_spill] sm:$0xff] %v9024_v15  ;;  %v3156_v23 = vadd.f32 %v3155_v25, %v2987_v46  ;;  %v2988_v13 = vpop.f32.mrf.mxu2  ;;  %v9035_v25 = vpack.c.bf16 %v3674_v12, %v3672_v35 }
 0x54c   :  { %v2989_v52 = vadd.f32 %v2988_v13, %v8790_v41 }
 0x54d   :  { %v3635_v2 = vadd.f32 %v8433_v28, %v3156_v23  ;;  %v3386_v23 = vadd.f32 %v3385_v40, %v3217_v57 }
 0x54f   :  { %v3763_v41 = vmax.f32 %v3635_v2, 0.0  ;;  %v3550_v12 = vadd.f32 %v8996_v26, %v3386_v23  ;;  %v10353_v2 = vld [vmem:[#allocation90_spill] sm:$0xff] }
 0x550   :  { %v3219_v48 = vpop.f32.mrf.mxu0  ;;  %4070 = vmatmul.bf16.gmra.mxu2 %v10348_v45  ;;  %v3384_v45 = vadd.f32 %v3383_v4, %v3215_v1  ;;  %v10354_v4 = vld [vmem:[#allocation20_spill] sm:$0xff]  ;;  %v10355_v1 = vld [vmem:[#allocation22_spill] sm:$0xff] }
 0x551   :  { %v3388_v47 = vpop.f32.mrf.mxu1 }
 0x552   :  { %v3157_v42 = vpop.f32.mrf.mxu3  ;;  %v3548_v35 = vadd.f32 %v8996_v26, %v3384_v45 }
 0x553   :  { %v3158_v9 = vadd.f32 %v3157_v42, %v2989_v52  ;;  %v2991_v7 = vpop.f32.mrf.mxu2  ;;  %3258 = vmatmul.bf16.gmra.mxu0 %v10349_v54 }
 0x554   :  { %3427 = vmatmul.bf16.gmra.mxu1 %v10350_v50  ;;  %v2992_v52 = vadd.f32 %v2991_v7, %v8797_v61  ;;  %v3676_v61 = vmax.f32 %v3548_v35, 0.0 }
 0x555   :  { %v3637_v46 = vadd.f32 %v8433_v28, %v3158_v9  ;;  %v3678_v9 = vmax.f32 %v3550_v12, 0.0 }
 0x557   :  { %v3765_v13 = vmax.f32 %v3637_v46, 0.0  ;;  %4239 = vmatmul.bf16.gmra.mxu3 %v9035_v25 }
 0x558   :  { %v3221_v24 = vpop.f32.mrf.mxu0 }
 0x559   :  { %v3390_v42 = vpop.f32.mrf.mxu1  ;;  %v9040_v54 = vpack.c.bf16 %v3765_v13, %v3763_v41  ;;  %v10356_v13 = vld [vmem:[#allocation54_spill] sm:$0xff] }
 0x55a   :  { %v3160_v50 = vpop.f32.mrf.mxu3  ;;  %v3222_v23 = vadd.f32 %v3221_v24, %v10356_v13 }
 0x55b   :  { %v3161_v11 = vadd.f32 %v3160_v50, %v2992_v52  ;;  %v2993_v14 = vpop.f32.mrf.mxu2  ;;  %v9051_v52 = vpack.c.bf16 %v3678_v9, %v3676_v61  ;;  %v10357_v50 = vld [vmem:[#allocation52_spill] sm:$0xff] }
 0x55c   :  { %v2994_v46 = vadd.f32 %v2993_v14, %v8808_v29  ;;  %v3220_v12 = vadd.f32 %v3219_v48, %v10357_v50  ;;  %v10359_v50 = vld [vmem:[#allocation58_spill] sm:$0xff] }
 0x55d   :  { %v3639_v7 = vadd.f32 %v8433_v28, %v3161_v11  ;;  %v3391_v11 = vadd.f32 %v3390_v42, %v3222_v23 }
 0x55f   :  { %v3767_v29 = vmax.f32 %v3639_v7, 0.0  ;;  %v3554_v9 = vadd.f32 %v8996_v26, %v3391_v11 }
 0x560   :  { %v3224_v44 = vpop.f32.mrf.mxu0  ;;  %4075 = vmatmul.bf16.gmra.mxu2 %v10353_v2  ;;  %v3389_v2 = vadd.f32 %v3388_v47, %v3220_v12 }
 0x561   :  { %v3393_v40 = vpop.f32.mrf.mxu1  ;;  %v3682_v7 = vmax.f32 %v3554_v9, 0.0 }
 0x562   :  { %v3162_v57 = vpop.f32.mrf.mxu3  ;;  %v3552_v61 = vadd.f32 %v8996_v26, %v3389_v2 }
 0x563   :  { %v3163_v18 = vadd.f32 %v3162_v57, %v2994_v46  ;;  %v2996_v41 = vpop.f32.mrf.mxu2  ;;  %3263 = vmatmul.bf16.gmra.mxu0 %v10354_v4 }
 0x564   :  { %3432 = vmatmul.bf16.gmra.mxu1 %v10355_v1  ;;  %v2997_v46 = vadd.f32 %v2996_v41, %v8815_v32  ;;  %v3680_v41 = vmax.f32 %v3552_v61, 0.0 }
 0x565   :  { %v3641_v45 = vadd.f32 %v8433_v28, %v3163_v18 }
 0x567   :  { %v3769_v14 = vmax.f32 %v3641_v45, 0.0  ;;  %4244 = vmatmul.bf16.gmra.mxu3 %v9051_v52 }
 0x568   :  { %v3226_v35 = vpop.f32.mrf.mxu0 }
 0x569   :  { %v3395_v57 = vpop.f32.mrf.mxu1  ;;  %v9056_v4 = vpack.c.bf16 %v3769_v14, %v3767_v29  ;;  %v3227_v2 = vadd.f32 %v3226_v35, %v10359_v50  ;;  %v9069_v29 = vpack.c.bf16 %v3682_v7, %v3680_v41  ;;  %v10360_v14 = vld [vmem:[#allocation56_spill] sm:$0xff] }
 0x56a   :  { %v3165_v1 = vpop.f32.mrf.mxu3 }
 0x56b   :  { %10358 = vst [vmem:[#allocation41_spill] sm:$0xff] %v9056_v4  ;;  %v3166_v24 = vadd.f32 %v3165_v1, %v2997_v46  ;;  %v2998_v13 = vpop.f32.mrf.mxu2 }
 0x56c   :  { %v2999_v18 = vadd.f32 %v2998_v13, %v8832_v53  ;;  %v3225_v53 = vadd.f32 %v3224_v44, %v10360_v14  ;;  %v6719_v44 = vld [vmem:[%s10063_s10 + $0x54] sm:$0xf] }
 0x56d   :  { %v3643_v23 = vadd.f32 %v8433_v28, %v3166_v24  ;;  %v3396_v24 = vadd.f32 %v3395_v57, %v3227_v2  ;;  %v6363_v57 = vld [vmem:[%s10063_s10 + $0x58] sm:$0xf0] }
 0x56e   :  { %v3394_v61 = vadd.f32 %v3393_v40, %v3225_v53  ;;  %v6366_v41 = vor.u32 %v6719_v44, %v6363_v57  ;;  %v6735_v40 = vld [vmem:[%s10063_s10 + $0xd4] sm:$0xf] }
 0x56f   :  { %v3771_v11 = vmax.f32 %v3643_v23, 0.0  ;;  %v3558_v7 = vadd.f32 %v8996_v26, %v3396_v24  ;;  %v6427_v23 = vld [vmem:[%s10063_s10 + $0xd8] sm:$0xf0] }
 0x570   :  { %v3229_v48 = vpop.f32.mrf.mxu0  ;;  %4080 = vmatmul.bf16.gmra.mxu2 %v8537_v0  ;;  %v6430_v2 = vor.u32 %v6735_v40, %v6427_v23  ;;  %4397 = vmatpush.bf16.msra.mxu0 %v6366_v41  ;;  %v10361_v24 = vld [vmem:[#allocation25_spill] sm:$0xff] }
 0x571   :  { %v9062_v42 = vpop.f32.mrf.mxu1 }
 0x572   :  { %v3167_v32 = vpop.f32.mrf.mxu3  ;;  %4566 = vmatpush.bf16.msra.mxu1 %v6430_v2 }
 0x573   :  { %v3168_v45 = vadd.f32 %v3167_v32, %v2999_v18  ;;  %v3001_v47 = vpop.f32.mrf.mxu2  ;;  %3268 = vmatmul.bf16.gmra.mxu0 %v7999_v56  ;;  %v3556_v32 = vadd.f32 %v8996_v26, %v3394_v61 }
 0x574   :  { %3437 = vmatmul.bf16.gmra.mxu1 %v10251_v30  ;;  %v3002_v13 = vadd.f32 %v3001_v47, %v8845_v49 }
 0x575   :  { %v3645_v12 = vadd.f32 %v8433_v28, %v3168_v45  ;;  %v3686_v45 = vmax.f32 %v3558_v7, 0.0  ;;  %v3684_v14 = vmax.f32 %v3556_v32, 0.0 }
 0x577   :  { %v3773_v46 = vmax.f32 %v3645_v12, 0.0  ;;  %4249 = vmatmul.bf16.gmra.mxu3 %v9069_v29  ;;  %v9097_v7 = vpack.c.bf16 %v3686_v45, %v3684_v14 }
 0x578   :  { %v3231_v1 = vpop.f32.mrf.mxu0 }
 0x579   :  { %v3400_v9 = vpop.f32.mrf.mxu1  ;;  %v9074_v56 = vpack.c.bf16 %v3773_v46, %v3771_v11 }
 0x57a   :  { %v3170_v30 = vpop.f32.mrf.mxu3 }
 0x57b   :  { %v3171_v35 = vadd.f32 %v3170_v30, %v3002_v13  ;;  %v3003_v18 = vpop.f32.mrf.mxu2  ;;  %v10362_v13 = vld [vmem:[#allocation62_spill] sm:$0xff] }
 0x57c   :  { %v3004_v47 = vadd.f32 %v3003_v18, %v8856_v51  ;;  %v3232_v30 = vadd.f32 %v3231_v1, %v10362_v13  ;;  %v10363_v51 = vld [vmem:[#allocation60_spill] sm:$0xff] }
 0x57d   :  { %v3647_v53 = vadd.f32 %v8433_v28, %v3171_v35  ;;  %v3230_v18 = vadd.f32 %v3229_v48, %v10363_v51  ;;  %v6748_v35 = vld [vmem:[%s10065_s12 + $0x38] sm:$0xff] }
 0x57e   :  { %v3401_v1 = vadd.f32 %v3400_v9, %v3232_v30  ;;  %5057 = vmatpush.bf16.msra.mxu2 %v6748_v35 }
 0x57f   :  { %v3775_v44 = vmax.f32 %v3647_v53, 0.0  ;;  %v3399_v45 = vadd.f32 %v9062_v42, %v3230_v18  ;;  %v10365_v42 = vld [vmem:[#allocation26_spill] sm:$0xff]  ;;  %v10366_v18 = vld [vmem:[#allocation28_spill] sm:$0xff] }
 0x580   :  { %v3234_v49 = vpop.f32.mrf.mxu0  ;;  %4085 = vmatmul.bf16.gmra.mxu2 %v8557_v62 }
 0x581   :  { %v3403_v50 = vpop.f32.mrf.mxu1  ;;  %v3560_v14 = vadd.f32 %v8996_v26, %v3399_v45 }
 0x582   :  { %v3172_v12 = vpop.f32.mrf.mxu3 }
 0x583   :  { %v3173_v11 = vadd.f32 %v3172_v12, %v3004_v47  ;;  %v3006_v46 = vpop.f32.mrf.mxu2  ;;  %3273 = vmatmul.bf16.gmra.mxu0 %v8014_v22  ;;  %v6756_v22 = vld [vmem:[%s10065_s12 + $0x78] sm:$0xff]  ;;  %v3562_v12 = vadd.f32 %v8996_v26, %v3401_v1  ;;  %v3688_v13 = vmax.f32 %v3560_v14, 0.0  ;;  %v10368_v1 = vld [vmem:[#allocation64_spill] sm:$0xff] }
 0x584   :  { %3442 = vmatmul.bf16.gmra.mxu1 %v10361_v24  ;;  %v3007_v41 = vadd.f32 %v3006_v46, %v8863_v27  ;;  %5226 = vmatpush.bf16.msra.mxu3 %v6756_v22 }
 0x585   :  { %v3649_v61 = vadd.f32 %v8433_v28, %v3173_v11  ;;  %v10364_v11 = vld [vmem:[#allocation94_spill] sm:$0xff]  ;;  %v3690_v9 = vmax.f32 %v3562_v12, 0.0 }
 0x587   :  { %v3777_v57 = vmax.f32 %v3649_v61, 0.0  ;;  %4254 = vmatmul.bf16.gmra.mxu3 %v9097_v7  ;;  %v9120_v22 = vpack.c.bf16 %v3690_v9, %v3688_v13 }
 0x588   :  { %v3236_v32 = vpop.f32.mrf.mxu0 }
 0x589   :  { %v3405_v40 = vpop.f32.mrf.mxu1  ;;  %v9108_v48 = vpack.c.bf16 %v3777_v57, %v3775_v44  ;;  %v10367_v44 = vld [vmem:[#allocation66_spill] sm:$0xff] }
 0x58a   :  { %v3175_v23 = vpop.f32.mrf.mxu3  ;;  %v3237_v57 = vadd.f32 %v3236_v32, %v10367_v44 }
 0x58b   :  { %v3176_v47 = vadd.f32 %v3175_v23, %v3007_v41  ;;  %v3008_v2 = vpop.f32.mrf.mxu2  ;;  %v3235_v41 = vadd.f32 %v3234_v49, %v10368_v1  ;;  %v10371_v1 = vld [vmem:[#allocation31_spill] sm:$0xff] }
 0x58c   :  { %v3009_v27 = vadd.f32 %v3008_v2, %v8874_v21 }
 0x58d   :  { %v3651_v30 = vadd.f32 %v8433_v28, %v3176_v47  ;;  %v3406_v47 = vadd.f32 %v3405_v40, %v3237_v57 }
 0x58f   :  { %v3779_v21 = vmax.f32 %v3651_v30, 0.0  ;;  %v3566_v9 = vadd.f32 %v8996_v26, %v3406_v47  ;;  %v10369_v30 = vld [vmem:[#allocation96_spill] sm:$0xff] }
 0x590   :  { %v3239_v53 = vpop.f32.mrf.mxu0  ;;  %4090 = vmatmul.bf16.gmra.mxu2 %v10364_v11 }
 0x591   :  { %v3408_v46 = vpop.f32.mrf.mxu1 }
 0x592   :  { %v3177_v24 = vpop.f32.mrf.mxu3 }
 0x593   :  { %v3178_v61 = vadd.f32 %v3177_v24, %v3009_v27  ;;  %v3011_v51 = vpop.f32.mrf.mxu2  ;;  %3278 = vmatmul.bf16.gmra.mxu0 %v10365_v42  ;;  %v3404_v24 = vadd.f32 %v3403_v50, %v3235_v41  ;;  %v10370_v50 = vld [vmem:[#allocation29_spill] sm:$0xff]  ;;  %v10372_v41 = vld [vmem:[#allocation70_spill] sm:$0xff] }
 0x594   :  { %3447 = vmatmul.bf16.gmra.mxu1 %v10366_v18  ;;  %v3012_v2 = vadd.f32 %v3011_v51, %v8881_v36 }
 0x595   :  { %v3653_v35 = vadd.f32 %v8433_v28, %v3178_v61  ;;  %v3564_v13 = vadd.f32 %v8996_v26, %v3404_v24  ;;  %v3694_v61 = vmax.f32 %v3566_v9, 0.0 }
 0x597   :  { %v3781_v23 = vmax.f32 %v3653_v35, 0.0  ;;  %4259 = vmatmul.bf16.gmra.mxu3 %v9120_v22  ;;  %v3692_v36 = vmax.f32 %v3564_v13, 0.0 }
 0x598   :  { %v3241_v45 = vpop.f32.mrf.mxu0 }
 0x599   :  { %v3410_v12 = vpop.f32.mrf.mxu1  ;;  %v9125_v14 = vpack.c.bf16 %v3781_v23, %v3779_v21  ;;  %v3242_v21 = vadd.f32 %v3241_v45, %v10372_v41  ;;  %v9136_v47 = vpack.c.bf16 %v3694_v61, %v3692_v36 }
 0x59a   :  { %v3180_v27 = vpop.f32.mrf.mxu3 }
 0x59b   :  { %v3181_v32 = vadd.f32 %v3180_v27, %v3012_v2  ;;  %v3013_v42 = vpop.f32.mrf.mxu2  ;;  %v10373_v2 = vld [vmem:[#allocation68_spill] sm:$0xff] }
 0x59c   :  { %v3014_v18 = vadd.f32 %v3013_v42, %v8892_v60  ;;  %v3240_v27 = vadd.f32 %v3239_v53, %v10373_v2 }
 0x59d   :  { %v3655_v51 = vadd.f32 %v8433_v28, %v3181_v32  ;;  %v3411_v32 = vadd.f32 %v3410_v12, %v3242_v21 }
 0x59f   :  { %v3783_v60 = vmax.f32 %v3655_v51, 0.0  ;;  %v3570_v61 = vadd.f32 %v8996_v26, %v3411_v32 }
 0x5a0   :  { %v3244_v49 = vpop.f32.mrf.mxu0  ;;  %4095 = vmatmul.bf16.gmra.mxu2 %v10369_v30 }
 0x5a1   :  { %v3413_v40 = vpop.f32.mrf.mxu1  ;;  %v3698_v51 = vmax.f32 %v3570_v61, 0.0 }
 0x5a2   :  { %v3182_v44 = vpop.f32.mrf.mxu3 }
 0x5a3   :  { %v3183_v57 = vadd.f32 %v3182_v44, %v3014_v18  ;;  %v3016_v35 = vpop.f32.mrf.mxu2  ;;  %3283 = vmatmul.bf16.gmra.mxu0 %v10370_v50  ;;  %v3409_v50 = vadd.f32 %v3408_v46, %v3240_v27 }
 0x5a4   :  { %3452 = vmatmul.bf16.gmra.mxu1 %v10371_v1  ;;  %v3017_v9 = vadd.f32 %v3016_v35, %v8905_v34 }
 0x5a5   :  { %v3657_v23 = vadd.f32 %v8433_v28, %v3183_v57  ;;  %v3568_v36 = vadd.f32 %v8996_v26, %v3409_v50 }
 0x5a7   :  { %v3785_v24 = vmax.f32 %v3657_v23, 0.0  ;;  %4264 = vmatmul.bf16.gmra.mxu3 %v9136_v47  ;;  %v3696_v35 = vmax.f32 %v3568_v36, 0.0  ;;  %v10374_v23 = vld [vmem:[#allocation74_spill] sm:$0xff] }
 0x5a8   :  { %v3246_v42 = vpop.f32.mrf.mxu0 }
 0x5a9   :  { %v3415_v13 = vpop.f32.mrf.mxu1  ;;  %v9141_v18 = vpack.c.bf16 %v3785_v24, %v3783_v60  ;;  %v3247_v2 = vadd.f32 %v3246_v42, %v10374_v23  ;;  %v9154_v60 = vpack.c.bf16 %v3698_v51, %v3696_v35  ;;  %v10375_v24 = vld [vmem:[#allocation72_spill] sm:$0xff]  ;;  %v6419_v35 = vld [vmem:[%s10063_s10 + $0xc8] sm:$0xf0] }
 0x5aa   :  { %v3185_v44 = vpop.f32.mrf.mxu3 }
 0x5ab   :  { %v3186_v45 = vadd.f32 %v3185_v44, %v3017_v9  ;;  %v3018_v1 = vpop.f32.mrf.mxu2  ;;  %v3416_v50 = vadd.f32 %v3415_v13, %v3247_v2  ;;  %v6355_v13 = vld [vmem:[%s10063_s10 + $0x48] sm:$0xf0] }
 0x5ac   :  { %v3019_v57 = vadd.f32 %v3018_v1, %v8928_v33  ;;  %v3245_v33 = vadd.f32 %v3244_v49, %v10375_v24  ;;  %v6717_v49 = vld [vmem:[%s10063_s10 + $0x44] sm:$0xf] }
 0x5ad   :  { %v3659_v41 = vadd.f32 %v8433_v28, %v3186_v45  ;;  %v3574_v51 = vadd.f32 %v8996_v26, %v3416_v50 }
 0x5ae   :  { %v3414_v61 = vadd.f32 %v3413_v40, %v3245_v33  ;;  %v6733_v40 = vld [vmem:[%s10063_s10 + $0xc4] sm:$0xf] }
 0x5af   :  { %v3787_v32 = vmax.f32 %v3659_v41, 0.0  ;;  %v3702_v41 = vmax.f32 %v3574_v51, 0.0  ;;  %v6422_v23 = vor.u32 %v6733_v40, %v6419_v35 }
 0x5b0   :  { %v3249_v53 = vpop.f32.mrf.mxu0  ;;  %4100 = vmatmul.bf16.gmra.mxu2 %v8641_v19 }
 0x5b1   :  { %v9147_v12 = vpop.f32.mrf.mxu1  ;;  %4567 = vmatpush.bf16.msra.mxu1 %v6422_v23 }
 0x5b2   :  { %v3187_v34 = vpop.f32.mrf.mxu3 }
 0x5b3   :  { %v3188_v21 = vadd.f32 %v3187_v34, %v3019_v57  ;;  %v3021_v46 = vpop.f32.mrf.mxu2  ;;  %3288 = vmatmul.bf16.gmra.mxu0 %v8071_v58  ;;  %v3572_v57 = vadd.f32 %v8996_v26, %v3414_v61  ;;  %v6358_v34 = vor.u32 %v6717_v49, %v6355_v13  ;;  %v10379_v49 = vld [vmem:[#allocation76_spill] sm:$0xff] }
 0x5b4   :  { %3457 = vmatmul.bf16.gmra.mxu1 %v10269_v55  ;;  %v3022_v45 = vadd.f32 %v3021_v46, %v8941_v3  ;;  %v3250_v13 = vadd.f32 %v3249_v53, %v10379_v49 }
 0x5b5   :  { %v3661_v27 = vadd.f32 %v8433_v28, %v3188_v21  ;;  %4398 = vmatpush.bf16.msra.mxu0 %v6358_v34  ;;  %v3700_v24 = vmax.f32 %v3572_v57, 0.0 }
 0x5b6   :  { %v3419_v23 = vadd.f32 %v9147_v12, %v3250_v13  ;;  %v10381_v12 = vld [vmem:[#allocation38_spill] sm:$0xff] }
 0x5b7   :  { %v3789_v9 = vmax.f32 %v3661_v27, 0.0  ;;  %4269 = vmatmul.bf16.gmra.mxu3 %v9154_v60  ;;  %v3891_v27 = vld [vmem:[%s10066_s11] sm:$0x3]  ;;  %v9187_v51 = vpack.c.bf16 %v3702_v41, %v3700_v24 }
 0x5b8   :  { %v3251_v44 = vpop.f32.mrf.mxu0  ;;  %v10382_v13 = vld [vmem:[#allocation82_spill] sm:$0xff] }
 0x5b9   :  { %v3420_v1 = vpop.f32.mrf.mxu1  ;;  %v9159_v58 = vpack.c.bf16 %v3789_v9, %v3787_v32  ;;  %v10376_v9 = vld [vmem:[#allocation34_spill] sm:$0xff] }
 0x5ba   :  { %v3190_v55 = vpop.f32.mrf.mxu3 }
 0x5bb   :  { %v3191_v42 = vadd.f32 %v3190_v55, %v3022_v45  ;;  %v3023_v36 = vpop.f32.mrf.mxu2  ;;  %v10377_v45 = vld [vmem:[#allocation35_spill] sm:$0xff]  ;;  %v10378_v55 = vld [vmem:[#allocation78_spill] sm:$0xff] }
 0x5bc   :  { %v3024_v21 = vadd.f32 %v3023_v36, %v8952_v16  ;;  %v3252_v16 = vadd.f32 %v3251_v44, %v10378_v55  ;;  %v9185_v36 = vperm.slane %v3891_v27, 0  ;;  %v6755_v44 = vld [vmem:[%s10065_s12 + $0x70] sm:$0xff] }
 0x5bd   :  { %v3663_v33 = vadd.f32 %v8433_v28, %v3191_v42  ;;  %v6747_v42 = vld [vmem:[%s10065_s12 + $0x30] sm:$0xff]  ;;  %5227 = vmatpush.bf16.msra.mxu3 %v6755_v44 }
 0x5be   :  { %5058 = vmatpush.bf16.msra.mxu2 %v6747_v42 }
 0x5bf   :  { %v3791_v57 = vmax.f32 %v3663_v33, 0.0  ;;  %v3576_v33 = vadd.f32 %v8996_v26, %v3419_v23 }
 0x5c0   :  { %v3254_v3 = vpop.f32.mrf.mxu0  ;;  %4105 = vmatmul.bf16.gmra.mxu2 %v8661_v39 }
 0x5c1   :  { %v3423_v46 = vpop.f32.mrf.mxu1  ;;  %v3704_v55 = vmax.f32 %v3576_v33, 0.0 }
 0x5c2   :  { %v3192_v2 = vpop.f32.mrf.mxu3 }
 0x5c3   :  { %v3193_v32 = vadd.f32 %v3192_v2, %v3024_v21  ;;  %3293 = vmatmul.bf16.gmra.mxu0 %v10376_v9  ;;  %v4066_v50 = vpop.f32.mrf.mxu2 }
 0x5c4   :  { %3462 = vmatmul.bf16.gmra.mxu1 %v10377_v45  ;;  %v4067_v35 = vadd.f32 %v4066_v50, %v9185_v36 }
 0x5c5   :  { %v3665_v61 = vadd.f32 %v8433_v28, %v3193_v32  ;;  %v3421_v28 = vadd.f32 %v3420_v1, %v3252_v16 }
 0x5c7   :  { %v3793_v34 = vmax.f32 %v3665_v61, 0.0  ;;  %4274 = vmatmul.bf16.gmra.mxu3 %v9187_v51  ;;  %v3578_v24 = vadd.f32 %v8996_v26, %v3421_v28  ;;  %v10380_v61 = vld [vmem:[#allocation36_spill] sm:$0xff] }
 0x5c8   :  { %v3256_v40 = vpop.f32.mrf.mxu0  ;;  %v10383_v28 = vld [vmem:[#allocation80_spill] sm:$0xff] }
 0x5c9   :  { %v3425_v41 = vpop.f32.mrf.mxu1  ;;  %v9198_v53 = vpack.c.bf16 %v3793_v34, %v3791_v57  ;;  %v3706_v1 = vmax.f32 %v3578_v24, 0.0  ;;  %v3257_v57 = vadd.f32 %v3256_v40, %v10382_v13 }
 0x5ca   :  { %v4235_v21 = vpop.f32.mrf.mxu3 }
 0x5cb   :  { %v4236_v2 = vadd.f32 %v4235_v21, %v4067_v35  ;;  %v4068_v27 = vpop.f32.mrf.mxu2  ;;  %v9208_v44 = vpack.c.bf16 %v3706_v1, %v3704_v55  ;;  %v3255_v35 = vadd.f32 %v3254_v3, %v10383_v28 }
 0x5cc   :  { %v4069_v9 = vadd.f32 %v4068_v27, %v9185_v36  ;;  %v3426_v27 = vadd.f32 %v3425_v41, %v3257_v57 }
 0x5cd   :  { %v4733_v34 = vmax.f32 %v4236_v2, 0.0 }
 0x5ce   :  { %v3582_v40 = vadd.f32 %v8996_v26, %v3426_v27 }
 0x5d0   :  { %v3259_v32 = vpop.f32.mrf.mxu0  ;;  %4110 = vmatmul.bf16.gmra.mxu2 %v8681_v37  ;;  %v3710_v3 = vmax.f32 %v3582_v40, 0.0 }
 0x5d1   :  { %v3428_v50 = vpop.f32.mrf.mxu1 }
 0x5d2   :  { %v4237_v45 = vpop.f32.mrf.mxu3 }
 0x5d3   :  { %v4238_v16 = vadd.f32 %v4237_v45, %v4069_v9  ;;  %3298 = vmatmul.bf16.gmra.mxu0 %v10380_v61  ;;  %v4071_v49 = vpop.f32.mrf.mxu2  ;;  %v3424_v45 = vadd.f32 %v3423_v46, %v3255_v35  ;;  %v10386_v46 = vld [vmem:[#allocation40_spill] sm:$0xff] }
 0x5d4   :  { %3467 = vmatmul.bf16.gmra.mxu1 %v10381_v12  ;;  %v4072_v24 = vadd.f32 %v4071_v49, %v9185_v36  ;;  %v10385_v49 = vld [vmem:[#allocation39_spill] sm:$0xff] }
 0x5d5   :  { %v4735_v42 = vmax.f32 %v4238_v16, 0.0  ;;  %v3580_v2 = vadd.f32 %v8996_v26, %v3424_v45 }
 0x5d7   :  { %v9211_v21 = vpack.c.bf16 %v4735_v42, %v4733_v34  ;;  %4279 = vmatmul.bf16.gmra.mxu3 %v9208_v44  ;;  %v3708_v41 = vmax.f32 %v3580_v2, 0.0  ;;  %v10387_v42 = vld [vmem:[#allocation85_spill] sm:$0xff] }
 0x5d8   :  { %v3261_v23 = vpop.f32.mrf.mxu0 }
 0x5d9   :  { %10384 = vst [vmem:[#allocation81_spill] sm:$0xff] %v9211_v21  ;;  %v3430_v33 = vpop.f32.mrf.mxu1  ;;  %v3262_v28 = vadd.f32 %v3261_v23, %v10387_v42 }
 0x5da   :  { %v4240_v9 = vpop.f32.mrf.mxu3 }
 0x5db   :  { %v4241_v61 = vadd.f32 %v4240_v9, %v4072_v24  ;;  %v4073_v12 = vpop.f32.mrf.mxu2  ;;  %v9222_v24 = vpack.c.bf16 %v3710_v3, %v3708_v41  ;;  %v10388_v9 = vld [vmem:[#allocation83_spill] sm:$0xff]  ;;  %v3431_v2 = vadd.f32 %v3430_v33, %v3262_v28 }
 0x5dc   :  { %v4074_v55 = vadd.f32 %v4073_v12, %v9185_v36  ;;  %v3260_v45 = vadd.f32 %v3259_v32, %v10388_v9 }
 0x5dd   :  { %v4737_v35 = vmax.f32 %v4241_v61, 0.0  ;;  %v3586_v23 = vadd.f32 %v8996_v26, %v3431_v2 }
 0x5df   :  { %v3714_v32 = vmax.f32 %v3586_v23, 0.0 }
 0x5e0   :  { %v3264_v1 = vpop.f32.mrf.mxu0  ;;  %4115 = vmatmul.bf16.gmra.mxu2 %v8707_v59  ;;  %v3429_v59 = vadd.f32 %v3428_v50, %v3260_v45  ;;  %v10389_v50 = vld [vmem:[#allocation87_spill] sm:$0xff]  ;;  %v10390_v45 = vld [vmem:[#allocation86_spill] sm:$0xff] }
 0x5e1   :  { %v3433_v16 = vpop.f32.mrf.mxu1  ;;  %v3265_v2 = vadd.f32 %v3264_v1, %v10390_v45  ;;  %v6715_v1 = vld [vmem:[%s10063_s10 + $0x34] sm:$0xf] }
 0x5e2   :  { %v4242_v13 = vpop.f32.mrf.mxu3  ;;  %v3584_v61 = vadd.f32 %v8996_v26, %v3429_v59 }
 0x5e3   :  { %v4243_v57 = vadd.f32 %v4242_v13, %v4074_v55  ;;  %3303 = vmatmul.bf16.gmra.mxu0 %v10385_v49  ;;  %v4076_v34 = vpop.f32.mrf.mxu2 }
 0x5e4   :  { %3472 = vmatmul.bf16.gmra.mxu1 %v10386_v46  ;;  %v4077_v55 = vadd.f32 %v4076_v34, %v9185_v36  ;;  %v3712_v33 = vmax.f32 %v3584_v61, 0.0 }
 0x5e5   :  { %v4739_v27 = vmax.f32 %v4243_v57, 0.0 }
 0x5e6   :  { %v9236_v59 = vpack.c.bf16 %v3714_v32, %v3712_v33  ;;  %v6347_v32 = vld [vmem:[%s10063_s10 + $0x38] sm:$0xf0] }
 0x5e7   :  { %4284 = vmatmul.bf16.gmra.mxu3 %v9222_v24  ;;  %v9226_v12 = vpack.c.bf16 %v4739_v27, %v4737_v35  ;;  %v6350_v33 = vor.u32 %v6715_v1, %v6347_v32 }
 0x5e8   :  { %v3266_v40 = vpop.f32.mrf.mxu0 }
 0x5e9   :  { %v3435_v13 = vpop.f32.mrf.mxu1  ;;  %v3267_v35 = vadd.f32 %v3266_v40, %v10389_v50  ;;  %4399 = vmatpush.bf16.msra.mxu0 %v6350_v33 }
 0x5ea   :  { %v4245_v49 = vpop.f32.mrf.mxu3 }
 0x5eb   :  { %v4246_v46 = vadd.f32 %v4245_v49, %v4077_v55  ;;  %v4078_v21 = vpop.f32.mrf.mxu2  ;;  %v3436_v49 = vadd.f32 %v3435_v13, %v3267_v35 }
 0x5ec   :  { %v4079_v41 = vadd.f32 %v4078_v21, %v9185_v36 }
 0x5ed   :  { %v4741_v27 = vmax.f32 %v4246_v46, 0.0  ;;  %v3590_v40 = vadd.f32 %v8996_v26, %v3436_v49 }
 0x5f0   :  { %v3269_v3 = vpop.f32.mrf.mxu0  ;;  %4120 = vmatmul.bf16.gmra.mxu2 %v8757_v38 }
 0x5f1   :  { %v3438_v57 = vpop.f32.mrf.mxu1 }
 0x5f2   :  { %v4247_v42 = vpop.f32.mrf.mxu3 }
 0x5f3   :  { %v4248_v28 = vadd.f32 %v4247_v42, %v4079_v41  ;;  %3308 = vmatmul.bf16.gmra.mxu0 %v8155_v5  ;;  %v4081_v34 = vpop.f32.mrf.mxu2  ;;  %v3434_v41 = vadd.f32 %v3433_v16, %v3265_v2  ;;  %v6731_v16 = vld [vmem:[%s10063_s10 + $0xb4] sm:$0xf] }
 0x5f4   :  { %3477 = vmatmul.bf16.gmra.mxu1 %v8178_v43  ;;  %v4082_v23 = vadd.f32 %v4081_v34, %v9185_v36  ;;  %v3718_v34 = vmax.f32 %v3590_v40, 0.0  ;;  %v10393_v40 = vld [vmem:[#allocation89_spill] sm:$0xff] }
 0x5f5   :  { %v4743_v9 = vmax.f32 %v4248_v28, 0.0  ;;  %v3588_v46 = vadd.f32 %v8996_v26, %v3434_v41  ;;  %v6411_v28 = vld [vmem:[%s10063_s10 + $0xb8] sm:$0xf0] }
 0x5f7   :  { %4289 = vmatmul.bf16.gmra.mxu3 %v9236_v59  ;;  %v9240_v21 = vpack.c.bf16 %v4743_v9, %v4741_v27  ;;  %v6414_v27 = vor.u32 %v6731_v16, %v6411_v28  ;;  %v3716_v45 = vmax.f32 %v3588_v46, 0.0  ;;  %v6746_v46 = vld [vmem:[%s10065_s12 + $0x28] sm:$0xff] }
 0x5f8   :  { %v3271_v55 = vpop.f32.mrf.mxu0  ;;  %5059 = vmatpush.bf16.msra.mxu2 %v6746_v46 }
 0x5f9   :  { %v3440_v5 = vpop.f32.mrf.mxu1  ;;  %4568 = vmatpush.bf16.msra.mxu1 %v6414_v27  ;;  %v9262_v32 = vpack.c.bf16 %v3718_v34, %v3716_v45 }
 0x5fa   :  { %v4250_v61 = vpop.f32.mrf.mxu3 }
 0x5fb   :  { %v4251_v43 = vadd.f32 %v4250_v61, %v4082_v23  ;;  %v4083_v42 = vpop.f32.mrf.mxu2  ;;  %v10391_v23 = vld [vmem:[#allocation18_spill] sm:$0xff]  ;;  %10392 = vst [vmem:[#allocation15_spill] sm:$0xff] %v9262_v32 }
 0x5fc   :  { %v4084_v50 = vadd.f32 %v4083_v42, %v9185_v36  ;;  %v3272_v61 = vadd.f32 %v3271_v55, %v10391_v23  ;;  %v3270_v42 = vadd.f32 %v3269_v3, %v10393_v40  ;;  %v10396_v40 = vld [vmem:[#allocation47_spill] sm:$0xff] }
 0x5fd   :  { %v4745_v41 = vmax.f32 %v4251_v43, 0.0 }
 0x5fe   :  { %v3441_v55 = vadd.f32 %v3440_v5, %v3272_v61  ;;  %v3439_v28 = vadd.f32 %v3438_v57, %v3270_v42  ;;  %v10397_v57 = vld [vmem:[#allocation49_spill] sm:$0xff] }
 0x5ff   :  { %v10398_v42 = vld [vmem:[#allocation21_spill] sm:$0xff] }
 0x600   :  { %v3274_v13 = vpop.f32.mrf.mxu0  ;;  %4125 = vmatmul.bf16.gmra.mxu2 %v8777_v63  ;;  %v3594_v27 = vadd.f32 %v8996_v26, %v3441_v55 }
 0x601   :  { %v3443_v35 = vpop.f32.mrf.mxu1 }
 0x602   :  { %v4252_v9 = vpop.f32.mrf.mxu3  ;;  %v3722_v23 = vmax.f32 %v3594_v27, 0.0 }
 0x603   :  { %v4253_v2 = vadd.f32 %v4252_v9, %v4084_v50  ;;  %3313 = vmatmul.bf16.gmra.mxu0 %v10284_v17  ;;  %v4086_v49 = vpop.f32.mrf.mxu2  ;;  %v6754_v17 = vld [vmem:[%s10065_s12 + $0x68] sm:$0xff]  ;;  %v3592_v9 = vadd.f32 %v8996_v26, %v3439_v28 }
 0x604   :  { %3482 = vmatmul.bf16.gmra.mxu1 %v10286_v10  ;;  %v4087_v43 = vadd.f32 %v4086_v49, %v9185_v36  ;;  %5228 = vmatpush.bf16.msra.mxu3 %v6754_v17  ;;  %v10400_v28 = vld [vmem:[#allocation91_spill] sm:$0xff] }
 0x605   :  { %v4747_v1 = vmax.f32 %v4253_v2, 0.0  ;;  %v10395_v2 = vld [vmem:[#allocation106_spill] sm:$0xff]  ;;  %v3720_v49 = vmax.f32 %v3592_v9, 0.0 }
 0x607   :  { %4294 = vmatmul.bf16.gmra.mxu3 %v9262_v32  ;;  %v9272_v33 = vpack.c.bf16 %v4747_v1, %v4745_v41 }
 0x608   :  { %v3276_v10 = vpop.f32.mrf.mxu0 }
 0x609   :  { %10394 = vst [vmem:[#allocation16_spill] sm:$0xff] %v9272_v33  ;;  %v3445_v16 = vpop.f32.mrf.mxu1  ;;  %v3277_v17 = vadd.f32 %v3276_v10, %v10398_v42 }
 0x60a   :  { %v4255_v3 = vpop.f32.mrf.mxu3 }
 0x60b   :  { %v4256_v34 = vadd.f32 %v4255_v3, %v4087_v43  ;;  %v4088_v50 = vpop.f32.mrf.mxu2  ;;  %v9282_v3 = vpack.c.bf16 %v3722_v23, %v3720_v49  ;;  %v3446_v9 = vadd.f32 %v3445_v16, %v3277_v17  ;;  %v10402_v49 = vld [vmem:[#allocation108_spill] sm:$0xff] }
 0x60c   :  { %v4089_v41 = vadd.f32 %v4088_v50, %v9185_v36 }
 0x60d   :  { %v4749_v55 = vmax.f32 %v4256_v34, 0.0  ;;  %10399 = vst [vmem:[#allocation46_spill] sm:$0xff] %v9282_v3  ;;  %v3598_v10 = vadd.f32 %v8996_v26, %v3446_v9 }
 0x610   :  { %v3279_v45 = vpop.f32.mrf.mxu0  ;;  %4130 = vmatmul.bf16.gmra.mxu2 %v10395_v2  ;;  %v3275_v2 = vadd.f32 %v3274_v13, %v10400_v28  ;;  %v3726_v13 = vmax.f32 %v3598_v10, 0.0 }
 0x611   :  { %v3448_v5 = vpop.f32.mrf.mxu1 }
 0x612   :  { %v4257_v61 = vpop.f32.mrf.mxu3  ;;  %v3444_v33 = vadd.f32 %v3443_v35, %v3275_v2  ;;  %v10404_v35 = vld [vmem:[#allocation53_spill] sm:$0xff]  ;;  %v10405_v2 = vld [vmem:[#allocation23_spill] sm:$0xff] }
 0x613   :  { %v4258_v1 = vadd.f32 %v4257_v61, %v4089_v41  ;;  %3318 = vmatmul.bf16.gmra.mxu0 %v10396_v40  ;;  %v4091_v46 = vpop.f32.mrf.mxu2 }
 0x614   :  { %3487 = vmatmul.bf16.gmra.mxu1 %v10397_v57  ;;  %v4092_v41 = vadd.f32 %v4091_v46, %v9185_v36  ;;  %v3596_v34 = vadd.f32 %v8996_v26, %v3444_v33  ;;  %v10403_v46 = vld [vmem:[#allocation51_spill] sm:$0xff] }
 0x615   :  { %v4751_v43 = vmax.f32 %v4258_v1, 0.0 }
 0x616   :  { %v3724_v16 = vmax.f32 %v3596_v34, 0.0 }
 0x617   :  { %4299 = vmatmul.bf16.gmra.mxu3 %v9282_v3  ;;  %v9286_v50 = vpack.c.bf16 %v4751_v43, %v4749_v55 }
 0x618   :  { %v3281_v27 = vpop.f32.mrf.mxu0  ;;  %v9296_v33 = vpack.c.bf16 %v3726_v13, %v3724_v16 }
 0x619   :  { %10401 = vst [vmem:[#allocation44_spill] sm:$0xff] %v9286_v50  ;;  %v3450_v61 = vpop.f32.mrf.mxu1  ;;  %v3282_v28 = vadd.f32 %v3281_v27, %v10405_v2 }
 0x61a   :  { %v4260_v40 = vpop.f32.mrf.mxu3 }
 0x61b   :  { %v4261_v57 = vadd.f32 %v4260_v40, %v4092_v41  ;;  %v4093_v32 = vpop.f32.mrf.mxu2  ;;  %v10406_v40 = vld [vmem:[#allocation92_spill] sm:$0xff]  ;;  %v3451_v34 = vadd.f32 %v3450_v61, %v3282_v28 }
 0x61c   :  { %v4094_v1 = vadd.f32 %v4093_v32, %v9185_v36 }
 0x61d   :  { %v4753_v9 = vmax.f32 %v4261_v57, 0.0  ;;  %v3602_v27 = vadd.f32 %v8996_v26, %v3451_v34  ;;  %v10410_v34 = vld [vmem:[#allocation93_spill] sm:$0xff] }
 0x620   :  { %v3284_v23 = vpop.f32.mrf.mxu0  ;;  %4135 = vmatmul.bf16.gmra.mxu2 %v10402_v49  ;;  %v3280_v49 = vadd.f32 %v3279_v45, %v10406_v40  ;;  %v3730_v45 = vmax.f32 %v3602_v27, 0.0 }
 0x621   :  { %v3453_v42 = vpop.f32.mrf.mxu1 }
 0x622   :  { %v4262_v55 = vpop.f32.mrf.mxu3  ;;  %v3449_v50 = vadd.f32 %v3448_v5, %v3280_v49  ;;  %v10407_v5 = vld [vmem:[#allocation57_spill] sm:$0xff]  ;;  %v10408_v49 = vld [vmem:[#allocation24_spill] sm:$0xff] }
 0x623   :  { %v4263_v17 = vadd.f32 %v4262_v55, %v4094_v1  ;;  %3323 = vmatmul.bf16.gmra.mxu0 %v10403_v46  ;;  %v4096_v43 = vpop.f32.mrf.mxu2 }
 0x624   :  { %3492 = vmatmul.bf16.gmra.mxu1 %v10404_v35  ;;  %v4097_v1 = vadd.f32 %v4096_v43, %v9185_v36  ;;  %v3600_v57 = vadd.f32 %v8996_v26, %v3449_v50 }
 0x625   :  { %v4755_v41 = vmax.f32 %v4263_v17, 0.0 }
 0x626   :  { %v3728_v61 = vmax.f32 %v3600_v57, 0.0 }
 0x627   :  { %4304 = vmatmul.bf16.gmra.mxu3 %v9296_v33  ;;  %v9300_v32 = vpack.c.bf16 %v4755_v41, %v4753_v9 }
 0x628   :  { %v3286_v10 = vpop.f32.mrf.mxu0  ;;  %v9310_v50 = vpack.c.bf16 %v3730_v45, %v3728_v61  ;;  %v6339_v45 = vld [vmem:[%s10063_s10 + $0x28] sm:$0xf0]  ;;  %v10412_v61 = vld [vmem:[#allocation6_spill] sm:$0xff] }
 0x629   :  { %v3455_v55 = vpop.f32.mrf.mxu1  ;;  %v3287_v9 = vadd.f32 %v3286_v10, %v10408_v49 }
 0x62a   :  { %v4265_v46 = vpop.f32.mrf.mxu3  ;;  %10409 = vst [vmem:[#allocation17_spill] sm:$0xff] %v9310_v50 }
 0x62b   :  { %v4266_v35 = vadd.f32 %v4265_v46, %v4097_v1  ;;  %v4098_v3 = vpop.f32.mrf.mxu2  ;;  %v3285_v1 = vadd.f32 %v3284_v23, %v10410_v34  ;;  %v3456_v27 = vadd.f32 %v3455_v55, %v3287_v9  ;;  %v6713_v23 = vld [vmem:[%s10063_s10 + $0x24] sm:$0xf] }
 0x62c   :  { %v4099_v16 = vadd.f32 %v4098_v3, %v9185_v36 }
 0x62d   :  { %v4757_v41 = vmax.f32 %v4266_v35, 0.0  ;;  %v3606_v10 = vadd.f32 %v8996_v26, %v3456_v27 }
 0x62f   :  { %v3734_v49 = vmax.f32 %v3606_v10, 0.0  ;;  %v10417_v10 = vld [vmem:[#allocation95_spill] sm:$0xff] }
 0x630   :  { %v3289_v13 = vpop.f32.mrf.mxu0  ;;  %4140 = vmatmul.bf16.gmra.mxu2 %v8843_v8 }
 0x631   :  { %v3458_v17 = vpop.f32.mrf.mxu1 }
 0x632   :  { %v4267_v2 = vpop.f32.mrf.mxu3 }
 0x633   :  { %v4268_v28 = vadd.f32 %v4267_v2, %v4099_v16  ;;  %3328 = vmatmul.bf16.gmra.mxu0 %v10301_v6  ;;  %v4101_v43 = vpop.f32.mrf.mxu2  ;;  %v3454_v2 = vadd.f32 %v3453_v42, %v3285_v1  ;;  %v6729_v42 = vld [vmem:[%s10063_s10 + $0xa4] sm:$0xf] }
 0x634   :  { %3497 = vmatmul.bf16.gmra.mxu1 %v10407_v5  ;;  %v4102_v57 = vadd.f32 %v4101_v43, %v9185_v36  ;;  %v6403_v43 = vld [vmem:[%s10063_s10 + $0xa8] sm:$0xf0] }
 0x635   :  { %v4759_v40 = vmax.f32 %v4268_v28, 0.0  ;;  %v3604_v35 = vadd.f32 %v8996_v26, %v3454_v2  ;;  %v6342_v28 = vor.u32 %v6713_v23, %v6339_v45  ;;  %v10414_v2 = vld [vmem:[#allocation61_spill] sm:$0xff]  ;;  %v10415_v23 = vld [vmem:[#allocation27_spill] sm:$0xff] }
 0x637   :  { %4309 = vmatmul.bf16.gmra.mxu3 %v9310_v50  ;;  %v9314_v3 = vpack.c.bf16 %v4759_v40, %v4757_v41  ;;  %v6406_v40 = vor.u32 %v6729_v42, %v6403_v43  ;;  %4400 = vmatpush.bf16.msra.mxu0 %v6342_v28  ;;  %v3732_v1 = vmax.f32 %v3604_v35, 0.0  ;;  %v6745_v35 = vld [vmem:[%s10065_s12 + $0x20] sm:$0xff] }
 0x638   :  { %v3291_v46 = vpop.f32.mrf.mxu0  ;;  %v6753_v28 = vld [vmem:[%s10065_s12 + $0x60] sm:$0xff]  ;;  %5060 = vmatpush.bf16.msra.mxu2 %v6745_v35 }
 0x639   :  { %10411 = vst [vmem:[#allocation19_spill] sm:$0xff] %v9314_v3  ;;  %v3460_v6 = vpop.f32.mrf.mxu1  ;;  %4569 = vmatpush.bf16.msra.mxu1 %v6406_v40  ;;  %v3292_v45 = vadd.f32 %v3291_v46, %v10415_v23  ;;  %v9336_v50 = vpack.c.bf16 %v3734_v49, %v3732_v1  ;;  %5229 = vmatpush.bf16.msra.mxu3 %v6753_v28 }
 0x63a   :  { %v4270_v16 = vpop.f32.mrf.mxu3 }
 0x63b   :  { %v4271_v5 = vadd.f32 %v4270_v16, %v4102_v57  ;;  %v4103_v8 = vpop.f32.mrf.mxu2  ;;  %v10413_v57 = vld [vmem:[#allocation59_spill] sm:$0xff]  ;;  %10416 = vst [vmem:[#allocation50_spill] sm:$0xff] %v9336_v50  ;;  %v3461_v46 = vadd.f32 %v3460_v6, %v3292_v45 }
 0x63c   :  { %v4104_v9 = vadd.f32 %v4103_v8, %v9185_v36  ;;  %v3290_v8 = vadd.f32 %v3289_v13, %v10417_v10  ;;  %v10420_v10 = vld [vmem:[#allocation63_spill] sm:$0xff] }
 0x63d   :  { %v3610_v1 = vadd.f32 %v8996_v26, %v3461_v46 }
 0x640   :  { %v3294_v55 = vpop.f32.mrf.mxu0  ;;  %4145 = vmatmul.bf16.gmra.mxu2 %v10412_v61  ;;  %v4761_v61 = vmax.f32 %v4271_v5, 0.0 }
 0x641   :  { %v3463_v41 = vpop.f32.mrf.mxu1 }
 0x642   :  { %v4272_v34 = vpop.f32.mrf.mxu3 }
 0x643   :  { %v4273_v27 = vadd.f32 %v4272_v34, %v4104_v9  ;;  %3333 = vmatmul.bf16.gmra.mxu0 %v10413_v57  ;;  %v4106_v16 = vpop.f32.mrf.mxu2  ;;  %v3459_v9 = vadd.f32 %v3458_v17, %v3290_v8  ;;  %v10421_v17 = vld [vmem:[#allocation65_spill] sm:$0xff]  ;;  %v10422_v8 = vld [vmem:[#allocation30_spill] sm:$0xff] }
 0x644   :  { %3502 = vmatmul.bf16.gmra.mxu1 %v10414_v2  ;;  %v4107_v5 = vadd.f32 %v4106_v16, %v9185_v36  ;;  %v10419_v2 = vld [vmem:[#allocation8_spill] sm:$0xff] }
 0x645   :  { %v4763_v3 = vmax.f32 %v4273_v27, 0.0  ;;  %v3608_v27 = vadd.f32 %v8996_v26, %v3459_v9  ;;  %v10424_v9 = vld [vmem:[#allocation97_spill] sm:$0xff] }
 0x647   :  { %4314 = vmatmul.bf16.gmra.mxu3 %v9336_v50  ;;  %v9346_v42 = vpack.c.bf16 %v4763_v3, %v4761_v61  ;;  %v3738_v3 = vmax.f32 %v3610_v1, 0.0  ;;  %v3736_v16 = vmax.f32 %v3608_v27, 0.0 }
 0x648   :  { %v3296_v43 = vpop.f32.mrf.mxu0 }
 0x649   :  { %10418 = vst [vmem:[#allocation48_spill] sm:$0xff] %v9346_v42  ;;  %v3465_v49 = vpop.f32.mrf.mxu1  ;;  %v3297_v28 = vadd.f32 %v3296_v43, %v10422_v8 }
 0x64a   :  { %v4275_v13 = vpop.f32.mrf.mxu3 }
 0x64b   :  { %v4276_v40 = vadd.f32 %v4275_v13, %v4107_v5  ;;  %v4108_v34 = vpop.f32.mrf.mxu2  ;;  %v9356_v13 = vpack.c.bf16 %v3738_v3, %v3736_v16  ;;  %v3466_v27 = vadd.f32 %v3465_v49, %v3297_v28  ;;  %v10426_v16 = vld [vmem:[#allocation113_spill] sm:$0xff] }
 0x64c   :  { %v4109_v61 = vadd.f32 %v4108_v34, %v9185_v36 }
 0x64d   :  { %v4765_v46 = vmax.f32 %v4276_v40, 0.0  ;;  %10423 = vst [vmem:[#allocation20_spill] sm:$0xff] %v9356_v13  ;;  %v3614_v43 = vadd.f32 %v8996_v26, %v3466_v27 }
 0x650   :  { %v3299_v57 = vpop.f32.mrf.mxu0  ;;  %4150 = vmatmul.bf16.gmra.mxu2 %v10419_v2  ;;  %v3295_v2 = vadd.f32 %v3294_v55, %v10424_v9  ;;  %v3742_v55 = vmax.f32 %v3614_v43, 0.0 }
 0x651   :  { %v3468_v6 = vpop.f32.mrf.mxu1 }
 0x652   :  { %v4277_v23 = vpop.f32.mrf.mxu3  ;;  %v3464_v42 = vadd.f32 %v3463_v41, %v3295_v2  ;;  %v10428_v41 = vld [vmem:[#allocation69_spill] sm:$0xff]  ;;  %v10429_v2 = vld [vmem:[#allocation32_spill] sm:$0xff] }
 0x653   :  { %v4278_v45 = vadd.f32 %v4277_v23, %v4109_v61  ;;  %3338 = vmatmul.bf16.gmra.mxu0 %v10420_v10  ;;  %v4111_v35 = vpop.f32.mrf.mxu2 }
 0x654   :  { %3507 = vmatmul.bf16.gmra.mxu1 %v10421_v17  ;;  %v4112_v61 = vadd.f32 %v4111_v35, %v9185_v36  ;;  %v3612_v40 = vadd.f32 %v8996_v26, %v3464_v42  ;;  %v10427_v35 = vld [vmem:[#allocation67_spill] sm:$0xff] }
 0x655   :  { %v4767_v5 = vmax.f32 %v4278_v45, 0.0 }
 0x656   :  { %v3740_v49 = vmax.f32 %v3612_v40, 0.0 }
 0x657   :  { %4319 = vmatmul.bf16.gmra.mxu3 %v9356_v13  ;;  %v9360_v34 = vpack.c.bf16 %v4767_v5, %v4765_v46 }
 0x658   :  { %v3301_v1 = vpop.f32.mrf.mxu0  ;;  %v9370_v42 = vpack.c.bf16 %v3742_v55, %v3740_v49  ;;  %v10433_v49 = vld [vmem:[#allocation10_spill] sm:$0xff] }
 0x659   :  { %10425 = vst [vmem:[#allocation22_spill] sm:$0xff] %v9360_v34  ;;  %v3470_v23 = vpop.f32.mrf.mxu1  ;;  %v3302_v9 = vadd.f32 %v3301_v1, %v10429_v2 }
 0x65a   :  { %v4280_v10 = vpop.f32.mrf.mxu3  ;;  %10430 = vst [vmem:[#allocation54_spill] sm:$0xff] %v9370_v42 }
 0x65b   :  { %v4281_v17 = vadd.f32 %v4280_v10, %v4112_v61  ;;  %v4113_v50 = vpop.f32.mrf.mxu2  ;;  %v10431_v10 = vld [vmem:[#allocation98_spill] sm:$0xff]  ;;  %v3471_v40 = vadd.f32 %v3470_v23, %v3302_v9 }
 0x65c   :  { %v4114_v45 = vadd.f32 %v4113_v50, %v9185_v36 }
 0x65d   :  { %v4769_v27 = vmax.f32 %v4281_v17, 0.0  ;;  %v3618_v1 = vadd.f32 %v8996_v26, %v3471_v40 }
 0x660   :  { %v3304_v3 = vpop.f32.mrf.mxu0  ;;  %4155 = vmatmul.bf16.gmra.mxu2 %v10426_v16  ;;  %v3300_v16 = vadd.f32 %v3299_v57, %v10431_v10  ;;  %v3746_v57 = vmax.f32 %v3618_v1, 0.0 }
 0x661   :  { %v3473_v8 = vpop.f32.mrf.mxu1 }
 0x662   :  { %v4282_v46 = vpop.f32.mrf.mxu3  ;;  %v3469_v34 = vadd.f32 %v3468_v6, %v3300_v16  ;;  %v10435_v16 = vld [vmem:[#allocation73_spill] sm:$0xff] }
 0x663   :  { %v4283_v28 = vadd.f32 %v4282_v46, %v4114_v45  ;;  %3343 = vmatmul.bf16.gmra.mxu0 %v10427_v35  ;;  %v4116_v5 = vpop.f32.mrf.mxu2 }
 0x664   :  { %3512 = vmatmul.bf16.gmra.mxu1 %v10428_v41  ;;  %v4117_v45 = vadd.f32 %v4116_v5, %v9185_v36  ;;  %v3616_v17 = vadd.f32 %v8996_v26, %v3469_v34 }
 0x665   :  { %v4771_v61 = vmax.f32 %v4283_v28, 0.0 }
 0x666   :  { %v3744_v9 = vmax.f32 %v3616_v17, 0.0 }
 0x667   :  { %4324 = vmatmul.bf16.gmra.mxu3 %v9370_v42  ;;  %v9374_v50 = vpack.c.bf16 %v4771_v61, %v4769_v27  ;;  %v10434_v27 = vld [vmem:[#allocation71_spill] sm:$0xff] }
 0x668   :  { %v3306_v43 = vpop.f32.mrf.mxu0  ;;  %v10436_v61 = vld [vmem:[#allocation99_spill] sm:$0xff] }
 0x669   :  { %10432 = vst [vmem:[#allocation52_spill] sm:$0xff] %v9374_v50  ;;  %v3475_v46 = vpop.f32.mrf.mxu1  ;;  %v3307_v10 = vadd.f32 %v3306_v43, %v10436_v61  ;;  %v6711_v43 = vld [vmem:[%s10063_s10 + $0x14] sm:$0xf]  ;;  %v6323_v61 = vld [vmem:[%s10063_s10 + $0x8] sm:$0xf0] }
 0x66a   :  { %v4285_v35 = vpop.f32.mrf.mxu3 }
 0x66b   :  { %v4286_v41 = vadd.f32 %v4285_v35, %v4117_v45  ;;  %v4118_v13 = vpop.f32.mrf.mxu2  ;;  %v9386_v45 = vpack.c.bf16 %v3746_v57, %v3744_v9  ;;  %v10438_v35 = vld [vmem:[#allocation33_spill] sm:$0xff]  ;;  %v3476_v17 = vadd.f32 %v3475_v46, %v3307_v10 }
 0x66c   :  { %v4119_v28 = vadd.f32 %v4118_v13, %v9185_v36  ;;  %v3305_v1 = vadd.f32 %v3304_v3, %v10438_v35  ;;  %v6331_v3 = vld [vmem:[%s10063_s10 + $0x18] sm:$0xf0]  ;;  %v6725_v35 = vld [vmem:[%s10063_s10 + $0x84] sm:$0xf] }
 0x66d   :  { %v4773_v40 = vmax.f32 %v4286_v41, 0.0  ;;  %10437 = vst [vmem:[#allocation58_spill] sm:$0xff] %v9386_v45  ;;  %v6727_v41 = vld [vmem:[%s10063_s10 + $0x94] sm:$0xf]  ;;  %v6334_v46 = vor.u32 %v6711_v43, %v6331_v3  ;;  %v6395_v57 = vld [vmem:[%s10063_s10 + $0x98] sm:$0xf0] }
 0x66e   :  { %v3474_v50 = vadd.f32 %v3473_v8, %v3305_v1  ;;  %v3622_v8 = vadd.f32 %v8996_v26, %v3476_v17  ;;  %v6398_v9 = vor.u32 %v6727_v41, %v6395_v57 }
 0x66f   :  { %4401 = vmatpush.bf16.msra.mxu0 %v6334_v46  ;;  %v10441_v46 = vld [vmem:[#allocation75_spill] sm:$0xff] }
 0x670   :  { %v3309_v55 = vpop.f32.mrf.mxu0  ;;  %4160 = vmatmul.bf16.gmra.mxu2 %v10433_v49  ;;  %4570 = vmatpush.bf16.msra.mxu1 %v6398_v9  ;;  %v3750_v1 = vmax.f32 %v3622_v8, 0.0  ;;  %v10442_v9 = vld [vmem:[#allocation77_spill] sm:$0xff]  ;;  %v10444_v8 = vld [vmem:[#allocation100_spill] sm:$0xff] }
 0x671   :  { %v9381_v2 = vpop.f32.mrf.mxu1 }
 0x672   :  { %v4287_v23 = vpop.f32.mrf.mxu3 }
 0x673   :  { %v4288_v5 = vadd.f32 %v4287_v23, %v4119_v28  ;;  %3348 = vmatmul.bf16.gmra.mxu0 %v10434_v27  ;;  %v4121_v6 = vpop.f32.mrf.mxu2 }
 0x674   :  { %3517 = vmatmul.bf16.gmra.mxu1 %v10435_v16  ;;  %v4122_v28 = vadd.f32 %v4121_v6, %v9185_v36  ;;  %v6709_v6 = vld [vmem:[%s10063_s10 + $0x4] sm:$0xf] }
 0x675   :  { %v4775_v34 = vmax.f32 %v4288_v5, 0.0  ;;  %v3620_v5 = vadd.f32 %v8996_v26, %v3474_v50  ;;  %v6387_v50 = vld [vmem:[%s10063_s10 + $0x88] sm:$0xf0] }
 0x677   :  { %4329 = vmatmul.bf16.gmra.mxu3 %v9386_v45  ;;  %v9390_v13 = vpack.c.bf16 %v4775_v34, %v4773_v40  ;;  %v10440_v40 = vld [vmem:[#allocation12_spill] sm:$0xff]  ;;  %v6326_v34 = vor.u32 %v6709_v6, %v6323_v61  ;;  %v3748_v3 = vmax.f32 %v3620_v5, 0.0  ;;  %v10443_v6 = vld [vmem:[#allocation37_spill] sm:$0xff] }
 0x678   :  { %v3311_v49 = vpop.f32.mrf.mxu0  ;;  %v6744_v5 = vld [vmem:[%s10065_s12 + $0x18] sm:$0xff] }
 0x679   :  { %10439 = vst [vmem:[#allocation56_spill] sm:$0xff] %v9390_v13  ;;  %v3480_v23 = vpop.f32.mrf.mxu1  ;;  %4402 = vmatpush.bf16.msra.mxu0 %v6326_v34  ;;  %v3312_v61 = vadd.f32 %v3311_v49, %v10443_v6  ;;  %v9424_v45 = vpack.c.bf16 %v3750_v1, %v3748_v3  ;;  %v6752_v34 = vld [vmem:[%s10065_s12 + $0x58] sm:$0xff]  ;;  %5061 = vmatpush.bf16.msra.mxu2 %v6744_v5 }
 0x67a   :  { %v4290_v27 = vpop.f32.mrf.mxu3  ;;  %5230 = vmatpush.bf16.msra.mxu3 %v6752_v34 }
 0x67b   :  { %v4291_v16 = vadd.f32 %v4290_v27, %v4122_v28  ;;  %v4123_v42 = vpop.f32.mrf.mxu2  ;;  %v6390_v27 = vor.u32 %v6725_v35, %v6387_v50  ;;  %v3481_v49 = vadd.f32 %v3480_v23, %v3312_v61 }
 0x67c   :  { %v4124_v17 = vadd.f32 %v4123_v42, %v9185_v36  ;;  %v3310_v42 = vadd.f32 %v3309_v55, %v10444_v8  ;;  %v10447_v8 = vld [vmem:[#allocation79_spill] sm:$0xff] }
 0x67d   :  { %4571 = vmatpush.bf16.msra.mxu1 %v6390_v27  ;;  %v3626_v3 = vadd.f32 %v8996_v26, %v3481_v49 }
 0x680   :  { %v3314_v10 = vpop.f32.mrf.mxu0  ;;  %4165 = vmatmul.bf16.gmra.mxu2 %v10440_v40  ;;  %v4777_v40 = vmax.f32 %v4291_v16, 0.0 }
 0x681   :  { %v3483_v28 = vpop.f32.mrf.mxu1 }
 0x682   :  { %v4292_v43 = vpop.f32.mrf.mxu3 }
 0x683   :  { %v4293_v41 = vadd.f32 %v4292_v43, %v4124_v17  ;;  %3353 = vmatmul.bf16.gmra.mxu0 %v10441_v46  ;;  %v4126_v57 = vpop.f32.mrf.mxu2  ;;  %v3479_v17 = vadd.f32 %v9381_v2, %v3310_v42  ;;  %v10448_v2 = vld [vmem:[#allocation103_spill] sm:$0xff] }
 0x684   :  { %3522 = vmatmul.bf16.gmra.mxu1 %v10442_v9  ;;  %v4127_v16 = vadd.f32 %v4126_v57, %v9185_v36  ;;  %v10446_v9 = vld [vmem:[#allocation13_spill] sm:$0xff] }
 0x685   :  { %v4779_v13 = vmax.f32 %v4293_v41, 0.0  ;;  %v3624_v41 = vadd.f32 %v8996_v26, %v3479_v17 }
 0x687   :  { %4334 = vmatmul.bf16.gmra.mxu3 %v9424_v45  ;;  %v9434_v35 = vpack.c.bf16 %v4779_v13, %v4777_v40  ;;  %v3754_v13 = vmax.f32 %v3626_v3, 0.0  ;;  %v3752_v6 = vmax.f32 %v3624_v41, 0.0 }
 0x688   :  { %v3316_v50 = vpop.f32.mrf.mxu0 }
 0x689   :  { %10445 = vst [vmem:[#allocation25_spill] sm:$0xff] %v9434_v35  ;;  %v3485_v1 = vpop.f32.mrf.mxu1  ;;  %v3317_v42 = vadd.f32 %v3316_v50, %v10448_v2 }
 0x68a   :  { %v4295_v55 = vpop.f32.mrf.mxu3 }
 0x68b   :  { %v4296_v27 = vadd.f32 %v4295_v55, %v4127_v16  ;;  %v4128_v43 = vpop.f32.mrf.mxu2  ;;  %v9445_v16 = vpack.c.bf16 %v3754_v13, %v3752_v6  ;;  %v10449_v55 = vld [vmem:[#allocation102_spill] sm:$0xff]  ;;  %v3486_v41 = vadd.f32 %v3485_v1, %v3317_v42 }
 0x68c   :  { %v4129_v23 = vadd.f32 %v4128_v43, %v9185_v36  ;;  %v3315_v17 = vadd.f32 %v3314_v10, %v10449_v55  ;;  %v10451_v6 = vld [vmem:[#allocation14_spill] sm:$0xff] }
 0x68d   :  { %v4781_v34 = vmax.f32 %v4296_v27, 0.0  ;;  %v3630_v50 = vadd.f32 %v8996_v26, %v3486_v41 }
 0x68f   :  { %v3758_v10 = vmax.f32 %v3630_v50, 0.0 }
 0x690   :  { %v3319_v46 = vpop.f32.mrf.mxu0  ;;  %4170 = vmatmul.bf16.gmra.mxu2 %v10446_v9  ;;  %v3484_v9 = vadd.f32 %v3483_v28, %v3315_v17  ;;  %v10453_v28 = vld [vmem:[#allocation105_spill] sm:$0xff] }
 0x691   :  { %v3488_v40 = vpop.f32.mrf.mxu1 }
 0x692   :  { %v4297_v57 = vpop.f32.mrf.mxu3  ;;  %v3628_v27 = vadd.f32 %v8996_v26, %v3484_v9 }
 0x693   :  { %v4298_v61 = vadd.f32 %v4297_v57, %v4129_v23  ;;  %3358 = vmatmul.bf16.gmra.mxu0 %v10447_v8  ;;  %v4131_v5 = vpop.f32.mrf.mxu2 }
 0x694   :  { %3527 = vmatmul.bf16.gmra.mxu1 %v10341_v31  ;;  %v4132_v23 = vadd.f32 %v4131_v5, %v9185_v36  ;;  %v3756_v1 = vmax.f32 %v3628_v27, 0.0 }
 0x695   :  { %v4783_v49 = vmax.f32 %v4298_v61, 0.0 }
 0x696   :  { %v9459_v9 = vpack.c.bf16 %v3758_v10, %v3756_v1 }
 0x697   :  { %4339 = vmatmul.bf16.gmra.mxu3 %v9445_v16  ;;  %v9449_v43 = vpack.c.bf16 %v4783_v49, %v4781_v34  ;;  %v10452_v49 = vld [vmem:[#allocation84_spill] sm:$0xff] }
 0x698   :  { %v3321_v3 = vpop.f32.mrf.mxu0 }
 0x699   :  { %10450 = vst [vmem:[#allocation62_spill] sm:$0xff] %v9449_v43  ;;  %v3490_v57 = vpop.f32.mrf.mxu1  ;;  %v3322_v55 = vadd.f32 %v3321_v3, %v10453_v28 }
 0x69a   :  { %v4300_v8 = vpop.f32.mrf.mxu3 }
 0x69b   :  { %v4301_v31 = vadd.f32 %v4300_v8, %v4132_v23  ;;  %v4133_v35 = vpop.f32.mrf.mxu2  ;;  %v10454_v23 = vld [vmem:[#allocation104_spill] sm:$0xff]  ;;  %v3491_v27 = vadd.f32 %v3490_v57, %v3322_v55 }
 0x69c   :  { %v4134_v61 = vadd.f32 %v4133_v35, %v9185_v36  ;;  %v3320_v8 = vadd.f32 %v3319_v46, %v10454_v23 }
 0x69d   :  { %v4785_v17 = vmax.f32 %v4301_v31, 0.0  ;;  %v3634_v3 = vadd.f32 %v8996_v26, %v3491_v27  ;;  %v10457_v27 = vld [vmem:[#allocation43_spill] sm:$0xff] }
 0x69f   :  { %v3762_v46 = vmax.f32 %v3634_v3, 0.0 }
 0x6a0   :  { %v3324_v13 = vpop.f32.mrf.mxu0  ;;  %4175 = vmatmul.bf16.gmra.mxu2 %v10451_v6  ;;  %v3489_v6 = vadd.f32 %v3488_v40, %v3320_v8  ;;  %v10456_v40 = vld [vmem:[#allocation45_spill] sm:$0xff] }
 0x6a1   :  { %v3493_v2 = vpop.f32.mrf.mxu1 }
 0x6a2   :  { %v4302_v34 = vpop.f32.mrf.mxu3  ;;  %v3632_v31 = vadd.f32 %v8996_v26, %v3489_v6 }
 0x6a3   :  { %v4303_v42 = vadd.f32 %v4302_v34, %v4134_v61  ;;  %v4136_v5 = vpop.f32.mrf.mxu2  ;;  %4403 = vmatmul.bf16.vlgmr.msra.gmra.mxu0 %v10452_v49 }
 0x6a4   :  { %4572 = vmatmul.bf16.vlgmr.msra.gmra.mxu1 %v9017_v20  ;;  %v4137_v61 = vadd.f32 %v4136_v5, %v9185_v36  ;;  %v3760_v57 = vmax.f32 %v3632_v31, 0.0 }
 0x6a5   :  { %v4787_v41 = vmax.f32 %v4303_v42, 0.0 }
 0x6a6   :  { %v9473_v6 = vpack.c.bf16 %v3762_v46, %v3760_v57 }
 0x6a7   :  { %4344 = vmatmul.bf16.gmra.mxu3 %v9459_v9  ;;  %v9463_v35 = vpack.c.bf16 %v4787_v41, %v4785_v17  ;;  %v10455_v17 = vld [vmem:[#allocation88_spill] sm:$0xff] }
 0x6a8   :  { %v3326_v50 = vpop.f32.mrf.mxu0 }
 0x6a9   :  { %v3495_v34 = vpop.f32.mrf.mxu1  ;;  %v3327_v41 = vadd.f32 %v3326_v50, %v10456_v40 }
 0x6aa   :  { %v4305_v49 = vpop.f32.mrf.mxu3 }
 0x6ab   :  { %v4306_v20 = vadd.f32 %v4305_v49, %v4137_v61  ;;  %v4138_v43 = vpop.f32.mrf.mxu2  ;;  %v3325_v61 = vadd.f32 %v3324_v13, %v10457_v27  ;;  %v3496_v3 = vadd.f32 %v3495_v34, %v3327_v41 }
 0x6ac   :  { %v4139_v1 = vadd.f32 %v4138_v43, %v9185_v36 }
 0x6ad   :  { %v4789_v23 = vmax.f32 %v4306_v20, 0.0  ;;  %v3638_v50 = vadd.f32 %v8996_v26, %v3496_v3 }
 0x6af   :  { %v3766_v13 = vmax.f32 %v3638_v50, 0.0 }
 0x6b0   :  { %v3329_v10 = vpop.f32.mrf.mxu0  ;;  %4180 = vmatmul.bf16.gmra.mxu2 %v9024_v15 }
 0x6b1   :  { %v3498_v42 = vpop.f32.mrf.mxu1 }
 0x6b2   :  { %v4307_v28 = vpop.f32.mrf.mxu3 }
 0x6b3   :  { %v4308_v55 = vadd.f32 %v4307_v28, %v4139_v1  ;;  %v4141_v5 = vpop.f32.mrf.mxu2  ;;  %4408 = vmatmul.bf16.gmra.mxu0 %v10455_v17  ;;  %v3494_v17 = vadd.f32 %v3493_v2, %v3325_v61  ;;  %v10459_v2 = vld [vmem:[#allocation2_spill] sm:$0xff] }
 0x6b4   :  { %4577 = vmatmul.bf16.gmra.mxu1 %v9035_v25  ;;  %v4142_v31 = vadd.f32 %v4141_v5, %v9185_v36 }
 0x6b5   :  { %v4791_v8 = vmax.f32 %v4308_v55, 0.0  ;;  %v3636_v20 = vadd.f32 %v8996_v26, %v3494_v17  ;;  %v6751_v17 = vld [vmem:[%s10065_s12 + $0x50] sm:$0xff] }
 0x6b6   :  { %5231 = vmatpush.bf16.msra.mxu3 %v6751_v17 }
 0x6b7   :  { %4349 = vmatmul.bf16.gmra.mxu3 %v9473_v6  ;;  %v9477_v43 = vpack.c.bf16 %v4791_v8, %v4789_v23  ;;  %v3764_v34 = vmax.f32 %v3636_v20, 0.0  ;;  %v10458_v23 = vld [vmem:[#allocation90_spill] sm:$0xff] }
 0x6b8   :  { %v3331_v49 = vpop.f32.mrf.mxu0 }
 0x6b9   :  { %v3500_v1 = vpop.f32.mrf.mxu1  ;;  %v3332_v8 = vadd.f32 %v3331_v49, %v10459_v2  ;;  %v9487_v3 = vpack.c.bf16 %v3766_v13, %v3764_v34 }
 0x6ba   :  { %v4310_v28 = vpop.f32.mrf.mxu3 }
 0x6bb   :  { %v4311_v25 = vadd.f32 %v4310_v28, %v4142_v31  ;;  %v4143_v15 = vpop.f32.mrf.mxu2  ;;  %v10460_v31 = vld [vmem:[#allocation107_spill] sm:$0xff]  ;;  %v3501_v49 = vadd.f32 %v3500_v1, %v3332_v8 }
 0x6bc   :  { %v4144_v57 = vadd.f32 %v4143_v15, %v9185_v36  ;;  %v3330_v28 = vadd.f32 %v3329_v10, %v10460_v31  ;;  %v6743_v15 = vld [vmem:[%s10065_s12 + $0x10] sm:$0xff] }
 0x6bd   :  { %v4793_v27 = vmax.f32 %v4311_v25, 0.0  ;;  %5062 = vmatpush.bf16.msra.mxu2 %v6743_v15  ;;  %v3642_v34 = vadd.f32 %v8996_v26, %v3501_v49 }
 0x6be   :  { %v3499_v13 = vadd.f32 %v3498_v42, %v3330_v28  ;;  %v10461_v42 = vld [vmem:[#allocation3_spill] sm:$0xff] }
 0x6bf   :  { %v3770_v2 = vmax.f32 %v3642_v34, 0.0 }
 0x6c0   :  { %v3334_v46 = vpop.f32.mrf.mxu0  ;;  %4185 = vmatmul.bf16.gmra.mxu2 %v9040_v54 }
 0x6c1   :  { %v3503_v55 = vpop.f32.mrf.mxu1 }
 0x6c2   :  { %v4312_v40 = vpop.f32.mrf.mxu3 }
 0x6c3   :  { %v4313_v41 = vadd.f32 %v4312_v40, %v4144_v57  ;;  %v4146_v5 = vpop.f32.mrf.mxu2  ;;  %4413 = vmatmul.bf16.gmra.mxu0 %v10458_v23 }
 0x6c4   :  { %4582 = vmatmul.bf16.gmra.mxu1 %v9051_v52  ;;  %v4147_v25 = vadd.f32 %v4146_v5, %v9185_v36 }
 0x6c5   :  { %v4795_v61 = vmax.f32 %v4313_v41, 0.0  ;;  %v3640_v41 = vadd.f32 %v8996_v26, %v3499_v13 }
 0x6c7   :  { %4354 = vmatmul.bf16.gmra.mxu3 %v9487_v3  ;;  %v9497_v50 = vpack.c.bf16 %v4795_v61, %v4793_v27  ;;  %v3768_v5 = vmax.f32 %v3640_v41, 0.0 }
 0x6c8   :  { %v3336_v52 = vpop.f32.mrf.mxu0 }
 0x6c9   :  { %v3505_v20 = vpop.f32.mrf.mxu1  ;;  %v3337_v28 = vadd.f32 %v3336_v52, %v10461_v42  ;;  %v9507_v49 = vpack.c.bf16 %v3770_v2, %v3768_v5 }
 0x6ca   :  { %v4315_v10 = vpop.f32.mrf.mxu3 }
 0x6cb   :  { %v4316_v57 = vadd.f32 %v4315_v10, %v4147_v25  ;;  %v4148_v40 = vpop.f32.mrf.mxu2  ;;  %v10462_v25 = vld [vmem:[#allocation109_spill] sm:$0xff]  ;;  %v3506_v34 = vadd.f32 %v3505_v20, %v3337_v28 }
 0x6cc   :  { %v4149_v27 = vadd.f32 %v4148_v40, %v9185_v36  ;;  %v3335_v10 = vadd.f32 %v3334_v46, %v10462_v25 }
 0x6cd   :  { %v4797_v15 = vmax.f32 %v4316_v57, 0.0  ;;  %v3646_v52 = vadd.f32 %v8996_v26, %v3506_v34  ;;  %v10464_v34 = vld [vmem:[#allocation55_spill] sm:$0xff] }
 0x6cf   :  { %v3774_v46 = vmax.f32 %v3646_v52, 0.0 }
 0x6d0   :  { %v3339_v23 = vpop.f32.mrf.mxu0  ;;  %4190 = vmatmul.bf16.gmra.mxu2 %v9056_v4 }
 0x6d1   :  { %v3508_v1 = vpop.f32.mrf.mxu1 }
 0x6d2   :  { %v4317_v8 = vpop.f32.mrf.mxu3 }
 0x6d3   :  { %v4318_v61 = vadd.f32 %v4317_v8, %v4149_v27  ;;  %v4151_v31 = vpop.f32.mrf.mxu2  ;;  %4418 = vmatmul.bf16.gmra.mxu0 %v8537_v0  ;;  %v3504_v8 = vadd.f32 %v3503_v55, %v3335_v10  ;;  %v10463_v55 = vld [vmem:[#allocation5_spill] sm:$0xff] }
 0x6d4   :  { %4587 = vmatmul.bf16.gmra.mxu1 %v9069_v29  ;;  %v4152_v41 = vadd.f32 %v4151_v31, %v9185_v36 }
 0x6d5   :  { %v4799_v17 = vmax.f32 %v4318_v61, 0.0  ;;  %v3644_v57 = vadd.f32 %v8996_v26, %v3504_v8 }
 0x6d7   :  { %4359 = vmatmul.bf16.gmra.mxu3 %v9507_v49  ;;  %v9511_v13 = vpack.c.bf16 %v4799_v17, %v4797_v15  ;;  %v3772_v20 = vmax.f32 %v3644_v57, 0.0 }
 0x6d8   :  { %v3341_v40 = vpop.f32.mrf.mxu0 }
 0x6d9   :  { %v3510_v27 = vpop.f32.mrf.mxu1  ;;  %v3342_v15 = vadd.f32 %v3341_v40, %v10463_v55  ;;  %v9521_v10 = vpack.c.bf16 %v3774_v46, %v3772_v20 }
 0x6da   :  { %v4320_v0 = vpop.f32.mrf.mxu3 }
 0x6db   :  { %v4321_v29 = vadd.f32 %v4320_v0, %v4152_v41  ;;  %v4153_v4 = vpop.f32.mrf.mxu2  ;;  %v3340_v41 = vadd.f32 %v3339_v23, %v10464_v34  ;;  %v3511_v8 = vadd.f32 %v3510_v27, %v3342_v15 }
 0x6dc   :  { %v4154_v5 = vadd.f32 %v4153_v4, %v9185_v36 }
 0x6dd   :  { %v4801_v17 = vmax.f32 %v4321_v29, 0.0  ;;  %v3650_v40 = vadd.f32 %v8996_v26, %v3511_v8  ;;  %v10466_v8 = vld [vmem:[#allocation110_spill] sm:$0xff] }
 0x6df   :  { %v3778_v23 = vmax.f32 %v3650_v40, 0.0 }
 0x6e0   :  { %v3344_v2 = vpop.f32.mrf.mxu0  ;;  %4195 = vmatmul.bf16.gmra.mxu2 %v9074_v56 }
 0x6e1   :  { %v3513_v61 = vpop.f32.mrf.mxu1 }
 0x6e2   :  { %v4322_v42 = vpop.f32.mrf.mxu3 }
 0x6e3   :  { %v4323_v28 = vadd.f32 %v4322_v42, %v4154_v5  ;;  %v4156_v31 = vpop.f32.mrf.mxu2  ;;  %4423 = vmatmul.bf16.gmra.mxu0 %v8557_v62  ;;  %v3509_v5 = vadd.f32 %v3508_v1, %v3340_v41  ;;  %v10465_v1 = vld [vmem:[#allocation7_spill] sm:$0xff] }
 0x6e4   :  { %4592 = vmatmul.bf16.gmra.mxu1 %v9097_v7  ;;  %v4157_v52 = vadd.f32 %v4156_v31, %v9185_v36 }
 0x6e5   :  { %v4803_v25 = vmax.f32 %v4323_v28, 0.0  ;;  %v3648_v29 = vadd.f32 %v8996_v26, %v3509_v5 }
 0x6e7   :  { %4364 = vmatmul.bf16.gmra.mxu3 %v9521_v10  ;;  %v9525_v4 = vpack.c.bf16 %v4803_v25, %v4801_v17  ;;  %v3776_v27 = vmax.f32 %v3648_v29, 0.0 }
 0x6e8   :  { %v3346_v0 = vpop.f32.mrf.mxu0 }
 0x6e9   :  { %v3515_v57 = vpop.f32.mrf.mxu1  ;;  %v3347_v17 = vadd.f32 %v3346_v0, %v10465_v1  ;;  %v9535_v41 = vpack.c.bf16 %v3778_v23, %v3776_v27 }
 0x6ea   :  { %v4325_v62 = vpop.f32.mrf.mxu3 }
 0x6eb   :  { %v4326_v7 = vadd.f32 %v4325_v62, %v4157_v52  ;;  %v4158_v42 = vpop.f32.mrf.mxu2  ;;  %v3345_v52 = vadd.f32 %v3344_v2, %v10466_v8 }
 0x6ec   :  { %v4159_v20 = vadd.f32 %v4158_v42, %v9185_v36  ;;  %v3516_v42 = vadd.f32 %v3515_v57, %v3347_v17 }
 0x6ed   :  { %v4805_v25 = vmax.f32 %v4326_v7, 0.0 }
 0x6ee   :  { %v3654_v0 = vadd.f32 %v8996_v26, %v3516_v42  ;;  %v6742_v42 = vld [vmem:[%s10065_s12 + $0x8] sm:$0xff] }
 0x6ef   :  { %5063 = vmatpush.bf16.msra.mxu2 %v6742_v42 }
 0x6f0   :  { %v3349_v46 = vpop.f32.mrf.mxu0  ;;  %4200 = vmatmul.bf16.gmra.mxu2 %v9108_v48  ;;  %v3782_v2 = vmax.f32 %v3654_v0, 0.0 }
 0x6f1   :  { %v3518_v28 = vpop.f32.mrf.mxu1 }
 0x6f2   :  { %v4327_v55 = vpop.f32.mrf.mxu3 }
 0x6f3   :  { %v4328_v15 = vadd.f32 %v4327_v55, %v4159_v20  ;;  %v4161_v31 = vpop.f32.mrf.mxu2  ;;  %4428 = vmatmul.bf16.gmra.mxu0 %v10364_v11  ;;  %v3514_v20 = vadd.f32 %v3513_v61, %v3345_v52  ;;  %v10467_v61 = vld [vmem:[#allocation112_spill] sm:$0xff] }
 0x6f4   :  { %4597 = vmatmul.bf16.gmra.mxu1 %v9120_v22  ;;  %v4162_v40 = vadd.f32 %v4161_v31, %v9185_v36 }
 0x6f5   :  { %v4807_v34 = vmax.f32 %v4328_v15, 0.0  ;;  %v3652_v7 = vadd.f32 %v8996_v26, %v3514_v20 }
 0x6f7   :  { %4369 = vmatmul.bf16.gmra.mxu3 %v9535_v41  ;;  %v9539_v62 = vpack.c.bf16 %v4807_v34, %v4805_v25  ;;  %v3780_v57 = vmax.f32 %v3652_v7, 0.0 }
 0x6f8   :  { %v3351_v5 = vpop.f32.mrf.mxu0 }
 0x6f9   :  { %v3520_v29 = vpop.f32.mrf.mxu1  ;;  %v3352_v25 = vadd.f32 %v3351_v5, %v10467_v61  ;;  %v9549_v52 = vpack.c.bf16 %v3782_v2, %v3780_v57 }
 0x6fa   :  { %v4330_v11 = vpop.f32.mrf.mxu3 }
 0x6fb   :  { %v4331_v22 = vadd.f32 %v4330_v11, %v4162_v40  ;;  %v4163_v55 = vpop.f32.mrf.mxu2  ;;  %v10468_v40 = vld [vmem:[#allocation111_spill] sm:$0xff]  ;;  %v3521_v20 = vadd.f32 %v3520_v29, %v3352_v25 }
 0x6fc   :  { %v4164_v27 = vadd.f32 %v4163_v55, %v9185_v36  ;;  %v3350_v11 = vadd.f32 %v3349_v46, %v10468_v40 }
 0x6fd   :  { %v4809_v34 = vmax.f32 %v4331_v22, 0.0  ;;  %v3658_v46 = vadd.f32 %v8996_v26, %v3521_v20  ;;  %v10470_v20 = vld [vmem:[#allocation114_spill] sm:$0xff] }
 0x6fe   :  { %v3519_v7 = vadd.f32 %v3518_v28, %v3350_v11  ;;  %v10469_v28 = vld [vmem:[#allocation9_spill] sm:$0xff] }
 0x700   :  { %v3354_v23 = vpop.f32.mrf.mxu0  ;;  %4205 = vmatmul.bf16.gmra.mxu2 %v9125_v14 }
 0x701   :  { %v3523_v15 = vpop.f32.mrf.mxu1 }
 0x702   :  { %v4332_v1 = vpop.f32.mrf.mxu3 }
 0x703   :  { %v4333_v17 = vadd.f32 %v4332_v1, %v4164_v27  ;;  %v4166_v31 = vpop.f32.mrf.mxu2  ;;  %4433 = vmatmul.bf16.gmra.mxu0 %v10369_v30  ;;  %v6750_v30 = vld [vmem:[%s10065_s12 + $0x48] sm:$0xff]  ;;  %v3656_v1 = vadd.f32 %v8996_v26, %v3519_v7 }
 0x704   :  { %4602 = vmatmul.bf16.gmra.mxu1 %v9136_v47  ;;  %v4167_v22 = vadd.f32 %v4166_v31, %v9185_v36  ;;  %5232 = vmatpush.bf16.msra.mxu3 %v6750_v30 }
 0x705   :  { %v4811_v8 = vmax.f32 %v4333_v17, 0.0  ;;  %v3786_v17 = vmax.f32 %v3658_v46, 0.0  ;;  %v3784_v25 = vmax.f32 %v3656_v1, 0.0 }
 0x707   :  { %4374 = vmatmul.bf16.gmra.mxu3 %v9549_v52  ;;  %v9559_v47 = vpack.c.bf16 %v4811_v8, %v4809_v34  ;;  %v9569_v30 = vpack.c.bf16 %v3786_v17, %v3784_v25 }
 0x708   :  { %v3356_v5 = vpop.f32.mrf.mxu0 }
 0x709   :  { %v3525_v55 = vpop.f32.mrf.mxu1  ;;  %v3357_v42 = vadd.f32 %v3356_v5, %v10469_v28 }
 0x70a   :  { %v4335_v0 = vpop.f32.mrf.mxu3 }
 0x70b   :  { %v4336_v2 = vadd.f32 %v4335_v0, %v4167_v22  ;;  %v4168_v27 = vpop.f32.mrf.mxu2  ;;  %v3355_v22 = vadd.f32 %v3354_v23, %v10470_v20 }
 0x70c   :  { %v4169_v61 = vadd.f32 %v4168_v27, %v9185_v36  ;;  %v3526_v27 = vadd.f32 %v3525_v55, %v3357_v42 }
 0x70d   :  { %v4813_v40 = vmax.f32 %v4336_v2, 0.0  ;;  %v6741_v2 = vld [vmem:[%s10065_s12] sm:$0xff] }
 0x70e   :  { %v3662_v5 = vadd.f32 %v8996_v26, %v3526_v27  ;;  %5064 = vmatpush.bf16.msra.mxu2 %v6741_v2 }
 0x710   :  { %v3359_v57 = vpop.f32.mrf.mxu0  ;;  %4210 = vmatmul.bf16.gmra.mxu2 %v9141_v18  ;;  %v3790_v55 = vmax.f32 %v3662_v5, 0.0 }
 0x711   :  { %v3528_v34 = vpop.f32.mrf.mxu1 }
 0x712   :  { %v4337_v29 = vpop.f32.mrf.mxu3 }
 0x713   :  { %v4338_v31 = vadd.f32 %v4337_v29, %v4169_v61  ;;  %v4171_v8 = vpop.f32.mrf.mxu2  ;;  %4438 = vmatmul.bf16.gmra.mxu0 %v8641_v19  ;;  %v3524_v61 = vadd.f32 %v3523_v15, %v3355_v22 }
 0x714   :  { %4607 = vmatmul.bf16.gmra.mxu1 %v9154_v60  ;;  %v4172_v46 = vadd.f32 %v4171_v8, %v9185_v36 }
 0x715   :  { %v4815_v11 = vmax.f32 %v4338_v31, 0.0  ;;  %v3660_v23 = vadd.f32 %v8996_v26, %v3524_v61 }
 0x717   :  { %4379 = vmatmul.bf16.gmra.mxu3 %v9569_v30  ;;  %v9573_v0 = vpack.c.bf16 %v4815_v11, %v4813_v40  ;;  %v3788_v15 = vmax.f32 %v3660_v23, 0.0  ;;  %v6749_v40 = vld [vmem:[%s10065_s12 + $0x40] sm:$0xff]  ;;  %v10471_v11 = vld [vmem:[#allocation11_spill] sm:$0xff] }
 0x718   :  { %v3361_v7 = vpop.f32.mrf.mxu0  ;;  %5233 = vmatpush.bf16.msra.mxu3 %v6749_v40 }
 0x719   :  { %v3530_v1 = vpop.f32.mrf.mxu1  ;;  %v3362_v20 = vadd.f32 %v3361_v7, %v10471_v11 }
 0x71a   :  { %v4340_v19 = vpop.f32.mrf.mxu3 }
 0x71b   :  { %v4341_v60 = vadd.f32 %v4340_v19, %v4172_v46  ;;  %v4173_v29 = vpop.f32.mrf.mxu2  ;;  %v9589_v46 = vpack.c.bf16 %v3790_v55, %v3788_v15  ;;  %v10472_v19 = vld [vmem:[#allocation115_spill] sm:$0xff]  ;;  %v3531_v5 = vadd.f32 %v3530_v1, %v3362_v20 }
 0x71c   :  { %v4174_v25 = vadd.f32 %v4173_v29, %v9185_v36  ;;  %v3360_v61 = vadd.f32 %v3359_v57, %v10472_v19 }
 0x71d   :  { %v4817_v22 = vmax.f32 %v4341_v60, 0.0  ;;  %v3666_v60 = vadd.f32 %v8996_v26, %v3531_v5 }
 0x71f   :  { %v3794_v15 = vmax.f32 %v3666_v60, 0.0 }
 0x720   :  { %4215 = vmatmul.bf16.gmra.mxu2 %v9159_v58  ;;  %v4404_v17 = vpop.f32.mrf.mxu0 }
 0x721   :  { %v4573_v31 = vpop.f32.mrf.mxu1 }
 0x722   :  { %v4342_v8 = vpop.f32.mrf.mxu3 }
 0x723   :  { %v4343_v28 = vadd.f32 %v4342_v8, %v4174_v25  ;;  %v4176_v42 = vpop.f32.mrf.mxu2  ;;  %4443 = vmatmul.bf16.gmra.mxu0 %v8661_v39 }
 0x724   :  { %4612 = vmatmul.bf16.gmra.mxu1 %v9187_v51  ;;  %v4177_v2 = vadd.f32 %v4176_v42, %v9185_v36  ;;  %v3529_v51 = vadd.f32 %v3528_v34, %v3360_v61 }
 0x725   :  { %v4819_v27 = vmax.f32 %v4343_v28, 0.0 }
 0x726   :  { %v3664_v55 = vadd.f32 %v8996_v26, %v3529_v51  ;;  %v6761_v26 = vld [vmem:[%s10066_s11] sm:$0x3] }
 0x727   :  { %4384 = vmatmul.bf16.gmra.mxu3 %v9589_v46  ;;  %v9593_v29 = vpack.c.bf16 %v4819_v27, %v4817_v22  ;;  %v9607_v19 = vperm.slane %v6761_v26, 1 }
 0x728   :  { %v4406_v39 = vpop.f32.mrf.mxu0  ;;  %v3792_v1 = vmax.f32 %v3664_v55, 0.0 }
 0x729   :  { %v4575_v23 = vpop.f32.mrf.mxu1  ;;  %v4405_v51 = vadd.f32 %v4404_v17, %v9607_v19 }
 0x72a   :  { %v4345_v25 = vpop.f32.mrf.mxu3  ;;  %v9602_v27 = vpack.c.bf16 %v3794_v15, %v3792_v1 }
 0x72b   :  { %v4346_v8 = vadd.f32 %v4345_v25, %v4177_v2  ;;  %v4178_v7 = vpop.f32.mrf.mxu2  ;;  %v4407_v2 = vadd.f32 %v4406_v39, %v9607_v19  ;;  %v4574_v55 = vadd.f32 %v4573_v31, %v4405_v51 }
 0x72c   :  { %v4179_v28 = vadd.f32 %v4178_v7, %v9185_v36 }
 0x72d   :  { %v4821_v34 = vmax.f32 %v4346_v8, 0.0  ;;  %v4576_v60 = vadd.f32 %v4575_v23, %v4407_v2 }
 0x730   :  { %4220 = vmatmul.bf16.gmra.mxu2 %v9198_v53  ;;  %v4409_v57 = vpop.f32.mrf.mxu0 }
 0x731   :  { %v4578_v40 = vpop.f32.mrf.mxu1 }
 0x732   :  { %v4347_v11 = vpop.f32.mrf.mxu3 }
 0x733   :  { %v4348_v20 = vadd.f32 %v4347_v11, %v4179_v28  ;;  %v4181_v42 = vpop.f32.mrf.mxu2  ;;  %4448 = vmatmul.bf16.gmra.mxu0 %v8681_v37  ;;  %v10473_v28 = vld [vmem:[#allocation81_spill] sm:$0xff]  ;;  %v4736_v11 = vmax.f32 %v4576_v60, 0.0 }
 0x734   :  { %4617 = vmatmul.bf16.gmra.mxu1 %v9208_v44  ;;  %v4182_v37 = vadd.f32 %v4181_v42, %v9185_v36  ;;  %v10474_v42 = vld [vmem:[#allocation101_spill] sm:$0xff] }
 0x735   :  { %v4823_v22 = vmax.f32 %v4348_v20, 0.0 }
 0x737   :  { %4389 = vmatmul.bf16.gmra.mxu3 %v9602_v27  ;;  %v9610_v61 = vpack.c.bf16 %v4823_v22, %v4821_v34  ;;  %v4734_v22 = vmax.f32 %v4574_v55, 0.0  ;;  %v4410_v55 = vadd.f32 %v4409_v57, %v9607_v19 }
 0x738   :  { %v4411_v5 = vpop.f32.mrf.mxu0 }
 0x739   :  { %v4580_v44 = vpop.f32.mrf.mxu1  ;;  %v4862_v17 = vpack.c.bf16 %v4736_v11, %v4734_v22  ;;  %v4412_v2 = vadd.f32 %v4411_v5, %v9607_v19 }
 0x73a   :  { %v4350_v25 = vpop.f32.mrf.mxu3 }
 0x73b   :  { %v4351_v8 = vadd.f32 %v4350_v25, %v4182_v37  ;;  %v4183_v7 = vpop.f32.mrf.mxu2 }
 0x73c   :  { %v4184_v1 = vadd.f32 %v4183_v7, %v9185_v36 }
 0x73d   :  { %v4825_v37 = vmax.f32 %v4351_v8, 0.0 }
 0x740   :  { %v4414_v15 = vpop.f32.mrf.mxu0  ;;  %5065 = vmatmul.bf16.vlgmr.msra.gmra.mxu2 %v10473_v28 }
 0x741   :  { %v4583_v20 = vpop.f32.mrf.mxu1 }
 0x742   :  { %v4352_v34 = vpop.f32.mrf.mxu3 }
 0x743   :  { %v4353_v39 = vadd.f32 %v4352_v34, %v4184_v1  ;;  %v4186_v26 = vpop.f32.mrf.mxu2  ;;  %4453 = vmatmul.bf16.gmra.mxu0 %v10474_v42  ;;  %v4581_v34 = vadd.f32 %v4580_v44, %v4412_v2  ;;  %v4579_v42 = vadd.f32 %v4578_v40, %v4410_v55  ;;  %v4415_v55 = vadd.f32 %v4414_v15, %v9607_v19 }
 0x744   :  { %4622 = vmatmul.bf16.gmra.mxu1 %v9222_v24  ;;  %v4187_v51 = vadd.f32 %v4186_v26, %v9185_v36 }
 0x745   :  { %v4827_v25 = vmax.f32 %v4353_v39, 0.0  ;;  %v4740_v8 = vmax.f32 %v4581_v34, 0.0 }
 0x747   :  { %5234 = vmatmul.bf16.vlgmr.msra.gmra.mxu3 %v4862_v17  ;;  %v9619_v31 = vpack.c.bf16 %v4827_v25, %v4825_v37  ;;  %v4738_v17 = vmax.f32 %v4579_v42, 0.0  ;;  %v4584_v42 = vadd.f32 %v4583_v20, %v4415_v55 }
 0x748   :  { %v4416_v23 = vpop.f32.mrf.mxu0 }
 0x749   :  { %v4585_v7 = vpop.f32.mrf.mxu1  ;;  %v4864_v25 = vpack.c.bf16 %v4740_v8, %v4738_v17  ;;  %v4742_v17 = vmax.f32 %v4584_v42, 0.0 }
 0x74a   :  { %v4355_v60 = vpop.f32.mrf.mxu3 }
 0x74b   :  { %v4356_v28 = vadd.f32 %v4355_v60, %v4187_v51  ;;  %v4188_v1 = vpop.f32.mrf.mxu2 }
 0x74c   :  { %v4189_v11 = vadd.f32 %v4188_v1, %v9185_v36 }
 0x74d   :  { %v4829_v57 = vmax.f32 %v4356_v28, 0.0 }
 0x750   :  { %v4419_v24 = vpop.f32.mrf.mxu0  ;;  %5070 = vmatmul.bf16.gmra.mxu2 %v9226_v12  ;;  %v4417_v12 = vadd.f32 %v4416_v23, %v9607_v19 }
 0x751   :  { %v4588_v22 = vpop.f32.mrf.mxu1 }
 0x752   :  { %v4357_v39 = vpop.f32.mrf.mxu3 }
 0x753   :  { %v4358_v5 = vadd.f32 %v4357_v39, %v4189_v11  ;;  %v4191_v37 = vpop.f32.mrf.mxu2  ;;  %4458 = vmatmul.bf16.gmra.mxu0 %v8757_v38  ;;  %v4586_v38 = vadd.f32 %v4585_v7, %v4417_v12 }
 0x754   :  { %4627 = vmatmul.bf16.gmra.mxu1 %v9236_v59  ;;  %v4192_v2 = vadd.f32 %v4191_v37, %v9185_v36  ;;  %v10475_v37 = vld [vmem:[#allocation15_spill] sm:$0xff] }
 0x755   :  { %v4831_v26 = vmax.f32 %v4358_v5, 0.0  ;;  %v4744_v28 = vmax.f32 %v4586_v38, 0.0 }
 0x757   :  { %5239 = vmatmul.bf16.gmra.mxu3 %v4864_v25  ;;  %v9628_v40 = vpack.c.bf16 %v4831_v26, %v4829_v57  ;;  %v4866_v26 = vpack.c.bf16 %v4744_v28, %v4742_v17 }
 0x758   :  { %v4421_v44 = vpop.f32.mrf.mxu0 }
 0x759   :  { %v4590_v51 = vpop.f32.mrf.mxu1 }
 0x75a   :  { %v4360_v60 = vpop.f32.mrf.mxu3 }
 0x75b   :  { %v4361_v1 = vadd.f32 %v4360_v60, %v4192_v2  ;;  %v4193_v34 = vpop.f32.mrf.mxu2  ;;  %v4420_v60 = vadd.f32 %v4419_v24, %v9607_v19 }
 0x75c   :  { %v4194_v8 = vadd.f32 %v4193_v34, %v9185_v36 }
 0x75d   :  { %v4833_v15 = vmax.f32 %v4361_v1, 0.0  ;;  %v4589_v38 = vadd.f32 %v4588_v22, %v4420_v60  ;;  %v10476_v1 = vld [vmem:[#allocation16_spill] sm:$0xff] }
 0x760   :  { %v4424_v59 = vpop.f32.mrf.mxu0  ;;  %5075 = vmatmul.bf16.gmra.mxu2 %v9240_v21  ;;  %v4422_v21 = vadd.f32 %v4421_v44, %v9607_v19 }
 0x761   :  { %v4593_v11 = vpop.f32.mrf.mxu1 }
 0x762   :  { %v4362_v39 = vpop.f32.mrf.mxu3 }
 0x763   :  { %v4363_v23 = vadd.f32 %v4362_v39, %v4194_v8  ;;  %v4196_v5 = vpop.f32.mrf.mxu2  ;;  %4463 = vmatmul.bf16.gmra.mxu0 %v8777_v63  ;;  %v4591_v63 = vadd.f32 %v4590_v51, %v4422_v21 }
 0x764   :  { %4632 = vmatmul.bf16.gmra.mxu1 %v10475_v37  ;;  %v4197_v25 = vadd.f32 %v4196_v5, %v9185_v36  ;;  %v10477_v5 = vld [vmem:[#allocation106_spill] sm:$0xff] }
 0x765   :  { %v4835_v57 = vmax.f32 %v4363_v23, 0.0  ;;  %v4748_v28 = vmax.f32 %v4591_v63, 0.0  ;;  %v4746_v23 = vmax.f32 %v4589_v38, 0.0 }
 0x767   :  { %5244 = vmatmul.bf16.gmra.mxu3 %v4866_v26  ;;  %v9637_v20 = vpack.c.bf16 %v4835_v57, %v4833_v15  ;;  %v10478_v15 = vld [vmem:[#allocation46_spill] sm:$0xff]  ;;  %v4868_v26 = vpack.c.bf16 %v4748_v28, %v4746_v23 }
 0x768   :  { %v4426_v7 = vpop.f32.mrf.mxu0 }
 0x769   :  { %v4595_v12 = vpop.f32.mrf.mxu1  ;;  %v4427_v21 = vadd.f32 %v4426_v7, %v9607_v19 }
 0x76a   :  { %v4365_v2 = vpop.f32.mrf.mxu3 }
 0x76b   :  { %v4366_v55 = vadd.f32 %v4365_v2, %v4197_v25  ;;  %v4198_v34 = vpop.f32.mrf.mxu2 }
 0x76c   :  { %v4199_v8 = vadd.f32 %v4198_v34, %v9185_v36  ;;  %v4425_v34 = vadd.f32 %v4424_v59, %v9607_v19 }
 0x76d   :  { %v4837_v24 = vmax.f32 %v4366_v55, 0.0  ;;  %v10479_v55 = vld [vmem:[#allocation44_spill] sm:$0xff] }
 0x770   :  { %v4429_v42 = vpop.f32.mrf.mxu0  ;;  %5080 = vmatmul.bf16.gmra.mxu2 %v10476_v1  ;;  %v4596_v1 = vadd.f32 %v4595_v12, %v4427_v21 }
 0x771   :  { %v4598_v39 = vpop.f32.mrf.mxu1 }
 0x772   :  { %v4367_v17 = vpop.f32.mrf.mxu3  ;;  %v4752_v28 = vmax.f32 %v4596_v1, 0.0 }
 0x773   :  { %v4368_v44 = vadd.f32 %v4367_v17, %v4199_v8  ;;  %v4201_v37 = vpop.f32.mrf.mxu2  ;;  %4468 = vmatmul.bf16.gmra.mxu0 %v10477_v5  ;;  %v4594_v8 = vadd.f32 %v4593_v11, %v4425_v34 }
 0x774   :  { %4637 = vmatmul.bf16.gmra.mxu1 %v10478_v15  ;;  %v4202_v25 = vadd.f32 %v4201_v37, %v9185_v36  ;;  %v10480_v37 = vld [vmem:[#allocation108_spill] sm:$0xff] }
 0x775   :  { %v4839_v57 = vmax.f32 %v4368_v44, 0.0  ;;  %v4750_v15 = vmax.f32 %v4594_v8, 0.0 }
 0x777   :  { %5249 = vmatmul.bf16.gmra.mxu3 %v4868_v26  ;;  %v9646_v22 = vpack.c.bf16 %v4839_v57, %v4837_v24  ;;  %v4870_v26 = vpack.c.bf16 %v4752_v28, %v4750_v15 }
 0x778   :  { %v4431_v51 = vpop.f32.mrf.mxu0 }
 0x779   :  { %v4600_v2 = vpop.f32.mrf.mxu1  ;;  %v4432_v21 = vadd.f32 %v4431_v51, %v9607_v19 }
 0x77a   :  { %v4370_v60 = vpop.f32.mrf.mxu3 }
 0x77b   :  { %v4371_v63 = vadd.f32 %v4370_v60, %v4202_v25  ;;  %v4203_v38 = vpop.f32.mrf.mxu2 }
 0x77c   :  { %v4204_v23 = vadd.f32 %v4203_v38, %v9185_v36  ;;  %v4430_v38 = vadd.f32 %v4429_v42, %v9607_v19 }
 0x77d   :  { %v4841_v59 = vmax.f32 %v4371_v63, 0.0 }
 0x780   :  { %v4434_v17 = vpop.f32.mrf.mxu0  ;;  %5085 = vmatmul.bf16.gmra.mxu2 %v10479_v55  ;;  %v4601_v55 = vadd.f32 %v4600_v2, %v4432_v21 }
 0x781   :  { %v4603_v44 = vpop.f32.mrf.mxu1 }
 0x782   :  { %v4372_v5 = vpop.f32.mrf.mxu3  ;;  %v4756_v63 = vmax.f32 %v4601_v55, 0.0 }
 0x783   :  { %v4373_v7 = vadd.f32 %v4372_v5, %v4204_v23  ;;  %v4206_v24 = vpop.f32.mrf.mxu2  ;;  %4473 = vmatmul.bf16.gmra.mxu0 %v10480_v37  ;;  %v4599_v23 = vadd.f32 %v4598_v39, %v4430_v38  ;;  %v4435_v38 = vadd.f32 %v4434_v17, %v9607_v19 }
 0x784   :  { %4642 = vmatmul.bf16.gmra.mxu1 %v9296_v33  ;;  %v4207_v25 = vadd.f32 %v4206_v24, %v9185_v36  ;;  %v10481_v24 = vld [vmem:[#allocation4_spill] sm:$0xff] }
 0x785   :  { %v4843_v57 = vmax.f32 %v4373_v7, 0.0  ;;  %v4754_v7 = vmax.f32 %v4599_v23, 0.0 }
 0x787   :  { %5254 = vmatmul.bf16.gmra.mxu3 %v4870_v26  ;;  %v9655_v11 = vpack.c.bf16 %v4843_v57, %v4841_v59  ;;  %v10482_v59 = vld [vmem:[#allocation17_spill] sm:$0xff]  ;;  %v4872_v26 = vpack.c.bf16 %v4756_v63, %v4754_v7 }
 0x788   :  { %v4436_v12 = vpop.f32.mrf.mxu0 }
 0x789   :  { %v4605_v60 = vpop.f32.mrf.mxu1 }
 0x78a   :  { %v4375_v34 = vpop.f32.mrf.mxu3 }
 0x78b   :  { %v4376_v1 = vadd.f32 %v4375_v34, %v4207_v25  ;;  %v4208_v8 = vpop.f32.mrf.mxu2 }
 0x78c   :  { %v4209_v28 = vadd.f32 %v4208_v8, %v9185_v36 }
 0x78d   :  { %v4845_v42 = vmax.f32 %v4376_v1, 0.0  ;;  %v10483_v1 = vld [vmem:[#allocation19_spill] sm:$0xff] }
 0x790   :  { %v4439_v33 = vpop.f32.mrf.mxu0  ;;  %5090 = vmatmul.bf16.gmra.mxu2 %v9300_v32  ;;  %v4437_v32 = vadd.f32 %v4436_v12, %v9607_v19 }
 0x791   :  { %v4608_v5 = vpop.f32.mrf.mxu1 }
 0x792   :  { %v4377_v15 = vpop.f32.mrf.mxu3  ;;  %v4606_v23 = vadd.f32 %v4605_v60, %v4437_v32 }
 0x793   :  { %v4378_v51 = vadd.f32 %v4377_v15, %v4209_v28  ;;  %v4211_v37 = vpop.f32.mrf.mxu2  ;;  %4478 = vmatmul.bf16.gmra.mxu0 %v10481_v24  ;;  %v4604_v28 = vadd.f32 %v4603_v44, %v4435_v38 }
 0x794   :  { %4647 = vmatmul.bf16.gmra.mxu1 %v10482_v59  ;;  %v4212_v21 = vadd.f32 %v4211_v37, %v9185_v36  ;;  %v4760_v63 = vmax.f32 %v4606_v23, 0.0  ;;  %v10484_v37 = vld [vmem:[#allocation6_spill] sm:$0xff]  ;;  %v4440_v23 = vadd.f32 %v4439_v33, %v9607_v19 }
 0x795   :  { %v4847_v57 = vmax.f32 %v4378_v51, 0.0  ;;  %v4758_v59 = vmax.f32 %v4604_v28, 0.0 }
 0x797   :  { %5259 = vmatmul.bf16.gmra.mxu3 %v4872_v26  ;;  %v9664_v39 = vpack.c.bf16 %v4847_v57, %v4845_v42  ;;  %v10485_v57 = vld [vmem:[#allocation50_spill] sm:$0xff] }
 0x798   :  { %v4441_v2 = vpop.f32.mrf.mxu0 }
 0x799   :  { %v4610_v25 = vpop.f32.mrf.mxu1  ;;  %v4442_v32 = vadd.f32 %v4441_v2, %v9607_v19 }
 0x79a   :  { %v4380_v34 = vpop.f32.mrf.mxu3 }
 0x79b   :  { %v4381_v8 = vadd.f32 %v4380_v34, %v4212_v21  ;;  %v4213_v55 = vpop.f32.mrf.mxu2  ;;  %v4874_v21 = vpack.c.bf16 %v4760_v63, %v4758_v59 }
 0x79c   :  { %v4214_v7 = vadd.f32 %v4213_v55, %v9185_v36 }
 0x79d   :  { %v4849_v17 = vmax.f32 %v4381_v8, 0.0  ;;  %v10486_v8 = vld [vmem:[#allocation48_spill] sm:$0xff] }
 0x7a0   :  { %v4444_v15 = vpop.f32.mrf.mxu0  ;;  %5095 = vmatmul.bf16.gmra.mxu2 %v10483_v1 }
 0x7a1   :  { %v4613_v51 = vpop.f32.mrf.mxu1 }
 0x7a2   :  { %v4382_v24 = vpop.f32.mrf.mxu3 }
 0x7a3   :  { %v4383_v12 = vadd.f32 %v4382_v24, %v4214_v7  ;;  %v4216_v42 = vpop.f32.mrf.mxu2  ;;  %4483 = vmatmul.bf16.gmra.mxu0 %v10484_v37  ;;  %v4611_v7 = vadd.f32 %v4610_v25, %v4442_v32  ;;  %v4609_v24 = vadd.f32 %v4608_v5, %v4440_v23 }
 0x7a4   :  { %4652 = vmatmul.bf16.gmra.mxu1 %v10485_v57  ;;  %v4217_v34 = vadd.f32 %v4216_v42, %v9185_v36  ;;  %v10487_v42 = vld [vmem:[#allocation8_spill] sm:$0xff] }
 0x7a5   :  { %v4851_v26 = vmax.f32 %v4383_v12, 0.0  ;;  %v4764_v63 = vmax.f32 %v4611_v7, 0.0 }
 0x7a7   :  { %5264 = vmatmul.bf16.gmra.mxu3 %v4874_v21  ;;  %v9673_v44 = vpack.c.bf16 %v4851_v26, %v4849_v17  ;;  %v4762_v17 = vmax.f32 %v4609_v24, 0.0  ;;  %v10488_v21 = vld [vmem:[#allocation20_spill] sm:$0xff]  ;;  %v4445_v24 = vadd.f32 %v4444_v15, %v9607_v19 }
 0x7a8   :  { %v4446_v60 = vpop.f32.mrf.mxu0 }
 0x7a9   :  { %v4615_v38 = vpop.f32.mrf.mxu1  ;;  %v4447_v32 = vadd.f32 %v4446_v60, %v9607_v19 }
 0x7aa   :  { %v4385_v55 = vpop.f32.mrf.mxu3 }
 0x7ab   :  { %v4386_v28 = vadd.f32 %v4385_v55, %v4217_v34  ;;  %v4218_v1 = vpop.f32.mrf.mxu2  ;;  %v4876_v55 = vpack.c.bf16 %v4764_v63, %v4762_v17 }
 0x7ac   :  { %v4219_v59 = vadd.f32 %v4218_v1, %v9185_v36 }
 0x7ad   :  { %v4853_v33 = vmax.f32 %v4386_v28, 0.0  ;;  %v10490_v28 = vld [vmem:[#allocation22_spill] sm:$0xff] }
 0x7b0   :  { %v4449_v37 = vpop.f32.mrf.mxu0  ;;  %5100 = vmatmul.bf16.gmra.mxu2 %v10486_v8 }
 0x7b1   :  { %v4618_v12 = vpop.f32.mrf.mxu1 }
 0x7b2   :  { %v4387_v57 = vpop.f32.mrf.mxu3 }
 0x7b3   :  { %v4388_v2 = vadd.f32 %v4387_v57, %v4219_v59  ;;  %v4221_v26 = vpop.f32.mrf.mxu2  ;;  %4488 = vmatmul.bf16.gmra.mxu0 %v10487_v42  ;;  %v4616_v57 = vadd.f32 %v4615_v38, %v4447_v32  ;;  %v4614_v42 = vadd.f32 %v4613_v51, %v4445_v24  ;;  %v9694_v51 = vld [vmem:[%s10067_s13] ss:$0 sm:$0xff] }
 0x7b4   :  { %4657 = vmatmul.bf16.gmra.mxu1 %v10488_v21  ;;  %v4222_v23 = vadd.f32 %v4221_v26, %v9185_v36 }
 0x7b5   :  { %v4855_v34 = vmax.f32 %v4388_v2, 0.0  ;;  %v4768_v63 = vmax.f32 %v4616_v57, 0.0 }
 0x7b7   :  { %5269 = vmatmul.bf16.gmra.mxu3 %v4876_v55  ;;  %v9682_v5 = vpack.c.bf16 %v4855_v34, %v4853_v33  ;;  %v4766_v34 = vmax.f32 %v4614_v42, 0.0  ;;  %v10491_v55 = vld [vmem:[#allocation113_spill] sm:$0xff] }
 0x7b8   :  { %v4451_v25 = vpop.f32.mrf.mxu0 }
 0x7b9   :  { %10489 = vst [vmem:[#allocation60_spill] sm:$0xff] %v9682_v5  ;;  %v4620_v1 = vpop.f32.mrf.mxu1  ;;  %v10492_v5 = vld [vmem:[#allocation54_spill] sm:$0xff]  ;;  %v4878_v38 = vpack.c.bf16 %v4768_v63, %v4766_v34 }
 0x7ba   :  { %v4390_v7 = vpop.f32.mrf.mxu3 }
 0x7bb   :  { %v4391_v8 = vadd.f32 %v4390_v7, %v4222_v23  ;;  %v4223_v59 = vpop.f32.mrf.mxu2  ;;  %v4452_v7 = vadd.f32 %v4451_v25, %v9607_v19 }
 0x7bc   :  { %v4224_v17 = vadd.f32 %v4223_v59, %v9185_v36 }
 0x7bd   :  { %v4857_v15 = vmax.f32 %v4391_v8, 0.0 }
 0x7c0   :  { %v4454_v21 = vpop.f32.mrf.mxu0  ;;  %5105 = vmatmul.bf16.gmra.mxu2 %v10490_v28  ;;  %v4621_v28 = vadd.f32 %v4620_v1, %v4452_v7 }
 0x7c1   :  { %v4623_v2 = vpop.f32.mrf.mxu1 }
 0x7c2   :  { %v4392_v33 = vpop.f32.mrf.mxu3  ;;  %v4772_v34 = vmax.f32 %v4621_v28, 0.0 }
 0x7c3   :  { %v4393_v60 = vadd.f32 %v4392_v33, %v4224_v17  ;;  %4493 = vmatmul.bf16.gmra.mxu0 %v10491_v55  ;;  %v5066_v26 = vpop.f32.mrf.mxu2  ;;  %v10493_v33 = vld [vmem:[#allocation52_spill] sm:$0xff] }
 0x7c4   :  { %4662 = vmatmul.bf16.gmra.mxu1 %v10492_v5  ;;  %v5067_v24 = vadd.f32 %v9694_v51, %v5066_v26  ;;  %v4450_v5 = vadd.f32 %v4449_v37, %v9607_v19 }
 0x7c5   :  { %v4859_v23 = vmax.f32 %v4393_v60, 0.0 }
 0x7c6   :  { %v4619_v63 = vadd.f32 %v4618_v12, %v4450_v5 }
 0x7c7   :  { %5274 = vmatmul.bf16.gmra.mxu3 %v4878_v38  ;;  %v9696_v32 = vpack.c.bf16 %v4859_v23, %v4857_v15  ;;  %v10494_v23 = vld [vmem:[#allocation10_spill] sm:$0xff] }
 0x7c8   :  { %v4456_v36 = vpop.f32.mrf.mxu0  ;;  %v4770_v26 = vmax.f32 %v4619_v63, 0.0  ;;  %v10495_v38 = vld [vmem:[#allocation58_spill] sm:$0xff] }
 0x7c9   :  { %v4625_v59 = vpop.f32.mrf.mxu1  ;;  %v4457_v7 = vadd.f32 %v4456_v36, %v9607_v19 }
 0x7ca   :  { %v5235_v57 = vpop.f32.mrf.mxu3  ;;  %v4880_v12 = vpack.c.bf16 %v4772_v34, %v4770_v26  ;;  %v10496_v34 = vld [vmem:[#allocation56_spill] sm:$0xff] }
 0x7cb   :  { %v5236_v8 = vadd.f32 %v5235_v57, %v5067_v24  ;;  %v5068_v42 = vpop.f32.mrf.mxu2  ;;  %v4626_v63 = vadd.f32 %v4625_v59, %v4457_v7 }
 0x7cc   :  { %v5069_v25 = vadd.f32 %v9694_v51, %v5068_v42 }
 0x7cd   :  { %5395 = vst [vmem:[%s10068_s14] sm:$0xff] %v5236_v8  ;;  %v4455_v8 = vadd.f32 %v4454_v21, %v9607_v19 }
 0x7d0   :  { %v4459_v17 = vpop.f32.mrf.mxu0  ;;  %5110 = vmatmul.bf16.gmra.mxu2 %v10493_v33  ;;  %v4624_v33 = vadd.f32 %v4623_v2, %v4455_v8 }
 0x7d1   :  { %v4628_v60 = vpop.f32.mrf.mxu1  ;;  %v4460_v8 = vadd.f32 %v4459_v17, %v9607_v19 }
 0x7d2   :  { %v5237_v55 = vpop.f32.mrf.mxu3 }
 0x7d3   :  { %v5238_v15 = vadd.f32 %v5237_v55, %v5069_v25  ;;  %4498 = vmatmul.bf16.gmra.mxu0 %v10494_v23  ;;  %v5071_v37 = vpop.f32.mrf.mxu2  ;;  %v4776_v55 = vmax.f32 %v4626_v63, 0.0  ;;  %v4774_v23 = vmax.f32 %v4624_v33, 0.0 }
 0x7d4   :  { %4667 = vmatmul.bf16.gmra.mxu1 %v10495_v38  ;;  %v5072_v24 = vadd.f32 %v9694_v51, %v5071_v37  ;;  %v10497_v38 = vld [vmem:[#allocation12_spill] sm:$0xff] }
 0x7d5   :  { %5396 = vst [vmem:[%s10068_s14 + $0x8] sm:$0xff] %v5238_v15  ;;  %v4882_v2 = vpack.c.bf16 %v4776_v55, %v4774_v23 }
 0x7d7   :  { %5279 = vmatmul.bf16.gmra.mxu3 %v4880_v12 }
 0x7d8   :  { %v4461_v1 = vpop.f32.mrf.mxu0 }
 0x7d9   :  { %v4630_v57 = vpop.f32.mrf.mxu1  ;;  %v4462_v12 = vadd.f32 %v4461_v1, %v9607_v19 }
 0x7da   :  { %v5240_v5 = vpop.f32.mrf.mxu3 }
 0x7db   :  { %v5241_v42 = vadd.f32 %v5240_v5, %v5072_v24  ;;  %v5073_v28 = vpop.f32.mrf.mxu2  ;;  %v4631_v63 = vadd.f32 %v4630_v57, %v4462_v12 }
 0x7dc   :  { %v5074_v36 = vadd.f32 %v9694_v51, %v5073_v28 }
 0x7dd   :  { %5397 = vst [vmem:[%s10068_s14 + $0x10] sm:$0xff] %v5241_v42  ;;  %v4780_v55 = vmax.f32 %v4631_v63, 0.0 }
 0x7e0   :  { %v4464_v25 = vpop.f32.mrf.mxu0  ;;  %5115 = vmatmul.bf16.gmra.mxu2 %v10496_v34  ;;  %v10498_v34 = vld [vmem:[#allocation25_spill] sm:$0xff] }
 0x7e1   :  { %v4633_v26 = vpop.f32.mrf.mxu1 }
 0x7e2   :  { %v5242_v15 = vpop.f32.mrf.mxu3 }
 0x7e3   :  { %v5243_v37 = vadd.f32 %v5242_v15, %v5074_v36  ;;  %4503 = vmatmul.bf16.gmra.mxu0 %v10497_v38  ;;  %v5076_v21 = vpop.f32.mrf.mxu2  ;;  %v10499_v38 = vld [vmem:[#allocation13_spill] sm:$0xff] }
 0x7e4   :  { %4672 = vmatmul.bf16.gmra.mxu1 %v9424_v45  ;;  %v5077_v7 = vadd.f32 %v9694_v51, %v5076_v21  ;;  %v4629_v45 = vadd.f32 %v4628_v60, %v4460_v8 }
 0x7e5   :  { %5398 = vst [vmem:[%s10068_s14 + $0x18] sm:$0xff] %v5243_v37 }
 0x7e6   :  { %v4778_v23 = vmax.f32 %v4629_v45, 0.0  ;;  %v10500_v45 = vld [vmem:[#allocation62_spill] sm:$0xff] }
 0x7e7   :  { %5284 = vmatmul.bf16.gmra.mxu3 %v4882_v2 }
 0x7e8   :  { %v4466_v59 = vpop.f32.mrf.mxu0  ;;  %v4884_v60 = vpack.c.bf16 %v4780_v55, %v4778_v23 }
 0x7e9   :  { %v4635_v24 = vpop.f32.mrf.mxu1  ;;  %v4467_v21 = vadd.f32 %v4466_v59, %v9607_v19 }
 0x7ea   :  { %v5245_v5 = vpop.f32.mrf.mxu3 }
 0x7eb   :  { %v5246_v42 = vadd.f32 %v5245_v5, %v5077_v7  ;;  %v5078_v28 = vpop.f32.mrf.mxu2  ;;  %v4465_v5 = vadd.f32 %v4464_v25, %v9607_v19 }
 0x7ec   :  { %v5079_v1 = vadd.f32 %v9694_v51, %v5078_v28  ;;  %v4636_v28 = vadd.f32 %v4635_v24, %v4467_v21 }
 0x7ed   :  { %5399 = vst [vmem:[%s10068_s14 + $0x20] sm:$0xff] %v5246_v42 }
 0x7f0   :  { %v4469_v33 = vpop.f32.mrf.mxu0  ;;  %5120 = vmatmul.bf16.gmra.mxu2 %v10498_v34  ;;  %v4784_v34 = vmax.f32 %v4636_v28, 0.0 }
 0x7f1   :  { %v4638_v36 = vpop.f32.mrf.mxu1 }
 0x7f2   :  { %v5247_v15 = vpop.f32.mrf.mxu3 }
 0x7f3   :  { %v5248_v37 = vadd.f32 %v5247_v15, %v5079_v1  ;;  %4508 = vmatmul.bf16.gmra.mxu0 %v10499_v38  ;;  %v5081_v17 = vpop.f32.mrf.mxu2 }
 0x7f4   :  { %4677 = vmatmul.bf16.gmra.mxu1 %v9445_v16  ;;  %v5082_v2 = vadd.f32 %v9694_v51, %v5081_v17  ;;  %v4634_v16 = vadd.f32 %v4633_v26, %v4465_v5 }
 0x7f5   :  { %5400 = vst [vmem:[%s10068_s14 + $0x28] sm:$0xff] %v5248_v37  ;;  %v10501_v37 = vld [vmem:[#allocation14_spill] sm:$0xff] }
 0x7f6   :  { %v4782_v15 = vmax.f32 %v4634_v16, 0.0 }
 0x7f7   :  { %5289 = vmatmul.bf16.gmra.mxu3 %v4884_v60 }
 0x7f8   :  { %v4471_v57 = vpop.f32.mrf.mxu0  ;;  %v4886_v26 = vpack.c.bf16 %v4784_v34, %v4782_v15 }
 0x7f9   :  { %v4640_v12 = vpop.f32.mrf.mxu1  ;;  %v4472_v38 = vadd.f32 %v4471_v57, %v9607_v19 }
 0x7fa   :  { %v5250_v7 = vpop.f32.mrf.mxu3 }
 0x7fb   :  { %v5251_v8 = vadd.f32 %v5250_v7, %v5082_v2  ;;  %v5083_v42 = vpop.f32.mrf.mxu2  ;;  %v4470_v2 = vadd.f32 %v4469_v33, %v9607_v19 }
 0x7fc   :  { %v5084_v59 = vadd.f32 %v9694_v51, %v5083_v42 }
 0x7fd   :  { %5401 = vst [vmem:[%s10068_s14 + $0x30] sm:$0xff] %v5251_v8  ;;  %v4641_v8 = vadd.f32 %v4640_v12, %v4472_v38 }
 0x7ff   :  { %v4788_v28 = vmax.f32 %v4641_v8, 0.0 }
 0x800   :  { %v4474_v63 = vpop.f32.mrf.mxu0  ;;  %5125 = vmatmul.bf16.gmra.mxu2 %v10500_v45 }
 0x801   :  { %v4643_v55 = vpop.f32.mrf.mxu1 }
 0x802   :  { %v5252_v1 = vpop.f32.mrf.mxu3 }
 0x803   :  { %v5253_v23 = vadd.f32 %v5252_v1, %v5084_v59  ;;  %4513 = vmatmul.bf16.gmra.mxu0 %v10501_v37  ;;  %v5086_v25 = vpop.f32.mrf.mxu2  ;;  %v10502_v1 = vld [vmem:[#allocation42_spill] sm:$0xff] }
 0x804   :  { %4682 = vmatmul.bf16.gmra.mxu1 %v9459_v9  ;;  %v5087_v17 = vadd.f32 %v9694_v51, %v5086_v25  ;;  %v4639_v9 = vadd.f32 %v4638_v36, %v4470_v2  ;;  %v4475_v25 = vadd.f32 %v4474_v63, %v9607_v19 }
 0x805   :  { %5402 = vst [vmem:[%s10068_s14 + $0x38] sm:$0xff] %v5253_v23 }
 0x806   :  { %v4786_v34 = vmax.f32 %v4639_v9, 0.0 }
 0x807   :  { %5294 = vmatmul.bf16.gmra.mxu3 %v4886_v26 }
 0x808   :  { %v4476_v24 = vpop.f32.mrf.mxu0  ;;  %v4888_v36 = vpack.c.bf16 %v4788_v28, %v4786_v34 }
 0x809   :  { %v4645_v60 = vpop.f32.mrf.mxu1 }
 0x80a   :  { %v5255_v21 = vpop.f32.mrf.mxu3 }
 0x80b   :  { %v5256_v7 = vadd.f32 %v5255_v21, %v5087_v17  ;;  %v5088_v5 = vpop.f32.mrf.mxu2 }
 0x80c   :  { %v5089_v57 = vadd.f32 %v9694_v51, %v5088_v5 }
 0x80d   :  { %5403 = vst [vmem:[%s10068_s14 + $0x40] sm:$0xff] %v5256_v7 }
 0x810   :  { %v4479_v42 = vpop.f32.mrf.mxu0  ;;  %5130 = vmatmul.bf16.gmra.mxu2 %v9463_v35  ;;  %v4477_v35 = vadd.f32 %v4476_v24, %v9607_v19 }
 0x811   :  { %v4648_v16 = vpop.f32.mrf.mxu1  ;;  %v4480_v34 = vadd.f32 %v4479_v42, %v9607_v19 }
 0x812   :  { %v5257_v45 = vpop.f32.mrf.mxu3  ;;  %v4646_v17 = vadd.f32 %v4645_v60, %v4477_v35 }
 0x813   :  { %v5258_v59 = vadd.f32 %v5257_v45, %v5089_v57  ;;  %4518 = vmatmul.bf16.gmra.mxu0 %v10502_v1  ;;  %v5091_v33 = vpop.f32.mrf.mxu2 }
 0x814   :  { %4687 = vmatmul.bf16.gmra.mxu1 %v9473_v6  ;;  %v5092_v15 = vadd.f32 %v9694_v51, %v5091_v33  ;;  %v4644_v6 = vadd.f32 %v4643_v55, %v4475_v25  ;;  %v4792_v2 = vmax.f32 %v4646_v17, 0.0 }
 0x815   :  { %5404 = vst [vmem:[%s10068_s14 + $0x48] sm:$0xff] %v5258_v59 }
 0x816   :  { %v4790_v8 = vmax.f32 %v4644_v6, 0.0 }
 0x817   :  { %5299 = vmatmul.bf16.gmra.mxu3 %v4888_v36 }
 0x818   :  { %v4481_v12 = vpop.f32.mrf.mxu0  ;;  %v4890_v55 = vpack.c.bf16 %v4792_v2, %v4790_v8 }
 0x819   :  { %v4650_v23 = vpop.f32.mrf.mxu1 }
 0x81a   :  { %v5260_v37 = vpop.f32.mrf.mxu3 }
 0x81b   :  { %v5261_v26 = vadd.f32 %v5260_v37, %v5092_v15  ;;  %v5093_v38 = vpop.f32.mrf.mxu2 }
 0x81c   :  { %v5094_v24 = vadd.f32 %v9694_v51, %v5093_v38 }
 0x81d   :  { %5405 = vst [vmem:[%s10068_s14 + $0x50] sm:$0xff] %v5261_v26  ;;  %v10503_v26 = vld [vmem:[#allocation41_spill] sm:$0xff] }
 0x820   :  { %v4484_v21 = vpop.f32.mrf.mxu0  ;;  %5135 = vmatmul.bf16.gmra.mxu2 %v9477_v43  ;;  %v4482_v43 = vadd.f32 %v4481_v12, %v9607_v19 }
 0x821   :  { %v4653_v7 = vpop.f32.mrf.mxu1  ;;  %v4485_v2 = vadd.f32 %v4484_v21, %v9607_v19 }
 0x822   :  { %v5262_v5 = vpop.f32.mrf.mxu3  ;;  %v4651_v1 = vadd.f32 %v4650_v23, %v4482_v43 }
 0x823   :  { %v5263_v9 = vadd.f32 %v5262_v5, %v5094_v24  ;;  %4523 = vmatmul.bf16.gmra.mxu0 %v9040_v54  ;;  %v5096_v63 = vpop.f32.mrf.mxu2 }
 0x824   :  { %4692 = vmatmul.bf16.gmra.mxu1 %v9487_v3  ;;  %v5097_v28 = vadd.f32 %v9694_v51, %v5096_v63  ;;  %v4649_v3 = vadd.f32 %v4648_v16, %v4480_v34  ;;  %v4796_v36 = vmax.f32 %v4651_v1, 0.0 }
 0x825   :  { %5406 = vst [vmem:[%s10068_s14 + $0x58] sm:$0xff] %v5263_v9 }
 0x826   :  { %v4794_v37 = vmax.f32 %v4649_v3, 0.0 }
 0x827   :  { %5304 = vmatmul.bf16.gmra.mxu3 %v4890_v55 }
 0x828   :  { %v4486_v60 = vpop.f32.mrf.mxu0  ;;  %v4892_v16 = vpack.c.bf16 %v4796_v36, %v4794_v37 }
 0x829   :  { %v4655_v57 = vpop.f32.mrf.mxu1 }
 0x82a   :  { %v5265_v45 = vpop.f32.mrf.mxu3 }
 0x82b   :  { %v5266_v59 = vadd.f32 %v5265_v45, %v5097_v28  ;;  %v5098_v54 = vpop.f32.mrf.mxu2 }
 0x82c   :  { %v5099_v12 = vadd.f32 %v9694_v51, %v5098_v54 }
 0x82d   :  { %5407 = vst [vmem:[%s10068_s14 + $0x60] sm:$0xff] %v5266_v59 }
 0x830   :  { %v4489_v33 = vpop.f32.mrf.mxu0  ;;  %5140 = vmatmul.bf16.gmra.mxu2 %v9497_v50  ;;  %v4487_v50 = vadd.f32 %v4486_v60, %v9607_v19 }
 0x831   :  { %v4658_v35 = vpop.f32.mrf.mxu1  ;;  %v4490_v1 = vadd.f32 %v4489_v33, %v9607_v19 }
 0x832   :  { %v5267_v15 = vpop.f32.mrf.mxu3  ;;  %v4656_v8 = vadd.f32 %v4655_v57, %v4487_v50 }
 0x833   :  { %v5268_v25 = vadd.f32 %v5267_v15, %v5099_v12  ;;  %4528 = vmatmul.bf16.gmra.mxu0 %v10503_v26  ;;  %v5101_v42 = vpop.f32.mrf.mxu2 }
 0x834   :  { %4697 = vmatmul.bf16.gmra.mxu1 %v9507_v49  ;;  %v5102_v38 = vadd.f32 %v9694_v51, %v5101_v42  ;;  %v4654_v49 = vadd.f32 %v4653_v7, %v4485_v2  ;;  %v4800_v63 = vmax.f32 %v4656_v8, 0.0 }
 0x835   :  { %5408 = vst [vmem:[%s10068_s14 + $0x68] sm:$0xff] %v5268_v25 }
 0x836   :  { %v4798_v28 = vmax.f32 %v4654_v49, 0.0 }
 0x837   :  { %5309 = vmatmul.bf16.gmra.mxu3 %v4892_v16 }
 0x838   :  { %v4491_v23 = vpop.f32.mrf.mxu0  ;;  %v4894_v7 = vpack.c.bf16 %v4800_v63, %v4798_v28 }
 0x839   :  { %v4660_v17 = vpop.f32.mrf.mxu1 }
 0x83a   :  { %v5270_v6 = vpop.f32.mrf.mxu3 }
 0x83b   :  { %v5271_v24 = vadd.f32 %v5270_v6, %v5102_v38  ;;  %v5103_v5 = vpop.f32.mrf.mxu2 }
 0x83c   :  { %v5104_v55 = vadd.f32 %v9694_v51, %v5103_v5 }
 0x83d   :  { %5409 = vst [vmem:[%s10068_s14 + $0x70] sm:$0xff] %v5271_v24 }
 0x840   :  { %v4494_v9 = vpop.f32.mrf.mxu0  ;;  %5145 = vmatmul.bf16.gmra.mxu2 %v9511_v13  ;;  %v4492_v13 = vadd.f32 %v4491_v23, %v9607_v19 }
 0x841   :  { %v4663_v60 = vpop.f32.mrf.mxu1  ;;  %v4495_v6 = vadd.f32 %v4494_v9, %v9607_v19 }
 0x842   :  { %v5272_v43 = vpop.f32.mrf.mxu3  ;;  %v4661_v36 = vadd.f32 %v4660_v17, %v4492_v13 }
 0x843   :  { %v5273_v45 = vadd.f32 %v5272_v43, %v5104_v55  ;;  %4533 = vmatmul.bf16.gmra.mxu0 %v9074_v56  ;;  %v5106_v21 = vpop.f32.mrf.mxu2 }
 0x844   :  { %4702 = vmatmul.bf16.gmra.mxu1 %v9521_v10  ;;  %v5107_v34 = vadd.f32 %v9694_v51, %v5106_v21  ;;  %v4659_v10 = vadd.f32 %v4658_v35, %v4490_v1  ;;  %v4804_v15 = vmax.f32 %v4661_v36, 0.0 }
 0x845   :  { %5410 = vst [vmem:[%s10068_s14 + $0x78] sm:$0xff] %v5273_v45 }
 0x846   :  { %v4802_v42 = vmax.f32 %v4659_v10, 0.0 }
 0x847   :  { %5314 = vmatmul.bf16.gmra.mxu3 %v4894_v7 }
 0x848   :  { %v4496_v57 = vpop.f32.mrf.mxu0  ;;  %v4896_v35 = vpack.c.bf16 %v4804_v15, %v4802_v42 }
 0x849   :  { %v4665_v59 = vpop.f32.mrf.mxu1 }
 0x84a   :  { %v5275_v54 = vpop.f32.mrf.mxu3 }
 0x84b   :  { %v5276_v3 = vadd.f32 %v5275_v54, %v5107_v34  ;;  %v5108_v56 = vpop.f32.mrf.mxu2 }
 0x84c   :  { %v5109_v37 = vadd.f32 %v9694_v51, %v5108_v56 }
 0x84d   :  { %5411 = vst [vmem:[%s10068_s14 + $0x80] sm:$0xff] %v5276_v3 }
 0x850   :  { %v4499_v12 = vpop.f32.mrf.mxu0  ;;  %5150 = vmatmul.bf16.gmra.mxu2 %v9525_v4  ;;  %v4497_v4 = vadd.f32 %v4496_v57, %v9607_v19 }
 0x851   :  { %v4668_v25 = vpop.f32.mrf.mxu1  ;;  %v4500_v13 = vadd.f32 %v4499_v12, %v9607_v19 }
 0x852   :  { %v5277_v26 = vpop.f32.mrf.mxu3  ;;  %v4666_v24 = vadd.f32 %v4665_v59, %v4497_v4 }
 0x853   :  { %v5278_v16 = vadd.f32 %v5277_v26, %v5109_v37  ;;  %4538 = vmatmul.bf16.gmra.mxu0 %v9108_v48  ;;  %v5111_v33 = vpop.f32.mrf.mxu2 }
 0x854   :  { %4707 = vmatmul.bf16.gmra.mxu1 %v9535_v41  ;;  %v5112_v50 = vadd.f32 %v9694_v51, %v5111_v33  ;;  %v4664_v41 = vadd.f32 %v4663_v60, %v4495_v6  ;;  %v4808_v8 = vmax.f32 %v4666_v24, 0.0 }
 0x855   :  { %5412 = vst [vmem:[%s10068_s14 + $0x88] sm:$0xff] %v5278_v16 }
 0x856   :  { %v4806_v43 = vmax.f32 %v4664_v41, 0.0 }
 0x857   :  { %5319 = vmatmul.bf16.gmra.mxu3 %v4896_v35 }
 0x858   :  { %v4501_v23 = vpop.f32.mrf.mxu0  ;;  %v4898_v60 = vpack.c.bf16 %v4808_v8, %v4806_v43 }
 0x859   :  { %v4670_v38 = vpop.f32.mrf.mxu1 }
 0x85a   :  { %v5280_v17 = vpop.f32.mrf.mxu3 }
 0x85b   :  { %v5281_v2 = vadd.f32 %v5280_v17, %v5112_v50  ;;  %v5113_v48 = vpop.f32.mrf.mxu2 }
 0x85c   :  { %v5114_v49 = vadd.f32 %v9694_v51, %v5113_v48 }
 0x85d   :  { %5413 = vst [vmem:[%s10068_s14 + $0x90] sm:$0xff] %v5281_v2 }
 0x860   :  { %v4504_v5 = vpop.f32.mrf.mxu0  ;;  %5155 = vmatmul.bf16.gmra.mxu2 %v9539_v62  ;;  %v4502_v62 = vadd.f32 %v4501_v23, %v9607_v19 }
 0x861   :  { %v4673_v63 = vpop.f32.mrf.mxu1  ;;  %v4505_v33 = vadd.f32 %v4504_v5, %v9607_v19 }
 0x862   :  { %v5282_v55 = vpop.f32.mrf.mxu3  ;;  %v4671_v59 = vadd.f32 %v4670_v38, %v4502_v62 }
 0x863   :  { %v5283_v28 = vadd.f32 %v5282_v55, %v5114_v49  ;;  %4543 = vmatmul.bf16.gmra.mxu0 %v9125_v14  ;;  %v5116_v9 = vpop.f32.mrf.mxu2 }
 0x864   :  { %4712 = vmatmul.bf16.gmra.mxu1 %v9549_v52  ;;  %v5117_v21 = vadd.f32 %v9694_v51, %v5116_v9  ;;  %v4669_v52 = vadd.f32 %v4668_v25, %v4500_v13  ;;  %v4812_v1 = vmax.f32 %v4671_v59, 0.0 }
 0x865   :  { %5414 = vst [vmem:[%s10068_s14 + $0x98] sm:$0xff] %v5283_v28 }
 0x866   :  { %v4810_v10 = vmax.f32 %v4669_v52, 0.0 }
 0x867   :  { %5324 = vmatmul.bf16.gmra.mxu3 %v4898_v60 }
 0x868   :  { %v4506_v45 = vpop.f32.mrf.mxu0  ;;  %v4900_v37 = vpack.c.bf16 %v4812_v1, %v4810_v10 }
 0x869   :  { %v4675_v7 = vpop.f32.mrf.mxu1 }
 0x86a   :  { %v5285_v57 = vpop.f32.mrf.mxu3 }
 0x86b   :  { %v5286_v34 = vadd.f32 %v5285_v57, %v5117_v21  ;;  %v5118_v14 = vpop.f32.mrf.mxu2 }
 0x86c   :  { %v5119_v3 = vadd.f32 %v9694_v51, %v5118_v14 }
 0x86d   :  { %5415 = vst [vmem:[%s10068_s14 + $0xa0] sm:$0xff] %v5286_v34 }
 0x870   :  { %v4509_v54 = vpop.f32.mrf.mxu0  ;;  %5160 = vmatmul.bf16.gmra.mxu2 %v9559_v47  ;;  %v4507_v47 = vadd.f32 %v4506_v45, %v9607_v19 }
 0x871   :  { %v4678_v56 = vpop.f32.mrf.mxu1  ;;  %v4510_v55 = vadd.f32 %v4509_v54, %v9607_v19 }
 0x872   :  { %v5287_v36 = vpop.f32.mrf.mxu3  ;;  %v4676_v23 = vadd.f32 %v4675_v7, %v4507_v47 }
 0x873   :  { %v5288_v15 = vadd.f32 %v5287_v36, %v5119_v3  ;;  %4548 = vmatmul.bf16.gmra.mxu0 %v9141_v18  ;;  %v5121_v12 = vpop.f32.mrf.mxu2 }
 0x874   :  { %4717 = vmatmul.bf16.gmra.mxu1 %v9569_v30  ;;  %v5122_v26 = vadd.f32 %v9694_v51, %v5121_v12  ;;  %v4674_v30 = vadd.f32 %v4673_v63, %v4505_v33  ;;  %v4816_v50 = vmax.f32 %v4676_v23, 0.0 }
 0x875   :  { %5416 = vst [vmem:[%s10068_s14 + $0xa8] sm:$0xff] %v5288_v15 }
 0x876   :  { %v4814_v2 = vmax.f32 %v4674_v30, 0.0 }
 0x877   :  { %5329 = vmatmul.bf16.gmra.mxu3 %v4900_v37 }
 0x878   :  { %v4511_v25 = vpop.f32.mrf.mxu0  ;;  %v4902_v41 = vpack.c.bf16 %v4816_v50, %v4814_v2 }
 0x879   :  { %v4680_v42 = vpop.f32.mrf.mxu1 }
 0x87a   :  { %v5290_v16 = vpop.f32.mrf.mxu3 }
 0x87b   :  { %v5291_v35 = vadd.f32 %v5290_v16, %v5122_v26  ;;  %v5123_v18 = vpop.f32.mrf.mxu2 }
 0x87c   :  { %v5124_v38 = vadd.f32 %v9694_v51, %v5123_v18 }
 0x87d   :  { %5417 = vst [vmem:[%s10068_s14 + $0xb0] sm:$0xff] %v5291_v35 }
 0x880   :  { %v4514_v4 = vpop.f32.mrf.mxu0  ;;  %5165 = vmatmul.bf16.gmra.mxu2 %v9573_v0  ;;  %v4512_v0 = vadd.f32 %v4511_v25, %v9607_v19 }
 0x881   :  { %v4683_v17 = vpop.f32.mrf.mxu1  ;;  %v4515_v1 = vadd.f32 %v4514_v4, %v9607_v19 }
 0x882   :  { %v5292_v6 = vpop.f32.mrf.mxu3  ;;  %v4681_v28 = vadd.f32 %v4680_v42, %v4512_v0 }
 0x883   :  { %v5293_v48 = vadd.f32 %v5292_v6, %v5124_v38  ;;  %4553 = vmatmul.bf16.gmra.mxu0 %v9159_v58  ;;  %v5126_v24 = vpop.f32.mrf.mxu2 }
 0x884   :  { %4722 = vmatmul.bf16.gmra.mxu1 %v9589_v46  ;;  %v5127_v8 = vadd.f32 %v9694_v51, %v5126_v24  ;;  %v4679_v46 = vadd.f32 %v4678_v56, %v4510_v55  ;;  %v4820_v60 = vmax.f32 %v4681_v28, 0.0 }
 0x885   :  { %5418 = vst [vmem:[%s10068_s14 + $0xb8] sm:$0xff] %v5293_v48 }
 0x886   :  { %v4818_v7 = vmax.f32 %v4679_v46, 0.0 }
 0x887   :  { %5334 = vmatmul.bf16.gmra.mxu3 %v4902_v41 }
 0x888   :  { %v4516_v5 = vpop.f32.mrf.mxu0  ;;  %v4904_v34 = vpack.c.bf16 %v4820_v60, %v4818_v7 }
 0x889   :  { %v4685_v49 = vpop.f32.mrf.mxu1 }
 0x88a   :  { %v5295_v63 = vpop.f32.mrf.mxu3 }
 0x88b   :  { %v5296_v43 = vadd.f32 %v5295_v63, %v5127_v8  ;;  %v5128_v58 = vpop.f32.mrf.mxu2 }
 0x88c   :  { %v5129_v45 = vadd.f32 %v9694_v51, %v5128_v58 }
 0x88d   :  { %5419 = vst [vmem:[%s10068_s14 + $0xc0] sm:$0xff] %v5296_v43 }
 0x890   :  { %v4519_v9 = vpop.f32.mrf.mxu0  ;;  %5170 = vmatmul.bf16.gmra.mxu2 %v9593_v29  ;;  %v4517_v29 = vadd.f32 %v4516_v5, %v9607_v19 }
 0x891   :  { %v4688_v62 = vpop.f32.mrf.mxu1  ;;  %v4520_v23 = vadd.f32 %v4519_v9, %v9607_v19 }
 0x892   :  { %v5297_v21 = vpop.f32.mrf.mxu3  ;;  %v4686_v56 = vadd.f32 %v4685_v49, %v4517_v29 }
 0x893   :  { %v5298_v57 = vadd.f32 %v5297_v21, %v5129_v45  ;;  %4558 = vmatmul.bf16.gmra.mxu0 %v9198_v53  ;;  %v5131_v13 = vpop.f32.mrf.mxu2  ;;  %v4689_v38 = vadd.f32 %v4688_v62, %v4520_v23 }
 0x894   :  { %4727 = vmatmul.bf16.gmra.mxu1 %v9602_v27  ;;  %v5132_v59 = vadd.f32 %v9694_v51, %v5131_v13  ;;  %v4684_v27 = vadd.f32 %v4683_v17, %v4515_v1  ;;  %v4824_v10 = vmax.f32 %v4686_v56, 0.0 }
 0x895   :  { %5420 = vst [vmem:[%s10068_s14 + $0xc8] sm:$0xff] %v5298_v57  ;;  %v4826_v41 = vmax.f32 %v4689_v38, 0.0 }
 0x896   :  { %v4822_v25 = vmax.f32 %v4684_v27, 0.0 }
 0x897   :  { %5339 = vmatmul.bf16.gmra.mxu3 %v4904_v34 }
 0x898   :  { %v4521_v14 = vpop.f32.mrf.mxu0  ;;  %v4906_v42 = vpack.c.bf16 %v4824_v10, %v4822_v25 }
 0x899   :  { %v4690_v52 = vpop.f32.mrf.mxu1  ;;  %v4522_v33 = vadd.f32 %v4521_v14, %v9607_v19 }
 0x89a   :  { %v5300_v54 = vpop.f32.mrf.mxu3 }
 0x89b   :  { %v5301_v3 = vadd.f32 %v5300_v54, %v5132_v59  ;;  %v5133_v53 = vpop.f32.mrf.mxu2  ;;  %v4691_v50 = vadd.f32 %v4690_v52, %v4522_v33 }
 0x89c   :  { %v5134_v15 = vadd.f32 %v9694_v51, %v5133_v53 }
 0x89d   :  { %5421 = vst [vmem:[%s10068_s14 + $0xd0] sm:$0xff] %v5301_v3  ;;  %v4828_v6 = vmax.f32 %v4691_v50, 0.0 }
 0x89f   :  { %v4908_v8 = vpack.c.bf16 %v4828_v6, %v4826_v41 }
 0x8a0   :  { %v4524_v36 = vpop.f32.mrf.mxu0  ;;  %5175 = vmatmul.bf16.gmra.mxu2 %v9610_v61 }
 0x8a1   :  { %v4693_v12 = vpop.f32.mrf.mxu1  ;;  %v4525_v58 = vadd.f32 %v4524_v36, %v9607_v19 }
 0x8a2   :  { %v5302_v37 = vpop.f32.mrf.mxu3 }
 0x8a3   :  { %v5303_v47 = vadd.f32 %v5302_v37, %v5134_v15  ;;  %v5136_v26 = vpop.f32.mrf.mxu2  ;;  %v4694_v60 = vadd.f32 %v4693_v12, %v4525_v58 }
 0x8a4   :  { %v5137_v35 = vadd.f32 %v9694_v51, %v5136_v26 }
 0x8a5   :  { %5422 = vst [vmem:[%s10068_s14 + $0xd8] sm:$0xff] %v5303_v47  ;;  %v4830_v13 = vmax.f32 %v4694_v60, 0.0 }
 0x8a7   :  { %5344 = vmatmul.bf16.gmra.mxu3 %v4906_v42 }
 0x8a8   :  { %v4526_v16 = vpop.f32.mrf.mxu0 }
 0x8a9   :  { %v4695_v61 = vpop.f32.mrf.mxu1  ;;  %v4527_v63 = vadd.f32 %v4526_v16, %v9607_v19 }
 0x8aa   :  { %v5305_v18 = vpop.f32.mrf.mxu3 }
 0x8ab   :  { %v5306_v30 = vadd.f32 %v5305_v18, %v5137_v35  ;;  %v5138_v4 = vpop.f32.mrf.mxu2  ;;  %v4696_v9 = vadd.f32 %v4695_v61, %v4527_v63 }
 0x8ac   :  { %v5139_v2 = vadd.f32 %v9694_v51, %v5138_v4 }
 0x8ad   :  { %5423 = vst [vmem:[%s10068_s14 + $0xe0] sm:$0xff] %v5306_v30  ;;  %v4832_v62 = vmax.f32 %v4696_v9, 0.0 }
 0x8af   :  { %v4910_v29 = vpack.c.bf16 %v4832_v62, %v4830_v13 }
 0x8b0   :  { %v4529_v17 = vpop.f32.mrf.mxu0  ;;  %5180 = vmatmul.bf16.gmra.mxu2 %v9619_v31 }
 0x8b1   :  { %v4698_v48 = vpop.f32.mrf.mxu1  ;;  %v4530_v3 = vadd.f32 %v4529_v17, %v9607_v19 }
 0x8b2   :  { %v5307_v24 = vpop.f32.mrf.mxu3 }
 0x8b3   :  { %v5308_v5 = vadd.f32 %v5307_v24, %v5139_v2  ;;  %v5141_v0 = vpop.f32.mrf.mxu2  ;;  %v4699_v36 = vadd.f32 %v4698_v48, %v4530_v3 }
 0x8b4   :  { %v5142_v55 = vadd.f32 %v9694_v51, %v5141_v0 }
 0x8b5   :  { %5424 = vst [vmem:[%s10068_s14 + $0xe8] sm:$0xff] %v5308_v5  ;;  %v4834_v47 = vmax.f32 %v4699_v36, 0.0 }
 0x8b7   :  { %5349 = vmatmul.bf16.gmra.mxu3 %v4908_v8 }
 0x8b8   :  { %v4531_v49 = vpop.f32.mrf.mxu0 }
 0x8b9   :  { %v4700_v31 = vpop.f32.mrf.mxu1  ;;  %v4532_v52 = vadd.f32 %v4531_v49, %v9607_v19 }
 0x8ba   :  { %v5310_v43 = vpop.f32.mrf.mxu3 }
 0x8bb   :  { %v5311_v28 = vadd.f32 %v5310_v43, %v5142_v55  ;;  %v5143_v46 = vpop.f32.mrf.mxu2  ;;  %v4701_v27 = vadd.f32 %v4700_v31, %v4532_v52 }
 0x8bc   :  { %v5144_v21 = vadd.f32 %v9694_v51, %v5143_v46 }
 0x8bd   :  { %5425 = vst [vmem:[%s10068_s14 + $0xf0] sm:$0xff] %v5311_v28  ;;  %v4836_v15 = vmax.f32 %v4701_v27, 0.0 }
 0x8bf   :  { %v4912_v16 = vpack.c.bf16 %v4836_v15, %v4834_v47 }
 0x8c0   :  { %v4534_v45 = vpop.f32.mrf.mxu0  ;;  %5185 = vmatmul.bf16.gmra.mxu2 %v9628_v40 }
 0x8c1   :  { %v4703_v7 = vpop.f32.mrf.mxu1  ;;  %v4535_v18 = vadd.f32 %v4534_v45, %v9607_v19 }
 0x8c2   :  { %v5312_v57 = vpop.f32.mrf.mxu3 }
 0x8c3   :  { %v5313_v34 = vadd.f32 %v5312_v57, %v5144_v21  ;;  %v5146_v14 = vpop.f32.mrf.mxu2  ;;  %v4704_v38 = vadd.f32 %v4703_v7, %v4535_v18 }
 0x8c4   :  { %v5147_v54 = vadd.f32 %v9694_v51, %v5146_v14 }
 0x8c5   :  { %5426 = vst [vmem:[%s10068_s14 + $0xf8] sm:$0xff] %v5313_v34  ;;  %v4838_v24 = vmax.f32 %v4704_v38, 0.0 }
 0x8c7   :  { %5354 = vmatmul.bf16.gmra.mxu3 %v4910_v29 }
 0x8c8   :  { %v4536_v59 = vpop.f32.mrf.mxu0 }
 0x8c9   :  { %v4705_v40 = vpop.f32.mrf.mxu1  ;;  %v4537_v35 = vadd.f32 %v4536_v59, %v9607_v19 }
 0x8ca   :  { %v5315_v1 = vpop.f32.mrf.mxu3 }
 0x8cb   :  { %v5316_v53 = vadd.f32 %v5315_v1, %v5147_v54  ;;  %v5148_v56 = vpop.f32.mrf.mxu2  ;;  %v4706_v50 = vadd.f32 %v4705_v40, %v4537_v35 }
 0x8cc   :  { %v5149_v12 = vadd.f32 %v9694_v51, %v5148_v56 }
 0x8cd   :  { %5427 = vst [vmem:[%s10068_s14 + $0x100] sm:$0xff] %v5316_v53  ;;  %v4840_v6 = vmax.f32 %v4706_v50, 0.0 }
 0x8cf   :  { %v4914_v0 = vpack.c.bf16 %v4840_v6, %v4838_v24 }
 0x8d0   :  { %v4539_v10 = vpop.f32.mrf.mxu0  ;;  %5190 = vmatmul.bf16.gmra.mxu2 %v9637_v20 }
 0x8d1   :  { %v4708_v37 = vpop.f32.mrf.mxu1  ;;  %v4540_v31 = vadd.f32 %v4539_v10, %v9607_v19 }
 0x8d2   :  { %v5317_v25 = vpop.f32.mrf.mxu3 }
 0x8d3   :  { %v5318_v26 = vadd.f32 %v5317_v25, %v5149_v12  ;;  %v5151_v42 = vpop.f32.mrf.mxu2  ;;  %v4709_v46 = vadd.f32 %v4708_v37, %v4540_v31 }
 0x8d4   :  { %v5152_v61 = vadd.f32 %v9694_v51, %v5151_v42 }
 0x8d5   :  { %5428 = vst [vmem:[%s10068_s14 + $0x108] sm:$0xff] %v5318_v26  ;;  %v4842_v21 = vmax.f32 %v4709_v46, 0.0 }
 0x8d7   :  { %5359 = vmatmul.bf16.gmra.mxu3 %v4912_v16 }
 0x8d8   :  { %v4541_v33 = vpop.f32.mrf.mxu0 }
 0x8d9   :  { %v4710_v4 = vpop.f32.mrf.mxu1  ;;  %v4542_v49 = vadd.f32 %v4541_v33, %v9607_v19 }
 0x8da   :  { %v5320_v20 = vpop.f32.mrf.mxu3 }
 0x8db   :  { %v5321_v23 = vadd.f32 %v5320_v20, %v5152_v61  ;;  %v5153_v30 = vpop.f32.mrf.mxu2  ;;  %v4711_v28 = vadd.f32 %v4710_v4, %v4542_v49 }
 0x8dc   :  { %v5154_v2 = vadd.f32 %v9694_v51, %v5153_v30 }
 0x8dd   :  { %5429 = vst [vmem:[%s10068_s14 + $0x110] sm:$0xff] %v5321_v23  ;;  %v4844_v60 = vmax.f32 %v4711_v28, 0.0 }
 0x8df   :  { %v4916_v34 = vpack.c.bf16 %v4844_v60, %v4842_v21 }
 0x8e0   :  { %v4544_v17 = vpop.f32.mrf.mxu0  ;;  %5195 = vmatmul.bf16.gmra.mxu2 %v9646_v22 }
 0x8e1   :  { %v4713_v8 = vpop.f32.mrf.mxu1  ;;  %v4545_v52 = vadd.f32 %v4544_v17, %v9607_v19 }
 0x8e2   :  { %v5322_v48 = vpop.f32.mrf.mxu3 }
 0x8e3   :  { %v5323_v41 = vadd.f32 %v5322_v48, %v5154_v2  ;;  %v5156_v5 = vpop.f32.mrf.mxu2  ;;  %v4714_v53 = vadd.f32 %v4713_v8, %v4545_v52 }
 0x8e4   :  { %v5157_v63 = vadd.f32 %v9694_v51, %v5156_v5 }
 0x8e5   :  { %5430 = vst [vmem:[%s10068_s14 + $0x118] sm:$0xff] %v5323_v41  ;;  %v4846_v10 = vmax.f32 %v4714_v53, 0.0 }
 0x8e7   :  { %5364 = vmatmul.bf16.gmra.mxu3 %v4914_v0 }
 0x8e8   :  { %v4546_v55 = vpop.f32.mrf.mxu0 }
 0x8e9   :  { %v4715_v9 = vpop.f32.mrf.mxu1  ;;  %v4547_v14 = vadd.f32 %v4546_v55, %v9607_v19 }
 0x8ea   :  { %v5325_v22 = vpop.f32.mrf.mxu3 }
 0x8eb   :  { %v5326_v43 = vadd.f32 %v5325_v22, %v5157_v63  ;;  %v5158_v58 = vpop.f32.mrf.mxu2  ;;  %v4716_v1 = vadd.f32 %v4715_v9, %v4547_v14  ;;  %v10504_v22 = vld [vmem:[#allocation60_spill] sm:$0xff] }
 0x8ec   :  { %v5159_v45 = vadd.f32 %v9694_v51, %v5158_v58 }
 0x8ed   :  { %5431 = vst [vmem:[%s10068_s14 + $0x120] sm:$0xff] %v5326_v43  ;;  %v4848_v56 = vmax.f32 %v4716_v1, 0.0 }
 0x8ef   :  { %v4918_v25 = vpack.c.bf16 %v4848_v56, %v4846_v10 }
 0x8f0   :  { %5200 = vmatmul.bf16.gmra.mxu2 %v9655_v11  ;;  %v4549_v13 = vpop.f32.mrf.mxu0 }
 0x8f1   :  { %v4718_v59 = vpop.f32.mrf.mxu1  ;;  %v4550_v16 = vadd.f32 %v4549_v13, %v9607_v19 }
 0x8f2   :  { %v5327_v62 = vpop.f32.mrf.mxu3 }
 0x8f3   :  { %v5328_v7 = vadd.f32 %v5327_v62, %v5159_v45  ;;  %v5161_v57 = vpop.f32.mrf.mxu2  ;;  %v4719_v18 = vadd.f32 %v4718_v59, %v4550_v16 }
 0x8f4   :  { %v5162_v29 = vadd.f32 %v9694_v51, %v5161_v57 }
 0x8f5   :  { %5432 = vst [vmem:[%s10068_s14 + $0x128] sm:$0xff] %v5328_v7  ;;  %v4850_v38 = vmax.f32 %v4719_v18, 0.0 }
 0x8f7   :  { %5369 = vmatmul.bf16.gmra.mxu3 %v4916_v34 }
 0x8f8   :  { %v4551_v3 = vpop.f32.mrf.mxu0 }
 0x8f9   :  { %v4720_v37 = vpop.f32.mrf.mxu1  ;;  %v4552_v26 = vadd.f32 %v4551_v3, %v9607_v19 }
 0x8fa   :  { %v5330_v11 = vpop.f32.mrf.mxu3 }
 0x8fb   :  { %v5331_v54 = vadd.f32 %v5330_v11, %v5162_v29  ;;  %v5163_v40 = vpop.f32.mrf.mxu2  ;;  %v4721_v61 = vadd.f32 %v4720_v37, %v4552_v26 }
 0x8fc   :  { %v5164_v27 = vadd.f32 %v9694_v51, %v5163_v40 }
 0x8fd   :  { %5433 = vst [vmem:[%s10068_s14 + $0x130] sm:$0xff] %v5331_v54  ;;  %v4852_v23 = vmax.f32 %v4721_v61, 0.0 }
 0x8ff   :  { %v4920_v2 = vpack.c.bf16 %v4852_v23, %v4850_v38 }
 0x900   :  { %5205 = vmatmul.bf16.gmra.mxu2 %v9664_v39  ;;  %v4554_v47 = vpop.f32.mrf.mxu0 }
 0x901   :  { %v4723_v20 = vpop.f32.mrf.mxu1  ;;  %v4555_v5 = vadd.f32 %v4554_v47, %v9607_v19 }
 0x902   :  { %v5332_v36 = vpop.f32.mrf.mxu3 }
 0x903   :  { %v5333_v15 = vadd.f32 %v5332_v36, %v5164_v27  ;;  %v5166_v12 = vpop.f32.mrf.mxu2  ;;  %v4724_v55 = vadd.f32 %v4723_v20, %v4555_v5 }
 0x904   :  { %v5167_v42 = vadd.f32 %v9694_v51, %v5166_v12 }
 0x905   :  { %5434 = vst [vmem:[%s10068_s14 + $0x138] sm:$0xff] %v5333_v15  ;;  %v4854_v46 = vmax.f32 %v4724_v55, 0.0 }
 0x907   :  { %5374 = vmatmul.bf16.gmra.mxu3 %v4918_v25 }
 0x908   :  { %v4556_v4 = vpop.f32.mrf.mxu0 }
 0x909   :  { %v4725_v48 = vpop.f32.mrf.mxu1  ;;  %v4557_v24 = vadd.f32 %v4556_v4, %v9607_v19 }
 0x90a   :  { %v5335_v39 = vpop.f32.mrf.mxu3 }
 0x90b   :  { %v5336_v33 = vadd.f32 %v5335_v39, %v5167_v42  ;;  %v5168_v35 = vpop.f32.mrf.mxu2  ;;  %v4726_v63 = vadd.f32 %v4725_v48, %v4557_v24 }
 0x90c   :  { %v5169_v30 = vadd.f32 %v9694_v51, %v5168_v35 }
 0x90d   :  { %5435 = vst [vmem:[%s10068_s14 + $0x140] sm:$0xff] %v5336_v33  ;;  %v4856_v31 = vmax.f32 %v4726_v63, 0.0 }
 0x90f   :  { %v4922_v45 = vpack.c.bf16 %v4856_v31, %v4854_v46 }
 0x910   :  { %5210 = vmatmul.bf16.gmra.mxu2 %v9673_v44  ;;  %v9959_v44 = vld [vmem:[%s10067_s13] ss:$0 sm:$0xff]  ;;  %v4559_v49 = vpop.f32.mrf.mxu0 }
 0x911   :  { %v4728_v58 = vpop.f32.mrf.mxu1  ;;  %v4560_v13 = vadd.f32 %v4559_v49, %v9607_v19 }
 0x912   :  { %v5337_v50 = vpop.f32.mrf.mxu3 }
 0x913   :  { %v5338_v17 = vadd.f32 %v5337_v50, %v5169_v30  ;;  %v5171_v6 = vpop.f32.mrf.mxu2  ;;  %v4729_v11 = vadd.f32 %v4728_v58, %v4560_v13 }
 0x914   :  { %v5172_v51 = vadd.f32 %v9959_v44, %v5171_v6 }
 0x915   :  { %5436 = vst [vmem:[%s10068_s14 + $0x148] sm:$0xff] %v5338_v17  ;;  %v4858_v1 = vmax.f32 %v4729_v11, 0.0 }
 0x917   :  { %5379 = vmatmul.bf16.gmra.mxu3 %v4920_v2 }
 0x918   :  { %v4561_v62 = vpop.f32.mrf.mxu0 }
 0x919   :  { %v4562_v21 = vadd.f32 %v4561_v62, %v9607_v19  ;;  %v4730_v29 = vpop.f32.mrf.mxu1 }
 0x91a   :  { %v5340_v41 = vpop.f32.mrf.mxu3 }
 0x91b   :  { %v5341_v0 = vadd.f32 %v5340_v41, %v5172_v51  ;;  %v5173_v8 = vpop.f32.mrf.mxu2  ;;  %v4731_v59 = vadd.f32 %v4730_v29, %v4562_v21 }
 0x91c   :  { %v5174_v43 = vadd.f32 %v9959_v44, %v5173_v8 }
 0x91d   :  { %5437 = vst [vmem:[%s10068_s14 + $0x150] sm:$0xff] %v5341_v0  ;;  %v4860_v52 = vmax.f32 %v4731_v59, 0.0 }
 0x91f   :  { %v4924_v56 = vpack.c.bf16 %v4860_v52, %v4858_v1 }
 0x920   :  { %5215 = vmatmul.bf16.gmra.mxu2 %v10504_v22 }
 0x922   :  { %v5342_v28 = vpop.f32.mrf.mxu3 }
 0x923   :  { %v5343_v9 = vadd.f32 %v5342_v28, %v5174_v43  ;;  %v5176_v60 = vpop.f32.mrf.mxu2 }
 0x924   :  { %v5177_v7 = vadd.f32 %v9959_v44, %v5176_v60 }
 0x925   :  { %5438 = vst [vmem:[%s10068_s14 + $0x158] sm:$0xff] %v5343_v9 }
 0x927   :  { %5384 = vmatmul.bf16.gmra.mxu3 %v4922_v45 }
 0x92a   :  { %v5345_v57 = vpop.f32.mrf.mxu3 }
 0x92b   :  { %v5346_v34 = vadd.f32 %v5345_v57, %v5177_v7  ;;  %v5178_v14 = vpop.f32.mrf.mxu2 }
 0x92c   :  { %v5179_v54 = vadd.f32 %v9959_v44, %v5178_v14 }
 0x92d   :  { %5439 = vst [vmem:[%s10068_s14 + $0x160] sm:$0xff] %v5346_v34 }
 0x930   :  { %5220 = vmatmul.bf16.gmra.mxu2 %v9696_v32 }
 0x932   :  { %v5347_v40 = vpop.f32.mrf.mxu3 }
 0x933   :  { %v5348_v3 = vadd.f32 %v5347_v40, %v5179_v54  ;;  %v5181_v53 = vpop.f32.mrf.mxu2 }
 0x934   :  { %v5182_v19 = vadd.f32 %v9959_v44, %v5181_v53 }
 0x935   :  { %5440 = vst [vmem:[%s10068_s14 + $0x168] sm:$0xff] %v5348_v3 }
 0x937   :  { %5389 = vmatmul.bf16.gmra.mxu3 %v4924_v56 }
 0x93a   :  { %v5350_v27 = vpop.f32.mrf.mxu3 }
 0x93b   :  { %v5351_v36 = vadd.f32 %v5350_v27, %v5182_v19  ;;  %v5183_v10 = vpop.f32.mrf.mxu2 }
 0x93c   :  { %v5184_v32 = vadd.f32 %v9959_v44, %v5183_v10 }
 0x93d   :  { %5441 = vst [vmem:[%s10068_s14 + $0x170] sm:$0xff] %v5351_v36 }
 0x942   :  { %v5352_v15 = vpop.f32.mrf.mxu3 }
 0x943   :  { %v5353_v12 = vadd.f32 %v5352_v15, %v5184_v32  ;;  %v5186_v37 = vpop.f32.mrf.mxu2 }
 0x944   :  { %v5187_v25 = vadd.f32 %v9959_v44, %v5186_v37 }
 0x945   :  { %5442 = vst [vmem:[%s10068_s14 + $0x178] sm:$0xff] %v5353_v12 }
 0x94a   :  { %v5355_v47 = vpop.f32.mrf.mxu3 }
 0x94b   :  { %v5356_v26 = vadd.f32 %v5355_v47, %v5187_v25  ;;  %v5188_v42 = vpop.f32.mrf.mxu2 }
 0x94c   :  { %v5189_v39 = vadd.f32 %v9959_v44, %v5188_v42 }
 0x94d   :  { %5443 = vst [vmem:[%s10068_s14 + $0x180] sm:$0xff] %v5356_v26 }
 0x952   :  { %v5357_v16 = vpop.f32.mrf.mxu3 }
 0x953   :  { %v5358_v33 = vadd.f32 %v5357_v16, %v5189_v39  ;;  %v5191_v35 = vpop.f32.mrf.mxu2 }
 0x954   :  { %v5192_v61 = vadd.f32 %v9959_v44, %v5191_v35 }
 0x955   :  { %5444 = vst [vmem:[%s10068_s14 + $0x188] sm:$0xff] %v5358_v33 }
 0x95a   :  { %v5360_v20 = vpop.f32.mrf.mxu3 }
 0x95b   :  { %v5361_v18 = vadd.f32 %v5360_v20, %v5192_v61  ;;  %v5193_v23 = vpop.f32.mrf.mxu2 }
 0x95c   :  { %v5194_v30 = vadd.f32 %v9959_v44, %v5193_v23 }
 0x95d   :  { %5445 = vst [vmem:[%s10068_s14 + $0x190] sm:$0xff] %v5361_v18 }
 0x962   :  { %v5362_v4 = vpop.f32.mrf.mxu3 }
 0x963   :  { %v5363_v50 = vadd.f32 %v5362_v4, %v5194_v30  ;;  %v5196_v38 = vpop.f32.mrf.mxu2 }
 0x964   :  { %v5197_v17 = vadd.f32 %v9959_v44, %v5196_v38 }
 0x965   :  { %5446 = vst [vmem:[%s10068_s14 + $0x198] sm:$0xff] %v5363_v50 }
 0x96a   :  { %v5365_v6 = vpop.f32.mrf.mxu3 }
 0x96b   :  { %v5366_v2 = vadd.f32 %v5365_v6, %v5197_v17  ;;  %v5198_v48 = vpop.f32.mrf.mxu2 }
 0x96c   :  { %v5199_v24 = vadd.f32 %v9959_v44, %v5198_v48 }
 0x96d   :  { %5447 = vst [vmem:[%s10068_s14 + $0x1a0] sm:$0xff] %v5366_v2 }
 0x972   :  { %v5367_v51 = vpop.f32.mrf.mxu3 }
 0x973   :  { %v5368_v41 = vadd.f32 %v5367_v51, %v5199_v24  ;;  %v5201_v5 = vpop.f32.mrf.mxu2 }
 0x974   :  { %v5202_v0 = vadd.f32 %v9959_v44, %v5201_v5 }
 0x975   :  { %5448 = vst [vmem:[%s10068_s14 + $0x1a8] sm:$0xff] %v5368_v41 }
 0x97a   :  { %v5370_v8 = vpop.f32.mrf.mxu3 }
 0x97b   :  { %v5371_v49 = vadd.f32 %v5370_v8, %v5202_v0  ;;  %v5203_v63 = vpop.f32.mrf.mxu2 }
 0x97c   :  { %v5204_v55 = vadd.f32 %v9959_v44, %v5203_v63 }
 0x97d   :  { %5449 = vst [vmem:[%s10068_s14 + $0x1b0] sm:$0xff] %v5371_v49 }
 0x982   :  { %v5372_v22 = vpop.f32.mrf.mxu3 }
 0x983   :  { %v5373_v31 = vadd.f32 %v5372_v22, %v5204_v55  ;;  %v5206_v43 = vpop.f32.mrf.mxu2 }
 0x984   :  { %v5207_v58 = vadd.f32 %v9959_v44, %v5206_v43 }
 0x985   :  { %5450 = vst [vmem:[%s10068_s14 + $0x1b8] sm:$0xff] %v5373_v31 }
 0x98a   :  { %v5375_v28 = vpop.f32.mrf.mxu3 }
 0x98b   :  { %v5376_v46 = vadd.f32 %v5375_v28, %v5207_v58  ;;  %v5208_v9 = vpop.f32.mrf.mxu2 }
 0x98c   :  { %v5209_v60 = vadd.f32 %v9959_v44, %v5208_v9 }
 0x98d   :  { %5451 = vst [vmem:[%s10068_s14 + $0x1c0] sm:$0xff] %v5376_v46 }
 0x992   :  { %v5377_v45 = vpop.f32.mrf.mxu3 }
 0x993   :  { %v5378_v62 = vadd.f32 %v5377_v45, %v5209_v60  ;;  %v5211_v21 = vpop.f32.mrf.mxu2 }
 0x994   :  { %v5212_v7 = vadd.f32 %v9959_v44, %v5211_v21 }
 0x995   :  { %5452 = vst [vmem:[%s10068_s14 + $0x1c8] sm:$0xff] %v5378_v62 }
 0x99a   :  { %v5380_v57 = vpop.f32.mrf.mxu3 }
 0x99b   :  { %v5381_v13 = vadd.f32 %v5380_v57, %v5212_v7  ;;  %v5213_v34 = vpop.f32.mrf.mxu2 }
 0x99c   :  { %v5214_v14 = vadd.f32 %v9959_v44, %v5213_v34 }
 0x99d   :  { %5453 = vst [vmem:[%s10068_s14 + $0x1d0] sm:$0xff] %v5381_v13 }
 0x9a2   :  { %v5382_v29 = vpop.f32.mrf.mxu3 }
 0x9a3   :  { %v5383_v59 = vadd.f32 %v5382_v29, %v5214_v14  ;;  %v5216_v11 = vpop.f32.mrf.mxu2 }
 0x9a4   :  { %v5217_v52 = vadd.f32 %v9959_v44, %v5216_v11 }
 0x9a5   :  { %5454 = vst [vmem:[%s10068_s14 + $0x1d8] sm:$0xff] %v5383_v59 }
 0x9aa   :  { %v5385_v54 = vpop.f32.mrf.mxu3 }
 0x9ab   :  { %v5386_v40 = vadd.f32 %v5385_v54, %v5217_v52  ;;  %v5218_v1 = vpop.f32.mrf.mxu2 }
 0x9ac   :  { %v5219_v3 = vadd.f32 %v9959_v44, %v5218_v1 }
 0x9ad   :  { %5455 = vst [vmem:[%s10068_s14 + $0x1e0] sm:$0xff] %v5386_v40 }
 0x9b2   :  { %v5387_v53 = vpop.f32.mrf.mxu3 }
 0x9b3   :  { %v5388_v56 = vadd.f32 %v5387_v53, %v5219_v3  ;;  %v5221_v19 = vpop.f32.mrf.mxu2 }
 0x9b4   :  { %v5222_v27 = vadd.f32 %v9959_v44, %v5221_v19 }
 0x9b5   :  { %5456 = vst [vmem:[%s10068_s14 + $0x1e8] sm:$0xff] %v5388_v56 }
 0x9ba   :  { %v5390_v36 = vpop.f32.mrf.mxu3 }
 0x9bb   :  { %v5391_v10 = vadd.f32 %v5390_v36, %v5222_v27  ;;  %v5223_v32 = vpop.f32.mrf.mxu2 }
 0x9bc   :  { %v5224_v15 = vadd.f32 %v9959_v44, %v5223_v32 }
 0x9bd   :  { %5457 = vst [vmem:[%s10068_s14 + $0x1f0] sm:$0xff] %v5391_v10 }
 0x9c2   :  { %v5392_v12 = vpop.f32.mrf.mxu3 }
 0x9c3   :  { %v5393_v37 = vadd.f32 %v5392_v12, %v5224_v15 }
 0x9c5   :  { %5458 = vst [vmem:[%s10068_s14 + $0x1f8] sm:$0xff] %v5393_v37 }

</bundles_post_ra>
